<compile_context>
chip_gen: v6e
topology: v6e:2x2x1
jax: 0.10.0
libtpu: 0.0.40
codegen_flags: <defaults>
</compile_context>

<pallas_src>
import functools

import numpy as np
import jax
import jax.numpy as jnp
from jax.experimental import pallas as pl
from jax.experimental.pallas import tpu as pltpu


# ---------------------------------------------------------------------------
# Chip detection (trace-time, host-side) — safe fallbacks if detection fails.
# ---------------------------------------------------------------------------

def _tpu_kind():
    try:
        d = jax.devices()[0]
        if d.platform != "tpu":
            return ""
        return d.device_kind.lower()
    except Exception:
        return ""


_KIND = _tpu_kind()
# v7x (2 TensorCores/chip) and v4/v5p megacore: 2 row blocks, one per core.
# Single-TC chips (v5e/v6e): collapse to a single grid step (per-step overhead
# is comparable to the compute of these tiny blocks).
_NUM_TC = 2 if any(t in _KIND for t in ("v7", "v4", "v5p")) else 1
# bf16 EUP exists on v6e/v7x; v5e has no bf16 VPU/EUP -> keep SiLU in f32.
_BF16_SILU = any(t in _KIND for t in ("v6", "v7"))

_MOSAIC_PARAMS = pltpu.CompilerParams(
    dimension_semantics=("parallel",),
    vmem_limit_bytes=32 * 1024 * 1024,
)


def _grid_rows(M, multiple=8):
    """Row block: M (single step) on 1-TC chips, M/2 on 2-TC chips."""
    if _NUM_TC > 1 and M % _NUM_TC == 0 and (M // _NUM_TC) % multiple == 0:
        return M // _NUM_TC
    return M


# ---------------------------------------------------------------------------
# Pallas kernels
# ---------------------------------------------------------------------------

def _proj_kernel(x_ref, w_ref, b_ref, qkv_ref, gcn_ref, *, n_proj):
    """Fused q/k/v (+GCN weight) projections.

    x_ref   : (bm, D)    bf16   activation rows, row order = (b, t, n)
    w_ref   : (D, 7D)    bf16   [geo_q|geo_k|geo_v|t_q|t_k|t_v|fc1@mlp]
    b_ref   : (1, 7D)    f32    biases (zeros in the GCN column block)
    qkv_ref : (bm, 6D)   bf16
    gcn_ref : (bm, D)    bf16   pre-aggregation GCN features
    """
    out = jnp.dot(x_ref[...], w_ref[...],
                  preferred_element_type=jnp.float32) + b_ref[...]
    qkv_ref[...] = out[:, :n_proj].astype(qkv_ref.dtype)   # 384-wide, vreg-aligned
    gcn_ref[...] = out[:, n_proj:].astype(gcn_ref.dtype)


def _epilogue_kernel(xi_ref, w13_ref, w2_ref, n1_ref, n2_ref, o_ref, *,
                     alpha, eps, d, dff, bf16_silu):
    """scaled residual + RMSNorm + SwiGLU FFN + residual + RMSNorm.

    xi_ref  : (bm, 2D)   f32    packed [x | gcn+sp+te] (lane-dense)
    w13_ref : (D, 2H)    bf16   [w1 | w3]
    w2_ref  : (H, D)     bf16
    n1/n2   : (1, D)     f32    RMSNorm weights
    o_ref   : (bm, D)    f32
    """
    xi = xi_ref[...]
    x = xi[:, :d]
    attn = xi[:, d:]
    h = (1.0 - 3.0 * alpha) * x + alpha * attn
    var1 = jnp.mean(h * h, axis=-1, keepdims=True)
    y1 = n1_ref[...] * (h * jax.lax.rsqrt(var1 + eps))
    u = jnp.dot(y1.astype(jnp.bfloat16), w13_ref[...],
                preferred_element_type=jnp.float32)
    gate = u[:, :dff]
    up = u[:, dff:]
    if bf16_silu:                       # bf16 EUP path on v6e/v7x
        g = gate.astype(jnp.bfloat16)
        mid = (g * jax.nn.sigmoid(g)) * up.astype(jnp.bfloat16)
    else:                               # v5e: no bf16 EUP/VPU
        mid = ((gate * jax.nn.sigmoid(gate)) * up).astype(jnp.bfloat16)
    ff = jnp.dot(mid, w2_ref[...], preferred_element_type=jnp.float32)
    z = y1 + ff
    var2 = jnp.mean(z * z, axis=-1, keepdims=True)
    o_ref[...] = (n2_ref[...] * (z * jax.lax.rsqrt(var2 + eps))).astype(o_ref.dtype)


# ---------------------------------------------------------------------------
# Kernel wrappers
# ---------------------------------------------------------------------------

def fused_proj(x, w_cat, b_cat):
    """One pallas_call: 448-wide projection, split bf16 outputs (qkv, gcn)."""
    B, T, N, D = x.shape
    M = B * T * N
    n_out = w_cat.shape[1]
    n_proj = n_out - D
    bm = _grid_rows(M)
    x2 = x.reshape(M, D).astype(jnp.bfloat16)

    flops = 2 * M * D * n_out
    bytes_accessed = M * D * 2 + D * n_out * 2 + n_out * 4 + M * n_out * 2
    kern = functools.partial(_proj_kernel, n_proj=n_proj)
    qkv, gcn_pre = pl.pallas_call(
        kern,
        out_shape=(jax.ShapeDtypeStruct((M, n_proj), jnp.bfloat16),
                   jax.ShapeDtypeStruct((M, D), jnp.bfloat16)),
        grid=(M // bm,),
        in_specs=[
            pl.BlockSpec((bm, D), lambda i: (i, 0)),
            pl.BlockSpec((D, n_out), lambda i: (0, 0)),
            pl.BlockSpec((1, n_out), lambda i: (0, 0)),
        ],
        out_specs=(pl.BlockSpec((bm, n_proj), lambda i: (i, 0)),
                   pl.BlockSpec((bm, D), lambda i: (i, 0))),
        compiler_params=_MOSAIC_PARAMS,
        cost_estimate=pl.CostEstimate(flops=int(flops), transcendentals=0,
                                      bytes_accessed=int(bytes_accessed)),
    )(x2, w_cat.astype(jnp.bfloat16), b_cat.reshape(1, n_out))
    return qkv, gcn_pre


def fused_block_epilogue(packed, w13, w2, norm1_w, norm2_w, alpha, out_shape4,
                         eps=1e-6):
    M, two_d = packed.shape
    D = two_d // 2
    dff = w2.shape[0]
    bm = _grid_rows(M)

    flops = 2 * M * D * (2 * dff) + 2 * M * dff * D + 16 * M * D
    bytes_accessed = M * two_d * 4 + (D * 2 * dff + dff * D) * 2 + M * D * 4
    kern = functools.partial(_epilogue_kernel, alpha=float(alpha),
                             eps=float(eps), d=D, dff=dff,
                             bf16_silu=_BF16_SILU)
    out = pl.pallas_call(
        kern,
        out_shape=jax.ShapeDtypeStruct((M, D), jnp.float32),
        grid=(M // bm,),
        in_specs=[
            pl.BlockSpec((bm, two_d), lambda i: (i, 0)),
            pl.BlockSpec((D, 2 * dff), lambda i: (0, 0)),
            pl.BlockSpec((dff, D), lambda i: (0, 0)),
            pl.BlockSpec((1, D), lambda i: (0, 0)),
            pl.BlockSpec((1, D), lambda i: (0, 0)),
        ],
        out_specs=pl.BlockSpec((bm, D), lambda i: (i, 0)),
        compiler_params=_MOSAIC_PARAMS,
        cost_estimate=pl.CostEstimate(flops=int(flops),
                                      transcendentals=int(M * dff + 2 * M),
                                      bytes_accessed=int(bytes_accessed)),
    )(packed, w13.astype(jnp.bfloat16), w2.astype(jnp.bfloat16),
      norm1_w.reshape(1, D), norm2_w.reshape(1, D))
    return out.reshape(out_shape4)


# ---------------------------------------------------------------------------
# Frequency-domain attention glue (selected-mode DFT as real matmuls)
# ---------------------------------------------------------------------------

def get_frequency_modes(seq_len, modes=64, mode_select_method='random'):
    modes = min(modes, seq_len // 2)
    if mode_select_method == 'random':
        index = list(range(0, seq_len // 2))
        np.random.shuffle(index)
        index = index[:modes]
    else:
        index = list(range(0, modes))
    index.sort()
    return index, modes


def build_dft_mats(L, vals):
    """Real matrices for rfft[..., vals] and the zero-filled irfft(n=L)."""
    vals = np.asarray(vals, dtype=np.int64)
    n = np.arange(L, dtype=np.float64)[:, None]           # (L, 1)
    k = vals[None, :].astype(np.float64)                  # (1, m)
    ang = 2.0 * np.pi * n * k / L
    Fr = np.cos(ang)                                      # (L, m)  real part
    Fi = -np.sin(ang)                                     # (L, m)  imag part
    c = np.where((vals == 0) | (2 * vals == L), 1.0, 2.0)[None, :]
    Gr = (c * np.cos(ang) / L).T                          # (m, L)
    Gi = (-c * np.sin(ang) / L).T                         # (m, L)
    f32 = lambda a: jnp.asarray(a, jnp.float32)
    return f32(Fr), f32(Fi), f32(Gr), f32(Gi)


def _sel_dft(t, Fr, Fi):
    re = jnp.einsum('...n,nm->...m', t, Fr)
    im = jnp.einsum('...n,nm->...m', t, Fi)
    return jax.lax.complex(re, im)


def _sel_idft(z, Gr, Gi):
    return (jnp.einsum('...m,mn->...n', z.real, Gr)
            + jnp.einsum('...m,mn->...n', z.imag, Gi))


def gc_sp(q, k, v, params, cfg):
    """Spatial frequency-domain attention (`_gc(inputs, 'sp')`)."""
    B, T, N, D = q.shape
    h, hd = cfg['geo_heads'], cfg['head_dim']
    scale = hd ** -0.5
    m = cfg['m_sp']
    Fr, Fi, Gr, Gi = cfg['sp_dft']

    def to_heads(t):                                       # (B,T,h,hd,N)
        return jnp.transpose(t.reshape(B, T, N, h, hd), (0, 1, 3, 4, 2))

    q_ = to_heads(q) / jnp.sqrt(jnp.sum(q * q))            # global L2 norm
    k_ = to_heads(k) / jnp.sqrt(jnp.sum(k * k))
    v_ = to_heads(v)

    q_ft = _sel_dft(q_, Fr, Fi)                            # (B,T,h,hd,m)
    k_ft = _sel_dft(k_, Fr, Fi)
    v_ft = _sel_dft(v_, Fr, Fi)

    q_sel = jnp.transpose(q_ft, (0, 1, 2, 4, 3))[:, :, :, :, None, :]
    wq = jnp.broadcast_to(params['weights_Q'].astype(jnp.complex64),
                          (B, T, h, m, m - 1, hd))
    q_cat = jnp.concatenate([q_sel, wq], axis=4)           # (B,T,h,m,m,hd)

    k_sel = jnp.transpose(k_ft, (0, 1, 2, 4, 3))[:, :, :, None, :, :]
    att = k_sel * jnp.conj(q_cat) * scale                  # (B,T,h,m,m,hd)
    att = jax.nn.softmax(jnp.abs(att), axis=-2)
    att = att.astype(jnp.complex64)
    att = jnp.transpose(att, (0, 1, 2, 3, 5, 4))           # (B,T,h,m,hd,m)

    v_rep = v_ft[:, :, :, None, :, :]                      # (B,T,h,1,hd,m)
    out = (v_rep * jnp.conj(att)).mean(axis=3)             # (B,T,h,hd,m)

    out_time = _sel_idft(out, Gr, Gi)                      # (B,T,h,hd,N)
    return jnp.transpose(out_time, (0, 1, 4, 2, 3)).reshape(B, T, N, D)


def gc_te(q, k, v, params, cfg):
    """Temporal frequency-domain attention (`_gc(inputs, 'te')`)."""
    B, T, N, D = q.shape
    h, hd = cfg['t_heads'], cfg['head_dim']
    scale = hd ** -0.5
    m = cfg['m_t']
    Fr, Fi, Gr, Gi = cfg['t_dft']

    def to_heads(t):                                       # (B,N,h,hd,T)
        # NOTE: mirrors the PyTorch raw `.reshape(B, N, T, h, hd)` on a
        # (B,T,N,D) contiguous tensor (reinterpretation, not a permute).
        return jnp.transpose(t.reshape(B, N, T, h, hd), (0, 1, 3, 4, 2))

    q_ = to_heads(q)
    q_ = q_ / jnp.sqrt(jnp.sum(q_ * q_))
    k_ = to_heads(k)
    k_ = k_ / jnp.sqrt(jnp.sum(k_ * k_))
    v_ = to_heads(v)

    q_ft = _sel_dft(q_, Fr, Fi)                            # (B,N,h,hd,m)
    k_ft = _sel_dft(k_, Fr, Fi)
    v_ft = _sel_dft(v_, Fr, Fi)

    q_sel = jnp.transpose(q_ft, (0, 1, 2, 4, 3))[:, :, :, :, None, :]
    wq = jnp.broadcast_to(params['weights_Q_t'].astype(jnp.complex64),
                          (B, N, h, m, m - 1, hd))
    q_cat = jnp.concatenate([q_sel, wq], axis=4)           # (B,N,h,m,m,hd)

    k_sel = jnp.transpose(k_ft, (0, 1, 2, 4, 3))[:, :, :, :, None, :]
    att = k_sel * jnp.conj(q_cat) * scale                  # (B,N,h,m,m,hd)
    att = jnp.transpose(att, (0, 1, 2, 5, 3, 4))           # (B,N,h,hd,m,m)
    # Reference quirk kept: softmax(abs(att * mask)) -> masked entries get
    # exp(0) weight instead of being excluded.
    mask = jnp.tril(jnp.ones((m, m), jnp.float32))
    att = jax.nn.softmax(jnp.abs(att * mask), axis=-1)
    att = att.astype(jnp.complex64)

    v_rep = v_ft[..., None]                                # (B,N,h,hd,m,1)
    out = (v_rep * jnp.conj(att)).mean(axis=-1)            # (B,N,h,hd,m)

    out_time = _sel_idft(out, Gr, Gi)                      # (B,N,h,hd,T)
    return jnp.transpose(out_time, (0, 4, 1, 2, 3)).reshape(B, T, N, D)


# ---------------------------------------------------------------------------
# STEncoderBlock forward
# ---------------------------------------------------------------------------

def st_encoder_block_forward(params, x, adj, cfg):
    B, T, N, D = x.shape
    M = B * T * N
    alpha = cfg['alpha']

    # Fused weights (tiny concat ops inside jit).
    w_gcn = params['gcn_fc1_w'] @ params['gcn_mlp_w']                  # (D, D)
    w_cat = jnp.concatenate([params['qkv_w'], w_gcn], axis=1)          # (D, 7D)
    b_cat = jnp.concatenate(
        [params['qkv_b'], jnp.zeros((D,), jnp.float32)], axis=0)       # (7D,)
    w13 = jnp.concatenate([params['w1'], params['w3']], axis=1)        # (D, 2H)

    a_norm = adj / jnp.sum(adj, axis=1, keepdims=True)

    # Kernel 1: lane-dense 448-wide projection, split bf16 outputs.
    qkv, gcn_pre = fused_proj(x, w_cat, b_cat)     # (M, 6D) bf16, (M, D) bf16

    def col(i):
        return qkv[:, i * D:(i + 1) * D].astype(jnp.float32).reshape(B, T, N, D)

    geo_q, geo_k, geo_v = col(0), col(1), col(2)
    t_q, t_k, t_v = col(3), col(4), col(5)

    # GCN node aggregation as a tiny XLA einsum on the separate GCN output
    # (mlp(fc1(a @ x)) == a @ (x @ fc1 @ mlp) by linearity; bias after).
    gcn = jnp.einsum('nk,btkd->btnd', a_norm,
                     gcn_pre.astype(jnp.float32).reshape(B, T, N, D))
    gcn = gcn + params['gcn_mlp_b']

    sp = gc_sp(geo_q, geo_k, geo_v, params, cfg)
    te = gc_te(t_q, t_k, t_v, params, cfg)

    # Pre-sum the attention branches and pack with x into one lane-dense
    # (M, 2D) stream for kernel 2.
    attn = (gcn + sp + te).reshape(M, D)
    packed = jnp.concatenate([x.reshape(M, D), attn], axis=1)          # (M, 2D)

    return fused_block_epilogue(packed, w13, params['w2'],
                                params['norm1_w'], params['norm2_w'],
                                alpha, (B, T, N, D))


def init_params(key, cfg):
    D = cfg['embed_dim']
    H = cfg['mlp_hidden']
    hd = cfg['head_dim']
    m_sp, m_t = cfg['m_sp'], cfg['m_t']
    keys = iter(jax.random.split(key, 32))

    def nrm(shape, scale=0.02):
        return (scale * jax.random.normal(next(keys), shape)).astype(jnp.float32)

    return dict(
        # order: geo_q | geo_k | geo_v | t_q | t_k | t_v   (qkv_bias=True)
        qkv_w=nrm((D, 6 * D)),
        qkv_b=nrm((6 * D,)),
        gcn_fc1_w=nrm((D, D)),
        gcn_mlp_w=nrm((D, D)),
        gcn_mlp_b=jnp.zeros((D,), jnp.float32),
        weights_Q=nrm((m_sp, m_sp - 1, hd), scale=0.5),
        weights_Q_t=nrm((m_t, m_t - 1, hd), scale=0.5),
        norm1_w=jnp.ones((D,), jnp.float32),
        norm2_w=jnp.ones((D,), jnp.float32),
        w1=nrm((D, H)), w3=nrm((D, H)), w2=nrm((H, D)),
    )


if __name__ == "__main__":
    # Small config consistent with the module: num_nodes=16, input_window=288
    # -> the encoder block sees T = 288 // 12 = 24 temporal patches, dim=64.
    B, N, D, heads = 2, 16, 64, 4
    input_window = 288
    T = input_window // 12
    mlp_ratio = 4.0
    alpha = 0.1

    np.random.seed(0)                      # deterministic frequency modes
    sp_index, m_sp = get_frequency_modes(N, modes=32, mode_select_method='random')
    t_index, m_t = get_frequency_modes(T, modes=T // 2, mode_select_method='random')

    cfg = dict(
        embed_dim=D, geo_heads=heads, t_heads=heads, head_dim=D // heads,
        mlp_hidden=int(D * mlp_ratio), alpha=alpha,
        m_sp=m_sp, m_t=m_t,
        sp_dft=build_dft_mats(N, sp_index),
        t_dft=build_dft_mats(T, t_index),
    )

    key = jax.random.PRNGKey(0)
    kx, ka, kp = jax.random.split(key, 3)
    x = jax.random.normal(kx, (B, T, N, D), dtype=jnp.float32)
    adj = (jax.random.uniform(ka, (N, N), dtype=jnp.float32)
           + jnp.eye(N, dtype=jnp.float32))
    params = init_params(kp, cfg)

    fwd = jax.jit(functools.partial(st_encoder_block_forward, cfg=cfg))
    out = jax.block_until_ready(fwd(params, x, adj))

    assert out.shape == (B, T, N, D), out.shape
    assert bool(jnp.all(jnp.isfinite(out)))
    print("KERNEL_OK")
</pallas_src>

<mosaic_0001>
module attributes {stable_mosaic.version = 11 : i64} {
  func.func @_proj_kernel(%arg0: i32, %arg1: memref<768x64xbf16, #tpu.memory_space<vmem>>, %arg2: memref<64x448xbf16, #tpu.memory_space<vmem>>, %arg3: memref<1x448xf32, #tpu.memory_space<vmem>>, %arg4: memref<768x384xbf16, #tpu.memory_space<vmem>>, %arg5: memref<768x64xbf16, #tpu.memory_space<vmem>>) attributes {dimension_semantics = [#tpu.dimension_semantics<parallel>], iteration_bounds = array<i64: 1>, scalar_prefetch = 0 : i64, scratch_operands = 0 : i64, tpu.core_type = #tpu.core_type<tc>, window_params = [{transform_indices = @transform_0, window_bounds = array<i64: 768, 64>}, {pipeline_mode = #tpu.pipeline_mode<synchronous>, transform_indices = @transform_1, window_bounds = array<i64: 64, 448>}, {pipeline_mode = #tpu.pipeline_mode<synchronous>, transform_indices = @transform_2, window_bounds = array<i64: 1, 448>}, {transform_indices = @transform_3, window_bounds = array<i64: 768, 384>}, {transform_indices = @transform_4, window_bounds = array<i64: 768, 64>}]} {
    %c0 = arith.constant 0 : index
    %c0_0 = arith.constant 0 : index
    %0 = vector.load %arg1[%c0, %c0_0] : memref<768x64xbf16, #tpu.memory_space<vmem>>, vector<768x64xbf16>
    %c0_1 = arith.constant 0 : index
    %c0_2 = arith.constant 0 : index
    %1 = vector.load %arg2[%c0_1, %c0_2] : memref<64x448xbf16, #tpu.memory_space<vmem>>, vector<64x448xbf16>
    %cst = arith.constant dense<0.000000e+00> : vector<768x448xf32>
    %2 = tpu.matmul %0, %1, %cst {dimension_numbers = #tpu.dot_dimension_numbers<[1], [0], [0], [1], [0, 0, 1, 1], [], []>} : vector<768x64xbf16>, vector<64x448xbf16>, vector<768x448xf32> -> vector<768x448xf32>
    %c0_3 = arith.constant 0 : index
    %c0_4 = arith.constant 0 : index
    %3 = vector.load %arg3[%c0_3, %c0_4] : memref<1x448xf32, #tpu.memory_space<vmem>>, vector<1x448xf32>
    %4 = vector.broadcast %3 : vector<1x448xf32> to vector<768x448xf32>
    %5 = arith.addf %2, %4 : vector<768x448xf32>
    %6 = vector.extract_strided_slice %5 {offsets = [0, 0], sizes = [768, 384], strides = [1, 1]} : vector<768x448xf32> to vector<768x384xf32>
    %7 = arith.truncf %6 : vector<768x384xf32> to vector<768x384xbf16>
    %c0_5 = arith.constant 0 : index
    %c0_6 = arith.constant 0 : index
    %8 = vector.load %arg4[%c0_5, %c0_6] : memref<768x384xbf16, #tpu.memory_space<vmem>>, vector<768x384xbf16>
    tpu.vector_store %arg4[%c0_5, %c0_6], %7 {strides = array<i32>} : memref<768x384xbf16, #tpu.memory_space<vmem>>, vector<768x384xbf16>,
    %9 = vector.extract_strided_slice %5 {offsets = [0, 384], sizes = [768, 64], strides = [1, 1]} : vector<768x448xf32> to vector<768x64xf32>
    %10 = arith.truncf %9 : vector<768x64xf32> to vector<768x64xbf16>
    %c0_7 = arith.constant 0 : index
    %c0_8 = arith.constant 0 : index
    %11 = vector.load %arg5[%c0_7, %c0_8] : memref<768x64xbf16, #tpu.memory_space<vmem>>, vector<768x64xbf16>
    tpu.vector_store %arg5[%c0_7, %c0_8], %10 {strides = array<i32>} : memref<768x64xbf16, #tpu.memory_space<vmem>>, vector<768x64xbf16>,
    return
  }
  func.func @transform_0(%arg0: i32) -> (i32, i32) {
    %c0_i32 = arith.constant 0 : i32
    %c0_i32_0 = arith.constant 0 : i32
    return %arg0, %c0_i32 : i32, i32
  }
  func.func @transform_1(%arg0: i32) -> (i32, i32) {
    %c0_i32 = arith.constant 0 : i32
    %c0_i32_0 = arith.constant 0 : i32
    %c0_i32_1 = arith.constant 0 : i32
    return %c0_i32, %c0_i32_0 : i32, i32
  }
  func.func @transform_2(%arg0: i32) -> (i32, i32) {
    %c0_i32 = arith.constant 0 : i32
    %c0_i32_0 = arith.constant 0 : i32
    %c0_i32_1 = arith.constant 0 : i32
    return %c0_i32, %c0_i32_0 : i32, i32
  }
  func.func @transform_3(%arg0: i32) -> (i32, i32) {
    %c0_i32 = arith.constant 0 : i32
    %c0_i32_0 = arith.constant 0 : i32
    return %arg0, %c0_i32 : i32, i32
  }
  func.func @transform_4(%arg0: i32) -> (i32, i32) {
    %c0_i32 = arith.constant 0 : i32
    %c0_i32_0 = arith.constant 0 : i32
    return %arg0, %c0_i32 : i32, i32
  }
}

module attributes {stable_mosaic.version = 11 : i64} {
  func.func @_epilogue_kernel(%arg0: i32, %arg1: memref<768x128xf32, #tpu.memory_space<vmem>>, %arg2: memref<64x512xbf16, #tpu.memory_space<vmem>>, %arg3: memref<256x64xbf16, #tpu.memory_space<vmem>>, %arg4: memref<1x64xf32, #tpu.memory_space<vmem>>, %arg5: memref<1x64xf32, #tpu.memory_space<vmem>>, %arg6: memref<768x64xf32, #tpu.memory_space<vmem>>) attributes {dimension_semantics = [#tpu.dimension_semantics<parallel>], iteration_bounds = array<i64: 1>, scalar_prefetch = 0 : i64, scratch_operands = 0 : i64, tpu.core_type = #tpu.core_type<tc>, window_params = [{transform_indices = @transform_0, window_bounds = array<i64: 768, 128>}, {pipeline_mode = #tpu.pipeline_mode<synchronous>, transform_indices = @transform_1, window_bounds = array<i64: 64, 512>}, {pipeline_mode = #tpu.pipeline_mode<synchronous>, transform_indices = @transform_2, window_bounds = array<i64: 256, 64>}, {pipeline_mode = #tpu.pipeline_mode<synchronous>, transform_indices = @transform_3, window_bounds = array<i64: 1, 64>}, {pipeline_mode = #tpu.pipeline_mode<synchronous>, transform_indices = @transform_4, window_bounds = array<i64: 1, 64>}, {transform_indices = @transform_5, window_bounds = array<i64: 768, 64>}]} {
    %c0 = arith.constant 0 : index
    %c0_0 = arith.constant 0 : index
    %0 = vector.load %arg1[%c0, %c0_0] : memref<768x128xf32, #tpu.memory_space<vmem>>, vector<768x128xf32>
    %1 = vector.extract_strided_slice %0 {offsets = [0, 0], sizes = [768, 64], strides = [1, 1]} : vector<768x128xf32> to vector<768x64xf32>
    %2 = vector.extract_strided_slice %0 {offsets = [0, 64], sizes = [768, 64], strides = [1, 1]} : vector<768x128xf32> to vector<768x64xf32>
    %cst = arith.constant 0.699999988 : f32
    %3 = vector.broadcast %cst : f32 to vector<768x64xf32>
    %4 = arith.mulf %3, %1 : vector<768x64xf32>
    %cst_1 = arith.constant 1.000000e-01 : f32
    %5 = vector.broadcast %cst_1 : f32 to vector<768x64xf32>
    %6 = arith.mulf %5, %2 : vector<768x64xf32>
    %7 = arith.addf %4, %6 : vector<768x64xf32>
    %8 = arith.mulf %7, %7 : vector<768x64xf32>
    %cst_2 = arith.constant dense<0.000000e+00> : vector<768xf32>
    %9 = vector.multi_reduction <add>, %8, %cst_2 [1] : vector<768x64xf32> to vector<768xf32>
    %10 = vector.shape_cast %9 : vector<768xf32> to vector<768x1xf32>
    %cst_3 = arith.constant 6.400000e+01 : f32
    %11 = vector.broadcast %cst_3 : f32 to vector<768x1xf32>
    %12 = arith.divf %10, %11 : vector<768x1xf32>
    %c0_4 = arith.constant 0 : index
    %c0_5 = arith.constant 0 : index
    %13 = vector.load %arg4[%c0_4, %c0_5] : memref<1x64xf32, #tpu.memory_space<vmem>>, vector<1x64xf32>
    %cst_6 = arith.constant 9.99999997E-7 : f32
    %14 = vector.broadcast %cst_6 : f32 to vector<768x1xf32>
    %15 = arith.addf %12, %14 : vector<768x1xf32>
    %16 = math.rsqrt %15 : vector<768x1xf32>
    %17 = vector.broadcast %16 : vector<768x1xf32> to vector<768x64xf32>
    %18 = arith.mulf %7, %17 : vector<768x64xf32>
    %19 = vector.broadcast %13 : vector<1x64xf32> to vector<768x64xf32>
    %20 = arith.mulf %19, %18 : vector<768x64xf32>
    %21 = arith.truncf %20 : vector<768x64xf32> to vector<768x64xbf16>
    %c0_7 = arith.constant 0 : index
    %c0_8 = arith.constant 0 : index
    %22 = vector.load %arg2[%c0_7, %c0_8] : memref<64x512xbf16, #tpu.memory_space<vmem>>, vector<64x512xbf16>
    %cst_9 = arith.constant dense<0.000000e+00> : vector<768x512xf32>
    %23 = tpu.matmul %21, %22, %cst_9 {dimension_numbers = #tpu.dot_dimension_numbers<[1], [0], [0], [1], [0, 0, 1, 1], [], []>} : vector<768x64xbf16>, vector<64x512xbf16>, vector<768x512xf32> -> vector<768x512xf32>
    %24 = vector.extract_strided_slice %23 {offsets = [0, 0], sizes = [768, 256], strides = [1, 1]} : vector<768x512xf32> to vector<768x256xf32>
    %25 = vector.extract_strided_slice %23 {offsets = [0, 256], sizes = [768, 256], strides = [1, 1]} : vector<768x512xf32> to vector<768x256xf32>
    %26 = arith.negf %24 : vector<768x256xf32>
    %27 = math.exp %26 : vector<768x256xf32>
    %cst_10 = arith.constant 1.000000e+00 : f32
    %28 = vector.broadcast %cst_10 : f32 to vector<768x256xf32>
    %29 = arith.addf %28, %27 : vector<768x256xf32>
    %30 = arith.divf %28, %29 : vector<768x256xf32>
    %31 = arith.mulf %24, %30 : vector<768x256xf32>
    %32 = arith.mulf %31, %25 : vector<768x256xf32>
    %33 = arith.truncf %32 : vector<768x256xf32> to vector<768x256xbf16>
    %c0_11 = arith.constant 0 : index
    %c0_12 = arith.constant 0 : index
    %34 = vector.load %arg3[%c0_11, %c0_12] : memref<256x64xbf16, #tpu.memory_space<vmem>>, vector<256x64xbf16>
    %cst_13 = arith.constant dense<0.000000e+00> : vector<768x64xf32>
    %35 = tpu.matmul %33, %34, %cst_13 {dimension_numbers = #tpu.dot_dimension_numbers<[1], [0], [0], [1], [0, 0, 1, 1], [], []>} : vector<768x256xbf16>, vector<256x64xbf16>, vector<768x64xf32> -> vector<768x64xf32>
    %36 = arith.addf %20, %35 : vector<768x64xf32>
    %37 = arith.mulf %36, %36 : vector<768x64xf32>
    %cst_14 = arith.constant dense<0.000000e+00> : vector<768xf32>
    %38 = vector.multi_reduction <add>, %37, %cst_14 [1] : vector<768x64xf32> to vector<768xf32>
    %39 = vector.shape_cast %38 : vector<768xf32> to vector<768x1xf32>
    %cst_15 = arith.constant 6.400000e+01 : f32
    %40 = vector.broadcast %cst_15 : f32 to vector<768x1xf32>
    %41 = arith.divf %39, %40 : vector<768x1xf32>
    %c0_16 = arith.constant 0 : index
    %c0_17 = arith.constant 0 : index
    %42 = vector.load %arg5[%c0_16, %c0_17] : memref<1x64xf32, #tpu.memory_space<vmem>>, vector<1x64xf32>
    %cst_18 = arith.constant 9.99999997E-7 : f32
    %43 = vector.broadcast %cst_18 : f32 to vector<768x1xf32>
    %44 = arith.addf %41, %43 : vector<768x1xf32>
    %45 = math.rsqrt %44 : vector<768x1xf32>
    %46 = vector.broadcast %45 : vector<768x1xf32> to vector<768x64xf32>
    %47 = arith.mulf %36, %46 : vector<768x64xf32>
    %48 = vector.broadcast %42 : vector<1x64xf32> to vector<768x64xf32>
    %49 = arith.mulf %48, %47 : vector<768x64xf32>
    %c0_19 = arith.constant 0 : index
    %c0_20 = arith.constant 0 : index
    %50 = vector.load %arg6[%c0_19, %c0_20] : memref<768x64xf32, #tpu.memory_space<vmem>>, vector<768x64xf32>
    tpu.vector_store %arg6[%c0_19, %c0_20], %49 {strides = array<i32>} : memref<768x64xf32, #tpu.memory_space<vmem>>, vector<768x64xf32>,
    return
  }
  func.func @transform_0(%arg0: i32) -> (i32, i32) {
    %c0_i32 = arith.constant 0 : i32
    %c0_i32_0 = arith.constant 0 : i32
    return %arg0, %c0_i32 : i32, i32
  }
  func.func @transform_1(%arg0: i32) -> (i32, i32) {
    %c0_i32 = arith.constant 0 : i32
    %c0_i32_0 = arith.constant 0 : i32
    %c0_i32_1 = arith.constant 0 : i32
    return %c0_i32, %c0_i32_0 : i32, i32
  }
  func.func @transform_2(%arg0: i32) -> (i32, i32) {
    %c0_i32 = arith.constant 0 : i32
    %c0_i32_0 = arith.constant 0 : i32
    %c0_i32_1 = arith.constant 0 : i32
    return %c0_i32, %c0_i32_0 : i32, i32
  }
  func.func @transform_3(%arg0: i32) -> (i32, i32) {
    %c0_i32 = arith.constant 0 : i32
    %c0_i32_0 = arith.constant 0 : i32
    %c0_i32_1 = arith.constant 0 : i32
    return %c0_i32, %c0_i32_0 : i32, i32
  }
  func.func @transform_4(%arg0: i32) -> (i32, i32) {
    %c0_i32 = arith.constant 0 : i32
    %c0_i32_0 = arith.constant 0 : i32
    %c0_i32_1 = arith.constant 0 : i32
    return %c0_i32, %c0_i32_0 : i32, i32
  }
  func.func @transform_5(%arg0: i32) -> (i32, i32) {
    %c0_i32 = arith.constant 0 : i32
    %c0_i32_0 = arith.constant 0 : i32
    return %arg0, %c0_i32 : i32, i32
  }
}

</mosaic_0001>

<bundles_post_ra>
// kernel: st_encoder_block_forward.2
= control target key start
LH: loop header
LB: loop body
LE: loop exit
PB: predicated region body
PF: predicated region fallthrough
CT: control target
= control target key end

     0   :  { %v4092_v1 = vmov 0   ;;  %vm471_vm0 = vcmask 523264   ;;  %v131_v40 = vlaneseq  ;;  %vm3178_vm1 = vcmask 519168   ;;  %s5857_s1 = inlined_call_operand.vmem [shape: bf16[64,448], index: 1, kind: input, shape index: {}]   ;;  %s5858_s0 = inlined_call_operand.vmem [shape: bf16[768,64], index: 0, kind: input, shape index: {}]   ;;  %s5859_s2 = inlined_call_operand.vmem [shape: f32[1,448], index: 2, kind: input, shape index: {}]   ;;  %s5860_s3 = inlined_call_operand.vmem [shape: bf16[768,384], index: 3, kind: output, shape index: {0}]   ;;  %s5861_s4 = inlined_call_operand.vmem [shape: bf16[768,64], index: 4, kind: output, shape index: {1}]  }
   0x1   :  { %v4020_v0 = vld [vmem:[%s5857_s1 + $0x64] ss:$16 sps:$4 sm:$0xff]   ;;  %648 = vmatprep.mubr.bf16.mxu0 %v4092_v1  ;;  %1161 = vmatprep.mubr.bf16.mxu1 %v4092_v1  ;;  %v4022_v2 = vld [vmem:[%s5857_s1 + $0x6c] ss:$16 sps:$4 sm:$0xff]   ;;  %v4024_v3 = vld [vmem:[%s5857_s1 + $0x60] ss:$16 sps:$4 sm:$0xff]  }
   0x2   :  { %624 = vmatprep.subr.bf16.mxu0 %v4020_v0  ;;  %v4025_v4 = vld [vmem:[%s5857_s1 + $0x68] ss:$16 sps:$4 sm:$0xff]   ;;  %1137 = vmatprep.subr.bf16.mxu1 %v4022_v2  ;;  %v4026_v5 = vld [vmem:[%s5857_s1 + $0x44] ss:$16 sps:$4 sm:$0xff]   ;;  %v4028_v6 = vld [vmem:[%s5857_s1 + $0x4c] ss:$16 sps:$4 sm:$0xff]  }
   0x3   :  { %625 = vmatpush1.bf16.msra.mxu0 %v4024_v3  ;;  %1138 = vmatpush1.bf16.msra.mxu1 %v4025_v4  ;;  %v4030_v7 = vld [vmem:[%s5857_s1 + $0x40] ss:$16 sps:$4 sm:$0xff]   ;;  %v4031_v8 = vld [vmem:[%s5857_s1 + $0x48] ss:$16 sps:$4 sm:$0xff]   ;;  %v4032_v9 = vld [vmem:[%s5857_s1 + $0x24] ss:$16 sps:$4 sm:$0xff]  }
   0x4   :  { %626 = vmatprep.subr.bf16.mxu0 %v4026_v5  ;;  %1139 = vmatprep.subr.bf16.mxu1 %v4028_v6  ;;  %v4034_v10 = vld [vmem:[%s5857_s1 + $0x2c] ss:$16 sps:$4 sm:$0xff]   ;;  %v4036_v11 = vld [vmem:[%s5857_s1 + $0x20] ss:$16 sps:$4 sm:$0xff]   ;;  %v4037_v12 = vld [vmem:[%s5857_s1 + $0x28] ss:$16 sps:$4 sm:$0xff]  }
   0x5   :  { %v4038_v13 = vld [vmem:[%s5857_s1 + $0x4] ss:$16 sps:$4 sm:$0xff]   ;;  %v4040_v14 = vld [vmem:[%s5857_s1 + $0xc] ss:$16 sps:$4 sm:$0xff]   ;;  %v4042_v15 = vld [vmem:[%s5857_s1] ss:$16 sps:$4 sm:$0xff]  }
   0x6   :  { %v4043_v16 = vld [vmem:[%s5857_s1 + $0x8] ss:$16 sps:$4 sm:$0xff]   ;;  %v4044_v17 = vld [vmem:[%s5858_s0] sm:$0xff]   ;;  %v4046_v19 = vld [vmem:[%s5858_s0 + $0x10] sm:$0xff]   ;;  %v132_v42 = vshrl.u32 %v131_v40, 7 }
   0x7   :  { %627 = vmatpush1.bf16.msra.mxu0 %v4030_v7  ;;  %1140 = vmatpush1.bf16.msra.mxu1 %v4031_v8  ;;  %v4045_v18 = vld [vmem:[%s5858_s0 + $0x8] sm:$0xff]   ;;  %v4047_v20 = vld [vmem:[%s5858_s0 + $0x18] sm:$0xff]   ;;  %v4048_v21 = vld [vmem:[%s5858_s0 + $0x20] sm:$0xff]  }
   0x8   :  { %628 = vmatprep.subr.bf16.mxu0 %v4032_v9  ;;  %1141 = vmatprep.subr.bf16.mxu1 %v4034_v10  ;;  %v4049_v22 = vld [vmem:[%s5858_s0 + $0x28] sm:$0xff]   ;;  %v4050_v23 = vld [vmem:[%s5858_s0 + $0x30] sm:$0xff]   ;;  %v4051_v24 = vld [vmem:[%s5858_s0 + $0x38] sm:$0xff]   ;;  %v141_v43 = vsub.s32 2, %v132_v42  ;;  %v133_v45 = vsub.s32 0, %v132_v42  ;;  %v137_v46 = vsub.s32 1, %v132_v42 }
   0x9   :  { %v4052_v25 = vld [vmem:[%s5858_s0 + $0x40] sm:$0xff]   ;;  %v4053_v26 = vld [vmem:[%s5858_s0 + $0x48] sm:$0xff]   ;;  %v4054_v27 = vld [vmem:[%s5858_s0 + $0x50] sm:$0xff]   ;;  %v145_v47 = vsub.s32 3, %v132_v42 }
   0xa   :  { %v4055_v28 = vld [vmem:[%s5858_s0 + $0x58] sm:$0xff]   ;;  %v4056_v29 = vld [vmem:[%s5858_s0 + $0x60] sm:$0xff]   ;;  %v4057_v30 = vld [vmem:[%s5858_s0 + $0x68] sm:$0xff]  }
   0xb   :  { %629 = vmatpush1.bf16.msra.mxu0 %v4036_v11  ;;  %1142 = vmatpush1.bf16.msra.mxu1 %v4037_v12  ;;  %v4058_v31 = vld [vmem:[%s5858_s0 + $0x70] sm:$0xff]   ;;  %v4059_v32 = vld [vmem:[%s5858_s0 + $0x78] sm:$0xff]   ;;  %v4060_v33 = vld [vmem:[%s5858_s0 + $0x80] sm:$0xff]  }
   0xc   :  { %630 = vmatprep.subr.bf16.mxu0 %v4038_v13  ;;  %1143 = vmatprep.subr.bf16.mxu1 %v4040_v14  ;;  %v4061_v34 = vld [vmem:[%s5858_s0 + $0x88] sm:$0xff]   ;;  %v4062_v35 = vld [vmem:[%s5858_s0 + $0x90] sm:$0xff]   ;;  %v4063_v36 = vld [vmem:[%s5858_s0 + $0x98] sm:$0xff]  }
   0xd   :  { %v4064_v37 = vld [vmem:[%s5858_s0 + $0xa0] sm:$0xff]   ;;  %v4065_v38 = vld [vmem:[%s5858_s0 + $0xa8] sm:$0xff]   ;;  %v4066_v39 = vld [vmem:[%s5858_s0 + $0xb0] sm:$0xff]  }
   0xe   :  { %v4067_v41 = vld [vmem:[%s5858_s0 + $0xb8] sm:$0xff]   ;;  %v129_v44 = vld [vmem:[%s5859_s2] sm:$0xf]  ;;  %v4069_v0 = vld [vmem:[%s5858_s0 + $0xc8] sm:$0xff]  }
   0xf   :  { %631 = vmatpush1.bf16.msra.mxu0 %v4042_v15  ;;  %1144 = vmatpush1.bf16.msra.mxu1 %v4043_v16  ;;  %v4068_v48 = vld [vmem:[%s5858_s0 + $0xc0] sm:$0xff]   ;;  %v4342_v49 = vrot.slane %v129_v44, %v141_v43  ;;  %v4344_v50 = vrot.slane %v129_v44, %v133_v45  ;;  %v4346_v51 = vrot.slane %v129_v44, %v137_v46 }
  0x10   :  { %v4348_v52 = vrot.slane %v129_v44, %v145_v47  ;;  %v4071_v47 = vld [vmem:[%s5858_s0 + $0xd8] sm:$0xff]  }
  0x12   :  { %3347 = vmatmul.mubr.msk.bf16.vlgmr.msra.gmra.mxu0 %vm471_vm0, %v4044_v17  ;;  %3395 = vmatmul.mubr.msk.bf16.vlgmr.msra.gmra.mxu1 %vm471_vm0, %v4044_v17 }
  0x13   :  { %658 = vmatprep.mubr.bf16.mxu0 %v4092_v1  ;;  %1171 = vmatprep.mubr.bf16.mxu1 %v4092_v1 }
  0x1a   :  { %3348 = vmatmul.mubr.msk.bf16.gmra.mxu0 %vm471_vm0, %v4045_v18  ;;  %3396 = vmatmul.mubr.msk.bf16.gmra.mxu1 %vm471_vm0, %v4045_v18 }
  0x1b   :  { %668 = vmatprep.mubr.bf16.mxu0 %v4092_v1  ;;  %1181 = vmatprep.mubr.bf16.mxu1 %v4092_v1 }
  0x22   :  { %3349 = vmatmul.mubr.msk.bf16.gmra.mxu0 %vm471_vm0, %v4046_v19  ;;  %3397 = vmatmul.mubr.msk.bf16.gmra.mxu1 %vm471_vm0, %v4046_v19 }
  0x23   :  { %678 = vmatprep.mubr.bf16.mxu0 %v4092_v1  ;;  %1191 = vmatprep.mubr.bf16.mxu1 %v4092_v1 }
  0x2a   :  { %3350 = vmatmul.mubr.msk.bf16.gmra.mxu0 %vm471_vm0, %v4047_v20  ;;  %3398 = vmatmul.mubr.msk.bf16.gmra.mxu1 %vm471_vm0, %v4047_v20 }
  0x2b   :  { %688 = vmatprep.mubr.bf16.mxu0 %v4092_v1  ;;  %1201 = vmatprep.mubr.bf16.mxu1 %v4092_v1 }
  0x32   :  { %3351 = vmatmul.mubr.msk.bf16.gmra.mxu0 %vm471_vm0, %v4048_v21  ;;  %3399 = vmatmul.mubr.msk.bf16.gmra.mxu1 %vm471_vm0, %v4048_v21 }
  0x33   :  { %698 = vmatprep.mubr.bf16.mxu0 %v4092_v1  ;;  %1211 = vmatprep.mubr.bf16.mxu1 %v4092_v1 }
  0x3a   :  { %3352 = vmatmul.mubr.msk.bf16.gmra.mxu0 %vm471_vm0, %v4049_v22  ;;  %3400 = vmatmul.mubr.msk.bf16.gmra.mxu1 %vm471_vm0, %v4049_v22 }
  0x3b   :  { %708 = vmatprep.mubr.bf16.mxu0 %v4092_v1  ;;  %1221 = vmatprep.mubr.bf16.mxu1 %v4092_v1 }
  0x42   :  { %3353 = vmatmul.mubr.msk.bf16.gmra.mxu0 %vm471_vm0, %v4050_v23  ;;  %3401 = vmatmul.mubr.msk.bf16.gmra.mxu1 %vm471_vm0, %v4050_v23 }
  0x43   :  { %718 = vmatprep.mubr.bf16.mxu0 %v4092_v1  ;;  %1231 = vmatprep.mubr.bf16.mxu1 %v4092_v1 }
  0x4a   :  { %3354 = vmatmul.mubr.msk.bf16.gmra.mxu0 %vm471_vm0, %v4051_v24  ;;  %3402 = vmatmul.mubr.msk.bf16.gmra.mxu1 %vm471_vm0, %v4051_v24  ;;  %v4070_v24 = vld [vmem:[%s5858_s0 + $0xd0] sm:$0xff]  }
  0x4b   :  { %728 = vmatprep.mubr.bf16.mxu0 %v4092_v1  ;;  %1241 = vmatprep.mubr.bf16.mxu1 %v4092_v1 }
  0x52   :  { %3355 = vmatmul.mubr.msk.bf16.gmra.mxu0 %vm471_vm0, %v4052_v25  ;;  %3403 = vmatmul.mubr.msk.bf16.gmra.mxu1 %vm471_vm0, %v4052_v25 }
  0x53   :  { %738 = vmatprep.mubr.bf16.mxu0 %v4092_v1  ;;  %1251 = vmatprep.mubr.bf16.mxu1 %v4092_v1 }
  0x5a   :  { %3356 = vmatmul.mubr.msk.bf16.gmra.mxu0 %vm471_vm0, %v4053_v26  ;;  %3404 = vmatmul.mubr.msk.bf16.gmra.mxu1 %vm471_vm0, %v4053_v26 }
  0x5b   :  { %748 = vmatprep.mubr.bf16.mxu0 %v4092_v1  ;;  %1261 = vmatprep.mubr.bf16.mxu1 %v4092_v1 }
  0x62   :  { %3357 = vmatmul.mubr.msk.bf16.gmra.mxu0 %vm471_vm0, %v4054_v27  ;;  %3405 = vmatmul.mubr.msk.bf16.gmra.mxu1 %vm471_vm0, %v4054_v27 }
  0x63   :  { %758 = vmatprep.mubr.bf16.mxu0 %v4092_v1  ;;  %1271 = vmatprep.mubr.bf16.mxu1 %v4092_v1 }
  0x6a   :  { %3358 = vmatmul.mubr.msk.bf16.gmra.mxu0 %vm471_vm0, %v4055_v28  ;;  %3406 = vmatmul.mubr.msk.bf16.gmra.mxu1 %vm471_vm0, %v4055_v28 }
  0x6b   :  { %768 = vmatprep.mubr.bf16.mxu0 %v4092_v1  ;;  %1281 = vmatprep.mubr.bf16.mxu1 %v4092_v1 }
  0x72   :  { %3359 = vmatmul.mubr.msk.bf16.gmra.mxu0 %vm471_vm0, %v4056_v29  ;;  %3407 = vmatmul.mubr.msk.bf16.gmra.mxu1 %vm471_vm0, %v4056_v29 }
  0x73   :  { %778 = vmatprep.mubr.bf16.mxu0 %v4092_v1  ;;  %1291 = vmatprep.mubr.bf16.mxu1 %v4092_v1 }
  0x7a   :  { %3360 = vmatmul.mubr.msk.bf16.gmra.mxu0 %vm471_vm0, %v4057_v30  ;;  %3408 = vmatmul.mubr.msk.bf16.gmra.mxu1 %vm471_vm0, %v4057_v30 }
  0x7b   :  { %788 = vmatprep.mubr.bf16.mxu0 %v4092_v1  ;;  %1301 = vmatprep.mubr.bf16.mxu1 %v4092_v1 }
  0x82   :  { %3361 = vmatmul.mubr.msk.bf16.gmra.mxu0 %vm471_vm0, %v4058_v31  ;;  %3409 = vmatmul.mubr.msk.bf16.gmra.mxu1 %vm471_vm0, %v4058_v31 }
  0x83   :  { %798 = vmatprep.mubr.bf16.mxu0 %v4092_v1  ;;  %1311 = vmatprep.mubr.bf16.mxu1 %v4092_v1 }
  0x8a   :  { %3362 = vmatmul.mubr.msk.bf16.gmra.mxu0 %vm471_vm0, %v4059_v32  ;;  %3410 = vmatmul.mubr.msk.bf16.gmra.mxu1 %vm471_vm0, %v4059_v32 }
  0x8b   :  { %808 = vmatprep.mubr.bf16.mxu0 %v4092_v1  ;;  %1321 = vmatprep.mubr.bf16.mxu1 %v4092_v1 }
  0x92   :  { %3363 = vmatmul.mubr.msk.bf16.gmra.mxu0 %vm471_vm0, %v4060_v33  ;;  %3411 = vmatmul.mubr.msk.bf16.gmra.mxu1 %vm471_vm0, %v4060_v33 }
  0x93   :  { %818 = vmatprep.mubr.bf16.mxu0 %v4092_v1  ;;  %1331 = vmatprep.mubr.bf16.mxu1 %v4092_v1 }
  0x9a   :  { %3364 = vmatmul.mubr.msk.bf16.gmra.mxu0 %vm471_vm0, %v4061_v34  ;;  %3412 = vmatmul.mubr.msk.bf16.gmra.mxu1 %vm471_vm0, %v4061_v34 }
  0x9b   :  { %828 = vmatprep.mubr.bf16.mxu0 %v4092_v1  ;;  %1341 = vmatprep.mubr.bf16.mxu1 %v4092_v1 }
  0xa2   :  { %3365 = vmatmul.mubr.msk.bf16.gmra.mxu0 %vm471_vm0, %v4062_v35  ;;  %3413 = vmatmul.mubr.msk.bf16.gmra.mxu1 %vm471_vm0, %v4062_v35 }
  0xa3   :  { %838 = vmatprep.mubr.bf16.mxu0 %v4092_v1  ;;  %1351 = vmatprep.mubr.bf16.mxu1 %v4092_v1 }
  0xaa   :  { %3366 = vmatmul.mubr.msk.bf16.gmra.mxu0 %vm471_vm0, %v4063_v36  ;;  %3414 = vmatmul.mubr.msk.bf16.gmra.mxu1 %vm471_vm0, %v4063_v36 }
  0xab   :  { %848 = vmatprep.mubr.bf16.mxu0 %v4092_v1  ;;  %1361 = vmatprep.mubr.bf16.mxu1 %v4092_v1 }
  0xb2   :  { %3367 = vmatmul.mubr.msk.bf16.gmra.mxu0 %vm471_vm0, %v4064_v37  ;;  %3415 = vmatmul.mubr.msk.bf16.gmra.mxu1 %vm471_vm0, %v4064_v37 }
  0xb3   :  { %858 = vmatprep.mubr.bf16.mxu0 %v4092_v1  ;;  %1371 = vmatprep.mubr.bf16.mxu1 %v4092_v1 }
  0xba   :  { %3368 = vmatmul.mubr.msk.bf16.gmra.mxu0 %vm471_vm0, %v4065_v38  ;;  %3416 = vmatmul.mubr.msk.bf16.gmra.mxu1 %vm471_vm0, %v4065_v38 }
  0xbb   :  { %868 = vmatprep.mubr.bf16.mxu0 %v4092_v1  ;;  %1381 = vmatprep.mubr.bf16.mxu1 %v4092_v1 }
  0xc2   :  { %3369 = vmatmul.mubr.msk.bf16.gmra.mxu0 %vm471_vm0, %v4066_v39  ;;  %3417 = vmatmul.mubr.msk.bf16.gmra.mxu1 %vm471_vm0, %v4066_v39 }
  0xc3   :  { %878 = vmatprep.mubr.bf16.mxu0 %v4092_v1  ;;  %1391 = vmatprep.mubr.bf16.mxu1 %v4092_v1 }
  0xca   :  { %3370 = vmatmul.mubr.msk.bf16.gmra.mxu0 %vm471_vm0, %v4067_v41  ;;  %3418 = vmatmul.mubr.msk.bf16.gmra.mxu1 %vm471_vm0, %v4067_v41 }
  0xcb   :  { %888 = vmatprep.mubr.bf16.mxu0 %v4092_v1  ;;  %1401 = vmatprep.mubr.bf16.mxu1 %v4092_v1 }
  0xd2   :  { %v650_v53 = vpop.f32.mrf.mxu0  ;;  %3371 = vmatmul.mubr.msk.bf16.gmra.mxu0 %vm471_vm0, %v4068_v48  ;;  %v1163_v54 = vpop.f32.mrf.mxu1  ;;  %3419 = vmatmul.mubr.msk.bf16.gmra.mxu1 %vm471_vm0, %v4068_v48 }
  0xd3   :  { %v1164_v55 = vadd.f32 %v1163_v54, %v4342_v49  ;;  %898 = vmatprep.mubr.bf16.mxu0 %v4092_v1  ;;  %1411 = vmatprep.mubr.bf16.mxu1 %v4092_v1  ;;  %v651_v58 = vadd.f32 %v650_v53, %v4344_v50 }
  0xd4   :  { %v652_v56 = vpop.f32.mrf.mxu0  ;;  %v1165_v57 = vpop.f32.mrf.mxu1 }
  0xd5   :  { %v3732_v59 = vpack.c.bf16 %v1164_v55, %v1164_v55  ;;  %v653_v60 = vadd.f32 %v652_v56, %v4346_v51  ;;  %v1166_v61 = vadd.f32 %v1165_v57, %v4348_v52 }
  0xd6   :  { %v654_v62 = vpop.f32.mrf.mxu0  ;;  %v1167_v63 = vpop.f32.mrf.mxu1 }
  0xd7   :  { %2603 = vst [vmem:[%s5860_s3 + $0x8] sm:$0xf] %v3732_v59  ;;  %v3731_v2 = vpack.c.bf16 %v653_v60, %v651_v58  ;;  %v3923_v3 = vpack.c.bf16 %v1166_v61, %v1166_v61  ;;  %v1168_v4 = vadd.f32 %v1167_v63, %v4342_v49  ;;  %v655_v7 = vadd.f32 %v654_v62, %v4344_v50 }
  0xd8   :  { %v656_v5 = vpop.f32.mrf.mxu0  ;;  %v1169_v6 = vpop.f32.mrf.mxu1 }
  0xd9   :  { %2602 = vst [vmem:[%s5860_s3] sm:$0xff] %v3731_v2  ;;  %3179 = vst.msk [vmem:[%s5861_s4] sm:$0xf] %vm3178_vm1, %v3923_v3  ;;  %v3734_v8 = vpack.c.bf16 %v1168_v4, %v1168_v4  ;;  %v657_v9 = vadd.f32 %v656_v5, %v4346_v51  ;;  %v1170_v10 = vadd.f32 %v1169_v6, %v4348_v52 }
  0xda   :  { %v660_v11 = vpop.f32.mrf.mxu0  ;;  %3372 = vmatmul.mubr.msk.bf16.gmra.mxu0 %vm471_vm0, %v4069_v0  ;;  %v1173_v12 = vpop.f32.mrf.mxu1  ;;  %3420 = vmatmul.mubr.msk.bf16.gmra.mxu1 %vm471_vm0, %v4069_v0 }
  0xdb   :  { %2605 = vst [vmem:[%s5860_s3 + $0x14] sm:$0xf] %v3734_v8  ;;  %v3733_v13 = vpack.c.bf16 %v657_v9, %v655_v7  ;;  %v3924_v14 = vpack.c.bf16 %v1170_v10, %v1170_v10  ;;  %v1174_v15 = vadd.f32 %v1173_v12, %v4342_v49  ;;  %908 = vmatprep.mubr.bf16.mxu0 %v4092_v1 }
  0xdc   :  { %v662_v16 = vpop.f32.mrf.mxu0  ;;  %v1175_v17 = vpop.f32.mrf.mxu1  ;;  %1421 = vmatprep.mubr.bf16.mxu1 %v4092_v1  ;;  %v661_v18 = vadd.f32 %v660_v11, %v4344_v50  ;;  %v4072_v11 = vld [vmem:[%s5858_s0 + $0xe0] sm:$0xff]  }
  0xdd   :  { %2604 = vst [vmem:[%s5860_s3 + $0xc] sm:$0xff] %v3733_v13  ;;  %3180 = vst.msk [vmem:[%s5861_s4 + $0x4] sm:$0xf] %vm3178_vm1, %v3924_v14  ;;  %v3736_v19 = vpack.c.bf16 %v1174_v15, %v1174_v15  ;;  %v663_v20 = vadd.f32 %v662_v16, %v4346_v51  ;;  %v1176_v21 = vadd.f32 %v1175_v17, %v4348_v52 }
  0xde   :  { %v664_v22 = vpop.f32.mrf.mxu0  ;;  %v1177_v23 = vpop.f32.mrf.mxu1 }
  0xdf   :  { %2607 = vst [vmem:[%s5860_s3 + $0x20] sm:$0xf] %v3736_v19  ;;  %v3735_v25 = vpack.c.bf16 %v663_v20, %v661_v18  ;;  %v3925_v26 = vpack.c.bf16 %v1176_v21, %v1176_v21  ;;  %v1178_v27 = vadd.f32 %v1177_v23, %v4342_v49  ;;  %v665_v30 = vadd.f32 %v664_v22, %v4344_v50 }
  0xe0   :  { %v666_v28 = vpop.f32.mrf.mxu0  ;;  %v1179_v29 = vpop.f32.mrf.mxu1 }
  0xe1   :  { %2606 = vst [vmem:[%s5860_s3 + $0x18] sm:$0xff] %v3735_v25  ;;  %3181 = vst.msk [vmem:[%s5861_s4 + $0x8] sm:$0xf] %vm3178_vm1, %v3925_v26  ;;  %v3738_v31 = vpack.c.bf16 %v1178_v27, %v1178_v27  ;;  %v667_v32 = vadd.f32 %v666_v28, %v4346_v51  ;;  %v1180_v33 = vadd.f32 %v1179_v29, %v4348_v52 }
  0xe2   :  { %v670_v34 = vpop.f32.mrf.mxu0  ;;  %3373 = vmatmul.mubr.msk.bf16.gmra.mxu0 %vm471_vm0, %v4070_v24  ;;  %v1183_v35 = vpop.f32.mrf.mxu1  ;;  %3421 = vmatmul.mubr.msk.bf16.gmra.mxu1 %vm471_vm0, %v4070_v24 }
  0xe3   :  { %2609 = vst [vmem:[%s5860_s3 + $0x2c] sm:$0xf] %v3738_v31  ;;  %v3737_v36 = vpack.c.bf16 %v667_v32, %v665_v30  ;;  %v3926_v37 = vpack.c.bf16 %v1180_v33, %v1180_v33  ;;  %v1184_v38 = vadd.f32 %v1183_v35, %v4342_v49  ;;  %918 = vmatprep.mubr.bf16.mxu0 %v4092_v1 }
  0xe4   :  { %v672_v39 = vpop.f32.mrf.mxu0  ;;  %v1185_v40 = vpop.f32.mrf.mxu1  ;;  %1431 = vmatprep.mubr.bf16.mxu1 %v4092_v1  ;;  %v671_v41 = vadd.f32 %v670_v34, %v4344_v50  ;;  %v4073_v34 = vld [vmem:[%s5858_s0 + $0xe8] sm:$0xff]  }
  0xe5   :  { %2608 = vst [vmem:[%s5860_s3 + $0x24] sm:$0xff] %v3737_v36  ;;  %3182 = vst.msk [vmem:[%s5861_s4 + $0xc] sm:$0xf] %vm3178_vm1, %v3926_v37  ;;  %v3740_v42 = vpack.c.bf16 %v1184_v38, %v1184_v38  ;;  %v673_v43 = vadd.f32 %v672_v39, %v4346_v51  ;;  %v1186_v44 = vadd.f32 %v1185_v40, %v4348_v52 }
  0xe6   :  { %v674_v45 = vpop.f32.mrf.mxu0  ;;  %v1187_v46 = vpop.f32.mrf.mxu1 }
  0xe7   :  { %2611 = vst [vmem:[%s5860_s3 + $0x38] sm:$0xf] %v3740_v42  ;;  %v3739_v48 = vpack.c.bf16 %v673_v43, %v671_v41  ;;  %v3927_v53 = vpack.c.bf16 %v1186_v44, %v1186_v44  ;;  %v1188_v54 = vadd.f32 %v1187_v46, %v4342_v49  ;;  %v675_v57 = vadd.f32 %v674_v45, %v4344_v50 }
  0xe8   :  { %v676_v55 = vpop.f32.mrf.mxu0  ;;  %v1189_v56 = vpop.f32.mrf.mxu1 }
  0xe9   :  { %2610 = vst [vmem:[%s5860_s3 + $0x30] sm:$0xff] %v3739_v48  ;;  %3183 = vst.msk [vmem:[%s5861_s4 + $0x10] sm:$0xf] %vm3178_vm1, %v3927_v53  ;;  %v3742_v58 = vpack.c.bf16 %v1188_v54, %v1188_v54  ;;  %v677_v59 = vadd.f32 %v676_v55, %v4346_v51  ;;  %v1190_v60 = vadd.f32 %v1189_v56, %v4348_v52 }
  0xea   :  { %v680_v61 = vpop.f32.mrf.mxu0  ;;  %3374 = vmatmul.mubr.msk.bf16.gmra.mxu0 %vm471_vm0, %v4071_v47  ;;  %v1193_v62 = vpop.f32.mrf.mxu1  ;;  %3422 = vmatmul.mubr.msk.bf16.gmra.mxu1 %vm471_vm0, %v4071_v47 }
  0xeb   :  { %2613 = vst [vmem:[%s5860_s3 + $0x44] sm:$0xf] %v3742_v58  ;;  %v3741_v63 = vpack.c.bf16 %v677_v59, %v675_v57  ;;  %v3928_v0 = vpack.c.bf16 %v1190_v60, %v1190_v60  ;;  %v1194_v2 = vadd.f32 %v1193_v62, %v4342_v49  ;;  %928 = vmatprep.mubr.bf16.mxu0 %v4092_v1 }
  0xec   :  { %v682_v3 = vpop.f32.mrf.mxu0  ;;  %v1195_v4 = vpop.f32.mrf.mxu1  ;;  %1441 = vmatprep.mubr.bf16.mxu1 %v4092_v1  ;;  %v681_v5 = vadd.f32 %v680_v61, %v4344_v50  ;;  %v4074_v61 = vld [vmem:[%s5858_s0 + $0xf0] sm:$0xff]  }
  0xed   :  { %2612 = vst [vmem:[%s5860_s3 + $0x3c] sm:$0xff] %v3741_v63  ;;  %3184 = vst.msk [vmem:[%s5861_s4 + $0x14] sm:$0xf] %vm3178_vm1, %v3928_v0  ;;  %v3744_v6 = vpack.c.bf16 %v1194_v2, %v1194_v2  ;;  %v683_v7 = vadd.f32 %v682_v3, %v4346_v51  ;;  %v1196_v8 = vadd.f32 %v1195_v4, %v4348_v52 }
  0xee   :  { %v684_v9 = vpop.f32.mrf.mxu0  ;;  %v1197_v10 = vpop.f32.mrf.mxu1 }
  0xef   :  { %2615 = vst [vmem:[%s5860_s3 + $0x50] sm:$0xf] %v3744_v6  ;;  %v3743_v12 = vpack.c.bf16 %v683_v7, %v681_v5  ;;  %v3929_v13 = vpack.c.bf16 %v1196_v8, %v1196_v8  ;;  %v1198_v14 = vadd.f32 %v1197_v10, %v4342_v49  ;;  %v685_v17 = vadd.f32 %v684_v9, %v4344_v50 }
  0xf0   :  { %v686_v15 = vpop.f32.mrf.mxu0  ;;  %v1199_v16 = vpop.f32.mrf.mxu1 }
  0xf1   :  { %2614 = vst [vmem:[%s5860_s3 + $0x48] sm:$0xff] %v3743_v12  ;;  %3185 = vst.msk [vmem:[%s5861_s4 + $0x18] sm:$0xf] %vm3178_vm1, %v3929_v13  ;;  %v3746_v18 = vpack.c.bf16 %v1198_v14, %v1198_v14  ;;  %v687_v19 = vadd.f32 %v686_v15, %v4346_v51  ;;  %v1200_v20 = vadd.f32 %v1199_v16, %v4348_v52 }
  0xf2   :  { %v690_v21 = vpop.f32.mrf.mxu0  ;;  %3375 = vmatmul.mubr.msk.bf16.gmra.mxu0 %vm471_vm0, %v4072_v11  ;;  %v1203_v22 = vpop.f32.mrf.mxu1  ;;  %3423 = vmatmul.mubr.msk.bf16.gmra.mxu1 %vm471_vm0, %v4072_v11 }
  0xf3   :  { %2617 = vst [vmem:[%s5860_s3 + $0x5c] sm:$0xf] %v3746_v18  ;;  %v3745_v23 = vpack.c.bf16 %v687_v19, %v685_v17  ;;  %v3930_v24 = vpack.c.bf16 %v1200_v20, %v1200_v20  ;;  %v1204_v25 = vadd.f32 %v1203_v22, %v4342_v49  ;;  %938 = vmatprep.mubr.bf16.mxu0 %v4092_v1 }
  0xf4   :  { %v692_v26 = vpop.f32.mrf.mxu0  ;;  %v1205_v27 = vpop.f32.mrf.mxu1  ;;  %1451 = vmatprep.mubr.bf16.mxu1 %v4092_v1  ;;  %v691_v28 = vadd.f32 %v690_v21, %v4344_v50  ;;  %v4075_v21 = vld [vmem:[%s5858_s0 + $0xf8] sm:$0xff]  }
  0xf5   :  { %2616 = vst [vmem:[%s5860_s3 + $0x54] sm:$0xff] %v3745_v23  ;;  %3186 = vst.msk [vmem:[%s5861_s4 + $0x1c] sm:$0xf] %vm3178_vm1, %v3930_v24  ;;  %v3748_v29 = vpack.c.bf16 %v1204_v25, %v1204_v25  ;;  %v693_v30 = vadd.f32 %v692_v26, %v4346_v51  ;;  %v1206_v31 = vadd.f32 %v1205_v27, %v4348_v52 }
  0xf6   :  { %v694_v32 = vpop.f32.mrf.mxu0  ;;  %v1207_v33 = vpop.f32.mrf.mxu1 }
  0xf7   :  { %2619 = vst [vmem:[%s5860_s3 + $0x68] sm:$0xf] %v3748_v29  ;;  %v3747_v35 = vpack.c.bf16 %v693_v30, %v691_v28  ;;  %v3931_v36 = vpack.c.bf16 %v1206_v31, %v1206_v31  ;;  %v1208_v37 = vadd.f32 %v1207_v33, %v4342_v49  ;;  %v695_v40 = vadd.f32 %v694_v32, %v4344_v50 }
  0xf8   :  { %v696_v38 = vpop.f32.mrf.mxu0  ;;  %v1209_v39 = vpop.f32.mrf.mxu1 }
  0xf9   :  { %2618 = vst [vmem:[%s5860_s3 + $0x60] sm:$0xff] %v3747_v35  ;;  %3187 = vst.msk [vmem:[%s5861_s4 + $0x20] sm:$0xf] %vm3178_vm1, %v3931_v36  ;;  %v3750_v41 = vpack.c.bf16 %v1208_v37, %v1208_v37  ;;  %v697_v42 = vadd.f32 %v696_v38, %v4346_v51  ;;  %v1210_v43 = vadd.f32 %v1209_v39, %v4348_v52 }
  0xfa   :  { %v700_v44 = vpop.f32.mrf.mxu0  ;;  %3376 = vmatmul.mubr.msk.bf16.gmra.mxu0 %vm471_vm0, %v4073_v34  ;;  %v1213_v45 = vpop.f32.mrf.mxu1  ;;  %3424 = vmatmul.mubr.msk.bf16.gmra.mxu1 %vm471_vm0, %v4073_v34 }
  0xfb   :  { %2621 = vst [vmem:[%s5860_s3 + $0x74] sm:$0xf] %v3750_v41  ;;  %v3749_v46 = vpack.c.bf16 %v697_v42, %v695_v40  ;;  %v3932_v47 = vpack.c.bf16 %v1210_v43, %v1210_v43  ;;  %v1214_v48 = vadd.f32 %v1213_v45, %v4342_v49  ;;  %948 = vmatprep.mubr.bf16.mxu0 %v4092_v1 }
  0xfc   :  { %v702_v53 = vpop.f32.mrf.mxu0  ;;  %v1215_v54 = vpop.f32.mrf.mxu1  ;;  %1461 = vmatprep.mubr.bf16.mxu1 %v4092_v1  ;;  %v701_v55 = vadd.f32 %v700_v44, %v4344_v50  ;;  %v4076_v44 = vld [vmem:[%s5858_s0 + $0x100] sm:$0xff]  }
  0xfd   :  { %2620 = vst [vmem:[%s5860_s3 + $0x6c] sm:$0xff] %v3749_v46  ;;  %3188 = vst.msk [vmem:[%s5861_s4 + $0x24] sm:$0xf] %vm3178_vm1, %v3932_v47  ;;  %v3752_v56 = vpack.c.bf16 %v1214_v48, %v1214_v48  ;;  %v703_v57 = vadd.f32 %v702_v53, %v4346_v51  ;;  %v1216_v58 = vadd.f32 %v1215_v54, %v4348_v52 }
  0xfe   :  { %v704_v59 = vpop.f32.mrf.mxu0  ;;  %v1217_v60 = vpop.f32.mrf.mxu1 }
  0xff   :  { %2623 = vst [vmem:[%s5860_s3 + $0x80] sm:$0xf] %v3752_v56  ;;  %v3751_v62 = vpack.c.bf16 %v703_v57, %v701_v55  ;;  %v3933_v63 = vpack.c.bf16 %v1216_v58, %v1216_v58  ;;  %v1218_v0 = vadd.f32 %v1217_v60, %v4342_v49  ;;  %v705_v4 = vadd.f32 %v704_v59, %v4344_v50 }
 0x100   :  { %v706_v2 = vpop.f32.mrf.mxu0  ;;  %v1219_v3 = vpop.f32.mrf.mxu1 }
 0x101   :  { %2622 = vst [vmem:[%s5860_s3 + $0x78] sm:$0xff] %v3751_v62  ;;  %3189 = vst.msk [vmem:[%s5861_s4 + $0x28] sm:$0xf] %vm3178_vm1, %v3933_v63  ;;  %v3754_v5 = vpack.c.bf16 %v1218_v0, %v1218_v0  ;;  %v707_v6 = vadd.f32 %v706_v2, %v4346_v51  ;;  %v1220_v7 = vadd.f32 %v1219_v3, %v4348_v52 }
 0x102   :  { %v710_v8 = vpop.f32.mrf.mxu0  ;;  %3377 = vmatmul.mubr.msk.bf16.gmra.mxu0 %vm471_vm0, %v4074_v61  ;;  %v1223_v9 = vpop.f32.mrf.mxu1  ;;  %3425 = vmatmul.mubr.msk.bf16.gmra.mxu1 %vm471_vm0, %v4074_v61 }
 0x103   :  { %2625 = vst [vmem:[%s5860_s3 + $0x8c] sm:$0xf] %v3754_v5  ;;  %v3753_v10 = vpack.c.bf16 %v707_v6, %v705_v4  ;;  %v3934_v11 = vpack.c.bf16 %v1220_v7, %v1220_v7  ;;  %v1224_v12 = vadd.f32 %v1223_v9, %v4342_v49  ;;  %958 = vmatprep.mubr.bf16.mxu0 %v4092_v1 }
 0x104   :  { %v712_v13 = vpop.f32.mrf.mxu0  ;;  %v1225_v14 = vpop.f32.mrf.mxu1  ;;  %1471 = vmatprep.mubr.bf16.mxu1 %v4092_v1  ;;  %v711_v15 = vadd.f32 %v710_v8, %v4344_v50  ;;  %v4077_v8 = vld [vmem:[%s5858_s0 + $0x108] sm:$0xff]  }
 0x105   :  { %2624 = vst [vmem:[%s5860_s3 + $0x84] sm:$0xff] %v3753_v10  ;;  %3190 = vst.msk [vmem:[%s5861_s4 + $0x2c] sm:$0xf] %vm3178_vm1, %v3934_v11  ;;  %v3756_v16 = vpack.c.bf16 %v1224_v12, %v1224_v12  ;;  %v713_v17 = vadd.f32 %v712_v13, %v4346_v51  ;;  %v1226_v18 = vadd.f32 %v1225_v14, %v4348_v52 }
 0x106   :  { %v714_v19 = vpop.f32.mrf.mxu0  ;;  %v1227_v20 = vpop.f32.mrf.mxu1 }
 0x107   :  { %2627 = vst [vmem:[%s5860_s3 + $0x98] sm:$0xf] %v3756_v16  ;;  %v3755_v22 = vpack.c.bf16 %v713_v17, %v711_v15  ;;  %v3935_v23 = vpack.c.bf16 %v1226_v18, %v1226_v18  ;;  %v1228_v24 = vadd.f32 %v1227_v20, %v4342_v49  ;;  %v715_v27 = vadd.f32 %v714_v19, %v4344_v50 }
 0x108   :  { %v716_v25 = vpop.f32.mrf.mxu0  ;;  %v1229_v26 = vpop.f32.mrf.mxu1 }
 0x109   :  { %2626 = vst [vmem:[%s5860_s3 + $0x90] sm:$0xff] %v3755_v22  ;;  %3191 = vst.msk [vmem:[%s5861_s4 + $0x30] sm:$0xf] %vm3178_vm1, %v3935_v23  ;;  %v3758_v28 = vpack.c.bf16 %v1228_v24, %v1228_v24  ;;  %v717_v29 = vadd.f32 %v716_v25, %v4346_v51  ;;  %v1230_v30 = vadd.f32 %v1229_v26, %v4348_v52 }
 0x10a   :  { %v720_v31 = vpop.f32.mrf.mxu0  ;;  %3378 = vmatmul.mubr.msk.bf16.gmra.mxu0 %vm471_vm0, %v4075_v21  ;;  %v1233_v32 = vpop.f32.mrf.mxu1  ;;  %3426 = vmatmul.mubr.msk.bf16.gmra.mxu1 %vm471_vm0, %v4075_v21 }
 0x10b   :  { %2629 = vst [vmem:[%s5860_s3 + $0xa4] sm:$0xf] %v3758_v28  ;;  %v3757_v33 = vpack.c.bf16 %v717_v29, %v715_v27  ;;  %v3936_v34 = vpack.c.bf16 %v1230_v30, %v1230_v30  ;;  %v1234_v35 = vadd.f32 %v1233_v32, %v4342_v49  ;;  %968 = vmatprep.mubr.bf16.mxu0 %v4092_v1 }
 0x10c   :  { %v722_v36 = vpop.f32.mrf.mxu0  ;;  %v1235_v37 = vpop.f32.mrf.mxu1  ;;  %1481 = vmatprep.mubr.bf16.mxu1 %v4092_v1  ;;  %v721_v38 = vadd.f32 %v720_v31, %v4344_v50  ;;  %v4078_v31 = vld [vmem:[%s5858_s0 + $0x110] sm:$0xff]  }
 0x10d   :  { %2628 = vst [vmem:[%s5860_s3 + $0x9c] sm:$0xff] %v3757_v33  ;;  %3192 = vst.msk [vmem:[%s5861_s4 + $0x34] sm:$0xf] %vm3178_vm1, %v3936_v34  ;;  %v3760_v39 = vpack.c.bf16 %v1234_v35, %v1234_v35  ;;  %v723_v40 = vadd.f32 %v722_v36, %v4346_v51  ;;  %v1236_v41 = vadd.f32 %v1235_v37, %v4348_v52 }
 0x10e   :  { %v724_v42 = vpop.f32.mrf.mxu0  ;;  %v1237_v43 = vpop.f32.mrf.mxu1 }
 0x10f   :  { %2631 = vst [vmem:[%s5860_s3 + $0xb0] sm:$0xf] %v3760_v39  ;;  %v3759_v45 = vpack.c.bf16 %v723_v40, %v721_v38  ;;  %v3937_v46 = vpack.c.bf16 %v1236_v41, %v1236_v41  ;;  %v1238_v47 = vadd.f32 %v1237_v43, %v4342_v49  ;;  %v725_v54 = vadd.f32 %v724_v42, %v4344_v50 }
 0x110   :  { %v726_v48 = vpop.f32.mrf.mxu0  ;;  %v1239_v53 = vpop.f32.mrf.mxu1 }
 0x111   :  { %2630 = vst [vmem:[%s5860_s3 + $0xa8] sm:$0xff] %v3759_v45  ;;  %3193 = vst.msk [vmem:[%s5861_s4 + $0x38] sm:$0xf] %vm3178_vm1, %v3937_v46  ;;  %v3762_v55 = vpack.c.bf16 %v1238_v47, %v1238_v47  ;;  %v727_v56 = vadd.f32 %v726_v48, %v4346_v51  ;;  %v1240_v57 = vadd.f32 %v1239_v53, %v4348_v52 }
 0x112   :  { %v730_v58 = vpop.f32.mrf.mxu0  ;;  %3379 = vmatmul.mubr.msk.bf16.gmra.mxu0 %vm471_vm0, %v4076_v44  ;;  %v1243_v59 = vpop.f32.mrf.mxu1  ;;  %3427 = vmatmul.mubr.msk.bf16.gmra.mxu1 %vm471_vm0, %v4076_v44 }
 0x113   :  { %2633 = vst [vmem:[%s5860_s3 + $0xbc] sm:$0xf] %v3762_v55  ;;  %v3761_v60 = vpack.c.bf16 %v727_v56, %v725_v54  ;;  %v3938_v61 = vpack.c.bf16 %v1240_v57, %v1240_v57  ;;  %v1244_v62 = vadd.f32 %v1243_v59, %v4342_v49  ;;  %978 = vmatprep.mubr.bf16.mxu0 %v4092_v1 }
 0x114   :  { %v732_v63 = vpop.f32.mrf.mxu0  ;;  %v1245_v0 = vpop.f32.mrf.mxu1  ;;  %1491 = vmatprep.mubr.bf16.mxu1 %v4092_v1  ;;  %v731_v2 = vadd.f32 %v730_v58, %v4344_v50  ;;  %v4079_v58 = vld [vmem:[%s5858_s0 + $0x118] sm:$0xff]  }
 0x115   :  { %2632 = vst [vmem:[%s5860_s3 + $0xb4] sm:$0xff] %v3761_v60  ;;  %3194 = vst.msk [vmem:[%s5861_s4 + $0x3c] sm:$0xf] %vm3178_vm1, %v3938_v61  ;;  %v3764_v3 = vpack.c.bf16 %v1244_v62, %v1244_v62  ;;  %v733_v4 = vadd.f32 %v732_v63, %v4346_v51  ;;  %v1246_v5 = vadd.f32 %v1245_v0, %v4348_v52 }
 0x116   :  { %v734_v6 = vpop.f32.mrf.mxu0  ;;  %v1247_v7 = vpop.f32.mrf.mxu1 }
 0x117   :  { %2635 = vst [vmem:[%s5860_s3 + $0xc8] sm:$0xf] %v3764_v3  ;;  %v3763_v9 = vpack.c.bf16 %v733_v4, %v731_v2  ;;  %v3939_v10 = vpack.c.bf16 %v1246_v5, %v1246_v5  ;;  %v1248_v11 = vadd.f32 %v1247_v7, %v4342_v49  ;;  %v735_v14 = vadd.f32 %v734_v6, %v4344_v50 }
 0x118   :  { %v736_v12 = vpop.f32.mrf.mxu0  ;;  %v1249_v13 = vpop.f32.mrf.mxu1 }
 0x119   :  { %2634 = vst [vmem:[%s5860_s3 + $0xc0] sm:$0xff] %v3763_v9  ;;  %3195 = vst.msk [vmem:[%s5861_s4 + $0x40] sm:$0xf] %vm3178_vm1, %v3939_v10  ;;  %v3766_v15 = vpack.c.bf16 %v1248_v11, %v1248_v11  ;;  %v737_v16 = vadd.f32 %v736_v12, %v4346_v51  ;;  %v1250_v17 = vadd.f32 %v1249_v13, %v4348_v52 }
 0x11a   :  { %v740_v18 = vpop.f32.mrf.mxu0  ;;  %3380 = vmatmul.mubr.msk.bf16.gmra.mxu0 %vm471_vm0, %v4077_v8  ;;  %v1253_v19 = vpop.f32.mrf.mxu1  ;;  %3428 = vmatmul.mubr.msk.bf16.gmra.mxu1 %vm471_vm0, %v4077_v8 }
 0x11b   :  { %2637 = vst [vmem:[%s5860_s3 + $0xd4] sm:$0xf] %v3766_v15  ;;  %v3765_v20 = vpack.c.bf16 %v737_v16, %v735_v14  ;;  %v3940_v21 = vpack.c.bf16 %v1250_v17, %v1250_v17  ;;  %v1254_v22 = vadd.f32 %v1253_v19, %v4342_v49  ;;  %988 = vmatprep.mubr.bf16.mxu0 %v4092_v1 }
 0x11c   :  { %v742_v23 = vpop.f32.mrf.mxu0  ;;  %v1255_v24 = vpop.f32.mrf.mxu1  ;;  %1501 = vmatprep.mubr.bf16.mxu1 %v4092_v1  ;;  %v741_v25 = vadd.f32 %v740_v18, %v4344_v50  ;;  %v4080_v18 = vld [vmem:[%s5858_s0 + $0x120] sm:$0xff]  }
 0x11d   :  { %2636 = vst [vmem:[%s5860_s3 + $0xcc] sm:$0xff] %v3765_v20  ;;  %3196 = vst.msk [vmem:[%s5861_s4 + $0x44] sm:$0xf] %vm3178_vm1, %v3940_v21  ;;  %v3768_v26 = vpack.c.bf16 %v1254_v22, %v1254_v22  ;;  %v743_v27 = vadd.f32 %v742_v23, %v4346_v51  ;;  %v1256_v28 = vadd.f32 %v1255_v24, %v4348_v52 }
 0x11e   :  { %v744_v29 = vpop.f32.mrf.mxu0  ;;  %v1257_v30 = vpop.f32.mrf.mxu1 }
 0x11f   :  { %2639 = vst [vmem:[%s5860_s3 + $0xe0] sm:$0xf] %v3768_v26  ;;  %v3767_v32 = vpack.c.bf16 %v743_v27, %v741_v25  ;;  %v3941_v33 = vpack.c.bf16 %v1256_v28, %v1256_v28  ;;  %v1258_v34 = vadd.f32 %v1257_v30, %v4342_v49  ;;  %v745_v37 = vadd.f32 %v744_v29, %v4344_v50 }
 0x120   :  { %v746_v35 = vpop.f32.mrf.mxu0  ;;  %v1259_v36 = vpop.f32.mrf.mxu1 }
 0x121   :  { %2638 = vst [vmem:[%s5860_s3 + $0xd8] sm:$0xff] %v3767_v32  ;;  %3197 = vst.msk [vmem:[%s5861_s4 + $0x48] sm:$0xf] %vm3178_vm1, %v3941_v33  ;;  %v3770_v38 = vpack.c.bf16 %v1258_v34, %v1258_v34  ;;  %v747_v39 = vadd.f32 %v746_v35, %v4346_v51  ;;  %v1260_v40 = vadd.f32 %v1259_v36, %v4348_v52 }
 0x122   :  { %v750_v41 = vpop.f32.mrf.mxu0  ;;  %3381 = vmatmul.mubr.msk.bf16.gmra.mxu0 %vm471_vm0, %v4078_v31  ;;  %v1263_v42 = vpop.f32.mrf.mxu1  ;;  %3429 = vmatmul.mubr.msk.bf16.gmra.mxu1 %vm471_vm0, %v4078_v31 }
 0x123   :  { %2641 = vst [vmem:[%s5860_s3 + $0xec] sm:$0xf] %v3770_v38  ;;  %v3769_v43 = vpack.c.bf16 %v747_v39, %v745_v37  ;;  %v3942_v44 = vpack.c.bf16 %v1260_v40, %v1260_v40  ;;  %v1264_v45 = vadd.f32 %v1263_v42, %v4342_v49  ;;  %998 = vmatprep.mubr.bf16.mxu0 %v4092_v1 }
 0x124   :  { %v752_v46 = vpop.f32.mrf.mxu0  ;;  %v1265_v47 = vpop.f32.mrf.mxu1  ;;  %1511 = vmatprep.mubr.bf16.mxu1 %v4092_v1  ;;  %v751_v48 = vadd.f32 %v750_v41, %v4344_v50  ;;  %v4081_v41 = vld [vmem:[%s5858_s0 + $0x128] sm:$0xff]  }
 0x125   :  { %2640 = vst [vmem:[%s5860_s3 + $0xe4] sm:$0xff] %v3769_v43  ;;  %3198 = vst.msk [vmem:[%s5861_s4 + $0x4c] sm:$0xf] %vm3178_vm1, %v3942_v44  ;;  %v3772_v53 = vpack.c.bf16 %v1264_v45, %v1264_v45  ;;  %v753_v54 = vadd.f32 %v752_v46, %v4346_v51  ;;  %v1266_v55 = vadd.f32 %v1265_v47, %v4348_v52 }
 0x126   :  { %v754_v56 = vpop.f32.mrf.mxu0  ;;  %v1267_v57 = vpop.f32.mrf.mxu1 }
 0x127   :  { %2643 = vst [vmem:[%s5860_s3 + $0xf8] sm:$0xf] %v3772_v53  ;;  %v3771_v59 = vpack.c.bf16 %v753_v54, %v751_v48  ;;  %v3943_v60 = vpack.c.bf16 %v1266_v55, %v1266_v55  ;;  %v1268_v61 = vadd.f32 %v1267_v57, %v4342_v49  ;;  %v755_v0 = vadd.f32 %v754_v56, %v4344_v50 }
 0x128   :  { %v756_v62 = vpop.f32.mrf.mxu0  ;;  %v1269_v63 = vpop.f32.mrf.mxu1 }
 0x129   :  { %2642 = vst [vmem:[%s5860_s3 + $0xf0] sm:$0xff] %v3771_v59  ;;  %3199 = vst.msk [vmem:[%s5861_s4 + $0x50] sm:$0xf] %vm3178_vm1, %v3943_v60  ;;  %v3774_v2 = vpack.c.bf16 %v1268_v61, %v1268_v61  ;;  %v757_v3 = vadd.f32 %v756_v62, %v4346_v51  ;;  %v1270_v4 = vadd.f32 %v1269_v63, %v4348_v52 }
 0x12a   :  { %v760_v5 = vpop.f32.mrf.mxu0  ;;  %3382 = vmatmul.mubr.msk.bf16.gmra.mxu0 %vm471_vm0, %v4079_v58  ;;  %v1273_v6 = vpop.f32.mrf.mxu1  ;;  %3430 = vmatmul.mubr.msk.bf16.gmra.mxu1 %vm471_vm0, %v4079_v58 }
 0x12b   :  { %2645 = vst [vmem:[%s5860_s3 + $0x104] sm:$0xf] %v3774_v2  ;;  %v3773_v7 = vpack.c.bf16 %v757_v3, %v755_v0  ;;  %v3944_v8 = vpack.c.bf16 %v1270_v4, %v1270_v4  ;;  %v1274_v9 = vadd.f32 %v1273_v6, %v4342_v49  ;;  %1008 = vmatprep.mubr.bf16.mxu0 %v4092_v1 }
 0x12c   :  { %v762_v10 = vpop.f32.mrf.mxu0  ;;  %v1275_v11 = vpop.f32.mrf.mxu1  ;;  %1521 = vmatprep.mubr.bf16.mxu1 %v4092_v1  ;;  %v761_v12 = vadd.f32 %v760_v5, %v4344_v50  ;;  %v4082_v5 = vld [vmem:[%s5858_s0 + $0x130] sm:$0xff]  }
 0x12d   :  { %2644 = vst [vmem:[%s5860_s3 + $0xfc] sm:$0xff] %v3773_v7  ;;  %3200 = vst.msk [vmem:[%s5861_s4 + $0x54] sm:$0xf] %vm3178_vm1, %v3944_v8  ;;  %v3776_v13 = vpack.c.bf16 %v1274_v9, %v1274_v9  ;;  %v763_v14 = vadd.f32 %v762_v10, %v4346_v51  ;;  %v1276_v15 = vadd.f32 %v1275_v11, %v4348_v52 }
 0x12e   :  { %v764_v16 = vpop.f32.mrf.mxu0  ;;  %v1277_v17 = vpop.f32.mrf.mxu1 }
 0x12f   :  { %2647 = vst [vmem:[%s5860_s3 + $0x110] sm:$0xf] %v3776_v13  ;;  %v3775_v19 = vpack.c.bf16 %v763_v14, %v761_v12  ;;  %v3945_v20 = vpack.c.bf16 %v1276_v15, %v1276_v15  ;;  %v1278_v21 = vadd.f32 %v1277_v17, %v4342_v49  ;;  %v765_v24 = vadd.f32 %v764_v16, %v4344_v50 }
 0x130   :  { %v766_v22 = vpop.f32.mrf.mxu0  ;;  %v1279_v23 = vpop.f32.mrf.mxu1 }
 0x131   :  { %2646 = vst [vmem:[%s5860_s3 + $0x108] sm:$0xff] %v3775_v19  ;;  %3201 = vst.msk [vmem:[%s5861_s4 + $0x58] sm:$0xf] %vm3178_vm1, %v3945_v20  ;;  %v3778_v25 = vpack.c.bf16 %v1278_v21, %v1278_v21  ;;  %v767_v26 = vadd.f32 %v766_v22, %v4346_v51  ;;  %v1280_v27 = vadd.f32 %v1279_v23, %v4348_v52 }
 0x132   :  { %v770_v28 = vpop.f32.mrf.mxu0  ;;  %3383 = vmatmul.mubr.msk.bf16.gmra.mxu0 %vm471_vm0, %v4080_v18  ;;  %v1283_v29 = vpop.f32.mrf.mxu1  ;;  %3431 = vmatmul.mubr.msk.bf16.gmra.mxu1 %vm471_vm0, %v4080_v18 }
 0x133   :  { %2649 = vst [vmem:[%s5860_s3 + $0x11c] sm:$0xf] %v3778_v25  ;;  %v3777_v30 = vpack.c.bf16 %v767_v26, %v765_v24  ;;  %v3946_v31 = vpack.c.bf16 %v1280_v27, %v1280_v27  ;;  %v1284_v32 = vadd.f32 %v1283_v29, %v4342_v49  ;;  %1018 = vmatprep.mubr.bf16.mxu0 %v4092_v1 }
 0x134   :  { %v772_v33 = vpop.f32.mrf.mxu0  ;;  %v1285_v34 = vpop.f32.mrf.mxu1  ;;  %1531 = vmatprep.mubr.bf16.mxu1 %v4092_v1  ;;  %v771_v35 = vadd.f32 %v770_v28, %v4344_v50  ;;  %v4083_v28 = vld [vmem:[%s5858_s0 + $0x138] sm:$0xff]  }
 0x135   :  { %2648 = vst [vmem:[%s5860_s3 + $0x114] sm:$0xff] %v3777_v30  ;;  %3202 = vst.msk [vmem:[%s5861_s4 + $0x5c] sm:$0xf] %vm3178_vm1, %v3946_v31  ;;  %v3780_v36 = vpack.c.bf16 %v1284_v32, %v1284_v32  ;;  %v773_v37 = vadd.f32 %v772_v33, %v4346_v51  ;;  %v1286_v38 = vadd.f32 %v1285_v34, %v4348_v52 }
 0x136   :  { %v774_v39 = vpop.f32.mrf.mxu0  ;;  %v1287_v40 = vpop.f32.mrf.mxu1 }
 0x137   :  { %2651 = vst [vmem:[%s5860_s3 + $0x128] sm:$0xf] %v3780_v36  ;;  %v3779_v42 = vpack.c.bf16 %v773_v37, %v771_v35  ;;  %v3947_v43 = vpack.c.bf16 %v1286_v38, %v1286_v38  ;;  %v1288_v44 = vadd.f32 %v1287_v40, %v4342_v49  ;;  %v775_v47 = vadd.f32 %v774_v39, %v4344_v50 }
 0x138   :  { %v776_v45 = vpop.f32.mrf.mxu0  ;;  %v1289_v46 = vpop.f32.mrf.mxu1 }
 0x139   :  { %2650 = vst [vmem:[%s5860_s3 + $0x120] sm:$0xff] %v3779_v42  ;;  %3203 = vst.msk [vmem:[%s5861_s4 + $0x60] sm:$0xf] %vm3178_vm1, %v3947_v43  ;;  %v3782_v48 = vpack.c.bf16 %v1288_v44, %v1288_v44  ;;  %v777_v53 = vadd.f32 %v776_v45, %v4346_v51  ;;  %v1290_v54 = vadd.f32 %v1289_v46, %v4348_v52 }
 0x13a   :  { %v780_v55 = vpop.f32.mrf.mxu0  ;;  %3384 = vmatmul.mubr.msk.bf16.gmra.mxu0 %vm471_vm0, %v4081_v41  ;;  %v1293_v56 = vpop.f32.mrf.mxu1  ;;  %3432 = vmatmul.mubr.msk.bf16.gmra.mxu1 %vm471_vm0, %v4081_v41 }
 0x13b   :  { %2653 = vst [vmem:[%s5860_s3 + $0x134] sm:$0xf] %v3782_v48  ;;  %v3781_v57 = vpack.c.bf16 %v777_v53, %v775_v47  ;;  %v3948_v58 = vpack.c.bf16 %v1290_v54, %v1290_v54  ;;  %v1294_v59 = vadd.f32 %v1293_v56, %v4342_v49  ;;  %1028 = vmatprep.mubr.bf16.mxu0 %v4092_v1 }
 0x13c   :  { %v782_v60 = vpop.f32.mrf.mxu0  ;;  %v1295_v61 = vpop.f32.mrf.mxu1  ;;  %1541 = vmatprep.mubr.bf16.mxu1 %v4092_v1  ;;  %v781_v62 = vadd.f32 %v780_v55, %v4344_v50  ;;  %v4084_v55 = vld [vmem:[%s5858_s0 + $0x140] sm:$0xff]  }
 0x13d   :  { %2652 = vst [vmem:[%s5860_s3 + $0x12c] sm:$0xff] %v3781_v57  ;;  %3204 = vst.msk [vmem:[%s5861_s4 + $0x64] sm:$0xf] %vm3178_vm1, %v3948_v58  ;;  %v3784_v63 = vpack.c.bf16 %v1294_v59, %v1294_v59  ;;  %v783_v0 = vadd.f32 %v782_v60, %v4346_v51  ;;  %v1296_v2 = vadd.f32 %v1295_v61, %v4348_v52 }
 0x13e   :  { %v784_v3 = vpop.f32.mrf.mxu0  ;;  %v1297_v4 = vpop.f32.mrf.mxu1 }
 0x13f   :  { %2655 = vst [vmem:[%s5860_s3 + $0x140] sm:$0xf] %v3784_v63  ;;  %v3783_v6 = vpack.c.bf16 %v783_v0, %v781_v62  ;;  %v3949_v7 = vpack.c.bf16 %v1296_v2, %v1296_v2  ;;  %v1298_v8 = vadd.f32 %v1297_v4, %v4342_v49  ;;  %v785_v11 = vadd.f32 %v784_v3, %v4344_v50 }
 0x140   :  { %v786_v9 = vpop.f32.mrf.mxu0  ;;  %v1299_v10 = vpop.f32.mrf.mxu1 }
 0x141   :  { %2654 = vst [vmem:[%s5860_s3 + $0x138] sm:$0xff] %v3783_v6  ;;  %3205 = vst.msk [vmem:[%s5861_s4 + $0x68] sm:$0xf] %vm3178_vm1, %v3949_v7  ;;  %v3786_v12 = vpack.c.bf16 %v1298_v8, %v1298_v8  ;;  %v787_v13 = vadd.f32 %v786_v9, %v4346_v51  ;;  %v1300_v14 = vadd.f32 %v1299_v10, %v4348_v52 }
 0x142   :  { %v790_v15 = vpop.f32.mrf.mxu0  ;;  %3385 = vmatmul.mubr.msk.bf16.gmra.mxu0 %vm471_vm0, %v4082_v5  ;;  %v1303_v16 = vpop.f32.mrf.mxu1  ;;  %3433 = vmatmul.mubr.msk.bf16.gmra.mxu1 %vm471_vm0, %v4082_v5 }
 0x143   :  { %2657 = vst [vmem:[%s5860_s3 + $0x14c] sm:$0xf] %v3786_v12  ;;  %v3785_v17 = vpack.c.bf16 %v787_v13, %v785_v11  ;;  %v3950_v18 = vpack.c.bf16 %v1300_v14, %v1300_v14  ;;  %v1304_v19 = vadd.f32 %v1303_v16, %v4342_v49  ;;  %1038 = vmatprep.mubr.bf16.mxu0 %v4092_v1 }
 0x144   :  { %v792_v20 = vpop.f32.mrf.mxu0  ;;  %v1305_v21 = vpop.f32.mrf.mxu1  ;;  %1551 = vmatprep.mubr.bf16.mxu1 %v4092_v1  ;;  %v791_v22 = vadd.f32 %v790_v15, %v4344_v50  ;;  %v4085_v15 = vld [vmem:[%s5858_s0 + $0x148] sm:$0xff]  }
 0x145   :  { %2656 = vst [vmem:[%s5860_s3 + $0x144] sm:$0xff] %v3785_v17  ;;  %3206 = vst.msk [vmem:[%s5861_s4 + $0x6c] sm:$0xf] %vm3178_vm1, %v3950_v18  ;;  %v3788_v23 = vpack.c.bf16 %v1304_v19, %v1304_v19  ;;  %v793_v24 = vadd.f32 %v792_v20, %v4346_v51  ;;  %v1306_v25 = vadd.f32 %v1305_v21, %v4348_v52 }
 0x146   :  { %v794_v26 = vpop.f32.mrf.mxu0  ;;  %v1307_v27 = vpop.f32.mrf.mxu1 }
 0x147   :  { %2659 = vst [vmem:[%s5860_s3 + $0x158] sm:$0xf] %v3788_v23  ;;  %v3787_v29 = vpack.c.bf16 %v793_v24, %v791_v22  ;;  %v3951_v30 = vpack.c.bf16 %v1306_v25, %v1306_v25  ;;  %v1308_v31 = vadd.f32 %v1307_v27, %v4342_v49  ;;  %v795_v34 = vadd.f32 %v794_v26, %v4344_v50 }
 0x148   :  { %v796_v32 = vpop.f32.mrf.mxu0  ;;  %v1309_v33 = vpop.f32.mrf.mxu1 }
 0x149   :  { %2658 = vst [vmem:[%s5860_s3 + $0x150] sm:$0xff] %v3787_v29  ;;  %3207 = vst.msk [vmem:[%s5861_s4 + $0x70] sm:$0xf] %vm3178_vm1, %v3951_v30  ;;  %v3790_v35 = vpack.c.bf16 %v1308_v31, %v1308_v31  ;;  %v797_v36 = vadd.f32 %v796_v32, %v4346_v51  ;;  %v1310_v37 = vadd.f32 %v1309_v33, %v4348_v52 }
 0x14a   :  { %v800_v38 = vpop.f32.mrf.mxu0  ;;  %3386 = vmatmul.mubr.msk.bf16.gmra.mxu0 %vm471_vm0, %v4083_v28  ;;  %v1313_v39 = vpop.f32.mrf.mxu1  ;;  %3434 = vmatmul.mubr.msk.bf16.gmra.mxu1 %vm471_vm0, %v4083_v28 }
 0x14b   :  { %2661 = vst [vmem:[%s5860_s3 + $0x164] sm:$0xf] %v3790_v35  ;;  %v3789_v40 = vpack.c.bf16 %v797_v36, %v795_v34  ;;  %v3952_v41 = vpack.c.bf16 %v1310_v37, %v1310_v37  ;;  %v1314_v42 = vadd.f32 %v1313_v39, %v4342_v49  ;;  %1048 = vmatprep.mubr.bf16.mxu0 %v4092_v1 }
 0x14c   :  { %v802_v43 = vpop.f32.mrf.mxu0  ;;  %v1315_v44 = vpop.f32.mrf.mxu1  ;;  %1561 = vmatprep.mubr.bf16.mxu1 %v4092_v1  ;;  %v801_v45 = vadd.f32 %v800_v38, %v4344_v50  ;;  %v4086_v38 = vld [vmem:[%s5858_s0 + $0x150] sm:$0xff]  }
 0x14d   :  { %2660 = vst [vmem:[%s5860_s3 + $0x15c] sm:$0xff] %v3789_v40  ;;  %3208 = vst.msk [vmem:[%s5861_s4 + $0x74] sm:$0xf] %vm3178_vm1, %v3952_v41  ;;  %v3792_v46 = vpack.c.bf16 %v1314_v42, %v1314_v42  ;;  %v803_v47 = vadd.f32 %v802_v43, %v4346_v51  ;;  %v1316_v48 = vadd.f32 %v1315_v44, %v4348_v52 }
 0x14e   :  { %v804_v53 = vpop.f32.mrf.mxu0  ;;  %v1317_v54 = vpop.f32.mrf.mxu1 }
 0x14f   :  { %2663 = vst [vmem:[%s5860_s3 + $0x170] sm:$0xf] %v3792_v46  ;;  %v3791_v56 = vpack.c.bf16 %v803_v47, %v801_v45  ;;  %v3953_v57 = vpack.c.bf16 %v1316_v48, %v1316_v48  ;;  %v1318_v58 = vadd.f32 %v1317_v54, %v4342_v49  ;;  %v805_v61 = vadd.f32 %v804_v53, %v4344_v50 }
 0x150   :  { %v806_v59 = vpop.f32.mrf.mxu0  ;;  %v1319_v60 = vpop.f32.mrf.mxu1 }
 0x151   :  { %2662 = vst [vmem:[%s5860_s3 + $0x168] sm:$0xff] %v3791_v56  ;;  %3209 = vst.msk [vmem:[%s5861_s4 + $0x78] sm:$0xf] %vm3178_vm1, %v3953_v57  ;;  %v3794_v62 = vpack.c.bf16 %v1318_v58, %v1318_v58  ;;  %v807_v63 = vadd.f32 %v806_v59, %v4346_v51  ;;  %v1320_v0 = vadd.f32 %v1319_v60, %v4348_v52 }
 0x152   :  { %v810_v2 = vpop.f32.mrf.mxu0  ;;  %3387 = vmatmul.mubr.msk.bf16.gmra.mxu0 %vm471_vm0, %v4084_v55  ;;  %v1323_v3 = vpop.f32.mrf.mxu1  ;;  %3435 = vmatmul.mubr.msk.bf16.gmra.mxu1 %vm471_vm0, %v4084_v55 }
 0x153   :  { %2665 = vst [vmem:[%s5860_s3 + $0x17c] sm:$0xf] %v3794_v62  ;;  %v3793_v4 = vpack.c.bf16 %v807_v63, %v805_v61  ;;  %v3954_v5 = vpack.c.bf16 %v1320_v0, %v1320_v0  ;;  %v1324_v6 = vadd.f32 %v1323_v3, %v4342_v49  ;;  %1058 = vmatprep.mubr.bf16.mxu0 %v4092_v1 }
 0x154   :  { %v812_v7 = vpop.f32.mrf.mxu0  ;;  %v1325_v8 = vpop.f32.mrf.mxu1  ;;  %1571 = vmatprep.mubr.bf16.mxu1 %v4092_v1  ;;  %v811_v9 = vadd.f32 %v810_v2, %v4344_v50  ;;  %v4087_v2 = vld [vmem:[%s5858_s0 + $0x158] sm:$0xff]  }
 0x155   :  { %2664 = vst [vmem:[%s5860_s3 + $0x174] sm:$0xff] %v3793_v4  ;;  %3210 = vst.msk [vmem:[%s5861_s4 + $0x7c] sm:$0xf] %vm3178_vm1, %v3954_v5  ;;  %v3796_v10 = vpack.c.bf16 %v1324_v6, %v1324_v6  ;;  %v813_v11 = vadd.f32 %v812_v7, %v4346_v51  ;;  %v1326_v12 = vadd.f32 %v1325_v8, %v4348_v52 }
 0x156   :  { %v814_v13 = vpop.f32.mrf.mxu0  ;;  %v1327_v14 = vpop.f32.mrf.mxu1 }
 0x157   :  { %2667 = vst [vmem:[%s5860_s3 + $0x188] sm:$0xf] %v3796_v10  ;;  %v3795_v16 = vpack.c.bf16 %v813_v11, %v811_v9  ;;  %v3955_v17 = vpack.c.bf16 %v1326_v12, %v1326_v12  ;;  %v1328_v18 = vadd.f32 %v1327_v14, %v4342_v49  ;;  %v815_v21 = vadd.f32 %v814_v13, %v4344_v50 }
 0x158   :  { %v816_v19 = vpop.f32.mrf.mxu0  ;;  %v1329_v20 = vpop.f32.mrf.mxu1 }
 0x159   :  { %2666 = vst [vmem:[%s5860_s3 + $0x180] sm:$0xff] %v3795_v16  ;;  %3211 = vst.msk [vmem:[%s5861_s4 + $0x80] sm:$0xf] %vm3178_vm1, %v3955_v17  ;;  %v3798_v22 = vpack.c.bf16 %v1328_v18, %v1328_v18  ;;  %v817_v23 = vadd.f32 %v816_v19, %v4346_v51  ;;  %v1330_v24 = vadd.f32 %v1329_v20, %v4348_v52 }
 0x15a   :  { %v820_v25 = vpop.f32.mrf.mxu0  ;;  %3388 = vmatmul.mubr.msk.bf16.gmra.mxu0 %vm471_vm0, %v4085_v15  ;;  %v1333_v26 = vpop.f32.mrf.mxu1  ;;  %3436 = vmatmul.mubr.msk.bf16.gmra.mxu1 %vm471_vm0, %v4085_v15 }
 0x15b   :  { %2669 = vst [vmem:[%s5860_s3 + $0x194] sm:$0xf] %v3798_v22  ;;  %v3797_v27 = vpack.c.bf16 %v817_v23, %v815_v21  ;;  %v3956_v28 = vpack.c.bf16 %v1330_v24, %v1330_v24  ;;  %v1334_v29 = vadd.f32 %v1333_v26, %v4342_v49  ;;  %1068 = vmatprep.mubr.bf16.mxu0 %v4092_v1 }
 0x15c   :  { %v822_v30 = vpop.f32.mrf.mxu0  ;;  %v1335_v31 = vpop.f32.mrf.mxu1  ;;  %1581 = vmatprep.mubr.bf16.mxu1 %v4092_v1  ;;  %v821_v32 = vadd.f32 %v820_v25, %v4344_v50  ;;  %v4088_v25 = vld [vmem:[%s5858_s0 + $0x160] sm:$0xff]  }
 0x15d   :  { %2668 = vst [vmem:[%s5860_s3 + $0x18c] sm:$0xff] %v3797_v27  ;;  %3212 = vst.msk [vmem:[%s5861_s4 + $0x84] sm:$0xf] %vm3178_vm1, %v3956_v28  ;;  %v3800_v33 = vpack.c.bf16 %v1334_v29, %v1334_v29  ;;  %v823_v34 = vadd.f32 %v822_v30, %v4346_v51  ;;  %v1336_v35 = vadd.f32 %v1335_v31, %v4348_v52 }
 0x15e   :  { %v824_v36 = vpop.f32.mrf.mxu0  ;;  %v1337_v37 = vpop.f32.mrf.mxu1 }
 0x15f   :  { %2671 = vst [vmem:[%s5860_s3 + $0x1a0] sm:$0xf] %v3800_v33  ;;  %v3799_v39 = vpack.c.bf16 %v823_v34, %v821_v32  ;;  %v3957_v40 = vpack.c.bf16 %v1336_v35, %v1336_v35  ;;  %v1338_v41 = vadd.f32 %v1337_v37, %v4342_v49  ;;  %v825_v44 = vadd.f32 %v824_v36, %v4344_v50 }
 0x160   :  { %v826_v42 = vpop.f32.mrf.mxu0  ;;  %v1339_v43 = vpop.f32.mrf.mxu1 }
 0x161   :  { %2670 = vst [vmem:[%s5860_s3 + $0x198] sm:$0xff] %v3799_v39  ;;  %3213 = vst.msk [vmem:[%s5861_s4 + $0x88] sm:$0xf] %vm3178_vm1, %v3957_v40  ;;  %v3802_v45 = vpack.c.bf16 %v1338_v41, %v1338_v41  ;;  %v827_v46 = vadd.f32 %v826_v42, %v4346_v51  ;;  %v1340_v47 = vadd.f32 %v1339_v43, %v4348_v52 }
 0x162   :  { %v830_v48 = vpop.f32.mrf.mxu0  ;;  %3389 = vmatmul.mubr.msk.bf16.gmra.mxu0 %vm471_vm0, %v4086_v38  ;;  %v1343_v53 = vpop.f32.mrf.mxu1  ;;  %3437 = vmatmul.mubr.msk.bf16.gmra.mxu1 %vm471_vm0, %v4086_v38 }
 0x163   :  { %2673 = vst [vmem:[%s5860_s3 + $0x1ac] sm:$0xf] %v3802_v45  ;;  %v3801_v54 = vpack.c.bf16 %v827_v46, %v825_v44  ;;  %v3958_v55 = vpack.c.bf16 %v1340_v47, %v1340_v47  ;;  %v1344_v56 = vadd.f32 %v1343_v53, %v4342_v49  ;;  %1078 = vmatprep.mubr.bf16.mxu0 %v4092_v1 }
 0x164   :  { %v832_v57 = vpop.f32.mrf.mxu0  ;;  %v1345_v58 = vpop.f32.mrf.mxu1  ;;  %1591 = vmatprep.mubr.bf16.mxu1 %v4092_v1  ;;  %v831_v59 = vadd.f32 %v830_v48, %v4344_v50  ;;  %v4089_v48 = vld [vmem:[%s5858_s0 + $0x168] sm:$0xff]  }
 0x165   :  { %2672 = vst [vmem:[%s5860_s3 + $0x1a4] sm:$0xff] %v3801_v54  ;;  %3214 = vst.msk [vmem:[%s5861_s4 + $0x8c] sm:$0xf] %vm3178_vm1, %v3958_v55  ;;  %v3804_v60 = vpack.c.bf16 %v1344_v56, %v1344_v56  ;;  %v833_v61 = vadd.f32 %v832_v57, %v4346_v51  ;;  %v1346_v62 = vadd.f32 %v1345_v58, %v4348_v52 }
 0x166   :  { %v834_v63 = vpop.f32.mrf.mxu0  ;;  %v1347_v0 = vpop.f32.mrf.mxu1 }
 0x167   :  { %2675 = vst [vmem:[%s5860_s3 + $0x1b8] sm:$0xf] %v3804_v60  ;;  %v3803_v3 = vpack.c.bf16 %v833_v61, %v831_v59  ;;  %v3959_v4 = vpack.c.bf16 %v1346_v62, %v1346_v62  ;;  %v1348_v5 = vadd.f32 %v1347_v0, %v4342_v49  ;;  %v835_v8 = vadd.f32 %v834_v63, %v4344_v50 }
 0x168   :  { %v836_v6 = vpop.f32.mrf.mxu0  ;;  %v1349_v7 = vpop.f32.mrf.mxu1 }
 0x169   :  { %2674 = vst [vmem:[%s5860_s3 + $0x1b0] sm:$0xff] %v3803_v3  ;;  %3215 = vst.msk [vmem:[%s5861_s4 + $0x90] sm:$0xf] %vm3178_vm1, %v3959_v4  ;;  %v3806_v9 = vpack.c.bf16 %v1348_v5, %v1348_v5  ;;  %v837_v10 = vadd.f32 %v836_v6, %v4346_v51  ;;  %v1350_v11 = vadd.f32 %v1349_v7, %v4348_v52 }
 0x16a   :  { %v840_v12 = vpop.f32.mrf.mxu0  ;;  %3390 = vmatmul.mubr.msk.bf16.gmra.mxu0 %vm471_vm0, %v4087_v2  ;;  %v1353_v13 = vpop.f32.mrf.mxu1  ;;  %3438 = vmatmul.mubr.msk.bf16.gmra.mxu1 %vm471_vm0, %v4087_v2 }
 0x16b   :  { %2677 = vst [vmem:[%s5860_s3 + $0x1c4] sm:$0xf] %v3806_v9  ;;  %v3805_v14 = vpack.c.bf16 %v837_v10, %v835_v8  ;;  %v3960_v15 = vpack.c.bf16 %v1350_v11, %v1350_v11  ;;  %v1354_v16 = vadd.f32 %v1353_v13, %v4342_v49  ;;  %1088 = vmatprep.mubr.bf16.mxu0 %v4092_v1 }
 0x16c   :  { %v842_v17 = vpop.f32.mrf.mxu0  ;;  %v1355_v18 = vpop.f32.mrf.mxu1  ;;  %1601 = vmatprep.mubr.bf16.mxu1 %v4092_v1  ;;  %v841_v19 = vadd.f32 %v840_v12, %v4344_v50  ;;  %v4090_v12 = vld [vmem:[%s5858_s0 + $0x170] sm:$0xff]  }
 0x16d   :  { %2676 = vst [vmem:[%s5860_s3 + $0x1bc] sm:$0xff] %v3805_v14  ;;  %3216 = vst.msk [vmem:[%s5861_s4 + $0x94] sm:$0xf] %vm3178_vm1, %v3960_v15  ;;  %v3808_v20 = vpack.c.bf16 %v1354_v16, %v1354_v16  ;;  %v843_v21 = vadd.f32 %v842_v17, %v4346_v51  ;;  %v1356_v22 = vadd.f32 %v1355_v18, %v4348_v52 }
 0x16e   :  { %v844_v23 = vpop.f32.mrf.mxu0  ;;  %v1357_v24 = vpop.f32.mrf.mxu1 }
 0x16f   :  { %2679 = vst [vmem:[%s5860_s3 + $0x1d0] sm:$0xf] %v3808_v20  ;;  %v3807_v26 = vpack.c.bf16 %v843_v21, %v841_v19  ;;  %v3961_v27 = vpack.c.bf16 %v1356_v22, %v1356_v22  ;;  %v1358_v28 = vadd.f32 %v1357_v24, %v4342_v49  ;;  %v845_v31 = vadd.f32 %v844_v23, %v4344_v50 }
 0x170   :  { %v846_v29 = vpop.f32.mrf.mxu0  ;;  %v1359_v30 = vpop.f32.mrf.mxu1 }
 0x171   :  { %2678 = vst [vmem:[%s5860_s3 + $0x1c8] sm:$0xff] %v3807_v26  ;;  %3217 = vst.msk [vmem:[%s5861_s4 + $0x98] sm:$0xf] %vm3178_vm1, %v3961_v27  ;;  %v3810_v32 = vpack.c.bf16 %v1358_v28, %v1358_v28  ;;  %v847_v33 = vadd.f32 %v846_v29, %v4346_v51  ;;  %v1360_v34 = vadd.f32 %v1359_v30, %v4348_v52 }
 0x172   :  { %v850_v35 = vpop.f32.mrf.mxu0  ;;  %3391 = vmatmul.mubr.msk.bf16.gmra.mxu0 %vm471_vm0, %v4088_v25  ;;  %v1363_v36 = vpop.f32.mrf.mxu1  ;;  %3439 = vmatmul.mubr.msk.bf16.gmra.mxu1 %vm471_vm0, %v4088_v25 }
 0x173   :  { %2681 = vst [vmem:[%s5860_s3 + $0x1dc] sm:$0xf] %v3810_v32  ;;  %v3809_v37 = vpack.c.bf16 %v847_v33, %v845_v31  ;;  %v3962_v38 = vpack.c.bf16 %v1360_v34, %v1360_v34  ;;  %v1364_v39 = vadd.f32 %v1363_v36, %v4342_v49  ;;  %1098 = vmatprep.mubr.bf16.mxu0 %v4092_v1 }
 0x174   :  { %v852_v40 = vpop.f32.mrf.mxu0  ;;  %v1365_v41 = vpop.f32.mrf.mxu1  ;;  %1611 = vmatprep.mubr.bf16.mxu1 %v4092_v1  ;;  %v851_v42 = vadd.f32 %v850_v35, %v4344_v50 }
 0x175   :  { %2680 = vst [vmem:[%s5860_s3 + $0x1d4] sm:$0xff] %v3809_v37  ;;  %3218 = vst.msk [vmem:[%s5861_s4 + $0x9c] sm:$0xf] %vm3178_vm1, %v3962_v38  ;;  %v3812_v43 = vpack.c.bf16 %v1364_v39, %v1364_v39  ;;  %v853_v44 = vadd.f32 %v852_v40, %v4346_v51  ;;  %v1366_v45 = vadd.f32 %v1365_v41, %v4348_v52 }
 0x176   :  { %v854_v46 = vpop.f32.mrf.mxu0  ;;  %v1367_v47 = vpop.f32.mrf.mxu1 }
 0x177   :  { %2683 = vst [vmem:[%s5860_s3 + $0x1e8] sm:$0xf] %v3812_v43  ;;  %v3811_v53 = vpack.c.bf16 %v853_v44, %v851_v42  ;;  %v3963_v54 = vpack.c.bf16 %v1366_v45, %v1366_v45  ;;  %v1368_v55 = vadd.f32 %v1367_v47, %v4342_v49  ;;  %v855_v58 = vadd.f32 %v854_v46, %v4344_v50 }
 0x178   :  { %v856_v56 = vpop.f32.mrf.mxu0  ;;  %v1369_v57 = vpop.f32.mrf.mxu1 }
 0x179   :  { %2682 = vst [vmem:[%s5860_s3 + $0x1e0] sm:$0xff] %v3811_v53  ;;  %3219 = vst.msk [vmem:[%s5861_s4 + $0xa0] sm:$0xf] %vm3178_vm1, %v3963_v54  ;;  %v3814_v59 = vpack.c.bf16 %v1368_v55, %v1368_v55  ;;  %v857_v60 = vadd.f32 %v856_v56, %v4346_v51  ;;  %v1370_v61 = vadd.f32 %v1369_v57, %v4348_v52 }
 0x17a   :  { %v860_v62 = vpop.f32.mrf.mxu0  ;;  %3392 = vmatmul.mubr.msk.bf16.gmra.mxu0 %vm471_vm0, %v4089_v48  ;;  %v1373_v63 = vpop.f32.mrf.mxu1  ;;  %3440 = vmatmul.mubr.msk.bf16.gmra.mxu1 %vm471_vm0, %v4089_v48 }
 0x17b   :  { %2685 = vst [vmem:[%s5860_s3 + $0x1f4] sm:$0xf] %v3814_v59  ;;  %v3813_v0 = vpack.c.bf16 %v857_v60, %v855_v58  ;;  %v3964_v2 = vpack.c.bf16 %v1370_v61, %v1370_v61  ;;  %v1374_v3 = vadd.f32 %v1373_v63, %v4342_v49  ;;  %1108 = vmatprep.mubr.bf16.mxu0 %v4092_v1 }
 0x17c   :  { %v862_v4 = vpop.f32.mrf.mxu0  ;;  %v1375_v5 = vpop.f32.mrf.mxu1  ;;  %1621 = vmatprep.mubr.bf16.mxu1 %v4092_v1  ;;  %v861_v6 = vadd.f32 %v860_v62, %v4344_v50 }
 0x17d   :  { %2684 = vst [vmem:[%s5860_s3 + $0x1ec] sm:$0xff] %v3813_v0  ;;  %3220 = vst.msk [vmem:[%s5861_s4 + $0xa4] sm:$0xf] %vm3178_vm1, %v3964_v2  ;;  %v3816_v7 = vpack.c.bf16 %v1374_v3, %v1374_v3  ;;  %v863_v8 = vadd.f32 %v862_v4, %v4346_v51  ;;  %v1376_v9 = vadd.f32 %v1375_v5, %v4348_v52 }
 0x17e   :  { %v864_v10 = vpop.f32.mrf.mxu0  ;;  %v1377_v11 = vpop.f32.mrf.mxu1 }
 0x17f   :  { %2687 = vst [vmem:[%s5860_s3 + $0x200] sm:$0xf] %v3816_v7  ;;  %v3815_v13 = vpack.c.bf16 %v863_v8, %v861_v6  ;;  %v3965_v14 = vpack.c.bf16 %v1376_v9, %v1376_v9  ;;  %v1378_v15 = vadd.f32 %v1377_v11, %v4342_v49  ;;  %v865_v18 = vadd.f32 %v864_v10, %v4344_v50 }
 0x180   :  { %v866_v16 = vpop.f32.mrf.mxu0  ;;  %v1379_v17 = vpop.f32.mrf.mxu1 }
 0x181   :  { %2686 = vst [vmem:[%s5860_s3 + $0x1f8] sm:$0xff] %v3815_v13  ;;  %3221 = vst.msk [vmem:[%s5861_s4 + $0xa8] sm:$0xf] %vm3178_vm1, %v3965_v14  ;;  %v3818_v19 = vpack.c.bf16 %v1378_v15, %v1378_v15  ;;  %v867_v20 = vadd.f32 %v866_v16, %v4346_v51  ;;  %v1380_v21 = vadd.f32 %v1379_v17, %v4348_v52 }
 0x182   :  { %v870_v22 = vpop.f32.mrf.mxu0  ;;  %3393 = vmatmul.mubr.msk.bf16.gmra.mxu0 %vm471_vm0, %v4090_v12  ;;  %v1383_v23 = vpop.f32.mrf.mxu1  ;;  %3441 = vmatmul.mubr.msk.bf16.gmra.mxu1 %vm471_vm0, %v4090_v12 }
 0x183   :  { %2689 = vst [vmem:[%s5860_s3 + $0x20c] sm:$0xf] %v3818_v19  ;;  %v3817_v24 = vpack.c.bf16 %v867_v20, %v865_v18  ;;  %v3966_v25 = vpack.c.bf16 %v1380_v21, %v1380_v21  ;;  %v1384_v26 = vadd.f32 %v1383_v23, %v4342_v49  ;;  %1118 = vmatprep.mubr.bf16.mxu0 %v4092_v1 }
 0x184   :  { %v872_v27 = vpop.f32.mrf.mxu0  ;;  %v1385_v28 = vpop.f32.mrf.mxu1  ;;  %1631 = vmatprep.mubr.bf16.mxu1 %v4092_v1  ;;  %v871_v29 = vadd.f32 %v870_v22, %v4344_v50  ;;  %v4091_v1 = vld [vmem:[%s5858_s0 + $0x178] sm:$0xff]  }
 0x185   :  { %2688 = vst [vmem:[%s5860_s3 + $0x204] sm:$0xff] %v3817_v24  ;;  %3222 = vst.msk [vmem:[%s5861_s4 + $0xac] sm:$0xf] %vm3178_vm1, %v3966_v25  ;;  %v3820_v30 = vpack.c.bf16 %v1384_v26, %v1384_v26  ;;  %v873_v31 = vadd.f32 %v872_v27, %v4346_v51  ;;  %v1386_v32 = vadd.f32 %v1385_v28, %v4348_v52 }
 0x186   :  { %v874_v33 = vpop.f32.mrf.mxu0  ;;  %v1387_v34 = vpop.f32.mrf.mxu1 }
 0x187   :  { %2691 = vst [vmem:[%s5860_s3 + $0x218] sm:$0xf] %v3820_v30  ;;  %v3819_v35 = vpack.c.bf16 %v873_v31, %v871_v29  ;;  %v3967_v36 = vpack.c.bf16 %v1386_v32, %v1386_v32  ;;  %v1388_v37 = vadd.f32 %v1387_v34, %v4342_v49  ;;  %v875_v40 = vadd.f32 %v874_v33, %v4344_v50 }
 0x188   :  { %v876_v38 = vpop.f32.mrf.mxu0  ;;  %v1389_v39 = vpop.f32.mrf.mxu1 }
 0x189   :  { %2690 = vst [vmem:[%s5860_s3 + $0x210] sm:$0xff] %v3819_v35  ;;  %3223 = vst.msk [vmem:[%s5861_s4 + $0xb0] sm:$0xf] %vm3178_vm1, %v3967_v36  ;;  %v3822_v41 = vpack.c.bf16 %v1388_v37, %v1388_v37  ;;  %v877_v42 = vadd.f32 %v876_v38, %v4346_v51  ;;  %v1390_v43 = vadd.f32 %v1389_v39, %v4348_v52 }
 0x18a   :  { %v880_v44 = vpop.f32.mrf.mxu0  ;;  %3394 = vmatmul.mubr.msk.bf16.gmra.mxu0 %vm471_vm0, %v4091_v1  ;;  %v1393_v45 = vpop.f32.mrf.mxu1  ;;  %3442 = vmatmul.mubr.msk.bf16.gmra.mxu1 %vm471_vm0, %v4091_v1 }
 0x18b   :  { %2693 = vst [vmem:[%s5860_s3 + $0x224] sm:$0xf] %v3822_v41  ;;  %v3821_v46 = vpack.c.bf16 %v877_v42, %v875_v40  ;;  %v3968_v47 = vpack.c.bf16 %v1390_v43, %v1390_v43  ;;  %v1394_v48 = vadd.f32 %v1393_v45, %v4342_v49  ;;  %v881_v55 = vadd.f32 %v880_v44, %v4344_v50 }
 0x18c   :  { %v882_v53 = vpop.f32.mrf.mxu0  ;;  %v1395_v54 = vpop.f32.mrf.mxu1 }
 0x18d   :  { %2692 = vst [vmem:[%s5860_s3 + $0x21c] sm:$0xff] %v3821_v46  ;;  %3224 = vst.msk [vmem:[%s5861_s4 + $0xb4] sm:$0xf] %vm3178_vm1, %v3968_v47  ;;  %v3824_v56 = vpack.c.bf16 %v1394_v48, %v1394_v48  ;;  %v883_v57 = vadd.f32 %v882_v53, %v4346_v51  ;;  %v1396_v58 = vadd.f32 %v1395_v54, %v4348_v52 }
 0x18e   :  { %v884_v59 = vpop.f32.mrf.mxu0  ;;  %v1397_v60 = vpop.f32.mrf.mxu1 }
 0x18f   :  { %2695 = vst [vmem:[%s5860_s3 + $0x230] sm:$0xf] %v3824_v56  ;;  %v3823_v61 = vpack.c.bf16 %v883_v57, %v881_v55  ;;  %v3969_v62 = vpack.c.bf16 %v1396_v58, %v1396_v58  ;;  %v1398_v63 = vadd.f32 %v1397_v60, %v4342_v49  ;;  %v885_v3 = vadd.f32 %v884_v59, %v4344_v50 }
 0x190   :  { %v886_v0 = vpop.f32.mrf.mxu0  ;;  %v1399_v2 = vpop.f32.mrf.mxu1 }
 0x191   :  { %2694 = vst [vmem:[%s5860_s3 + $0x228] sm:$0xff] %v3823_v61  ;;  %3225 = vst.msk [vmem:[%s5861_s4 + $0xb8] sm:$0xf] %vm3178_vm1, %v3969_v62  ;;  %v3826_v4 = vpack.c.bf16 %v1398_v63, %v1398_v63  ;;  %v887_v5 = vadd.f32 %v886_v0, %v4346_v51  ;;  %v1400_v6 = vadd.f32 %v1399_v2, %v4348_v52 }
 0x192   :  { %v890_v7 = vpop.f32.mrf.mxu0  ;;  %v1403_v8 = vpop.f32.mrf.mxu1 }
 0x193   :  { %2697 = vst [vmem:[%s5860_s3 + $0x23c] sm:$0xf] %v3826_v4  ;;  %v3825_v9 = vpack.c.bf16 %v887_v5, %v885_v3  ;;  %v3970_v10 = vpack.c.bf16 %v1400_v6, %v1400_v6  ;;  %v1404_v11 = vadd.f32 %v1403_v8, %v4342_v49  ;;  %v891_v14 = vadd.f32 %v890_v7, %v4344_v50 }
 0x194   :  { %v892_v12 = vpop.f32.mrf.mxu0  ;;  %v1405_v13 = vpop.f32.mrf.mxu1 }
 0x195   :  { %2696 = vst [vmem:[%s5860_s3 + $0x234] sm:$0xff] %v3825_v9  ;;  %3226 = vst.msk [vmem:[%s5861_s4 + $0xbc] sm:$0xf] %vm3178_vm1, %v3970_v10  ;;  %v3828_v15 = vpack.c.bf16 %v1404_v11, %v1404_v11  ;;  %v893_v16 = vadd.f32 %v892_v12, %v4346_v51  ;;  %v1406_v17 = vadd.f32 %v1405_v13, %v4348_v52 }
 0x196   :  { %v894_v18 = vpop.f32.mrf.mxu0  ;;  %v1407_v19 = vpop.f32.mrf.mxu1 }
 0x197   :  { %2699 = vst [vmem:[%s5860_s3 + $0x248] sm:$0xf] %v3828_v15  ;;  %v3827_v20 = vpack.c.bf16 %v893_v16, %v891_v14  ;;  %v3971_v21 = vpack.c.bf16 %v1406_v17, %v1406_v17  ;;  %v1408_v22 = vadd.f32 %v1407_v19, %v4342_v49  ;;  %v895_v25 = vadd.f32 %v894_v18, %v4344_v50 }
 0x198   :  { %v896_v23 = vpop.f32.mrf.mxu0  ;;  %v1409_v24 = vpop.f32.mrf.mxu1 }
 0x199   :  { %2698 = vst [vmem:[%s5860_s3 + $0x240] sm:$0xff] %v3827_v20  ;;  %3227 = vst.msk [vmem:[%s5861_s4 + $0xc0] sm:$0xf] %vm3178_vm1, %v3971_v21  ;;  %v3830_v26 = vpack.c.bf16 %v1408_v22, %v1408_v22  ;;  %v897_v27 = vadd.f32 %v896_v23, %v4346_v51  ;;  %v1410_v28 = vadd.f32 %v1409_v24, %v4348_v52 }
 0x19a   :  { %v900_v29 = vpop.f32.mrf.mxu0  ;;  %v1413_v30 = vpop.f32.mrf.mxu1 }
 0x19b   :  { %2701 = vst [vmem:[%s5860_s3 + $0x254] sm:$0xf] %v3830_v26  ;;  %v3829_v31 = vpack.c.bf16 %v897_v27, %v895_v25  ;;  %v3972_v32 = vpack.c.bf16 %v1410_v28, %v1410_v28  ;;  %v1414_v33 = vadd.f32 %v1413_v30, %v4342_v49  ;;  %v901_v35 = vadd.f32 %v900_v29, %v4344_v50 }
 0x19c   :  { %v902_v34 = vpop.f32.mrf.mxu0  ;;  %v1415_v1 = vpop.f32.mrf.mxu1 }
 0x19d   :  { %2700 = vst [vmem:[%s5860_s3 + $0x24c] sm:$0xff] %v3829_v31  ;;  %3228 = vst.msk [vmem:[%s5861_s4 + $0xc4] sm:$0xf] %vm3178_vm1, %v3972_v32  ;;  %v3832_v36 = vpack.c.bf16 %v1414_v33, %v1414_v33  ;;  %v903_v37 = vadd.f32 %v902_v34, %v4346_v51  ;;  %v1416_v38 = vadd.f32 %v1415_v1, %v4348_v52 }
 0x19e   :  { %v904_v39 = vpop.f32.mrf.mxu0  ;;  %v1417_v40 = vpop.f32.mrf.mxu1 }
 0x19f   :  { %2703 = vst [vmem:[%s5860_s3 + $0x260] sm:$0xf] %v3832_v36  ;;  %v3831_v41 = vpack.c.bf16 %v903_v37, %v901_v35  ;;  %v3973_v42 = vpack.c.bf16 %v1416_v38, %v1416_v38  ;;  %v1418_v43 = vadd.f32 %v1417_v40, %v4342_v49  ;;  %v905_v46 = vadd.f32 %v904_v39, %v4344_v50 }
 0x1a0   :  { %v906_v44 = vpop.f32.mrf.mxu0  ;;  %v1419_v45 = vpop.f32.mrf.mxu1 }
 0x1a1   :  { %2702 = vst [vmem:[%s5860_s3 + $0x258] sm:$0xff] %v3831_v41  ;;  %3229 = vst.msk [vmem:[%s5861_s4 + $0xc8] sm:$0xf] %vm3178_vm1, %v3973_v42  ;;  %v3834_v47 = vpack.c.bf16 %v1418_v43, %v1418_v43  ;;  %v907_v48 = vadd.f32 %v906_v44, %v4346_v51  ;;  %v1420_v53 = vadd.f32 %v1419_v45, %v4348_v52 }
 0x1a2   :  { %v910_v54 = vpop.f32.mrf.mxu0  ;;  %v1423_v55 = vpop.f32.mrf.mxu1 }
 0x1a3   :  { %2705 = vst [vmem:[%s5860_s3 + $0x26c] sm:$0xf] %v3834_v47  ;;  %v3833_v56 = vpack.c.bf16 %v907_v48, %v905_v46  ;;  %v3974_v57 = vpack.c.bf16 %v1420_v53, %v1420_v53  ;;  %v1424_v58 = vadd.f32 %v1423_v55, %v4342_v49  ;;  %v911_v61 = vadd.f32 %v910_v54, %v4344_v50 }
 0x1a4   :  { %v912_v59 = vpop.f32.mrf.mxu0  ;;  %v1425_v60 = vpop.f32.mrf.mxu1 }
 0x1a5   :  { %2704 = vst [vmem:[%s5860_s3 + $0x264] sm:$0xff] %v3833_v56  ;;  %3230 = vst.msk [vmem:[%s5861_s4 + $0xcc] sm:$0xf] %vm3178_vm1, %v3974_v57  ;;  %v3836_v62 = vpack.c.bf16 %v1424_v58, %v1424_v58  ;;  %v913_v63 = vadd.f32 %v912_v59, %v4346_v51  ;;  %v1426_v0 = vadd.f32 %v1425_v60, %v4348_v52 }
 0x1a6   :  { %v914_v2 = vpop.f32.mrf.mxu0  ;;  %v1427_v3 = vpop.f32.mrf.mxu1 }
 0x1a7   :  { %2707 = vst [vmem:[%s5860_s3 + $0x278] sm:$0xf] %v3836_v62  ;;  %v3835_v4 = vpack.c.bf16 %v913_v63, %v911_v61  ;;  %v3975_v5 = vpack.c.bf16 %v1426_v0, %v1426_v0  ;;  %v1428_v6 = vadd.f32 %v1427_v3, %v4342_v49  ;;  %v915_v9 = vadd.f32 %v914_v2, %v4344_v50 }
 0x1a8   :  { %v916_v7 = vpop.f32.mrf.mxu0  ;;  %v1429_v8 = vpop.f32.mrf.mxu1 }
 0x1a9   :  { %2706 = vst [vmem:[%s5860_s3 + $0x270] sm:$0xff] %v3835_v4  ;;  %3231 = vst.msk [vmem:[%s5861_s4 + $0xd0] sm:$0xf] %vm3178_vm1, %v3975_v5  ;;  %v3838_v10 = vpack.c.bf16 %v1428_v6, %v1428_v6  ;;  %v917_v11 = vadd.f32 %v916_v7, %v4346_v51  ;;  %v1430_v12 = vadd.f32 %v1429_v8, %v4348_v52 }
 0x1aa   :  { %v920_v13 = vpop.f32.mrf.mxu0  ;;  %v1433_v14 = vpop.f32.mrf.mxu1 }
 0x1ab   :  { %2709 = vst [vmem:[%s5860_s3 + $0x284] sm:$0xf] %v3838_v10  ;;  %v3837_v15 = vpack.c.bf16 %v917_v11, %v915_v9  ;;  %v3976_v16 = vpack.c.bf16 %v1430_v12, %v1430_v12  ;;  %v1434_v17 = vadd.f32 %v1433_v14, %v4342_v49  ;;  %v921_v20 = vadd.f32 %v920_v13, %v4344_v50 }
 0x1ac   :  { %v922_v18 = vpop.f32.mrf.mxu0  ;;  %v1435_v19 = vpop.f32.mrf.mxu1 }
 0x1ad   :  { %2708 = vst [vmem:[%s5860_s3 + $0x27c] sm:$0xff] %v3837_v15  ;;  %3232 = vst.msk [vmem:[%s5861_s4 + $0xd4] sm:$0xf] %vm3178_vm1, %v3976_v16  ;;  %v3840_v21 = vpack.c.bf16 %v1434_v17, %v1434_v17  ;;  %v923_v22 = vadd.f32 %v922_v18, %v4346_v51  ;;  %v1436_v23 = vadd.f32 %v1435_v19, %v4348_v52 }
 0x1ae   :  { %v924_v24 = vpop.f32.mrf.mxu0  ;;  %v1437_v25 = vpop.f32.mrf.mxu1 }
 0x1af   :  { %2711 = vst [vmem:[%s5860_s3 + $0x290] sm:$0xf] %v3840_v21  ;;  %v3839_v26 = vpack.c.bf16 %v923_v22, %v921_v20  ;;  %v3977_v27 = vpack.c.bf16 %v1436_v23, %v1436_v23  ;;  %v1438_v28 = vadd.f32 %v1437_v25, %v4342_v49  ;;  %v925_v31 = vadd.f32 %v924_v24, %v4344_v50 }
 0x1b0   :  { %v926_v29 = vpop.f32.mrf.mxu0  ;;  %v1439_v30 = vpop.f32.mrf.mxu1 }
 0x1b1   :  { %2710 = vst [vmem:[%s5860_s3 + $0x288] sm:$0xff] %v3839_v26  ;;  %3233 = vst.msk [vmem:[%s5861_s4 + $0xd8] sm:$0xf] %vm3178_vm1, %v3977_v27  ;;  %v3842_v32 = vpack.c.bf16 %v1438_v28, %v1438_v28  ;;  %v927_v33 = vadd.f32 %v926_v29, %v4346_v51  ;;  %v1440_v34 = vadd.f32 %v1439_v30, %v4348_v52 }
 0x1b2   :  { %v930_v1 = vpop.f32.mrf.mxu0  ;;  %v1443_v35 = vpop.f32.mrf.mxu1 }
 0x1b3   :  { %2713 = vst [vmem:[%s5860_s3 + $0x29c] sm:$0xf] %v3842_v32  ;;  %v3841_v36 = vpack.c.bf16 %v927_v33, %v925_v31  ;;  %v3978_v37 = vpack.c.bf16 %v1440_v34, %v1440_v34  ;;  %v1444_v38 = vadd.f32 %v1443_v35, %v4342_v49  ;;  %v931_v41 = vadd.f32 %v930_v1, %v4344_v50 }
 0x1b4   :  { %v932_v39 = vpop.f32.mrf.mxu0  ;;  %v1445_v40 = vpop.f32.mrf.mxu1 }
 0x1b5   :  { %2712 = vst [vmem:[%s5860_s3 + $0x294] sm:$0xff] %v3841_v36  ;;  %3234 = vst.msk [vmem:[%s5861_s4 + $0xdc] sm:$0xf] %vm3178_vm1, %v3978_v37  ;;  %v3844_v42 = vpack.c.bf16 %v1444_v38, %v1444_v38  ;;  %v933_v43 = vadd.f32 %v932_v39, %v4346_v51  ;;  %v1446_v44 = vadd.f32 %v1445_v40, %v4348_v52 }
 0x1b6   :  { %v934_v45 = vpop.f32.mrf.mxu0  ;;  %v1447_v46 = vpop.f32.mrf.mxu1 }
 0x1b7   :  { %2715 = vst [vmem:[%s5860_s3 + $0x2a8] sm:$0xf] %v3844_v42  ;;  %v3843_v47 = vpack.c.bf16 %v933_v43, %v931_v41  ;;  %v3979_v48 = vpack.c.bf16 %v1446_v44, %v1446_v44  ;;  %v1448_v53 = vadd.f32 %v1447_v46, %v4342_v49  ;;  %v935_v56 = vadd.f32 %v934_v45, %v4344_v50 }
 0x1b8   :  { %v936_v54 = vpop.f32.mrf.mxu0  ;;  %v1449_v55 = vpop.f32.mrf.mxu1 }
 0x1b9   :  { %2714 = vst [vmem:[%s5860_s3 + $0x2a0] sm:$0xff] %v3843_v47  ;;  %3235 = vst.msk [vmem:[%s5861_s4 + $0xe0] sm:$0xf] %vm3178_vm1, %v3979_v48  ;;  %v3846_v57 = vpack.c.bf16 %v1448_v53, %v1448_v53  ;;  %v937_v58 = vadd.f32 %v936_v54, %v4346_v51  ;;  %v1450_v59 = vadd.f32 %v1449_v55, %v4348_v52 }
 0x1ba   :  { %v940_v60 = vpop.f32.mrf.mxu0  ;;  %v1453_v61 = vpop.f32.mrf.mxu1 }
 0x1bb   :  { %2717 = vst [vmem:[%s5860_s3 + $0x2b4] sm:$0xf] %v3846_v57  ;;  %v3845_v62 = vpack.c.bf16 %v937_v58, %v935_v56  ;;  %v3980_v63 = vpack.c.bf16 %v1450_v59, %v1450_v59  ;;  %v1454_v0 = vadd.f32 %v1453_v61, %v4342_v49  ;;  %v941_v4 = vadd.f32 %v940_v60, %v4344_v50 }
 0x1bc   :  { %v942_v2 = vpop.f32.mrf.mxu0  ;;  %v1455_v3 = vpop.f32.mrf.mxu1 }
 0x1bd   :  { %2716 = vst [vmem:[%s5860_s3 + $0x2ac] sm:$0xff] %v3845_v62  ;;  %3236 = vst.msk [vmem:[%s5861_s4 + $0xe4] sm:$0xf] %vm3178_vm1, %v3980_v63  ;;  %v3848_v5 = vpack.c.bf16 %v1454_v0, %v1454_v0  ;;  %v943_v6 = vadd.f32 %v942_v2, %v4346_v51  ;;  %v1456_v7 = vadd.f32 %v1455_v3, %v4348_v52 }
 0x1be   :  { %v944_v8 = vpop.f32.mrf.mxu0  ;;  %v1457_v9 = vpop.f32.mrf.mxu1 }
 0x1bf   :  { %2719 = vst [vmem:[%s5860_s3 + $0x2c0] sm:$0xf] %v3848_v5  ;;  %v3847_v10 = vpack.c.bf16 %v943_v6, %v941_v4  ;;  %v3981_v11 = vpack.c.bf16 %v1456_v7, %v1456_v7  ;;  %v1458_v12 = vadd.f32 %v1457_v9, %v4342_v49  ;;  %v945_v15 = vadd.f32 %v944_v8, %v4344_v50 }
 0x1c0   :  { %v946_v13 = vpop.f32.mrf.mxu0  ;;  %v1459_v14 = vpop.f32.mrf.mxu1 }
 0x1c1   :  { %2718 = vst [vmem:[%s5860_s3 + $0x2b8] sm:$0xff] %v3847_v10  ;;  %3237 = vst.msk [vmem:[%s5861_s4 + $0xe8] sm:$0xf] %vm3178_vm1, %v3981_v11  ;;  %v3850_v16 = vpack.c.bf16 %v1458_v12, %v1458_v12  ;;  %v947_v17 = vadd.f32 %v946_v13, %v4346_v51  ;;  %v1460_v18 = vadd.f32 %v1459_v14, %v4348_v52 }
 0x1c2   :  { %v950_v19 = vpop.f32.mrf.mxu0  ;;  %v1463_v20 = vpop.f32.mrf.mxu1 }
 0x1c3   :  { %2721 = vst [vmem:[%s5860_s3 + $0x2cc] sm:$0xf] %v3850_v16  ;;  %v3849_v21 = vpack.c.bf16 %v947_v17, %v945_v15  ;;  %v3982_v22 = vpack.c.bf16 %v1460_v18, %v1460_v18  ;;  %v1464_v23 = vadd.f32 %v1463_v20, %v4342_v49  ;;  %v951_v26 = vadd.f32 %v950_v19, %v4344_v50 }
 0x1c4   :  { %v952_v24 = vpop.f32.mrf.mxu0  ;;  %v1465_v25 = vpop.f32.mrf.mxu1 }
 0x1c5   :  { %2720 = vst [vmem:[%s5860_s3 + $0x2c4] sm:$0xff] %v3849_v21  ;;  %3238 = vst.msk [vmem:[%s5861_s4 + $0xec] sm:$0xf] %vm3178_vm1, %v3982_v22  ;;  %v3852_v27 = vpack.c.bf16 %v1464_v23, %v1464_v23  ;;  %v953_v28 = vadd.f32 %v952_v24, %v4346_v51  ;;  %v1466_v29 = vadd.f32 %v1465_v25, %v4348_v52 }
 0x1c6   :  { %v954_v30 = vpop.f32.mrf.mxu0  ;;  %v1467_v31 = vpop.f32.mrf.mxu1 }
 0x1c7   :  { %2723 = vst [vmem:[%s5860_s3 + $0x2d8] sm:$0xf] %v3852_v27  ;;  %v3851_v32 = vpack.c.bf16 %v953_v28, %v951_v26  ;;  %v3983_v33 = vpack.c.bf16 %v1466_v29, %v1466_v29  ;;  %v1468_v34 = vadd.f32 %v1467_v31, %v4342_v49  ;;  %v955_v36 = vadd.f32 %v954_v30, %v4344_v50 }
 0x1c8   :  { %v956_v1 = vpop.f32.mrf.mxu0  ;;  %v1469_v35 = vpop.f32.mrf.mxu1 }
 0x1c9   :  { %2722 = vst [vmem:[%s5860_s3 + $0x2d0] sm:$0xff] %v3851_v32  ;;  %3239 = vst.msk [vmem:[%s5861_s4 + $0xf0] sm:$0xf] %vm3178_vm1, %v3983_v33  ;;  %v3854_v37 = vpack.c.bf16 %v1468_v34, %v1468_v34  ;;  %v957_v38 = vadd.f32 %v956_v1, %v4346_v51  ;;  %v1470_v39 = vadd.f32 %v1469_v35, %v4348_v52 }
 0x1ca   :  { %v960_v40 = vpop.f32.mrf.mxu0  ;;  %v1473_v41 = vpop.f32.mrf.mxu1 }
 0x1cb   :  { %2725 = vst [vmem:[%s5860_s3 + $0x2e4] sm:$0xf] %v3854_v37  ;;  %v3853_v42 = vpack.c.bf16 %v957_v38, %v955_v36  ;;  %v3984_v43 = vpack.c.bf16 %v1470_v39, %v1470_v39  ;;  %v1474_v44 = vadd.f32 %v1473_v41, %v4342_v49  ;;  %v961_v47 = vadd.f32 %v960_v40, %v4344_v50 }
 0x1cc   :  { %v962_v45 = vpop.f32.mrf.mxu0  ;;  %v1475_v46 = vpop.f32.mrf.mxu1 }
 0x1cd   :  { %2724 = vst [vmem:[%s5860_s3 + $0x2dc] sm:$0xff] %v3853_v42  ;;  %3240 = vst.msk [vmem:[%s5861_s4 + $0xf4] sm:$0xf] %vm3178_vm1, %v3984_v43  ;;  %v3856_v48 = vpack.c.bf16 %v1474_v44, %v1474_v44  ;;  %v963_v53 = vadd.f32 %v962_v45, %v4346_v51  ;;  %v1476_v54 = vadd.f32 %v1475_v46, %v4348_v52 }
 0x1ce   :  { %v964_v55 = vpop.f32.mrf.mxu0  ;;  %v1477_v56 = vpop.f32.mrf.mxu1 }
 0x1cf   :  { %2727 = vst [vmem:[%s5860_s3 + $0x2f0] sm:$0xf] %v3856_v48  ;;  %v3855_v57 = vpack.c.bf16 %v963_v53, %v961_v47  ;;  %v3985_v58 = vpack.c.bf16 %v1476_v54, %v1476_v54  ;;  %v1478_v59 = vadd.f32 %v1477_v56, %v4342_v49  ;;  %v965_v62 = vadd.f32 %v964_v55, %v4344_v50 }
 0x1d0   :  { %v966_v60 = vpop.f32.mrf.mxu0  ;;  %v1479_v61 = vpop.f32.mrf.mxu1 }
 0x1d1   :  { %2726 = vst [vmem:[%s5860_s3 + $0x2e8] sm:$0xff] %v3855_v57  ;;  %3241 = vst.msk [vmem:[%s5861_s4 + $0xf8] sm:$0xf] %vm3178_vm1, %v3985_v58  ;;  %v3858_v63 = vpack.c.bf16 %v1478_v59, %v1478_v59  ;;  %v967_v0 = vadd.f32 %v966_v60, %v4346_v51  ;;  %v1480_v2 = vadd.f32 %v1479_v61, %v4348_v52 }
 0x1d2   :  { %v970_v3 = vpop.f32.mrf.mxu0  ;;  %v1483_v4 = vpop.f32.mrf.mxu1 }
 0x1d3   :  { %2729 = vst [vmem:[%s5860_s3 + $0x2fc] sm:$0xf] %v3858_v63  ;;  %v3857_v5 = vpack.c.bf16 %v967_v0, %v965_v62  ;;  %v3986_v6 = vpack.c.bf16 %v1480_v2, %v1480_v2  ;;  %v1484_v7 = vadd.f32 %v1483_v4, %v4342_v49  ;;  %v971_v10 = vadd.f32 %v970_v3, %v4344_v50 }
 0x1d4   :  { %v972_v8 = vpop.f32.mrf.mxu0  ;;  %v1485_v9 = vpop.f32.mrf.mxu1 }
 0x1d5   :  { %2728 = vst [vmem:[%s5860_s3 + $0x2f4] sm:$0xff] %v3857_v5  ;;  %3242 = vst.msk [vmem:[%s5861_s4 + $0xfc] sm:$0xf] %vm3178_vm1, %v3986_v6  ;;  %v3860_v11 = vpack.c.bf16 %v1484_v7, %v1484_v7  ;;  %v973_v12 = vadd.f32 %v972_v8, %v4346_v51  ;;  %v1486_v13 = vadd.f32 %v1485_v9, %v4348_v52 }
 0x1d6   :  { %v974_v14 = vpop.f32.mrf.mxu0  ;;  %v1487_v15 = vpop.f32.mrf.mxu1 }
 0x1d7   :  { %2731 = vst [vmem:[%s5860_s3 + $0x308] sm:$0xf] %v3860_v11  ;;  %v3859_v16 = vpack.c.bf16 %v973_v12, %v971_v10  ;;  %v3987_v17 = vpack.c.bf16 %v1486_v13, %v1486_v13  ;;  %v1488_v18 = vadd.f32 %v1487_v15, %v4342_v49  ;;  %v975_v21 = vadd.f32 %v974_v14, %v4344_v50 }
 0x1d8   :  { %v976_v19 = vpop.f32.mrf.mxu0  ;;  %v1489_v20 = vpop.f32.mrf.mxu1 }
 0x1d9   :  { %2730 = vst [vmem:[%s5860_s3 + $0x300] sm:$0xff] %v3859_v16  ;;  %3243 = vst.msk [vmem:[%s5861_s4 + $0x100] sm:$0xf] %vm3178_vm1, %v3987_v17  ;;  %v3862_v22 = vpack.c.bf16 %v1488_v18, %v1488_v18  ;;  %v977_v23 = vadd.f32 %v976_v19, %v4346_v51  ;;  %v1490_v24 = vadd.f32 %v1489_v20, %v4348_v52 }
 0x1da   :  { %v980_v25 = vpop.f32.mrf.mxu0  ;;  %v1493_v26 = vpop.f32.mrf.mxu1 }
 0x1db   :  { %2733 = vst [vmem:[%s5860_s3 + $0x314] sm:$0xf] %v3862_v22  ;;  %v3861_v27 = vpack.c.bf16 %v977_v23, %v975_v21  ;;  %v3988_v28 = vpack.c.bf16 %v1490_v24, %v1490_v24  ;;  %v1494_v29 = vadd.f32 %v1493_v26, %v4342_v49  ;;  %v981_v32 = vadd.f32 %v980_v25, %v4344_v50 }
 0x1dc   :  { %v982_v30 = vpop.f32.mrf.mxu0  ;;  %v1495_v31 = vpop.f32.mrf.mxu1 }
 0x1dd   :  { %2732 = vst [vmem:[%s5860_s3 + $0x30c] sm:$0xff] %v3861_v27  ;;  %3244 = vst.msk [vmem:[%s5861_s4 + $0x104] sm:$0xf] %vm3178_vm1, %v3988_v28  ;;  %v3864_v33 = vpack.c.bf16 %v1494_v29, %v1494_v29  ;;  %v983_v34 = vadd.f32 %v982_v30, %v4346_v51  ;;  %v1496_v1 = vadd.f32 %v1495_v31, %v4348_v52 }
 0x1de   :  { %v984_v35 = vpop.f32.mrf.mxu0  ;;  %v1497_v36 = vpop.f32.mrf.mxu1 }
 0x1df   :  { %2735 = vst [vmem:[%s5860_s3 + $0x320] sm:$0xf] %v3864_v33  ;;  %v3863_v37 = vpack.c.bf16 %v983_v34, %v981_v32  ;;  %v3989_v38 = vpack.c.bf16 %v1496_v1, %v1496_v1  ;;  %v1498_v39 = vadd.f32 %v1497_v36, %v4342_v49  ;;  %v985_v42 = vadd.f32 %v984_v35, %v4344_v50 }
 0x1e0   :  { %v986_v40 = vpop.f32.mrf.mxu0  ;;  %v1499_v41 = vpop.f32.mrf.mxu1 }
 0x1e1   :  { %2734 = vst [vmem:[%s5860_s3 + $0x318] sm:$0xff] %v3863_v37  ;;  %3245 = vst.msk [vmem:[%s5861_s4 + $0x108] sm:$0xf] %vm3178_vm1, %v3989_v38  ;;  %v3866_v43 = vpack.c.bf16 %v1498_v39, %v1498_v39  ;;  %v987_v44 = vadd.f32 %v986_v40, %v4346_v51  ;;  %v1500_v45 = vadd.f32 %v1499_v41, %v4348_v52 }
 0x1e2   :  { %v990_v46 = vpop.f32.mrf.mxu0  ;;  %v1503_v47 = vpop.f32.mrf.mxu1 }
 0x1e3   :  { %2737 = vst [vmem:[%s5860_s3 + $0x32c] sm:$0xf] %v3866_v43  ;;  %v3865_v48 = vpack.c.bf16 %v987_v44, %v985_v42  ;;  %v3990_v53 = vpack.c.bf16 %v1500_v45, %v1500_v45  ;;  %v1504_v54 = vadd.f32 %v1503_v47, %v4342_v49  ;;  %v991_v57 = vadd.f32 %v990_v46, %v4344_v50 }
 0x1e4   :  { %v992_v55 = vpop.f32.mrf.mxu0  ;;  %v1505_v56 = vpop.f32.mrf.mxu1 }
 0x1e5   :  { %2736 = vst [vmem:[%s5860_s3 + $0x324] sm:$0xff] %v3865_v48  ;;  %3246 = vst.msk [vmem:[%s5861_s4 + $0x10c] sm:$0xf] %vm3178_vm1, %v3990_v53  ;;  %v3868_v58 = vpack.c.bf16 %v1504_v54, %v1504_v54  ;;  %v993_v59 = vadd.f32 %v992_v55, %v4346_v51  ;;  %v1506_v60 = vadd.f32 %v1505_v56, %v4348_v52 }
 0x1e6   :  { %v994_v61 = vpop.f32.mrf.mxu0  ;;  %v1507_v62 = vpop.f32.mrf.mxu1 }
 0x1e7   :  { %2739 = vst [vmem:[%s5860_s3 + $0x338] sm:$0xf] %v3868_v58  ;;  %v3867_v63 = vpack.c.bf16 %v993_v59, %v991_v57  ;;  %v3991_v0 = vpack.c.bf16 %v1506_v60, %v1506_v60  ;;  %v1508_v2 = vadd.f32 %v1507_v62, %v4342_v49  ;;  %v995_v5 = vadd.f32 %v994_v61, %v4344_v50 }
 0x1e8   :  { %v996_v3 = vpop.f32.mrf.mxu0  ;;  %v1509_v4 = vpop.f32.mrf.mxu1 }
 0x1e9   :  { %2738 = vst [vmem:[%s5860_s3 + $0x330] sm:$0xff] %v3867_v63  ;;  %3247 = vst.msk [vmem:[%s5861_s4 + $0x110] sm:$0xf] %vm3178_vm1, %v3991_v0  ;;  %v3870_v6 = vpack.c.bf16 %v1508_v2, %v1508_v2  ;;  %v997_v7 = vadd.f32 %v996_v3, %v4346_v51  ;;  %v1510_v8 = vadd.f32 %v1509_v4, %v4348_v52 }
 0x1ea   :  { %v1000_v9 = vpop.f32.mrf.mxu0  ;;  %v1513_v10 = vpop.f32.mrf.mxu1 }
 0x1eb   :  { %2741 = vst [vmem:[%s5860_s3 + $0x344] sm:$0xf] %v3870_v6  ;;  %v3869_v11 = vpack.c.bf16 %v997_v7, %v995_v5  ;;  %v3992_v12 = vpack.c.bf16 %v1510_v8, %v1510_v8  ;;  %v1514_v13 = vadd.f32 %v1513_v10, %v4342_v49  ;;  %v1001_v16 = vadd.f32 %v1000_v9, %v4344_v50 }
 0x1ec   :  { %v1002_v14 = vpop.f32.mrf.mxu0  ;;  %v1515_v15 = vpop.f32.mrf.mxu1 }
 0x1ed   :  { %2740 = vst [vmem:[%s5860_s3 + $0x33c] sm:$0xff] %v3869_v11  ;;  %3248 = vst.msk [vmem:[%s5861_s4 + $0x114] sm:$0xf] %vm3178_vm1, %v3992_v12  ;;  %v3872_v17 = vpack.c.bf16 %v1514_v13, %v1514_v13  ;;  %v1003_v18 = vadd.f32 %v1002_v14, %v4346_v51  ;;  %v1516_v19 = vadd.f32 %v1515_v15, %v4348_v52 }
 0x1ee   :  { %v1004_v20 = vpop.f32.mrf.mxu0  ;;  %v1517_v21 = vpop.f32.mrf.mxu1 }
 0x1ef   :  { %2743 = vst [vmem:[%s5860_s3 + $0x350] sm:$0xf] %v3872_v17  ;;  %v3871_v22 = vpack.c.bf16 %v1003_v18, %v1001_v16  ;;  %v3993_v23 = vpack.c.bf16 %v1516_v19, %v1516_v19  ;;  %v1518_v24 = vadd.f32 %v1517_v21, %v4342_v49  ;;  %v1005_v27 = vadd.f32 %v1004_v20, %v4344_v50 }
 0x1f0   :  { %v1006_v25 = vpop.f32.mrf.mxu0  ;;  %v1519_v26 = vpop.f32.mrf.mxu1 }
 0x1f1   :  { %2742 = vst [vmem:[%s5860_s3 + $0x348] sm:$0xff] %v3871_v22  ;;  %3249 = vst.msk [vmem:[%s5861_s4 + $0x118] sm:$0xf] %vm3178_vm1, %v3993_v23  ;;  %v3874_v28 = vpack.c.bf16 %v1518_v24, %v1518_v24  ;;  %v1007_v29 = vadd.f32 %v1006_v25, %v4346_v51  ;;  %v1520_v30 = vadd.f32 %v1519_v26, %v4348_v52 }
 0x1f2   :  { %v1010_v31 = vpop.f32.mrf.mxu0  ;;  %v1523_v32 = vpop.f32.mrf.mxu1 }
 0x1f3   :  { %2745 = vst [vmem:[%s5860_s3 + $0x35c] sm:$0xf] %v3874_v28  ;;  %v3873_v33 = vpack.c.bf16 %v1007_v29, %v1005_v27  ;;  %v3994_v34 = vpack.c.bf16 %v1520_v30, %v1520_v30  ;;  %v1524_v1 = vadd.f32 %v1523_v32, %v4342_v49  ;;  %v1011_v37 = vadd.f32 %v1010_v31, %v4344_v50 }
 0x1f4   :  { %v1012_v35 = vpop.f32.mrf.mxu0  ;;  %v1525_v36 = vpop.f32.mrf.mxu1 }
 0x1f5   :  { %2744 = vst [vmem:[%s5860_s3 + $0x354] sm:$0xff] %v3873_v33  ;;  %3250 = vst.msk [vmem:[%s5861_s4 + $0x11c] sm:$0xf] %vm3178_vm1, %v3994_v34  ;;  %v3876_v38 = vpack.c.bf16 %v1524_v1, %v1524_v1  ;;  %v1013_v39 = vadd.f32 %v1012_v35, %v4346_v51  ;;  %v1526_v40 = vadd.f32 %v1525_v36, %v4348_v52 }
 0x1f6   :  { %v1014_v41 = vpop.f32.mrf.mxu0  ;;  %v1527_v42 = vpop.f32.mrf.mxu1 }
 0x1f7   :  { %2747 = vst [vmem:[%s5860_s3 + $0x368] sm:$0xf] %v3876_v38  ;;  %v3875_v43 = vpack.c.bf16 %v1013_v39, %v1011_v37  ;;  %v3995_v44 = vpack.c.bf16 %v1526_v40, %v1526_v40  ;;  %v1528_v45 = vadd.f32 %v1527_v42, %v4342_v49  ;;  %v1015_v48 = vadd.f32 %v1014_v41, %v4344_v50 }
 0x1f8   :  { %v1016_v46 = vpop.f32.mrf.mxu0  ;;  %v1529_v47 = vpop.f32.mrf.mxu1 }
 0x1f9   :  { %2746 = vst [vmem:[%s5860_s3 + $0x360] sm:$0xff] %v3875_v43  ;;  %3251 = vst.msk [vmem:[%s5861_s4 + $0x120] sm:$0xf] %vm3178_vm1, %v3995_v44  ;;  %v3878_v53 = vpack.c.bf16 %v1528_v45, %v1528_v45  ;;  %v1017_v54 = vadd.f32 %v1016_v46, %v4346_v51  ;;  %v1530_v55 = vadd.f32 %v1529_v47, %v4348_v52 }
 0x1fa   :  { %v1020_v56 = vpop.f32.mrf.mxu0  ;;  %v1533_v57 = vpop.f32.mrf.mxu1 }
 0x1fb   :  { %2749 = vst [vmem:[%s5860_s3 + $0x374] sm:$0xf] %v3878_v53  ;;  %v3877_v58 = vpack.c.bf16 %v1017_v54, %v1015_v48  ;;  %v3996_v59 = vpack.c.bf16 %v1530_v55, %v1530_v55  ;;  %v1534_v60 = vadd.f32 %v1533_v57, %v4342_v49  ;;  %v1021_v63 = vadd.f32 %v1020_v56, %v4344_v50 }
 0x1fc   :  { %v1022_v61 = vpop.f32.mrf.mxu0  ;;  %v1535_v62 = vpop.f32.mrf.mxu1 }
 0x1fd   :  { %2748 = vst [vmem:[%s5860_s3 + $0x36c] sm:$0xff] %v3877_v58  ;;  %3252 = vst.msk [vmem:[%s5861_s4 + $0x124] sm:$0xf] %vm3178_vm1, %v3996_v59  ;;  %v3880_v0 = vpack.c.bf16 %v1534_v60, %v1534_v60  ;;  %v1023_v2 = vadd.f32 %v1022_v61, %v4346_v51  ;;  %v1536_v3 = vadd.f32 %v1535_v62, %v4348_v52 }
 0x1fe   :  { %v1024_v4 = vpop.f32.mrf.mxu0  ;;  %v1537_v5 = vpop.f32.mrf.mxu1 }
 0x1ff   :  { %2751 = vst [vmem:[%s5860_s3 + $0x380] sm:$0xf] %v3880_v0  ;;  %v3879_v6 = vpack.c.bf16 %v1023_v2, %v1021_v63  ;;  %v3997_v7 = vpack.c.bf16 %v1536_v3, %v1536_v3  ;;  %v1538_v8 = vadd.f32 %v1537_v5, %v4342_v49  ;;  %v1025_v11 = vadd.f32 %v1024_v4, %v4344_v50 }
 0x200   :  { %v1026_v9 = vpop.f32.mrf.mxu0  ;;  %v1539_v10 = vpop.f32.mrf.mxu1 }
 0x201   :  { %2750 = vst [vmem:[%s5860_s3 + $0x378] sm:$0xff] %v3879_v6  ;;  %3253 = vst.msk [vmem:[%s5861_s4 + $0x128] sm:$0xf] %vm3178_vm1, %v3997_v7  ;;  %v3882_v12 = vpack.c.bf16 %v1538_v8, %v1538_v8  ;;  %v1027_v13 = vadd.f32 %v1026_v9, %v4346_v51  ;;  %v1540_v14 = vadd.f32 %v1539_v10, %v4348_v52 }
 0x202   :  { %v1030_v15 = vpop.f32.mrf.mxu0  ;;  %v1543_v16 = vpop.f32.mrf.mxu1 }
 0x203   :  { %2753 = vst [vmem:[%s5860_s3 + $0x38c] sm:$0xf] %v3882_v12  ;;  %v3881_v17 = vpack.c.bf16 %v1027_v13, %v1025_v11  ;;  %v3998_v18 = vpack.c.bf16 %v1540_v14, %v1540_v14  ;;  %v1544_v19 = vadd.f32 %v1543_v16, %v4342_v49  ;;  %v1031_v22 = vadd.f32 %v1030_v15, %v4344_v50 }
 0x204   :  { %v1032_v20 = vpop.f32.mrf.mxu0  ;;  %v1545_v21 = vpop.f32.mrf.mxu1 }
 0x205   :  { %2752 = vst [vmem:[%s5860_s3 + $0x384] sm:$0xff] %v3881_v17  ;;  %3254 = vst.msk [vmem:[%s5861_s4 + $0x12c] sm:$0xf] %vm3178_vm1, %v3998_v18  ;;  %v3884_v23 = vpack.c.bf16 %v1544_v19, %v1544_v19  ;;  %v1033_v24 = vadd.f32 %v1032_v20, %v4346_v51  ;;  %v1546_v25 = vadd.f32 %v1545_v21, %v4348_v52 }
 0x206   :  { %v1034_v26 = vpop.f32.mrf.mxu0  ;;  %v1547_v27 = vpop.f32.mrf.mxu1 }
 0x207   :  { %2755 = vst [vmem:[%s5860_s3 + $0x398] sm:$0xf] %v3884_v23  ;;  %v3883_v28 = vpack.c.bf16 %v1033_v24, %v1031_v22  ;;  %v3999_v29 = vpack.c.bf16 %v1546_v25, %v1546_v25  ;;  %v1548_v30 = vadd.f32 %v1547_v27, %v4342_v49  ;;  %v1035_v33 = vadd.f32 %v1034_v26, %v4344_v50 }
 0x208   :  { %v1036_v31 = vpop.f32.mrf.mxu0  ;;  %v1549_v32 = vpop.f32.mrf.mxu1 }
 0x209   :  { %2754 = vst [vmem:[%s5860_s3 + $0x390] sm:$0xff] %v3883_v28  ;;  %3255 = vst.msk [vmem:[%s5861_s4 + $0x130] sm:$0xf] %vm3178_vm1, %v3999_v29  ;;  %v3886_v34 = vpack.c.bf16 %v1548_v30, %v1548_v30  ;;  %v1037_v1 = vadd.f32 %v1036_v31, %v4346_v51  ;;  %v1550_v35 = vadd.f32 %v1549_v32, %v4348_v52 }
 0x20a   :  { %v1040_v36 = vpop.f32.mrf.mxu0  ;;  %v1553_v37 = vpop.f32.mrf.mxu1 }
 0x20b   :  { %2757 = vst [vmem:[%s5860_s3 + $0x3a4] sm:$0xf] %v3886_v34  ;;  %v3885_v38 = vpack.c.bf16 %v1037_v1, %v1035_v33  ;;  %v4000_v39 = vpack.c.bf16 %v1550_v35, %v1550_v35  ;;  %v1554_v40 = vadd.f32 %v1553_v37, %v4342_v49  ;;  %v1041_v43 = vadd.f32 %v1040_v36, %v4344_v50 }
 0x20c   :  { %v1042_v41 = vpop.f32.mrf.mxu0  ;;  %v1555_v42 = vpop.f32.mrf.mxu1 }
 0x20d   :  { %2756 = vst [vmem:[%s5860_s3 + $0x39c] sm:$0xff] %v3885_v38  ;;  %3256 = vst.msk [vmem:[%s5861_s4 + $0x134] sm:$0xf] %vm3178_vm1, %v4000_v39  ;;  %v3888_v44 = vpack.c.bf16 %v1554_v40, %v1554_v40  ;;  %v1043_v45 = vadd.f32 %v1042_v41, %v4346_v51  ;;  %v1556_v46 = vadd.f32 %v1555_v42, %v4348_v52 }
 0x20e   :  { %v1044_v47 = vpop.f32.mrf.mxu0  ;;  %v1557_v48 = vpop.f32.mrf.mxu1 }
 0x20f   :  { %2759 = vst [vmem:[%s5860_s3 + $0x3b0] sm:$0xf] %v3888_v44  ;;  %v3887_v53 = vpack.c.bf16 %v1043_v45, %v1041_v43  ;;  %v4001_v54 = vpack.c.bf16 %v1556_v46, %v1556_v46  ;;  %v1558_v55 = vadd.f32 %v1557_v48, %v4342_v49  ;;  %v1045_v58 = vadd.f32 %v1044_v47, %v4344_v50 }
 0x210   :  { %v1046_v56 = vpop.f32.mrf.mxu0  ;;  %v1559_v57 = vpop.f32.mrf.mxu1 }
 0x211   :  { %2758 = vst [vmem:[%s5860_s3 + $0x3a8] sm:$0xff] %v3887_v53  ;;  %3257 = vst.msk [vmem:[%s5861_s4 + $0x138] sm:$0xf] %vm3178_vm1, %v4001_v54  ;;  %v3890_v59 = vpack.c.bf16 %v1558_v55, %v1558_v55  ;;  %v1047_v60 = vadd.f32 %v1046_v56, %v4346_v51  ;;  %v1560_v61 = vadd.f32 %v1559_v57, %v4348_v52 }
 0x212   :  { %v1050_v62 = vpop.f32.mrf.mxu0  ;;  %v1563_v63 = vpop.f32.mrf.mxu1 }
 0x213   :  { %2761 = vst [vmem:[%s5860_s3 + $0x3bc] sm:$0xf] %v3890_v59  ;;  %v3889_v0 = vpack.c.bf16 %v1047_v60, %v1045_v58  ;;  %v4002_v2 = vpack.c.bf16 %v1560_v61, %v1560_v61  ;;  %v1564_v3 = vadd.f32 %v1563_v63, %v4342_v49  ;;  %v1051_v6 = vadd.f32 %v1050_v62, %v4344_v50 }
 0x214   :  { %v1052_v4 = vpop.f32.mrf.mxu0  ;;  %v1565_v5 = vpop.f32.mrf.mxu1 }
 0x215   :  { %2760 = vst [vmem:[%s5860_s3 + $0x3b4] sm:$0xff] %v3889_v0  ;;  %3258 = vst.msk [vmem:[%s5861_s4 + $0x13c] sm:$0xf] %vm3178_vm1, %v4002_v2  ;;  %v3892_v7 = vpack.c.bf16 %v1564_v3, %v1564_v3  ;;  %v1053_v8 = vadd.f32 %v1052_v4, %v4346_v51  ;;  %v1566_v9 = vadd.f32 %v1565_v5, %v4348_v52 }
 0x216   :  { %v1054_v10 = vpop.f32.mrf.mxu0  ;;  %v1567_v11 = vpop.f32.mrf.mxu1 }
 0x217   :  { %2763 = vst [vmem:[%s5860_s3 + $0x3c8] sm:$0xf] %v3892_v7  ;;  %v3891_v12 = vpack.c.bf16 %v1053_v8, %v1051_v6  ;;  %v4003_v13 = vpack.c.bf16 %v1566_v9, %v1566_v9  ;;  %v1568_v14 = vadd.f32 %v1567_v11, %v4342_v49  ;;  %v1055_v17 = vadd.f32 %v1054_v10, %v4344_v50 }
 0x218   :  { %v1056_v15 = vpop.f32.mrf.mxu0  ;;  %v1569_v16 = vpop.f32.mrf.mxu1 }
 0x219   :  { %2762 = vst [vmem:[%s5860_s3 + $0x3c0] sm:$0xff] %v3891_v12  ;;  %3259 = vst.msk [vmem:[%s5861_s4 + $0x140] sm:$0xf] %vm3178_vm1, %v4003_v13  ;;  %v3894_v18 = vpack.c.bf16 %v1568_v14, %v1568_v14  ;;  %v1057_v19 = vadd.f32 %v1056_v15, %v4346_v51  ;;  %v1570_v20 = vadd.f32 %v1569_v16, %v4348_v52 }
 0x21a   :  { %v1060_v21 = vpop.f32.mrf.mxu0  ;;  %v1573_v22 = vpop.f32.mrf.mxu1 }
 0x21b   :  { %2765 = vst [vmem:[%s5860_s3 + $0x3d4] sm:$0xf] %v3894_v18  ;;  %v3893_v23 = vpack.c.bf16 %v1057_v19, %v1055_v17  ;;  %v4004_v24 = vpack.c.bf16 %v1570_v20, %v1570_v20  ;;  %v1574_v25 = vadd.f32 %v1573_v22, %v4342_v49  ;;  %v1061_v28 = vadd.f32 %v1060_v21, %v4344_v50 }
 0x21c   :  { %v1062_v26 = vpop.f32.mrf.mxu0  ;;  %v1575_v27 = vpop.f32.mrf.mxu1 }
 0x21d   :  { %2764 = vst [vmem:[%s5860_s3 + $0x3cc] sm:$0xff] %v3893_v23  ;;  %3260 = vst.msk [vmem:[%s5861_s4 + $0x144] sm:$0xf] %vm3178_vm1, %v4004_v24  ;;  %v3896_v29 = vpack.c.bf16 %v1574_v25, %v1574_v25  ;;  %v1063_v30 = vadd.f32 %v1062_v26, %v4346_v51  ;;  %v1576_v31 = vadd.f32 %v1575_v27, %v4348_v52 }
 0x21e   :  { %v1064_v32 = vpop.f32.mrf.mxu0  ;;  %v1577_v33 = vpop.f32.mrf.mxu1 }
 0x21f   :  { %2767 = vst [vmem:[%s5860_s3 + $0x3e0] sm:$0xf] %v3896_v29  ;;  %v3895_v34 = vpack.c.bf16 %v1063_v30, %v1061_v28  ;;  %v4005_v1 = vpack.c.bf16 %v1576_v31, %v1576_v31  ;;  %v1578_v35 = vadd.f32 %v1577_v33, %v4342_v49  ;;  %v1065_v38 = vadd.f32 %v1064_v32, %v4344_v50 }
 0x220   :  { %v1066_v36 = vpop.f32.mrf.mxu0  ;;  %v1579_v37 = vpop.f32.mrf.mxu1 }
 0x221   :  { %2766 = vst [vmem:[%s5860_s3 + $0x3d8] sm:$0xff] %v3895_v34  ;;  %3261 = vst.msk [vmem:[%s5861_s4 + $0x148] sm:$0xf] %vm3178_vm1, %v4005_v1  ;;  %v3898_v39 = vpack.c.bf16 %v1578_v35, %v1578_v35  ;;  %v1067_v40 = vadd.f32 %v1066_v36, %v4346_v51  ;;  %v1580_v41 = vadd.f32 %v1579_v37, %v4348_v52 }
 0x222   :  { %v1070_v42 = vpop.f32.mrf.mxu0  ;;  %v1583_v43 = vpop.f32.mrf.mxu1 }
 0x223   :  { %2769 = vst [vmem:[%s5860_s3 + $0x3ec] sm:$0xf] %v3898_v39  ;;  %v3897_v44 = vpack.c.bf16 %v1067_v40, %v1065_v38  ;;  %v4006_v45 = vpack.c.bf16 %v1580_v41, %v1580_v41  ;;  %v1584_v46 = vadd.f32 %v1583_v43, %v4342_v49  ;;  %v1071_v53 = vadd.f32 %v1070_v42, %v4344_v50 }
 0x224   :  { %v1072_v47 = vpop.f32.mrf.mxu0  ;;  %v1585_v48 = vpop.f32.mrf.mxu1 }
 0x225   :  { %2768 = vst [vmem:[%s5860_s3 + $0x3e4] sm:$0xff] %v3897_v44  ;;  %3262 = vst.msk [vmem:[%s5861_s4 + $0x14c] sm:$0xf] %vm3178_vm1, %v4006_v45  ;;  %v3900_v54 = vpack.c.bf16 %v1584_v46, %v1584_v46  ;;  %v1073_v55 = vadd.f32 %v1072_v47, %v4346_v51  ;;  %v1586_v56 = vadd.f32 %v1585_v48, %v4348_v52 }
 0x226   :  { %v1074_v57 = vpop.f32.mrf.mxu0  ;;  %v1587_v58 = vpop.f32.mrf.mxu1 }
 0x227   :  { %2771 = vst [vmem:[%s5860_s3 + $0x3f8] sm:$0xf] %v3900_v54  ;;  %v3899_v59 = vpack.c.bf16 %v1073_v55, %v1071_v53  ;;  %v4007_v60 = vpack.c.bf16 %v1586_v56, %v1586_v56  ;;  %v1588_v61 = vadd.f32 %v1587_v58, %v4342_v49  ;;  %v1075_v0 = vadd.f32 %v1074_v57, %v4344_v50 }
 0x228   :  { %v1076_v62 = vpop.f32.mrf.mxu0  ;;  %v1589_v63 = vpop.f32.mrf.mxu1 }
 0x229   :  { %2770 = vst [vmem:[%s5860_s3 + $0x3f0] sm:$0xff] %v3899_v59  ;;  %3263 = vst.msk [vmem:[%s5861_s4 + $0x150] sm:$0xf] %vm3178_vm1, %v4007_v60  ;;  %v3902_v2 = vpack.c.bf16 %v1588_v61, %v1588_v61  ;;  %v1077_v3 = vadd.f32 %v1076_v62, %v4346_v51  ;;  %v1590_v4 = vadd.f32 %v1589_v63, %v4348_v52 }
 0x22a   :  { %v1080_v5 = vpop.f32.mrf.mxu0  ;;  %v1593_v6 = vpop.f32.mrf.mxu1 }
 0x22b   :  { %2773 = vst [vmem:[%s5860_s3 + $0x404] sm:$0xf] %v3902_v2  ;;  %v3901_v7 = vpack.c.bf16 %v1077_v3, %v1075_v0  ;;  %v4008_v8 = vpack.c.bf16 %v1590_v4, %v1590_v4  ;;  %v1594_v9 = vadd.f32 %v1593_v6, %v4342_v49  ;;  %v1081_v12 = vadd.f32 %v1080_v5, %v4344_v50 }
 0x22c   :  { %v1082_v10 = vpop.f32.mrf.mxu0  ;;  %v1595_v11 = vpop.f32.mrf.mxu1 }
 0x22d   :  { %2772 = vst [vmem:[%s5860_s3 + $0x3fc] sm:$0xff] %v3901_v7  ;;  %3264 = vst.msk [vmem:[%s5861_s4 + $0x154] sm:$0xf] %vm3178_vm1, %v4008_v8  ;;  %v3904_v13 = vpack.c.bf16 %v1594_v9, %v1594_v9  ;;  %v1083_v14 = vadd.f32 %v1082_v10, %v4346_v51  ;;  %v1596_v15 = vadd.f32 %v1595_v11, %v4348_v52 }
 0x22e   :  { %v1084_v16 = vpop.f32.mrf.mxu0  ;;  %v1597_v17 = vpop.f32.mrf.mxu1 }
 0x22f   :  { %2775 = vst [vmem:[%s5860_s3 + $0x410] sm:$0xf] %v3904_v13  ;;  %v3903_v18 = vpack.c.bf16 %v1083_v14, %v1081_v12  ;;  %v4009_v19 = vpack.c.bf16 %v1596_v15, %v1596_v15  ;;  %v1598_v20 = vadd.f32 %v1597_v17, %v4342_v49  ;;  %v1085_v23 = vadd.f32 %v1084_v16, %v4344_v50 }
 0x230   :  { %v1086_v21 = vpop.f32.mrf.mxu0  ;;  %v1599_v22 = vpop.f32.mrf.mxu1 }
 0x231   :  { %2774 = vst [vmem:[%s5860_s3 + $0x408] sm:$0xff] %v3903_v18  ;;  %3265 = vst.msk [vmem:[%s5861_s4 + $0x158] sm:$0xf] %vm3178_vm1, %v4009_v19  ;;  %v3906_v24 = vpack.c.bf16 %v1598_v20, %v1598_v20  ;;  %v1087_v25 = vadd.f32 %v1086_v21, %v4346_v51  ;;  %v1600_v26 = vadd.f32 %v1599_v22, %v4348_v52 }
 0x232   :  { %v1090_v27 = vpop.f32.mrf.mxu0  ;;  %v1603_v28 = vpop.f32.mrf.mxu1 }
 0x233   :  { %2777 = vst [vmem:[%s5860_s3 + $0x41c] sm:$0xf] %v3906_v24  ;;  %v3905_v29 = vpack.c.bf16 %v1087_v25, %v1085_v23  ;;  %v4010_v30 = vpack.c.bf16 %v1600_v26, %v1600_v26  ;;  %v1604_v31 = vadd.f32 %v1603_v28, %v4342_v49  ;;  %v1091_v34 = vadd.f32 %v1090_v27, %v4344_v50 }
 0x234   :  { %v1092_v32 = vpop.f32.mrf.mxu0  ;;  %v1605_v33 = vpop.f32.mrf.mxu1 }
 0x235   :  { %2776 = vst [vmem:[%s5860_s3 + $0x414] sm:$0xff] %v3905_v29  ;;  %3266 = vst.msk [vmem:[%s5861_s4 + $0x15c] sm:$0xf] %vm3178_vm1, %v4010_v30  ;;  %v3908_v1 = vpack.c.bf16 %v1604_v31, %v1604_v31  ;;  %v1093_v35 = vadd.f32 %v1092_v32, %v4346_v51  ;;  %v1606_v36 = vadd.f32 %v1605_v33, %v4348_v52 }
 0x236   :  { %v1094_v37 = vpop.f32.mrf.mxu0  ;;  %v1607_v38 = vpop.f32.mrf.mxu1 }
 0x237   :  { %2779 = vst [vmem:[%s5860_s3 + $0x428] sm:$0xf] %v3908_v1  ;;  %v3907_v39 = vpack.c.bf16 %v1093_v35, %v1091_v34  ;;  %v4011_v40 = vpack.c.bf16 %v1606_v36, %v1606_v36  ;;  %v1608_v41 = vadd.f32 %v1607_v38, %v4342_v49  ;;  %v1095_v44 = vadd.f32 %v1094_v37, %v4344_v50 }
 0x238   :  { %v1096_v42 = vpop.f32.mrf.mxu0  ;;  %v1609_v43 = vpop.f32.mrf.mxu1 }
 0x239   :  { %2778 = vst [vmem:[%s5860_s3 + $0x420] sm:$0xff] %v3907_v39  ;;  %3267 = vst.msk [vmem:[%s5861_s4 + $0x160] sm:$0xf] %vm3178_vm1, %v4011_v40  ;;  %v3910_v45 = vpack.c.bf16 %v1608_v41, %v1608_v41  ;;  %v1097_v46 = vadd.f32 %v1096_v42, %v4346_v51  ;;  %v1610_v47 = vadd.f32 %v1609_v43, %v4348_v52 }
 0x23a   :  { %v1100_v48 = vpop.f32.mrf.mxu0  ;;  %v1613_v53 = vpop.f32.mrf.mxu1 }
 0x23b   :  { %2781 = vst [vmem:[%s5860_s3 + $0x434] sm:$0xf] %v3910_v45  ;;  %v3909_v54 = vpack.c.bf16 %v1097_v46, %v1095_v44  ;;  %v4012_v55 = vpack.c.bf16 %v1610_v47, %v1610_v47  ;;  %v1614_v56 = vadd.f32 %v1613_v53, %v4342_v49  ;;  %v1101_v59 = vadd.f32 %v1100_v48, %v4344_v50 }
 0x23c   :  { %v1102_v57 = vpop.f32.mrf.mxu0  ;;  %v1615_v58 = vpop.f32.mrf.mxu1 }
 0x23d   :  { %2780 = vst [vmem:[%s5860_s3 + $0x42c] sm:$0xff] %v3909_v54  ;;  %3268 = vst.msk [vmem:[%s5861_s4 + $0x164] sm:$0xf] %vm3178_vm1, %v4012_v55  ;;  %v3912_v60 = vpack.c.bf16 %v1614_v56, %v1614_v56  ;;  %v1103_v61 = vadd.f32 %v1102_v57, %v4346_v51  ;;  %v1616_v62 = vadd.f32 %v1615_v58, %v4348_v52 }
 0x23e   :  { %v1104_v63 = vpop.f32.mrf.mxu0  ;;  %v1617_v0 = vpop.f32.mrf.mxu1 }
 0x23f   :  { %2783 = vst [vmem:[%s5860_s3 + $0x440] sm:$0xf] %v3912_v60  ;;  %v3911_v2 = vpack.c.bf16 %v1103_v61, %v1101_v59  ;;  %v4013_v3 = vpack.c.bf16 %v1616_v62, %v1616_v62  ;;  %v1618_v4 = vadd.f32 %v1617_v0, %v4342_v49  ;;  %v1105_v7 = vadd.f32 %v1104_v63, %v4344_v50 }
 0x240   :  { %v1106_v5 = vpop.f32.mrf.mxu0  ;;  %v1619_v6 = vpop.f32.mrf.mxu1 }
 0x241   :  { %2782 = vst [vmem:[%s5860_s3 + $0x438] sm:$0xff] %v3911_v2  ;;  %3269 = vst.msk [vmem:[%s5861_s4 + $0x168] sm:$0xf] %vm3178_vm1, %v4013_v3  ;;  %v3914_v8 = vpack.c.bf16 %v1618_v4, %v1618_v4  ;;  %v1107_v9 = vadd.f32 %v1106_v5, %v4346_v51  ;;  %v1620_v10 = vadd.f32 %v1619_v6, %v4348_v52 }
 0x242   :  { %v1110_v11 = vpop.f32.mrf.mxu0  ;;  %v1623_v12 = vpop.f32.mrf.mxu1 }
 0x243   :  { %2785 = vst [vmem:[%s5860_s3 + $0x44c] sm:$0xf] %v3914_v8  ;;  %v3913_v13 = vpack.c.bf16 %v1107_v9, %v1105_v7  ;;  %v4014_v14 = vpack.c.bf16 %v1620_v10, %v1620_v10  ;;  %v1624_v15 = vadd.f32 %v1623_v12, %v4342_v49  ;;  %v1111_v18 = vadd.f32 %v1110_v11, %v4344_v50 }
 0x244   :  { %v1112_v16 = vpop.f32.mrf.mxu0  ;;  %v1625_v17 = vpop.f32.mrf.mxu1 }
 0x245   :  { %2784 = vst [vmem:[%s5860_s3 + $0x444] sm:$0xff] %v3913_v13  ;;  %3270 = vst.msk [vmem:[%s5861_s4 + $0x16c] sm:$0xf] %vm3178_vm1, %v4014_v14  ;;  %v3916_v19 = vpack.c.bf16 %v1624_v15, %v1624_v15  ;;  %v1113_v20 = vadd.f32 %v1112_v16, %v4346_v51  ;;  %v1626_v21 = vadd.f32 %v1625_v17, %v4348_v52 }
 0x246   :  { %v1114_v22 = vpop.f32.mrf.mxu0  ;;  %v1627_v23 = vpop.f32.mrf.mxu1 }
 0x247   :  { %2787 = vst [vmem:[%s5860_s3 + $0x458] sm:$0xf] %v3916_v19  ;;  %v3915_v24 = vpack.c.bf16 %v1113_v20, %v1111_v18  ;;  %v4015_v25 = vpack.c.bf16 %v1626_v21, %v1626_v21  ;;  %v1628_v26 = vadd.f32 %v1627_v23, %v4342_v49  ;;  %v1115_v29 = vadd.f32 %v1114_v22, %v4344_v50 }
 0x248   :  { %v1116_v27 = vpop.f32.mrf.mxu0  ;;  %v1629_v28 = vpop.f32.mrf.mxu1 }
 0x249   :  { %2786 = vst [vmem:[%s5860_s3 + $0x450] sm:$0xff] %v3915_v24  ;;  %3271 = vst.msk [vmem:[%s5861_s4 + $0x170] sm:$0xf] %vm3178_vm1, %v4015_v25  ;;  %v3918_v30 = vpack.c.bf16 %v1628_v26, %v1628_v26  ;;  %v1117_v31 = vadd.f32 %v1116_v27, %v4346_v51  ;;  %v1630_v32 = vadd.f32 %v1629_v28, %v4348_v52 }
 0x24a   :  { %v1120_v33 = vpop.f32.mrf.mxu0  ;;  %v1633_v34 = vpop.f32.mrf.mxu1 }
 0x24b   :  { %2789 = vst [vmem:[%s5860_s3 + $0x464] sm:$0xf] %v3918_v30  ;;  %v3917_v1 = vpack.c.bf16 %v1117_v31, %v1115_v29  ;;  %v4016_v35 = vpack.c.bf16 %v1630_v32, %v1630_v32  ;;  %v1634_v36 = vadd.f32 %v1633_v34, %v4342_v49  ;;  %v1121_v39 = vadd.f32 %v1120_v33, %v4344_v50 }
 0x24c   :  { %v1122_v37 = vpop.f32.mrf.mxu0  ;;  %v1635_v38 = vpop.f32.mrf.mxu1 }
 0x24d   :  { %2788 = vst [vmem:[%s5860_s3 + $0x45c] sm:$0xff] %v3917_v1  ;;  %3272 = vst.msk [vmem:[%s5861_s4 + $0x174] sm:$0xf] %vm3178_vm1, %v4016_v35  ;;  %v3920_v40 = vpack.c.bf16 %v1634_v36, %v1634_v36  ;;  %v1123_v41 = vadd.f32 %v1122_v37, %v4346_v51  ;;  %v1636_v42 = vadd.f32 %v1635_v38, %v4348_v52 }
 0x24e   :  { %v1124_v43 = vpop.f32.mrf.mxu0  ;;  %v1637_v44 = vpop.f32.mrf.mxu1 }
 0x24f   :  { %2791 = vst [vmem:[%s5860_s3 + $0x470] sm:$0xf] %v3920_v40  ;;  %v3919_v45 = vpack.c.bf16 %v1123_v41, %v1121_v39  ;;  %v4017_v46 = vpack.c.bf16 %v1636_v42, %v1636_v42  ;;  %v1638_v47 = vadd.f32 %v1637_v44, %v4342_v49  ;;  %v1125_v54 = vadd.f32 %v1124_v43, %v4344_v50 }
 0x250   :  { %v1126_v48 = vpop.f32.mrf.mxu0  ;;  %v1639_v53 = vpop.f32.mrf.mxu1 }
 0x251   :  { %2790 = vst [vmem:[%s5860_s3 + $0x468] sm:$0xff] %v3919_v45  ;;  %3273 = vst.msk [vmem:[%s5861_s4 + $0x178] sm:$0xf] %vm3178_vm1, %v4017_v46  ;;  %v3922_v55 = vpack.c.bf16 %v1638_v47, %v1638_v47  ;;  %v1127_v56 = vadd.f32 %v1126_v48, %v4346_v51  ;;  %v1640_v57 = vadd.f32 %v1639_v53, %v4348_v52 }
 0x253   :  { %2793 = vst [vmem:[%s5860_s3 + $0x47c] sm:$0xf] %v3922_v55  ;;  %v3921_v49 = vpack.c.bf16 %v1127_v56, %v1125_v54  ;;  %v4018_v58 = vpack.c.bf16 %v1640_v57, %v1640_v57 }
 0x255   :  { %2792 = vst [vmem:[%s5860_s3 + $0x474] sm:$0xff] %v3921_v49  ;;  %3274 = vst.msk [vmem:[%s5861_s4 + $0x17c] sm:$0xf] %vm3178_vm1, %v4018_v58 }

// kernel: st_encoder_block_forward.3
= control target key start
LH: loop header
LB: loop body
LE: loop exit
PB: predicated region body
PF: predicated region fallthrough
CT: control target
= control target key end

     0   :  { %s7787_s26 = smov 64   ;;  %s12688_s0 = inlined_call_operand.vmem [shape: f32[768,128], index: 0, kind: input, shape index: {}]   ;;  %s12689_s1 = inlined_call_operand.vmem [shape: bf16[64,512], index: 1, kind: input, shape index: {}]   ;;  %s12690_s2 = inlined_call_operand.vmem [shape: bf16[256,64], index: 2, kind: input, shape index: {}]   ;;  %s12691_s3 = inlined_call_operand.vmem [shape: f32[1,64], index: 3, kind: input, shape index: {}]   ;;  %s12692_s4 = inlined_call_operand.vmem [shape: f32[1,64], index: 4, kind: input, shape index: {}]   ;;  %s12693_s5 = inlined_call_operand.hbm [shape: f32[768,64], index: 5, kind: output, shape index: {}]  }
   0x1   :  { %v70_v0 = vld [vmem:[%s12688_s0 + $0x180] sm:$0xff]  ;;  %v72_v1 = vld [vmem:[%s12688_s0 + $0x190] sm:$0xff]  ;;  %v71_v2 = vld [vmem:[%s12688_s0 + $0x188] sm:$0xff] }
   0x2   :  { %v262_v3 = vmul.f32 0.1, %v70_v0  ;;  %v264_v4 = vmul.f32 0.1, %v72_v1  ;;  %v73_v5 = vld [vmem:[%s12688_s0 + $0x198] sm:$0xff]  ;;  %v7839_v8 = vld [vmem:[%s12688_s0 + $0x1a0] sm:$0xff] }
   0x3   :  { %v263_v6 = vmul.f32 0.1, %v71_v2  ;;  %v265_v7 = vmul.f32 0.1, %v73_v5  ;;  %v7844_v9 = vld [vmem:[%s12688_s0 + $0x1a8] sm:$0xff]  ;;  %v7853_v12 = vld [vmem:[%s12688_s0 + $0x1b8] sm:$0xff] }
   0x4   :  { %502 = vrot.lane.b32.xlu0 %v262_v3, %s7787_s26  ;;  %506 = vrot.lane.b32.xlu1 %v264_v4, %s7787_s26  ;;  %v266_v10 = vmul.f32 0.1, %v7839_v8  ;;  %v267_v11 = vmul.f32 0.1, %v7844_v9  ;;  %v7858_v13 = vld [vmem:[%s12688_s0 + $0x1b0] sm:$0xff]  ;;  %v7863_v14 = vld [vmem:[%s12688_s0 + $0x1c8] sm:$0xff] }
   0x5   :  { %v7868_v15 = vld [vmem:[%s12688_s0 + $0x1c0] sm:$0xff]  ;;  %v269_v16 = vmul.f32 0.1, %v7853_v12  ;;  %v268_v17 = vmul.f32 0.1, %v7858_v13  ;;  %v7877_v18 = vld [vmem:[%s12688_s0 + $0x1d8] sm:$0xff] }
   0x6   :  { %v7882_v19 = vld [vmem:[%s12688_s0 + $0x1d0] sm:$0xff]  ;;  %v271_v20 = vmul.f32 0.1, %v7863_v14  ;;  %v270_v21 = vmul.f32 0.1, %v7868_v15  ;;  %v7892_v23 = vld [vmem:[%s12688_s0 + $0x1e8] sm:$0xff] }
   0x7   :  { %v273_v22 = vmul.f32 0.1, %v7877_v18  ;;  %v7897_v24 = vld [vmem:[%s12688_s0 + $0x1e0] sm:$0xff]  ;;  %v7902_v25 = vld [vmem:[%s12688_s0 + $0x1f8] sm:$0xff]  ;;  %v272_v26 = vmul.f32 0.1, %v7882_v19 }
   0x8   :  { %504 = vrot.lane.b32.xlu0 %v263_v6, %s7787_s26  ;;  %508 = vrot.lane.b32.xlu1 %v265_v7, %s7787_s26  ;;  %v275_v27 = vmul.f32 0.1, %v7892_v23  ;;  %v274_v28 = vmul.f32 0.1, %v7897_v24  ;;  %v7912_v29 = vld [vmem:[%s12688_s0 + $0x1f0] sm:$0xff]  ;;  %v7920_v31 = vld [vmem:[%s12688_s0 + $0x208] sm:$0xff] }
   0x9   :  { %v277_v30 = vmul.f32 0.1, %v7902_v25  ;;  %v7925_v32 = vld [vmem:[%s12688_s0 + $0x200] sm:$0xff]  ;;  %v276_v33 = vmul.f32 0.1, %v7912_v29 }
   0xc   :  { %510 = vrot.lane.b32.xlu0 %v266_v10, %s7787_s26  ;;  %512 = vrot.lane.b32.xlu1 %v267_v11, %s7787_s26 }
  0x10   :  { %516 = vrot.lane.b32.xlu1 %v269_v16, %s7787_s26  ;;  %514 = vrot.lane.b32.xlu0 %v268_v17, %s7787_s26 }
  0x14   :  { %520 = vrot.lane.b32.xlu1 %v271_v20, %s7787_s26  ;;  %518 = vrot.lane.b32.xlu0 %v270_v21, %s7787_s26 }
  0x18   :  { %524 = vrot.lane.b32.xlu1 %v273_v22, %s7787_s26  ;;  %522 = vrot.lane.b32.xlu0 %v272_v26, %s7787_s26 }
  0x1c   :  { %528 = vrot.lane.b32.xlu1 %v275_v27, %s7787_s26  ;;  %526 = vrot.lane.b32.xlu0 %v274_v28, %s7787_s26 }
  0x1d   :  { %10 = vsyncpa [#allocation3], 0  ;;  %v279_v34 = vmul.f32 0.1, %v7920_v31  ;;  %v278_v35 = vmul.f32 0.1, %v7925_v32 }
  0x1e   :  { %v166_v36 = vmul.f32 0.7, %v70_v0  ;;  %v168_v37 = vmul.f32 0.7, %v72_v1  ;;  %v167_v42 = vmul.f32 0.7, %v71_v2 }
  0x1f   :  { %v169_v43 = vmul.f32 0.7, %v73_v5  ;;  %vm886_vm0 = vcmask 523264   ;;  %v7959_v56 = vld [vmem:[%s12688_s0 + $0x218] sm:$0xff]  ;;  %v7964_v57 = vld [vmem:[%s12688_s0 + $0x210] sm:$0xff]  ;;  %v12694_v4 = vmov 0  }
  0x20   :  { %532 = vrot.lane.b32.xlu1 %v277_v30, %s7787_s26  ;;  %530 = vrot.lane.b32.xlu0 %v276_v33, %s7787_s26  ;;  %v281_v58 = vmul.f32 0.1, %v7959_v56  ;;  %v6568_v59 = vld [vmem:[%s12689_s1 + $0x64] ss:$16 sps:$4 sm:$0xff]   ;;  %v280_v60 = vmul.f32 0.1, %v7964_v57 }
  0x21   :  { %v6570_v61 = vld [vmem:[%s12689_s1 + $0x60] ss:$16 sps:$4 sm:$0xff]   ;;  %v6571_v62 = vld [vmem:[%s12689_s1 + $0x44] ss:$16 sps:$4 sm:$0xff]   ;;  %6555 = vmatprep.subr.bf16.mxu1 %v6568_v59  ;;  %1959 = vmatprep.subr.bf16.mxu0 %v6568_v59  ;;  %v170_v5 = vmul.f32 0.7, %v7839_v8 }
  0x22   :  { %6559 = vmatpush1.bf16.msra.mxu1 %v6570_v61  ;;  %v6573_v63 = vld [vmem:[%s12689_s1 + $0x40] ss:$16 sps:$4 sm:$0xff]   ;;  %1960 = vmatpush1.bf16.msra.mxu0 %v6570_v61  ;;  %v6574_v0 = vld [vmem:[%s12689_s1 + $0x24] ss:$16 sps:$4 sm:$0xff]   ;;  %v171_v10 = vmul.f32 0.7, %v7844_v9 }
  0x23   :  { %6556 = vmatprep.subr.bf16.mxu1 %v6571_v62  ;;  %1961 = vmatprep.subr.bf16.mxu0 %v6571_v62  ;;  %v6576_v1 = vld [vmem:[%s12689_s1 + $0x20] ss:$16 sps:$4 sm:$0xff]   ;;  %v6577_v2 = vld [vmem:[%s12689_s1 + $0x4] ss:$16 sps:$4 sm:$0xff]   ;;  %v8012_v8 = vld [vmem:[%s12688_s0 + $0x228] sm:$0xff] }
  0x24   :  { %536 = vrot.lane.b32.xlu1 %v279_v34, %s7787_s26  ;;  %534 = vrot.lane.b32.xlu0 %v278_v35, %s7787_s26  ;;  %v6579_v3 = vld [vmem:[%s12689_s1] ss:$16 sps:$4 sm:$0xff]   ;;  %v283_v26 = vmul.f32 0.1, %v8012_v8  ;;  %v172_v28 = vmul.f32 0.7, %v7858_v13 }
  0x25   :  { %2223 = vmatprep.mubr.bf16.mxu1 %v12694_v4  ;;  %1983 = vmatprep.mubr.bf16.mxu0 %v12694_v4  ;;  %v8017_v9 = vld [vmem:[%s12688_s0 + $0x220] sm:$0xff]  ;;  %v173_v34 = vmul.f32 0.7, %v7853_v12 }
  0x26   :  { %6560 = vmatpush1.bf16.msra.mxu1 %v6573_v63  ;;  %1962 = vmatpush1.bf16.msra.mxu0 %v6573_v63  ;;  %v282_v27 = vmul.f32 0.1, %v8017_v9 }
  0x27   :  { %6557 = vmatprep.subr.bf16.mxu1 %v6574_v0  ;;  %1963 = vmatprep.subr.bf16.mxu0 %v6574_v0 }
  0x2a   :  { %6561 = vmatpush1.bf16.msra.mxu1 %v6576_v1  ;;  %1964 = vmatpush1.bf16.msra.mxu0 %v6576_v1 }
  0x2b   :  { %6558 = vmatprep.subr.bf16.mxu1 %v6577_v2  ;;  %1965 = vmatprep.subr.bf16.mxu0 %v6577_v2 }
  0x2e   :  { %6562 = vmatpush1.bf16.msra.mxu1 %v6579_v3  ;;  %1966 = vmatpush1.bf16.msra.mxu0 %v6579_v3 }
  0x2f   :  { %4737 = vmatprep.subr.bf16.mxu0 %v12694_v4 }
  0x76   :  { %v503_v38 = vpop.permute.xlu0 %502  ;;  %v507_v39 = vpop.permute.xlu1 %506 }
  0x77   :  { %v7936_v40 = vadd.f32 %v503_v38, %v166_v36  ;;  %v7938_v41 = vadd.f32 %v507_v39, %v168_v37 }
  0x79   :  { %v838_v44 = vmul.f32 %v7936_v40, %v7936_v40  ;;  %v840_v45 = vmul.f32 %v7938_v41, %v7938_v41 }
  0x7a   :  { %v505_v46 = vpop.permute.xlu0 %504  ;;  %v509_v47 = vpop.permute.xlu1 %508 }
  0x7b   :  { %v7944_v48 = vadd.f32 %v505_v46, %v167_v42  ;;  %v1031_v49 = vsel %vm886_vm0, %v838_v44, 0.0  ;;  %v7947_v50 = vadd.f32 %v509_v47, %v169_v43  ;;  %v1037_v52 = vsel %vm886_vm0, %v840_v45, 0.0  ;;  %v8044_v46 = vld [vmem:[%s12688_s0 + $0x238] sm:$0xff] }
  0x7c   :  { %1032 = vadd.xlane.f32.xlu0 %v1031_v49  ;;  %v8051_v49 = vld [vmem:[%s12688_s0 + $0x230] sm:$0xff] }
  0x7d   :  { %v839_v51 = vmul.f32 %v7944_v48, %v7944_v48  ;;  %v841_v53 = vmul.f32 %v7947_v50, %v7947_v50 }
  0x7e   :  { %v511_v6 = vpop.permute.xlu0 %510  ;;  %v513_v11 = vpop.permute.xlu1 %512 }
  0x7f   :  { %v1034_v54 = vsel %vm886_vm0, %v839_v51, 0.0  ;;  %v1040_v55 = vsel %vm886_vm0, %v841_v53, 0.0  ;;  %v7998_v7 = vadd.f32 %v511_v6, %v170_v5  ;;  %v8001_v16 = vadd.f32 %v513_v11, %v171_v10 }
  0x80   :  { %1035 = vadd.xlane.f32.xlu1 %v1034_v54  ;;  %1038 = vadd.xlane.f32.xlu0 %v1037_v52  ;;  %v285_v52 = vmul.f32 0.1, %v8044_v46  ;;  %v284_v53 = vmul.f32 0.1, %v8051_v49  ;;  %v174_v11 = vmul.f32 0.7, %v7868_v15 }
  0x81   :  { %v842_v17 = vmul.f32 %v7998_v7, %v7998_v7  ;;  %v843_v21 = vmul.f32 %v8001_v16, %v8001_v16 }
  0x82   :  { %v515_v30 = vpop.permute.xlu0 %514  ;;  %v517_v35 = vpop.permute.xlu1 %516 }
  0x83   :  { %v1043_v20 = vsel %vm886_vm0, %v842_v17, 0.0  ;;  %v1046_v22 = vsel %vm886_vm0, %v843_v21, 0.0  ;;  %v8024_v33 = vadd.f32 %v515_v30, %v172_v28  ;;  %v8027_v36 = vadd.f32 %v517_v35, %v173_v34  ;;  %v8077_v30 = vld [vmem:[%s12691_s3] ss:$0 sm:$0xff] }
  0x84   :  { %1041 = vadd.xlane.f32.xlu1 %v1040_v55 }
  0x85   :  { %v844_v37 = vmul.f32 %v8024_v33, %v8024_v33  ;;  %v845_v42 = vmul.f32 %v8027_v36, %v8027_v36 }
  0x86   :  { %v519_v38 = vpop.permute.xlu0 %518  ;;  %v521_v43 = vpop.permute.xlu1 %520 }
  0x87   :  { %v1049_v39 = vsel %vm886_vm0, %v844_v37, 0.0  ;;  %v1052_v13 = vsel %vm886_vm0, %v845_v42, 0.0  ;;  %v8066_v17 = vadd.f32 %v519_v38, %v174_v11  ;;  %v177_v11 = vmul.f32 0.7, %v7877_v18 }
  0x8a   :  { %v8035_v44 = vpop.permute.xlu0 %522  ;;  %v8037_v12 = vpop.permute.xlu1 %524 }
  0x8e   :  { %v8039_v45 = vpop.permute.xlu0 %526  ;;  %v8046_v47 = vpop.permute.xlu1 %528 }
  0x92   :  { %v8053_v51 = vpop.permute.xlu0 %530  ;;  %v8057_v54 = vpop.permute.xlu1 %532 }
  0x95   :  { %540 = vrot.lane.b32.xlu1 %v281_v58, %s7787_s26 }
  0x96   :  { %538 = vrot.lane.b32.xlu0 %v280_v60, %s7787_s26  ;;  %v8061_v55 = vpop.permute.xlu0 %534  ;;  %v8063_v58 = vpop.permute.xlu1 %536 }
  0xb5   :  { %1044 = vadd.xlane.f32.xlu0 %v1043_v20  ;;  %v175_v20 = vmul.f32 0.7, %v7863_v14 }
  0xb9   :  { %1047 = vadd.xlane.f32.xlu1 %v1046_v22  ;;  %v8069_v22 = vadd.f32 %v521_v43, %v175_v20  ;;  %v8136_v20 = vadd.f32 %v8037_v12, %v177_v11 }
  0xca   :  { %544 = vrot.lane.b32.xlu1 %v283_v26, %s7787_s26  ;;  %v846_v26 = vmul.f32 %v8066_v17, %v8066_v17 }
  0xcb   :  { %542 = vrot.lane.b32.xlu0 %v282_v27, %s7787_s26 }
  0xcc   :  { %v1055_v35 = vsel %vm886_vm0, %v846_v26, 0.0 }
  0xea   :  { %1050 = vadd.xlane.f32.xlu0 %v1049_v39 }
  0xee   :  { %1053 = vadd.xlane.f32.xlu1 %v1052_v13 }
  0xff   :  { %548 = vrot.lane.b32.xlu1 %v285_v52, %s7787_s26 }
 0x100   :  { %546 = vrot.lane.b32.xlu0 %v284_v53, %s7787_s26 }
 0x105   :  { %v1033_v59 = vpop.xlane.xlu0 %1032 }
 0x106   :  { %v1224_v60 = vmul.f32 0.015625, %v1033_v59 }
 0x108   :  { %v1321_v61 = vadd.f32 1e-06, %v1224_v60 }
 0x109   :  { %v1036_v62 = vpop.xlane.xlu1 %1035  ;;  %v1039_v63 = vpop.xlane.xlu0 %1038 }
 0x10a   :  { %6608 = vrsqrt.f32 %v1321_v61  ;;  %v1225_v0 = vmul.f32 0.015625, %v1036_v62  ;;  %v1226_v1 = vmul.f32 0.015625, %v1039_v63 }
 0x10c   :  { %v1322_v2 = vadd.f32 1e-06, %v1225_v0  ;;  %v1323_v3 = vadd.f32 1e-06, %v1226_v1 }
 0x10d   :  { %v1042_v5 = vpop.xlane.xlu1 %1041  ;;  %v8126_v61 = vpop.permute.xlu0 %538 }
 0x10e   :  { %6610 = vrsqrt.f32 %v1322_v2  ;;  %v1227_v6 = vmul.f32 0.015625, %v1042_v5 }
 0x10f   :  { %6612 = vrsqrt.f32 %v1323_v3 }
 0x110   :  { %v1324_v10 = vadd.f32 1e-06, %v1227_v6  ;;  %v176_v6 = vmul.f32 0.7, %v7882_v19 }
 0x111   :  { %v8128_v62 = vpop.permute.xlu1 %540 }
 0x112   :  { %6614 = vrsqrt.f32 %v1324_v10  ;;  %v8132_v10 = vadd.f32 %v8035_v44, %v176_v6 }
 0x117   :  { %v6609_v21 = vpop.eup %6608 }
 0x118   :  { %v1513_v27 = vmul.f32 %v6609_v21, %v7936_v40  ;;  %v847_v40 = vmul.f32 %v8069_v22, %v8069_v22  ;;  %v848_v21 = vmul.f32 %v8132_v10, %v8132_v10 }
 0x11a   :  { %v8082_v14 = vmul.f32 %v8077_v30, %v1513_v27  ;;  %v1058_v42 = vsel %vm886_vm0, %v847_v40, 0.0  ;;  %v1061_v27 = vsel %vm886_vm0, %v848_v21, 0.0 }
 0x11b   :  { %v6611_v28 = vpop.eup %6610 }
 0x11c   :  { %v1514_v15 = vmul.f32 %v6611_v28, %v7944_v48  ;;  %v6613_v34 = vpop.eup %6612  ;;  %12965 = vst [vmem:[#allocation5_spill] sm:$0xff] %v8082_v14  ;;  %v849_v28 = vmul.f32 %v8136_v20, %v8136_v20 }
 0x11d   :  { %v1515_v43 = vmul.f32 %v6613_v34, %v7938_v41  ;;  %v8115_v41 = vld [vmem:[%s12688_s0 + $0x248] sm:$0xff] }
 0x11e   :  { %v8085_v37 = vmul.f32 %v8077_v30, %v1514_v15  ;;  %v287_v59 = vmul.f32 0.1, %v8115_v41  ;;  %v1064_v18 = vsel %vm886_vm0, %v849_v28, 0.0 }
 0x11f   :  { %v6615_v38 = vpop.eup %6614  ;;  %1056 = vadd.xlane.f32.xlu0 %v1055_v35  ;;  %v8103_v52 = vmul.f32 %v8077_v30, %v1515_v43 }
 0x120   :  { %12966 = vst [vmem:[#allocation6_spill] sm:$0xff] %v8085_v37  ;;  %v8091_v39 = vpack.c.bf16 %v8085_v37, %v8082_v14  ;;  %v1516_v48 = vmul.f32 %v6615_v38, %v7947_v50  ;;  %v8120_v50 = vld [vmem:[%s12688_s0 + $0x240] sm:$0xff] }
 0x121   :  { %12969 = vst [vmem:[#allocation9_spill] sm:$0xff] %v8103_v52  ;;  %v286_v60 = vmul.f32 0.1, %v8120_v50 }
 0x122   :  { %12967 = vst [vmem:[#allocation7_spill] sm:$0xff] %v8091_v39  ;;  %6274 = vmatmul.mubr.msk.bf16.vlgmr.msra.gmra.mxu1 %vm886_vm0, %v8091_v39  ;;  %v8100_v13 = vmul.f32 %v8077_v30, %v1516_v48 }
 0x123   :  { %1059 = vadd.xlane.f32.xlu1 %v1058_v42  ;;  %2233 = vmatprep.mubr.bf16.mxu1 %v12694_v4 }
 0x124   :  { %12968 = vst [vmem:[#allocation8_spill] sm:$0xff] %v8100_v13  ;;  %v8107_v53 = vpack.c.bf16 %v8100_v13, %v8103_v52 }
 0x126   :  { %12970 = vst [vmem:[#allocation10_spill] sm:$0xff] %v8107_v53 }
 0x12a   :  { %6275 = vmatmul.mubr.msk.bf16.gmra.mxu1 %vm886_vm0, %v8107_v53 }
 0x12b   :  { %2243 = vmatprep.mubr.bf16.mxu1 %v12694_v4 }
 0x134   :  { %552 = vrot.lane.b32.xlu1 %v287_v59, %s7787_s26 }
 0x135   :  { %550 = vrot.lane.b32.xlu0 %v286_v60, %s7787_s26 }
 0x13e   :  { %v1045_v63 = vpop.xlane.xlu0 %1044 }
 0x13f   :  { %v1228_v0 = vmul.f32 0.015625, %v1045_v63 }
 0x141   :  { %v1325_v1 = vadd.f32 1e-06, %v1228_v0 }
 0x142   :  { %v1048_v2 = vpop.xlane.xlu1 %1047  ;;  %v8173_v48 = vpop.permute.xlu0 %542 }
 0x143   :  { %6616 = vrsqrt.f32 %v1325_v1  ;;  %v1229_v3 = vmul.f32 0.015625, %v1048_v2  ;;  %v178_v2 = vmul.f32 0.7, %v7897_v24 }
 0x145   :  { %v1326_v5 = vadd.f32 1e-06, %v1229_v3  ;;  %v8179_v3 = vadd.f32 %v8039_v45, %v178_v2  ;;  %v180_v2 = vmul.f32 0.7, %v7912_v29 }
 0x146   :  { %v8175_v42 = vpop.permute.xlu1 %544 }
 0x147   :  { %6618 = vrsqrt.f32 %v1326_v5  ;;  %v179_v5 = vmul.f32 0.7, %v7892_v23  ;;  %v850_v11 = vmul.f32 %v8179_v3, %v8179_v3 }
 0x149   :  { %v8183_v6 = vadd.f32 %v8046_v47, %v179_v5  ;;  %v8226_v5 = vadd.f32 %v8053_v51, %v180_v2 }
 0x150   :  { %v6617_v26 = vpop.eup %6616 }
 0x151   :  { %v1517_v19 = vmul.f32 %v6617_v26, %v7998_v7  ;;  %v8162_v7 = vld [vmem:[%s12688_s0 + $0x258] sm:$0xff]  ;;  %v1067_v26 = vsel %vm886_vm0, %v850_v11, 0.0  ;;  %v181_v11 = vmul.f32 0.7, %v7902_v25 }
 0x152   :  { %v289_v40 = vmul.f32 0.1, %v8162_v7 }
 0x153   :  { %v8147_v12 = vmul.f32 %v8077_v30, %v1517_v19 }
 0x154   :  { %v6619_v15 = vpop.eup %6618  ;;  %1062 = vadd.xlane.f32.xlu0 %v1061_v27  ;;  %v851_v27 = vmul.f32 %v8183_v6, %v8183_v6 }
 0x155   :  { %v1518_v44 = vmul.f32 %v6619_v15, %v8001_v16  ;;  %12971 = vst [vmem:[#allocation11_spill] sm:$0xff] %v8147_v12  ;;  %v8167_v16 = vld [vmem:[%s12688_s0 + $0x250] sm:$0xff] }
 0x156   :  { %v288_v38 = vmul.f32 0.1, %v8167_v16  ;;  %v1070_v23 = vsel %vm886_vm0, %v851_v27, 0.0 }
 0x157   :  { %v8150_v34 = vmul.f32 %v8077_v30, %v1518_v44 }
 0x158   :  { %1065 = vadd.xlane.f32.xlu1 %v1064_v18 }
 0x159   :  { %12972 = vst [vmem:[#allocation12_spill] sm:$0xff] %v8150_v34  ;;  %v8154_v35 = vpack.c.bf16 %v8150_v34, %v8147_v12 }
 0x15b   :  { %12973 = vst [vmem:[#allocation13_spill] sm:$0xff] %v8154_v35  ;;  %6276 = vmatmul.mubr.msk.bf16.gmra.mxu1 %vm886_vm0, %v8154_v35 }
 0x15c   :  { %2253 = vmatprep.mubr.bf16.mxu1 %v12694_v4 }
 0x169   :  { %556 = vrot.lane.b32.xlu1 %v289_v40, %s7787_s26 }
 0x16a   :  { %554 = vrot.lane.b32.xlu0 %v288_v38, %s7787_s26 }
 0x173   :  { %v1051_v43 = vpop.xlane.xlu0 %1050 }
 0x174   :  { %v1230_v59 = vmul.f32 0.015625, %v1051_v43 }
 0x176   :  { %v1327_v60 = vadd.f32 1e-06, %v1230_v59 }
 0x177   :  { %v1054_v63 = vpop.xlane.xlu1 %1053  ;;  %v8220_v40 = vpop.permute.xlu0 %546 }
 0x178   :  { %6620 = vrsqrt.f32 %v1327_v60  ;;  %v1231_v0 = vmul.f32 0.015625, %v1054_v63 }
 0x17a   :  { %v1328_v1 = vadd.f32 1e-06, %v1231_v0 }
 0x17b   :  { %v8222_v38 = vpop.permute.xlu1 %548 }
 0x17c   :  { %6622 = vrsqrt.f32 %v1328_v1 }
 0x185   :  { %v6621_v21 = vpop.eup %6620 }
 0x186   :  { %v1519_v24 = vmul.f32 %v6621_v21, %v8024_v33  ;;  %v8209_v33 = vld [vmem:[%s12688_s0 + $0x268] sm:$0xff]  ;;  %v8230_v21 = vadd.f32 %v8057_v54, %v181_v11 }
 0x187   :  { %v291_v44 = vmul.f32 0.1, %v8209_v33 }
 0x188   :  { %v8194_v47 = vmul.f32 %v8077_v30, %v1519_v24 }
 0x189   :  { %v6623_v28 = vpop.eup %6622  ;;  %1068 = vadd.xlane.f32.xlu0 %v1067_v26  ;;  %v852_v26 = vmul.f32 %v8226_v5, %v8226_v5 }
 0x18a   :  { %v1520_v45 = vmul.f32 %v6623_v28, %v8027_v36  ;;  %12974 = vst [vmem:[#allocation14_spill] sm:$0xff] %v8194_v47  ;;  %v8214_v36 = vld [vmem:[%s12688_s0 + $0x260] sm:$0xff]  ;;  %v853_v28 = vmul.f32 %v8230_v21, %v8230_v21 }
 0x18b   :  { %v290_v18 = vmul.f32 0.1, %v8214_v36  ;;  %v1073_v24 = vsel %vm886_vm0, %v852_v26, 0.0  ;;  %v194_v52 = vmul.f32 0.7, %v8214_v36 }
 0x18c   :  { %v8197_v19 = vmul.f32 %v8077_v30, %v1520_v45  ;;  %v1076_v25 = vsel %vm886_vm0, %v853_v28, 0.0  ;;  %v183_v28 = vmul.f32 0.7, %v7920_v31 }
 0x18d   :  { %1071 = vadd.xlane.f32.xlu1 %v1070_v23 }
 0x18e   :  { %12975 = vst [vmem:[#allocation15_spill] sm:$0xff] %v8197_v19  ;;  %v8201_v15 = vpack.c.bf16 %v8197_v19, %v8194_v47 }
 0x190   :  { %12976 = vst [vmem:[#allocation16_spill] sm:$0xff] %v8201_v15  ;;  %6277 = vmatmul.mubr.msk.bf16.gmra.mxu1 %vm886_vm0, %v8201_v15 }
 0x191   :  { %2263 = vmatprep.mubr.bf16.mxu1 %v12694_v4 }
 0x19e   :  { %560 = vrot.lane.b32.xlu1 %v291_v44, %s7787_s26 }
 0x19f   :  { %558 = vrot.lane.b32.xlu0 %v290_v18, %s7787_s26 }
 0x1a8   :  { %v1057_v43 = vpop.xlane.xlu0 %1056 }
 0x1a9   :  { %v1232_v59 = vmul.f32 0.015625, %v1057_v43 }
 0x1ab   :  { %v1329_v60 = vadd.f32 1e-06, %v1232_v59 }
 0x1ac   :  { %v1060_v63 = vpop.xlane.xlu1 %1059  ;;  %v8267_v59 = vpop.permute.xlu0 %550 }
 0x1ad   :  { %6624 = vrsqrt.f32 %v1329_v60  ;;  %v1233_v0 = vmul.f32 0.015625, %v1060_v63 }
 0x1af   :  { %v1330_v1 = vadd.f32 1e-06, %v1233_v0 }
 0x1b0   :  { %v8269_v60 = vpop.permute.xlu1 %552 }
 0x1b1   :  { %6626 = vrsqrt.f32 %v1330_v1 }
 0x1ba   :  { %v6625_v27 = vpop.eup %6624 }
 0x1bb   :  { %v1521_v29 = vmul.f32 %v6625_v27, %v8066_v17  ;;  %v8256_v17 = vld [vmem:[%s12688_s0 + $0x278] sm:$0xff]  ;;  %v182_v27 = vmul.f32 0.7, %v7925_v32 }
 0x1bc   :  { %v293_v18 = vmul.f32 0.1, %v8256_v17 }
 0x1bd   :  { %v8241_v54 = vmul.f32 %v8077_v30, %v1521_v29  ;;  %v8277_v29 = vadd.f32 %v8063_v58, %v183_v28 }
 0x1be   :  { %v6627_v45 = vpop.eup %6626  ;;  %1074 = vadd.xlane.f32.xlu0 %v1073_v24  ;;  %v8273_v24 = vadd.f32 %v8061_v55, %v182_v27 }
 0x1bf   :  { %v1522_v51 = vmul.f32 %v6627_v45, %v8069_v22  ;;  %12977 = vst [vmem:[#allocation17_spill] sm:$0xff] %v8241_v54  ;;  %v8261_v22 = vld [vmem:[%s12688_s0 + $0x270] sm:$0xff] }
 0x1c0   :  { %v292_v43 = vmul.f32 0.1, %v8261_v22  ;;  %v854_v45 = vmul.f32 %v8273_v24, %v8273_v24 }
 0x1c1   :  { %v8244_v23 = vmul.f32 %v8077_v30, %v1522_v51 }
 0x1c2   :  { %1077 = vadd.xlane.f32.xlu1 %v1076_v25  ;;  %v1079_v25 = vsel %vm886_vm0, %v854_v45, 0.0 }
 0x1c3   :  { %12978 = vst [vmem:[#allocation18_spill] sm:$0xff] %v8244_v23  ;;  %v8248_v44 = vpack.c.bf16 %v8244_v23, %v8241_v54 }
 0x1c5   :  { %12979 = vst [vmem:[#allocation19_spill] sm:$0xff] %v8248_v44  ;;  %6278 = vmatmul.mubr.msk.bf16.gmra.mxu1 %vm886_vm0, %v8248_v44 }
 0x1c6   :  { %2273 = vmatprep.mubr.bf16.mxu1 %v12694_v4 }
 0x1d3   :  { %564 = vrot.lane.b32.xlu1 %v293_v18, %s7787_s26  ;;  %v855_v18 = vmul.f32 %v8277_v29, %v8277_v29 }
 0x1d4   :  { %562 = vrot.lane.b32.xlu0 %v292_v43, %s7787_s26 }
 0x1d5   :  { %v1082_v31 = vsel %vm886_vm0, %v855_v18, 0.0 }
 0x1dd   :  { %v1063_v63 = vpop.xlane.xlu0 %1062 }
 0x1de   :  { %v1234_v0 = vmul.f32 0.015625, %v1063_v63 }
 0x1e0   :  { %v1331_v1 = vadd.f32 1e-06, %v1234_v0 }
 0x1e1   :  { %v1066_v2 = vpop.xlane.xlu1 %1065 }
 0x1e2   :  { %6628 = vrsqrt.f32 %v1331_v1  ;;  %v1235_v11 = vmul.f32 0.015625, %v1066_v2 }
 0x1e4   :  { %v1332_v26 = vadd.f32 1e-06, %v1235_v11  ;;  %v8314_v11 = vpop.permute.xlu0 %554 }
 0x1e6   :  { %6630 = vrsqrt.f32 %v1332_v26  ;;  %v8316_v26 = vpop.permute.xlu1 %556 }
 0x1ef   :  { %v6629_v51 = vpop.eup %6628 }
 0x1f0   :  { %v1523_v32 = vmul.f32 %v6629_v51, %v8132_v10  ;;  %v8303_v10 = vld [vmem:[%s12688_s0 + $0x288] sm:$0xff] }
 0x1f1   :  { %v295_v1 = vmul.f32 0.1, %v8303_v10 }
 0x1f2   :  { %v8288_v58 = vmul.f32 %v8077_v30, %v1523_v32  ;;  %v184_v32 = vmul.f32 0.7, %v7964_v57 }
 0x1f3   :  { %v6631_v43 = vpop.eup %6630  ;;  %1080 = vadd.xlane.f32.xlu0 %v1079_v25 }
 0x1f4   :  { %v1524_v55 = vmul.f32 %v6631_v43, %v8136_v20  ;;  %12980 = vst [vmem:[#allocation20_spill] sm:$0xff] %v8288_v58  ;;  %v8308_v20 = vld [vmem:[%s12688_s0 + $0x280] sm:$0xff]  ;;  %v8320_v43 = vadd.f32 %v8126_v61, %v184_v32 }
 0x1f5   :  { %v294_v2 = vmul.f32 0.1, %v8308_v20 }
 0x1f6   :  { %v8291_v63 = vmul.f32 %v8077_v30, %v1524_v55  ;;  %v185_v55 = vmul.f32 0.7, %v7959_v56 }
 0x1f7   :  { %1083 = vadd.xlane.f32.xlu1 %v1082_v31 }
 0x1f8   :  { %12981 = vst [vmem:[#allocation21_spill] sm:$0xff] %v8291_v63  ;;  %v8295_v0 = vpack.c.bf16 %v8291_v63, %v8288_v58  ;;  %v8324_v31 = vadd.f32 %v8128_v62, %v185_v55 }
 0x1fa   :  { %12982 = vst [vmem:[#allocation22_spill] sm:$0xff] %v8295_v0  ;;  %6279 = vmatmul.mubr.msk.bf16.gmra.mxu1 %vm886_vm0, %v8295_v0  ;;  %v198_v0 = vmul.f32 0.7, %v8308_v20 }
 0x1fb   :  { %2283 = vmatprep.mubr.bf16.mxu1 %v12694_v4 }
 0x208   :  { %568 = vrot.lane.b32.xlu1 %v295_v1, %s7787_s26  ;;  %v856_v1 = vmul.f32 %v8320_v43, %v8320_v43 }
 0x209   :  { %566 = vrot.lane.b32.xlu0 %v294_v2, %s7787_s26 }
 0x212   :  { %v1069_v27 = vpop.xlane.xlu0 %1068 }
 0x213   :  { %v1236_v28 = vmul.f32 0.015625, %v1069_v27  ;;  %v1085_v27 = vsel %vm886_vm0, %v856_v1, 0.0 }
 0x215   :  { %v1333_v45 = vadd.f32 1e-06, %v1236_v28  ;;  %v857_v28 = vmul.f32 %v8324_v31, %v8324_v31 }
 0x216   :  { %v1072_v51 = vpop.xlane.xlu1 %1071  ;;  %v8361_v55 = vpop.permute.xlu0 %558 }
 0x217   :  { %6632 = vrsqrt.f32 %v1333_v45  ;;  %v1237_v25 = vmul.f32 0.015625, %v1072_v51  ;;  %v1088_v56 = vsel %vm886_vm0, %v857_v28, 0.0 }
 0x219   :  { %v1334_v18 = vadd.f32 1e-06, %v1237_v25 }
 0x21a   :  { %v8363_v1 = vpop.permute.xlu1 %560 }
 0x21b   :  { %6634 = vrsqrt.f32 %v1334_v18 }
 0x224   :  { %v6633_v2 = vpop.eup %6632 }
 0x225   :  { %v1525_v57 = vmul.f32 %v6633_v2, %v8179_v3  ;;  %v8350_v3 = vld [vmem:[%s12688_s0 + $0x298] sm:$0xff] }
 0x226   :  { %v297_v18 = vmul.f32 0.1, %v8350_v3 }
 0x227   :  { %v8335_v62 = vmul.f32 %v8077_v30, %v1525_v57 }
 0x228   :  { %v6635_v45 = vpop.eup %6634  ;;  %1086 = vadd.xlane.f32.xlu0 %v1085_v27 }
 0x229   :  { %v1526_v61 = vmul.f32 %v6635_v45, %v8183_v6  ;;  %12983 = vst [vmem:[#allocation23_spill] sm:$0xff] %v8335_v62  ;;  %v8355_v6 = vld [vmem:[%s12688_s0 + $0x290] sm:$0xff] }
 0x22a   :  { %v296_v32 = vmul.f32 0.1, %v8355_v6 }
 0x22b   :  { %v8338_v51 = vmul.f32 %v8077_v30, %v1526_v61 }
 0x22c   :  { %1089 = vadd.xlane.f32.xlu1 %v1088_v56  ;;  %v186_v56 = vmul.f32 0.7, %v8017_v9 }
 0x22d   :  { %12984 = vst [vmem:[#allocation24_spill] sm:$0xff] %v8338_v51  ;;  %v8342_v25 = vpack.c.bf16 %v8338_v51, %v8335_v62 }
 0x22f   :  { %12985 = vst [vmem:[#allocation25_spill] sm:$0xff] %v8342_v25  ;;  %6280 = vmatmul.mubr.msk.bf16.gmra.mxu1 %vm886_vm0, %v8342_v25 }
 0x230   :  { %2293 = vmatprep.mubr.bf16.mxu1 %v12694_v4  ;;  %v8367_v4 = vadd.f32 %v8173_v48, %v186_v56 }
 0x232   :  { %v858_v51 = vmul.f32 %v8367_v4, %v8367_v4 }
 0x23d   :  { %572 = vrot.lane.b32.xlu1 %v297_v18, %s7787_s26  ;;  %v187_v18 = vmul.f32 0.7, %v8012_v8 }
 0x23e   :  { %570 = vrot.lane.b32.xlu0 %v296_v32, %s7787_s26 }
 0x23f   :  { %v8371_v32 = vadd.f32 %v8175_v42, %v187_v18 }
 0x247   :  { %v1075_v2 = vpop.xlane.xlu0 %1074 }
 0x248   :  { %v1238_v27 = vmul.f32 0.015625, %v1075_v2 }
 0x24a   :  { %v1335_v28 = vadd.f32 1e-06, %v1238_v27  ;;  %v1091_v27 = vsel %vm886_vm0, %v858_v51, 0.0 }
 0x24b   :  { %v1078_v57 = vpop.xlane.xlu1 %1077 }
 0x24c   :  { %6636 = vrsqrt.f32 %v1335_v28  ;;  %v1239_v45 = vmul.f32 0.015625, %v1078_v57  ;;  %v859_v28 = vmul.f32 %v8371_v32, %v8371_v32 }
 0x24e   :  { %v1336_v61 = vadd.f32 1e-06, %v1239_v45  ;;  %v1094_v8 = vsel %vm886_vm0, %v859_v28, 0.0 }
 0x250   :  { %6638 = vrsqrt.f32 %v1336_v61  ;;  %v8402_v61 = vld [vmem:[%s12688_s0 + $0x2a0] sm:$0xff] }
 0x251   :  { %v298_v18 = vmul.f32 0.1, %v8402_v61 }
 0x259   :  { %v6637_v2 = vpop.eup %6636 }
 0x25a   :  { %v1527_v9 = vmul.f32 %v6637_v2, %v8226_v5  ;;  %v12989_v5 = vmov 0   ;;  %v8408_v2 = vpop.permute.xlu0 %562 }
 0x25c   :  { %v8382_v42 = vmul.f32 %v8077_v30, %v1527_v9 }
 0x25d   :  { %v6639_v57 = vpop.eup %6638  ;;  %1092 = vadd.xlane.f32.xlu0 %v1091_v27  ;;  %v8410_v27 = vpop.permute.xlu1 %564 }
 0x25e   :  { %v1528_v48 = vmul.f32 %v6639_v57, %v8230_v21  ;;  %12986 = vst [vmem:[#allocation26_spill] sm:$0xff] %v8382_v42  ;;  %v8397_v21 = vld [vmem:[%s12688_s0 + $0x2a8] sm:$0xff] }
 0x25f   :  { %v299_v56 = vmul.f32 0.1, %v8397_v21 }
 0x260   :  { %v8385_v45 = vmul.f32 %v8077_v30, %v1528_v48 }
 0x261   :  { %1095 = vadd.xlane.f32.xlu1 %v1094_v8 }
 0x262   :  { %12987 = vst [vmem:[#allocation27_spill] sm:$0xff] %v8385_v45  ;;  %v8389_v51 = vpack.c.bf16 %v8385_v45, %v8382_v42  ;;  %v188_v42 = vmul.f32 0.7, %v8051_v49 }
 0x264   :  { %12988 = vst [vmem:[#allocation28_spill] sm:$0xff] %v8389_v51  ;;  %6281 = vmatmul.mubr.msk.bf16.gmra.mxu1 %vm886_vm0, %v8389_v51  ;;  %v8414_v62 = vadd.f32 %v8220_v40, %v188_v42 }
 0x265   :  { %2303 = vmatprep.mubr.bf16.mxu1 %v12989_v5 }
 0x266   :  { %v860_v63 = vmul.f32 %v8414_v62, %v8414_v62 }
 0x272   :  { %576 = vrot.lane.b32.xlu1 %v299_v56, %s7787_s26  ;;  %v189_v56 = vmul.f32 0.7, %v8044_v46 }
 0x273   :  { %574 = vrot.lane.b32.xlu0 %v298_v18, %s7787_s26 }
 0x274   :  { %v8418_v18 = vadd.f32 %v8222_v38, %v189_v56  ;;  %v8456_v56 = vld [vmem:[%s12688_s0 + $0x8] sm:$0xff] }
 0x27c   :  { %v1081_v28 = vpop.xlane.xlu0 %1080 }
 0x27d   :  { %v1240_v9 = vmul.f32 0.015625, %v1081_v28 }
 0x27f   :  { %v1337_v57 = vadd.f32 1e-06, %v1240_v9  ;;  %v1097_v9 = vsel %vm886_vm0, %v860_v63, 0.0 }
 0x280   :  { %v1084_v48 = vpop.xlane.xlu1 %1083 }
 0x281   :  { %6640 = vrsqrt.f32 %v1337_v57  ;;  %v1241_v8 = vmul.f32 0.015625, %v1084_v48  ;;  %v861_v57 = vmul.f32 %v8418_v18, %v8418_v18 }
 0x283   :  { %v1338_v45 = vadd.f32 1e-06, %v1241_v8  ;;  %v1100_v46 = vsel %vm886_vm0, %v861_v57, 0.0 }
 0x285   :  { %6642 = vrsqrt.f32 %v1338_v45 }
 0x28e   :  { %v6641_v28 = vpop.eup %6640 }
 0x28f   :  { %v1529_v49 = vmul.f32 %v6641_v28, %v8273_v24  ;;  %v8444_v24 = vld [vmem:[%s12688_s0 + $0x2b8] sm:$0xff]  ;;  %v8461_v28 = vld [vmem:[%s12688_s0] sm:$0xff] }
 0x290   :  { %v301_v48 = vmul.f32 0.1, %v8444_v24  ;;  %v214_v57 = vmul.f32 0.1, %v8461_v28  ;;  %v118_v39 = vmul.f32 0.7, %v8461_v28 }
 0x291   :  { %v8429_v38 = vmul.f32 %v8077_v30, %v1529_v49  ;;  %v8469_v49 = vpop.permute.xlu0 %566 }
 0x292   :  { %v6643_v45 = vpop.eup %6642  ;;  %1098 = vadd.xlane.f32.xlu0 %v1097_v9  ;;  %v215_v9 = vmul.f32 0.1, %v8456_v56 }
 0x293   :  { %v1530_v40 = vmul.f32 %v6643_v45, %v8277_v29  ;;  %12990 = vst [vmem:[#allocation29_spill] sm:$0xff] %v8429_v38  ;;  %v8449_v29 = vld [vmem:[%s12688_s0 + $0x2b0] sm:$0xff]  ;;  %v8471_v45 = vpop.permute.xlu1 %568 }
 0x294   :  { %v300_v8 = vmul.f32 0.1, %v8449_v29 }
 0x295   :  { %v8432_v42 = vmul.f32 %v8077_v30, %v1530_v40 }
 0x296   :  { %1101 = vadd.xlane.f32.xlu1 %v1100_v46 }
 0x297   :  { %12991 = vst [vmem:[#allocation30_spill] sm:$0xff] %v8432_v42  ;;  %v8436_v63 = vpack.c.bf16 %v8432_v42, %v8429_v38 }
 0x299   :  { %12992 = vst [vmem:[#allocation31_spill] sm:$0xff] %v8436_v63  ;;  %6282 = vmatmul.mubr.msk.bf16.gmra.mxu1 %vm886_vm0, %v8436_v63 }
 0x29a   :  { %2313 = vmatprep.mubr.bf16.mxu1 %v12989_v5 }
 0x2a7   :  { %580 = vrot.lane.b32.xlu1 %v301_v48, %s7787_s26 }
 0x2a8   :  { %578 = vrot.lane.b32.xlu0 %v300_v8, %s7787_s26  ;;  %v190_v8 = vmul.f32 0.7, %v8120_v50 }
 0x2aa   :  { %v8475_v23 = vadd.f32 %v8267_v59, %v190_v8 }
 0x2ab   :  { %408 = vrot.lane.b32.xlu1 %v215_v9, %s7787_s26  ;;  %v191_v9 = vmul.f32 0.7, %v8115_v41 }
 0x2ac   :  { %406 = vrot.lane.b32.xlu0 %v214_v57, %s7787_s26 }
 0x2ad   :  { %v8479_v54 = vadd.f32 %v8269_v60, %v191_v9 }
 0x2af   :  { %v863_v41 = vmul.f32 %v8479_v54, %v8479_v54 }
 0x2b1   :  { %v1087_v40 = vpop.xlane.xlu0 %1086 }
 0x2b2   :  { %v1242_v46 = vmul.f32 0.015625, %v1087_v40  ;;  %v862_v40 = vmul.f32 %v8475_v23, %v8475_v23 }
 0x2b4   :  { %v1339_v42 = vadd.f32 1e-06, %v1242_v46 }
 0x2b5   :  { %v1090_v38 = vpop.xlane.xlu1 %1089 }
 0x2b6   :  { %6644 = vrsqrt.f32 %v1339_v42  ;;  %v1243_v48 = vmul.f32 0.015625, %v1090_v38 }
 0x2b8   :  { %v1340_v58 = vadd.f32 1e-06, %v1243_v48  ;;  %v8510_v48 = vld [vmem:[%s12688_s0 + $0x2c0] sm:$0xff] }
 0x2b9   :  { %v302_v9 = vmul.f32 0.1, %v8510_v48 }
 0x2ba   :  { %6646 = vrsqrt.f32 %v1340_v58  ;;  %v1103_v58 = vsel %vm886_vm0, %v862_v40, 0.0  ;;  %v8522_v40 = vld [vmem:[%s12688_s0 + $0x10] sm:$0xff] }
 0x2c3   :  { %v6645_v57 = vpop.eup %6644 }
 0x2c4   :  { %v1531_v46 = vmul.f32 %v6645_v57, %v8320_v43  ;;  %v1106_v43 = vsel %vm886_vm0, %v863_v41, 0.0  ;;  %v8517_v57 = vld [vmem:[%s12688_s0 + $0x18] sm:$0xff] }
 0x2c6   :  { %v8487_v50 = vmul.f32 %v8077_v30, %v1531_v46  ;;  %v217_v46 = vmul.f32 0.1, %v8517_v57 }
 0x2c7   :  { %v6647_v42 = vpop.eup %6646 }
 0x2c8   :  { %v1532_v38 = vmul.f32 %v6647_v42, %v8324_v31  ;;  %12993 = vst [vmem:[#allocation32_spill] sm:$0xff] %v8487_v50  ;;  %v8505_v31 = vld [vmem:[%s12688_s0 + $0x2c8] sm:$0xff]  ;;  %v216_v42 = vmul.f32 0.1, %v8522_v40 }
 0x2c9   :  { %v303_v8 = vmul.f32 0.1, %v8505_v31 }
 0x2ca   :  { %v8490_v59 = vmul.f32 %v8077_v30, %v1532_v38  ;;  %v8528_v38 = vpop.permute.xlu0 %570 }
 0x2cb   :  { %1104 = vadd.xlane.f32.xlu0 %v1103_v58  ;;  %v8532_v58 = vpop.permute.xlu1 %572 }
 0x2cc   :  { %12994 = vst [vmem:[#allocation33_spill] sm:$0xff] %v8490_v59  ;;  %v8496_v60 = vpack.c.bf16 %v8490_v59, %v8487_v50 }
 0x2ce   :  { %12995 = vst [vmem:[#allocation34_spill] sm:$0xff] %v8496_v60  ;;  %6283 = vmatmul.mubr.msk.bf16.gmra.mxu1 %vm886_vm0, %v8496_v60  ;;  %v196_v60 = vmul.f32 0.7, %v8261_v22 }
 0x2cf   :  { %1107 = vadd.xlane.f32.xlu1 %v1106_v43  ;;  %2323 = vmatprep.mubr.bf16.mxu1 %v12989_v5 }
 0x2e0   :  { %584 = vrot.lane.b32.xlu1 %v303_v8, %s7787_s26 }
 0x2e1   :  { %582 = vrot.lane.b32.xlu0 %v302_v9, %s7787_s26  ;;  %v192_v9 = vmul.f32 0.7, %v8167_v16 }
 0x2e3   :  { %v8536_v34 = vadd.f32 %v8314_v11, %v192_v9  ;;  %v8571_v11 = vld [vmem:[%s12688_s0 + $0x2d0] sm:$0xff] }
 0x2e4   :  { %412 = vrot.lane.b32.xlu1 %v217_v46, %s7787_s26  ;;  %v193_v46 = vmul.f32 0.7, %v8162_v7 }
 0x2e5   :  { %410 = vrot.lane.b32.xlu0 %v216_v42, %s7787_s26  ;;  %v864_v16 = vmul.f32 %v8536_v34, %v8536_v34 }
 0x2e6   :  { %v1093_v41 = vpop.xlane.xlu0 %1092 }
 0x2e7   :  { %v1244_v43 = vmul.f32 0.015625, %v1093_v41  ;;  %v8542_v41 = vadd.f32 %v8316_v26, %v193_v46 }
 0x2e9   :  { %v1341_v59 = vadd.f32 1e-06, %v1244_v43 }
 0x2ea   :  { %v1096_v50 = vpop.xlane.xlu1 %1095  ;;  %v8580_v43 = vpop.permute.xlu0 %574 }
 0x2eb   :  { %6648 = vrsqrt.f32 %v1341_v59  ;;  %v1245_v8 = vmul.f32 0.015625, %v1096_v50  ;;  %v8578_v59 = vld [vmem:[%s12688_s0 + $0x28] sm:$0xff] }
 0x2ec   :  { %v219_v9 = vmul.f32 0.1, %v8578_v59 }
 0x2ed   :  { %v1342_v19 = vadd.f32 1e-06, %v1245_v8  ;;  %v8585_v8 = vld [vmem:[%s12688_s0 + $0x20] sm:$0xff] }
 0x2ee   :  { %v218_v46 = vmul.f32 0.1, %v8585_v8 }
 0x2ef   :  { %6650 = vrsqrt.f32 %v1342_v19 }
 0x2f8   :  { %v6649_v47 = vpop.eup %6648 }
 0x2f9   :  { %v1533_v42 = vmul.f32 %v6649_v47, %v8367_v4  ;;  %v1109_v4 = vsel %vm886_vm0, %v864_v16, 0.0  ;;  %v8566_v47 = vld [vmem:[%s12688_s0 + $0x2d8] sm:$0xff] }
 0x2fa   :  { %v305_v26 = vmul.f32 0.1, %v8566_v47 }
 0x2fb   :  { %v8545_v50 = vmul.f32 %v8077_v30, %v1533_v42  ;;  %v8591_v42 = vpop.permute.xlu1 %576 }
 0x2fc   :  { %v6651_v12 = vpop.eup %6650 }
 0x2fd   :  { %v1534_v13 = vmul.f32 %v6651_v12, %v8371_v32  ;;  %12996 = vst [vmem:[#allocation35_spill] sm:$0xff] %v8545_v50  ;;  %v865_v12 = vmul.f32 %v8542_v41, %v8542_v41  ;;  %v304_v32 = vmul.f32 0.1, %v8571_v11 }
 0x2ff   :  { %v8548_v19 = vmul.f32 %v8077_v30, %v1534_v13  ;;  %v1112_v13 = vsel %vm886_vm0, %v865_v12, 0.0 }
 0x301   :  { %12997 = vst [vmem:[#allocation36_spill] sm:$0xff] %v8548_v19  ;;  %v8554_v7 = vpack.c.bf16 %v8548_v19, %v8545_v50 }
 0x303   :  { %12998 = vst [vmem:[#allocation37_spill] sm:$0xff] %v8554_v7  ;;  %6284 = vmatmul.mubr.msk.bf16.gmra.mxu1 %vm886_vm0, %v8554_v7 }
 0x304   :  { %1110 = vadd.xlane.f32.xlu0 %v1109_v4  ;;  %2333 = vmatprep.mubr.bf16.mxu1 %v12989_v5 }
 0x308   :  { %1113 = vadd.xlane.f32.xlu1 %v1112_v13 }
 0x319   :  { %588 = vrot.lane.b32.xlu1 %v305_v26, %s7787_s26 }
 0x31a   :  { %586 = vrot.lane.b32.xlu0 %v304_v32, %s7787_s26 }
 0x31b   :  { %v1099_v16 = vpop.xlane.xlu0 %1098 }
 0x31c   :  { %v1246_v4 = vmul.f32 0.015625, %v1099_v16  ;;  %v8599_v16 = vadd.f32 %v8361_v55, %v194_v52  ;;  %v8629_v55 = vld [vmem:[%s12688_s0 + $0x2e8] sm:$0xff] }
 0x31d   :  { %416 = vrot.lane.b32.xlu1 %v219_v9, %s7787_s26  ;;  %v195_v9 = vmul.f32 0.7, %v8209_v33 }
 0x31e   :  { %v1343_v12 = vadd.f32 1e-06, %v1246_v4  ;;  %414 = vrot.lane.b32.xlu0 %v218_v46, %s7787_s26 }
 0x31f   :  { %v1102_v13 = vpop.xlane.xlu1 %1101  ;;  %v8613_v36 = vadd.f32 %v8363_v1, %v195_v9  ;;  %v8634_v1 = vld [vmem:[%s12688_s0 + $0x2e0] sm:$0xff] }
 0x320   :  { %6652 = vrsqrt.f32 %v1343_v12  ;;  %v1247_v19 = vmul.f32 0.015625, %v1102_v13  ;;  %v306_v12 = vmul.f32 0.1, %v8634_v1  ;;  %v8643_v13 = vld [vmem:[%s12688_s0 + $0x38] sm:$0xff] }
 0x321   :  { %v221_v9 = vmul.f32 0.1, %v8643_v13 }
 0x322   :  { %v1344_v50 = vadd.f32 1e-06, %v1247_v19  ;;  %v307_v19 = vmul.f32 0.1, %v8629_v55 }
 0x324   :  { %6654 = vrsqrt.f32 %v1344_v50 }
 0x32d   :  { %v6653_v26 = vpop.eup %6652 }
 0x32e   :  { %v1535_v32 = vmul.f32 %v6653_v26, %v8414_v62  ;;  %v8624_v62 = vpop.permute.xlu0 %578 }
 0x330   :  { %v8603_v46 = vmul.f32 %v8077_v30, %v1535_v32  ;;  %v8650_v32 = vld [vmem:[%s12688_s0 + $0x30] sm:$0xff] }
 0x331   :  { %v6655_v37 = vpop.eup %6654 }
 0x332   :  { %v1536_v14 = vmul.f32 %v6655_v37, %v8418_v18  ;;  %12999 = vst [vmem:[#allocation38_spill] sm:$0xff] %v8603_v46  ;;  %v866_v37 = vmul.f32 %v8599_v16, %v8599_v16  ;;  %v8636_v18 = vpop.permute.xlu1 %580  ;;  %v8645_v26 = vpop.permute.xlu0 %406 }
 0x334   :  { %v8606_v4 = vmul.f32 %v8077_v30, %v1536_v14  ;;  %v1115_v52 = vsel %vm886_vm0, %v866_v37, 0.0  ;;  %v867_v14 = vmul.f32 %v8613_v36, %v8613_v36  ;;  %v220_v37 = vmul.f32 0.1, %v8650_v32 }
 0x336   :  { %13000 = vst [vmem:[#allocation39_spill] sm:$0xff] %v8606_v4  ;;  %v8610_v50 = vpack.c.bf16 %v8606_v4, %v8603_v46  ;;  %v1118_v33 = vsel %vm886_vm0, %v867_v14, 0.0 }
 0x338   :  { %13001 = vst [vmem:[#allocation40_spill] sm:$0xff] %v8610_v50  ;;  %6285 = vmatmul.mubr.msk.bf16.gmra.mxu1 %vm886_vm0, %v8610_v50 }
 0x339   :  { %2343 = vmatprep.mubr.bf16.mxu1 %v12989_v5 }
 0x33d   :  { %1116 = vadd.xlane.f32.xlu0 %v1115_v52  ;;  %v8656_v52 = vpop.permute.xlu1 %408 }
 0x341   :  { %1119 = vadd.xlane.f32.xlu1 %v1118_v33 }
 0x352   :  { %592 = vrot.lane.b32.xlu1 %v307_v19, %s7787_s26 }
 0x353   :  { %590 = vrot.lane.b32.xlu0 %v306_v12, %s7787_s26 }
 0x354   :  { %v1105_v14 = vpop.xlane.xlu0 %1104 }
 0x355   :  { %v1248_v33 = vmul.f32 0.015625, %v1105_v14  ;;  %v8664_v14 = vadd.f32 %v8408_v2, %v196_v60 }
 0x356   :  { %420 = vrot.lane.b32.xlu1 %v221_v9, %s7787_s26  ;;  %v197_v9 = vmul.f32 0.7, %v8256_v17 }
 0x357   :  { %v1345_v4 = vadd.f32 1e-06, %v1248_v33  ;;  %418 = vrot.lane.b32.xlu0 %v220_v37, %s7787_s26  ;;  %v8708_v33 = vld [vmem:[%s12688_s0 + $0x48] sm:$0xff] }
 0x358   :  { %v1108_v46 = vpop.xlane.xlu1 %1107  ;;  %v8689_v2 = vpop.permute.xlu0 %582 }
 0x359   :  { %6656 = vrsqrt.f32 %v1345_v4  ;;  %v1249_v50 = vmul.f32 0.015625, %v1108_v46 }
 0x35b   :  { %v1346_v7 = vadd.f32 1e-06, %v1249_v50 }
 0x35c   :  { %v8701_v60 = vpop.permute.xlu1 %584 }
 0x35d   :  { %6658 = vrsqrt.f32 %v1346_v7 }
 0x366   :  { %v6657_v19 = vpop.eup %6656 }
 0x367   :  { %v1537_v12 = vmul.f32 %v6657_v19, %v8475_v23  ;;  %v8678_v23 = vadd.f32 %v8410_v27, %v197_v9  ;;  %v8694_v27 = vld [vmem:[%s12688_s0 + $0x2f8] sm:$0xff]  ;;  %v8710_v19 = vpop.permute.xlu0 %410  ;;  %v223_v9 = vmul.f32 0.1, %v8708_v33 }
 0x368   :  { %v309_v4 = vmul.f32 0.1, %v8694_v27 }
 0x369   :  { %v8668_v37 = vmul.f32 %v8077_v30, %v1537_v12  ;;  %v869_v22 = vmul.f32 %v8678_v23, %v8678_v23  ;;  %v8715_v12 = vld [vmem:[%s12688_s0 + $0x40] sm:$0xff] }
 0x36a   :  { %v6659_v63 = vpop.eup %6658 }
 0x36b   :  { %v1538_v51 = vmul.f32 %v6659_v63, %v8479_v54  ;;  %13002 = vst [vmem:[#allocation41_spill] sm:$0xff] %v8668_v37  ;;  %v868_v54 = vmul.f32 %v8664_v14, %v8664_v14  ;;  %v8699_v63 = vld [vmem:[%s12688_s0 + $0x2f0] sm:$0xff] }
 0x36c   :  { %v308_v50 = vmul.f32 0.1, %v8699_v63 }
 0x36d   :  { %v8671_v46 = vmul.f32 %v8077_v30, %v1538_v51  ;;  %v1121_v17 = vsel %vm886_vm0, %v868_v54, 0.0  ;;  %v1124_v51 = vsel %vm886_vm0, %v869_v22, 0.0  ;;  %v222_v54 = vmul.f32 0.1, %v8715_v12 }
 0x36f   :  { %13003 = vst [vmem:[#allocation42_spill] sm:$0xff] %v8671_v46  ;;  %v8675_v7 = vpack.c.bf16 %v8671_v46, %v8668_v37 }
 0x371   :  { %13004 = vst [vmem:[#allocation43_spill] sm:$0xff] %v8675_v7  ;;  %6286 = vmatmul.mubr.msk.bf16.gmra.mxu1 %vm886_vm0, %v8675_v7 }
 0x372   :  { %2353 = vmatprep.mubr.bf16.mxu1 %v12989_v5 }
 0x376   :  { %1122 = vadd.xlane.f32.xlu0 %v1121_v17  ;;  %v8721_v17 = vpop.permute.xlu1 %412 }
 0x37a   :  { %1125 = vadd.xlane.f32.xlu1 %v1124_v51 }
 0x38b   :  { %596 = vrot.lane.b32.xlu1 %v309_v4, %s7787_s26 }
 0x38c   :  { %594 = vrot.lane.b32.xlu0 %v308_v50, %s7787_s26 }
 0x38d   :  { %v1111_v22 = vpop.xlane.xlu0 %1110 }
 0x38e   :  { %v1250_v51 = vmul.f32 0.015625, %v1111_v22  ;;  %v8729_v22 = vadd.f32 %v8469_v49, %v198_v0  ;;  %v8759_v49 = vld [vmem:[%s12688_s0 + $0x58] sm:$0xff] }
 0x38f   :  { %424 = vrot.lane.b32.xlu1 %v223_v9, %s7787_s26  ;;  %v199_v9 = vmul.f32 0.7, %v8303_v10 }
 0x390   :  { %v1347_v46 = vadd.f32 1e-06, %v1250_v51  ;;  %422 = vrot.lane.b32.xlu0 %v222_v54, %s7787_s26 }
 0x391   :  { %v1114_v37 = vpop.xlane.xlu1 %1113  ;;  %v8754_v20 = vpop.permute.xlu0 %586 }
 0x392   :  { %6660 = vrsqrt.f32 %v1347_v46  ;;  %v1251_v7 = vmul.f32 0.015625, %v1114_v37  ;;  %v225_v46 = vmul.f32 0.1, %v8759_v49 }
 0x394   :  { %v1348_v25 = vadd.f32 1e-06, %v1251_v7 }
 0x395   :  { %v8770_v51 = vpop.permute.xlu0 %414 }
 0x396   :  { %6662 = vrsqrt.f32 %v1348_v25 }
 0x39f   :  { %v6661_v4 = vpop.eup %6660 }
 0x3a0   :  { %v1539_v50 = vmul.f32 %v6661_v4, %v8536_v34  ;;  %v8743_v34 = vadd.f32 %v8471_v45, %v199_v9  ;;  %v8764_v45 = vld [vmem:[%s12688_s0 + $0x50] sm:$0xff] }
 0x3a1   :  { %v224_v7 = vmul.f32 0.1, %v8764_v45 }
 0x3a2   :  { %v8733_v54 = vmul.f32 %v8077_v30, %v1539_v50 }
 0x3a3   :  { %v6663_v44 = vpop.eup %6662 }
 0x3a4   :  { %v1540_v15 = vmul.f32 %v6663_v44, %v8542_v41  ;;  %13005 = vst [vmem:[#allocation44_spill] sm:$0xff] %v8733_v54  ;;  %v870_v44 = vmul.f32 %v8729_v22, %v8729_v22  ;;  %v8766_v41 = vpop.permute.xlu1 %588 }
 0x3a6   :  { %v8736_v37 = vmul.f32 %v8077_v30, %v1540_v15  ;;  %v1127_v0 = vsel %vm886_vm0, %v870_v44, 0.0  ;;  %v871_v15 = vmul.f32 %v8743_v34, %v8743_v34 }
 0x3a8   :  { %13006 = vst [vmem:[#allocation45_spill] sm:$0xff] %v8736_v37  ;;  %v8740_v25 = vpack.c.bf16 %v8736_v37, %v8733_v54  ;;  %v1130_v10 = vsel %vm886_vm0, %v871_v15, 0.0  ;;  %v8774_v4 = vpop.permute.xlu1 %416  ;;  %v200_v37 = vmul.f32 0.7, %v8355_v6 }
 0x3aa   :  { %13007 = vst [vmem:[#allocation46_spill] sm:$0xff] %v8740_v25  ;;  %6287 = vmatmul.mubr.msk.bf16.gmra.mxu1 %vm886_vm0, %v8740_v25  ;;  %v8778_v25 = vadd.f32 %v8528_v38, %v200_v37 }
 0x3ab   :  { %2363 = vmatprep.mubr.bf16.mxu1 %v12989_v5 }
 0x3ac   :  { %v872_v6 = vmul.f32 %v8778_v25, %v8778_v25 }
 0x3af   :  { %1128 = vadd.xlane.f32.xlu0 %v1127_v0 }
 0x3b3   :  { %1131 = vadd.xlane.f32.xlu1 %v1130_v10 }
 0x3c4   :  { %428 = vrot.lane.b32.xlu1 %v225_v46, %s7787_s26  ;;  %v201_v46 = vmul.f32 0.7, %v8350_v3 }
 0x3c5   :  { %426 = vrot.lane.b32.xlu0 %v224_v7, %s7787_s26 }
 0x3c6   :  { %v1117_v50 = vpop.xlane.xlu0 %1116 }
 0x3c7   :  { %v1252_v9 = vmul.f32 0.015625, %v1117_v50  ;;  %v8784_v50 = vadd.f32 %v8532_v58, %v201_v46  ;;  %v8813_v58 = vld [vmem:[%s12688_s0 + $0x60] sm:$0xff] }
 0x3c9   :  { %v1349_v44 = vadd.f32 1e-06, %v1252_v9  ;;  %v873_v38 = vmul.f32 %v8784_v50, %v8784_v50 }
 0x3ca   :  { %v1120_v0 = vpop.xlane.xlu1 %1119 }
 0x3cb   :  { %6664 = vrsqrt.f32 %v1349_v44  ;;  %v1253_v15 = vmul.f32 0.015625, %v1120_v0 }
 0x3cd   :  { %v1350_v10 = vadd.f32 1e-06, %v1253_v15 }
 0x3ce   :  { %v8819_v37 = vpop.permute.xlu1 %592 }
 0x3cf   :  { %6666 = vrsqrt.f32 %v1350_v10 }
 0x3d2   :  { %v8825_v15 = vpop.permute.xlu1 %420 }
 0x3d8   :  { %v6665_v54 = vpop.eup %6664 }
 0x3d9   :  { %v1541_v7 = vmul.f32 %v6665_v54, %v8599_v16  ;;  %v8815_v16 = vpop.permute.xlu0 %590  ;;  %v226_v54 = vmul.f32 0.1, %v8813_v58 }
 0x3db   :  { %v8787_v9 = vmul.f32 %v8077_v30, %v1541_v7 }
 0x3dc   :  { %v6667_v35 = vpop.eup %6666 }
 0x3dd   :  { %v1542_v53 = vmul.f32 %v6667_v35, %v8613_v36  ;;  %13008 = vst [vmem:[#allocation47_spill] sm:$0xff] %v8787_v9  ;;  %v1133_v35 = vsel %vm886_vm0, %v872_v6, 0.0  ;;  %v8823_v0 = vpop.permute.xlu0 %418 }
 0x3df   :  { %v8790_v44 = vmul.f32 %v8077_v30, %v1542_v53  ;;  %v1136_v30 = vsel %vm886_vm0, %v873_v38, 0.0  ;;  %v8808_v53 = vld [vmem:[%s12688_s0 + $0x68] sm:$0xff] }
 0x3e0   :  { %v227_v36 = vmul.f32 0.1, %v8808_v53 }
 0x3e1   :  { %13009 = vst [vmem:[#allocation48_spill] sm:$0xff] %v8790_v44  ;;  %v8796_v3 = vpack.c.bf16 %v8790_v44, %v8787_v9 }
 0x3e3   :  { %13010 = vst [vmem:[#allocation49_spill] sm:$0xff] %v8796_v3  ;;  %6288 = vmatmul.mubr.msk.bf16.gmra.mxu1 %vm886_vm0, %v8796_v3  ;;  %v204_v3 = vmul.f32 0.7, %v8449_v29 }
 0x3e4   :  { %1134 = vadd.xlane.f32.xlu0 %v1133_v35  ;;  %2373 = vmatprep.mubr.bf16.mxu1 %v12989_v5 }
 0x3e8   :  { %1137 = vadd.xlane.f32.xlu1 %v1136_v30  ;;  %v202_v30 = vmul.f32 0.7, %v8402_v61  ;;  %v8843_v61 = vld [vmem:[%s12691_s3] ss:$0 sm:$0xff] }
 0x3ea   :  { %v8829_v44 = vadd.f32 %v8580_v43, %v202_v30  ;;  %v8869_v30 = vld [vmem:[%s12688_s0 + $0x70] sm:$0xff] }
 0x3f9   :  { %432 = vrot.lane.b32.xlu1 %v227_v36, %s7787_s26  ;;  %v203_v36 = vmul.f32 0.7, %v8397_v21 }
 0x3fa   :  { %430 = vrot.lane.b32.xlu0 %v226_v54, %s7787_s26 }
 0x3fb   :  { %v8833_v9 = vadd.f32 %v8591_v42, %v203_v36 }
 0x3fd   :  { %v875_v42 = vmul.f32 %v8833_v9, %v8833_v9 }
 0x3ff   :  { %v1123_v10 = vpop.xlane.xlu0 %1122 }
 0x400   :  { %v1254_v46 = vmul.f32 0.015625, %v1123_v10  ;;  %v874_v10 = vmul.f32 %v8829_v44, %v8829_v44 }
 0x402   :  { %v1351_v7 = vadd.f32 1e-06, %v1254_v46 }
 0x403   :  { %v1126_v6 = vpop.xlane.xlu1 %1125 }
 0x404   :  { %6668 = vrsqrt.f32 %v1351_v7  ;;  %v1255_v35 = vmul.f32 0.015625, %v1126_v6 }
 0x406   :  { %v1352_v38 = vadd.f32 1e-06, %v1255_v35  ;;  %v1139_v35 = vsel %vm886_vm0, %v874_v10, 0.0  ;;  %v8873_v10 = vpop.permute.xlu0 %594 }
 0x408   :  { %6670 = vrsqrt.f32 %v1352_v38  ;;  %v8864_v38 = vld [vmem:[%s12688_s0 + $0x78] sm:$0xff] }
 0x409   :  { %13014 = vst [vmem:[#allocation53_spill] sm:$0xff] %v8864_v38  ;;  %v229_v36 = vmul.f32 0.1, %v8864_v38 }
 0x411   :  { %v6669_v54 = vpop.eup %6668 }
 0x412   :  { %v1543_v46 = vmul.f32 %v6669_v54, %v8664_v14  ;;  %v228_v54 = vmul.f32 0.1, %v8869_v30 }
 0x414   :  { %v8846_v21 = vmul.f32 %v8843_v61, %v1543_v46  ;;  %v8877_v46 = vpop.permute.xlu1 %596 }
 0x415   :  { %v6671_v7 = vpop.eup %6670 }
 0x416   :  { %v1544_v6 = vmul.f32 %v6671_v7, %v8678_v23  ;;  %13011 = vst [vmem:[#allocation50_spill] sm:$0xff] %v8846_v21  ;;  %v1142_v23 = vsel %vm886_vm0, %v875_v42, 0.0  ;;  %v8879_v7 = vpop.permute.xlu0 %422 }
 0x418   :  { %v8849_v43 = vmul.f32 %v8843_v61, %v1544_v6  ;;  %v8881_v6 = vpop.permute.xlu1 %424 }
 0x419   :  { %1140 = vadd.xlane.f32.xlu0 %v1139_v35 }
 0x41a   :  { %13012 = vst [vmem:[#allocation51_spill] sm:$0xff] %v8849_v43  ;;  %v8855_v14 = vpack.c.bf16 %v8849_v43, %v8846_v21 }
 0x41c   :  { %13013 = vst [vmem:[#allocation52_spill] sm:$0xff] %v8855_v14  ;;  %6289 = vmatmul.mubr.msk.bf16.gmra.mxu1 %vm886_vm0, %v8855_v14 }
 0x41d   :  { %1143 = vadd.xlane.f32.xlu1 %v1142_v23  ;;  %2383 = vmatprep.mubr.bf16.mxu1 %v12989_v5 }
 0x42e   :  { %436 = vrot.lane.b32.xlu1 %v229_v36, %s7787_s26  ;;  %v205_v36 = vmul.f32 0.7, %v8444_v24 }
 0x42f   :  { %434 = vrot.lane.b32.xlu0 %v228_v54, %s7787_s26  ;;  %v8886_v54 = vadd.f32 %v8624_v62, %v204_v3 }
 0x430   :  { %v8890_v38 = vadd.f32 %v8636_v18, %v205_v36  ;;  %v8929_v36 = vld [vmem:[%s12688_s0 + $0x80] sm:$0xff] }
 0x432   :  { %v877_v24 = vmul.f32 %v8890_v38, %v8890_v38 }
 0x434   :  { %v1148_v3 = vsel %vm886_vm0, %v877_v24, 0.0 }
 0x438   :  { %v1129_v35 = vpop.xlane.xlu0 %1128 }
 0x439   :  { %v1256_v42 = vmul.f32 0.015625, %v1129_v35  ;;  %v8893_v35 = vadd.f32 %v8645_v26, %v118_v39 }
 0x43b   :  { %v1353_v23 = vadd.f32 1e-06, %v1256_v42  ;;  %v119_v42 = vmul.f32 0.7, %v8456_v56  ;;  %v790_v18 = vmul.f32 %v8893_v35, %v8893_v35 }
 0x43c   :  { %v1132_v43 = vpop.xlane.xlu1 %1131  ;;  %v8939_v24 = vpop.permute.xlu0 %426 }
 0x43d   :  { %6672 = vrsqrt.f32 %v1353_v23  ;;  %v1257_v21 = vmul.f32 0.015625, %v1132_v43  ;;  %v8901_v62 = vadd.f32 %v8656_v52, %v119_v42  ;;  %v887_v43 = vsel %vm886_vm0, %v790_v18, 0.0 }
 0x43e   :  { %v230_v42 = vmul.f32 0.1, %v8929_v36 }
 0x43f   :  { %v1354_v14 = vadd.f32 1e-06, %v1257_v21  ;;  %v876_v21 = vmul.f32 %v8886_v54, %v8886_v54  ;;  %v791_v23 = vmul.f32 %v8901_v62, %v8901_v62 }
 0x441   :  { %6674 = vrsqrt.f32 %v1354_v14  ;;  %v1145_v28 = vsel %vm886_vm0, %v876_v21, 0.0  ;;  %v8936_v21 = vld [vmem:[%s12688_s0 + $0x88] sm:$0xff] }
 0x44a   :  { %v6673_v29 = vpop.eup %6672 }
 0x44b   :  { %v1545_v39 = vmul.f32 %v6673_v29, %v8729_v22  ;;  %v231_v29 = vmul.f32 0.1, %v8936_v21 }
 0x44d   :  { %v8911_v14 = vmul.f32 %v8843_v61, %v1545_v39 }
 0x44e   :  { %v6675_v26 = vpop.eup %6674  ;;  %1146 = vadd.xlane.f32.xlu0 %v1145_v28  ;;  %v8942_v28 = vpop.permute.xlu1 %428 }
 0x44f   :  { %v1546_v56 = vmul.f32 %v6675_v26, %v8743_v34  ;;  %13015 = vst [vmem:[#allocation54_spill] sm:$0xff] %v8911_v14  ;;  %v890_v34 = vsel %vm886_vm0, %v791_v23, 0.0  ;;  %v206_v23 = vmul.f32 0.7, %v8510_v48 }
 0x451   :  { %v8914_v52 = vmul.f32 %v8843_v61, %v1546_v56 }
 0x452   :  { %1149 = vadd.xlane.f32.xlu1 %v1148_v3  ;;  %888 = vadd.xlane.f32.xlu0 %v887_v43 }
 0x453   :  { %13016 = vst [vmem:[#allocation55_spill] sm:$0xff] %v8914_v52  ;;  %v8920_v22 = vpack.c.bf16 %v8914_v52, %v8911_v14  ;;  %v207_v52 = vmul.f32 0.7, %v8505_v31 }
 0x455   :  { %13017 = vst [vmem:[#allocation56_spill] sm:$0xff] %v8920_v22  ;;  %6290 = vmatmul.mubr.msk.bf16.gmra.mxu1 %vm886_vm0, %v8920_v22 }
 0x456   :  { %891 = vadd.xlane.f32.xlu0 %v890_v34  ;;  %2393 = vmatprep.mubr.bf16.mxu1 %v12989_v5  ;;  %v8946_v34 = vadd.f32 %v8689_v2, %v206_v23  ;;  %v8990_v23 = vld [vmem:[%s12688_s0 + $0x90] sm:$0xff] }
 0x463   :  { %438 = vrot.lane.b32.xlu1 %v230_v42, %s7787_s26  ;;  %v120_v42 = vmul.f32 0.7, %v8522_v40 }
 0x465   :  { %v8951_v14 = vadd.f32 %v8710_v19, %v120_v42  ;;  %v232_v42 = vmul.f32 0.1, %v8990_v23 }
 0x467   :  { %v792_v31 = vmul.f32 %v8951_v14, %v8951_v14 }
 0x46c   :  { %440 = vrot.lane.b32.xlu0 %v231_v29, %s7787_s26 }
 0x46d   :  { %v1135_v18 = vpop.xlane.xlu0 %1134 }
 0x46e   :  { %v1258_v39 = vmul.f32 0.015625, %v1135_v18  ;;  %v878_v18 = vmul.f32 %v8946_v34, %v8946_v34 }
 0x470   :  { %v1355_v26 = vadd.f32 1e-06, %v1258_v39  ;;  %v8956_v39 = vadd.f32 %v8701_v60, %v207_v52  ;;  %v1151_v40 = vsel %vm886_vm0, %v878_v18, 0.0  ;;  %v8999_v18 = vld [vmem:[%s12688_s0 + $0x98] sm:$0xff] }
 0x471   :  { %v1138_v56 = vpop.xlane.xlu1 %1137 }
 0x472   :  { %6676 = vrsqrt.f32 %v1355_v26  ;;  %v1259_v3 = vmul.f32 0.015625, %v1138_v56  ;;  %v121_v26 = vmul.f32 0.7, %v8517_v57  ;;  %v879_v57 = vmul.f32 %v8956_v39, %v8956_v39 }
 0x474   :  { %v1356_v43 = vadd.f32 1e-06, %v1259_v3  ;;  %v8965_v19 = vadd.f32 %v8721_v17, %v121_v26  ;;  %v893_v17 = vsel %vm886_vm0, %v792_v31, 0.0  ;;  %v233_v26 = vmul.f32 0.1, %v8999_v18 }
 0x476   :  { %6678 = vrsqrt.f32 %v1356_v43  ;;  %v793_v52 = vmul.f32 %v8965_v19, %v8965_v19 }
 0x478   :  { %v896_v43 = vsel %vm886_vm0, %v793_v52, 0.0 }
 0x47f   :  { %v6677_v29 = vpop.eup %6676 }
 0x480   :  { %v1547_v48 = vmul.f32 %v6677_v29, %v8778_v25  ;;  %v8994_v29 = vpop.permute.xlu0 %430 }
 0x482   :  { %v8968_v3 = vmul.f32 %v8843_v61, %v1547_v48  ;;  %v9002_v48 = vpop.permute.xlu1 %432 }
 0x483   :  { %v6679_v2 = vpop.eup %6678 }
 0x484   :  { %v1548_v56 = vmul.f32 %v6679_v2, %v8784_v50  ;;  %13018 = vst [vmem:[#allocation57_spill] sm:$0xff] %v8968_v3  ;;  %v1154_v50 = vsel %vm886_vm0, %v879_v57, 0.0 }
 0x486   :  { %v8971_v60 = vmul.f32 %v8843_v61, %v1548_v56 }
 0x487   :  { %1152 = vadd.xlane.f32.xlu1 %v1151_v40 }
 0x488   :  { %13019 = vst [vmem:[#allocation58_spill] sm:$0xff] %v8971_v60  ;;  %v8977_v25 = vpack.c.bf16 %v8971_v60, %v8968_v3  ;;  %v122_v60 = vmul.f32 0.7, %v8585_v8 }
 0x48a   :  { %13020 = vst [vmem:[#allocation59_spill] sm:$0xff] %v8977_v25  ;;  %6291 = vmatmul.mubr.msk.bf16.gmra.mxu1 %vm886_vm0, %v8977_v25 }
 0x48b   :  { %894 = vadd.xlane.f32.xlu1 %v893_v17  ;;  %1155 = vadd.xlane.f32.xlu0 %v1154_v50  ;;  %v208_v50 = vmul.f32 0.7, %v8571_v11 }
 0x48c   :  { %2403 = vmatprep.mubr.bf16.mxu1 %v12989_v5 }
 0x48f   :  { %897 = vadd.xlane.f32.xlu0 %v896_v43  ;;  %v9007_v43 = vadd.f32 %v8754_v20, %v208_v50  ;;  %v9020_v20 = vadd.f32 %v8770_v51, %v122_v60  ;;  %v9051_v50 = vld [vmem:[%s12688_s0 + $0xa0] sm:$0xff] }
 0x491   :  { %v794_v51 = vmul.f32 %v9020_v20, %v9020_v20 }
 0x493   :  { %v899_v60 = vsel %vm886_vm0, %v794_v51, 0.0 }
 0x49c   :  { %442 = vrot.lane.b32.xlu1 %v232_v42, %s7787_s26  ;;  %v209_v42 = vmul.f32 0.7, %v8566_v47 }
 0x49e   :  { %v9017_v11 = vadd.f32 %v8766_v41, %v209_v42 }
 0x4a2   :  { %v1141_v2 = vpop.xlane.xlu0 %1140 }
 0x4a3   :  { %v1260_v56 = vmul.f32 0.015625, %v1141_v2 }
 0x4a5   :  { %v1357_v40 = vadd.f32 1e-06, %v1260_v56  ;;  %444 = vrot.lane.b32.xlu0 %v233_v26, %s7787_s26 }
 0x4a6   :  { %v1144_v31 = vpop.xlane.xlu1 %1143  ;;  %v9054_v42 = vpop.permute.xlu0 %434 }
 0x4a7   :  { %6680 = vrsqrt.f32 %v1357_v40  ;;  %v1261_v57 = vmul.f32 0.015625, %v1144_v31  ;;  %v123_v40 = vmul.f32 0.7, %v8578_v59  ;;  %v880_v31 = vmul.f32 %v9007_v43, %v9007_v43 }
 0x4a9   :  { %v1358_v17 = vadd.f32 1e-06, %v1261_v57  ;;  %v9033_v59 = vadd.f32 %v8774_v4, %v123_v40  ;;  %v1157_v41 = vsel %vm886_vm0, %v880_v31, 0.0 }
 0x4ab   :  { %6682 = vrsqrt.f32 %v1358_v17  ;;  %v795_v4 = vmul.f32 %v9033_v59, %v9033_v59 }
 0x4ad   :  { %v902_v17 = vsel %vm886_vm0, %v795_v4, 0.0 }
 0x4b4   :  { %v6681_v52 = vpop.eup %6680 }
 0x4b5   :  { %v1549_v2 = vmul.f32 %v6681_v52, %v8829_v44  ;;  %v881_v44 = vmul.f32 %v9017_v11, %v9017_v11  ;;  %v234_v52 = vmul.f32 0.1, %v9051_v50 }
 0x4b7   :  { %v9023_v47 = vmul.f32 %v8843_v61, %v1549_v2  ;;  %v1160_v57 = vsel %vm886_vm0, %v881_v44, 0.0  ;;  %v9057_v2 = vpop.permute.xlu1 %436 }
 0x4b8   :  { %v6683_v56 = vpop.eup %6682 }
 0x4b9   :  { %v1550_v26 = vmul.f32 %v6683_v56, %v8833_v9  ;;  %13021 = vst [vmem:[#allocation60_spill] sm:$0xff] %v9023_v47 }
 0x4bb   :  { %v9026_v8 = vmul.f32 %v8843_v61, %v1550_v26  ;;  %v9062_v26 = vld [vmem:[%s12688_s0 + $0xa8] sm:$0xff] }
 0x4bd   :  { %13022 = vst [vmem:[#allocation61_spill] sm:$0xff] %v9026_v8  ;;  %v9030_v9 = vpack.c.bf16 %v9026_v8, %v9023_v47 }
 0x4bf   :  { %13023 = vst [vmem:[#allocation62_spill] sm:$0xff] %v9030_v9  ;;  %6292 = vmatmul.mubr.msk.bf16.gmra.mxu1 %vm886_vm0, %v9030_v9 }
 0x4c0   :  { %1158 = vadd.xlane.f32.xlu1 %v1157_v41  ;;  %2413 = vmatprep.mubr.bf16.mxu1 %v12989_v5  ;;  %v235_v41 = vmul.f32 0.1, %v9062_v26 }
 0x4c4   :  { %900 = vadd.xlane.f32.xlu1 %v899_v60  ;;  %1161 = vadd.xlane.f32.xlu0 %v1160_v57 }
 0x4c8   :  { %903 = vadd.xlane.f32.xlu0 %v902_v17 }
 0x4d5   :  { %446 = vrot.lane.b32.xlu1 %v234_v52, %s7787_s26 }
 0x4d7   :  { %v1147_v56 = vpop.xlane.xlu0 %1146 }
 0x4d8   :  { %v1262_v40 = vmul.f32 0.015625, %v1147_v56  ;;  %v210_v56 = vmul.f32 0.7, %v8634_v1 }
 0x4da   :  { %v1359_v31 = vadd.f32 1e-06, %v1262_v40 }
 0x4db   :  { %v1150_v51 = vpop.xlane.xlu1 %1149  ;;  %v889_v44 = vpop.xlane.xlu0 %888 }
 0x4dc   :  { %6684 = vrsqrt.f32 %v1359_v31  ;;  %v1263_v60 = vmul.f32 0.015625, %v1150_v51  ;;  %v1176_v57 = vmul.f32 0.015625, %v889_v44  ;;  %v9070_v51 = vadd.f32 %v8815_v16, %v210_v56 }
 0x4dd   :  { %v124_v44 = vmul.f32 0.7, %v8650_v32 }
 0x4de   :  { %v1360_v4 = vadd.f32 1e-06, %v1263_v60  ;;  %v1273_v17 = vadd.f32 1e-06, %v1176_v57  ;;  %448 = vrot.lane.b32.xlu0 %v235_v41, %s7787_s26  ;;  %v211_v41 = vmul.f32 0.7, %v8629_v55  ;;  %v882_v55 = vmul.f32 %v9070_v51, %v9070_v51 }
 0x4df   :  { %v892_v52 = vpop.xlane.xlu0 %891 }
 0x4e0   :  { %6686 = vrsqrt.f32 %v1360_v4  ;;  %v1177_v8 = vmul.f32 0.015625, %v892_v52  ;;  %v9090_v32 = vadd.f32 %v8819_v37, %v211_v41  ;;  %v9127_v52 = vld [vmem:[%s12688_s0 + $0xb0] sm:$0xff] }
 0x4e1   :  { %6688 = vrsqrt.f32 %v1273_v17  ;;  %v236_v56 = vmul.f32 0.1, %v9127_v52 }
 0x4e2   :  { %v1274_v47 = vadd.f32 1e-06, %v1177_v8  ;;  %v9093_v8 = vadd.f32 %v8823_v0, %v124_v44  ;;  %v1163_v0 = vsel %vm886_vm0, %v882_v55, 0.0  ;;  %v9138_v44 = vld [vmem:[%s12688_s0 + $0xb8] sm:$0xff] }
 0x4e4   :  { %6690 = vrsqrt.f32 %v1274_v47 }
 0x4e9   :  { %v6685_v3 = vpop.eup %6684 }
 0x4ea   :  { %v1551_v40 = vmul.f32 %v6685_v3, %v8886_v54 }
 0x4ec   :  { %v9075_v60 = vmul.f32 %v8843_v61, %v1551_v40  ;;  %v9130_v40 = vpop.permute.xlu1 %438 }
 0x4ed   :  { %v6687_v9 = vpop.eup %6686 }
 0x4ee   :  { %v6689_v25 = vpop.eup %6688  ;;  %v1552_v31 = vmul.f32 %v6687_v9, %v8890_v38  ;;  %13024 = vst [vmem:[#allocation63_spill] sm:$0xff] %v9075_v60  ;;  %v125_v38 = vmul.f32 0.7, %v8643_v13  ;;  %v883_v9 = vmul.f32 %v9090_v32, %v9090_v32 }
 0x4ef   :  { %v1465_v1 = vmul.f32 %v6689_v25, %v8893_v35 }
 0x4f0   :  { %v9078_v47 = vmul.f32 %v8843_v61, %v1552_v31  ;;  %v9109_v37 = vadd.f32 %v8825_v15, %v125_v38  ;;  %v1166_v4 = vsel %vm886_vm0, %v883_v9, 0.0  ;;  %v9133_v31 = vpop.permute.xlu0 %440 }
 0x4f1   :  { %v6691_v54 = vpop.eup %6690  ;;  %v9098_v35 = vmul.f32 %v8843_v61, %v1465_v1 }
 0x4f2   :  { %13025 = vst [vmem:[#allocation64_spill] sm:$0xff] %v9078_v47  ;;  %v9083_v3 = vpack.c.bf16 %v9078_v47, %v9075_v60  ;;  %v1466_v16 = vmul.f32 %v6691_v54, %v8901_v62  ;;  %v796_v62 = vmul.f32 %v9093_v8, %v9093_v8  ;;  %v797_v15 = vmul.f32 %v9109_v37, %v9109_v37 }
 0x4f3   :  { %13027 = vst [vmem:[#allocation66_spill] sm:$0xff] %v9098_v35 }
 0x4f4   :  { %13026 = vst [vmem:[#allocation65_spill] sm:$0xff] %v9083_v3  ;;  %6293 = vmatmul.mubr.msk.bf16.gmra.mxu1 %vm886_vm0, %v9083_v3  ;;  %v9101_v25 = vmul.f32 %v8843_v61, %v1466_v16  ;;  %v905_v57 = vsel %vm886_vm0, %v796_v62, 0.0  ;;  %v908_v17 = vsel %vm886_vm0, %v797_v15, 0.0  ;;  %v237_v16 = vmul.f32 0.1, %v9138_v44 }
 0x4f5   :  { %2423 = vmatprep.mubr.bf16.mxu1 %v12989_v5 }
 0x4f6   :  { %13028 = vst [vmem:[#allocation67_spill] sm:$0xff] %v9101_v25  ;;  %v9106_v13 = vpack.c.bf16 %v9101_v25, %v9098_v35  ;;  %v140_v35 = vmul.f32 0.7, %v9127_v52 }
 0x4f8   :  { %6250 = vmatmul.mubr.msk.bf16.vlgmr.msra.gmra.mxu0 %vm886_vm0, %v9106_v13 }
 0x4f9   :  { %1164 = vadd.xlane.f32.xlu1 %v1163_v0  ;;  %1993 = vmatprep.mubr.bf16.mxu0 %v12989_v5 }
 0x4fd   :  { %906 = vadd.xlane.f32.xlu1 %v905_v57  ;;  %1167 = vadd.xlane.f32.xlu0 %v1166_v4 }
 0x501   :  { %909 = vadd.xlane.f32.xlu0 %v908_v17 }
 0x50e   :  { %450 = vrot.lane.b32.xlu1 %v236_v56, %s7787_s26 }
 0x510   :  { %v1153_v41 = vpop.xlane.xlu1 %1152 }
 0x511   :  { %v1264_v1 = vmul.f32 0.015625, %v1153_v41  ;;  %v212_v41 = vmul.f32 0.7, %v8699_v63 }
 0x513   :  { %v1361_v54 = vadd.f32 1e-06, %v1264_v1 }
 0x514   :  { %v895_v38 = vpop.xlane.xlu1 %894  ;;  %v1156_v55 = vpop.xlane.xlu0 %1155 }
 0x515   :  { %v1178_v0 = vmul.f32 0.015625, %v895_v38  ;;  %v1265_v62 = vmul.f32 0.015625, %v1156_v55  ;;  %6692 = vrsqrt.f32 %v1361_v54  ;;  %v9145_v38 = vadd.f32 %v8873_v10, %v212_v41 }
 0x516   :  { %v126_v55 = vmul.f32 0.7, %v8715_v12  ;;  %v127_v10 = vmul.f32 0.7, %v8708_v33 }
 0x517   :  { %v1275_v9 = vadd.f32 1e-06, %v1178_v0  ;;  %v1362_v57 = vadd.f32 1e-06, %v1265_v62  ;;  %452 = vrot.lane.b32.xlu0 %v237_v16, %s7787_s26  ;;  %v213_v16 = vmul.f32 0.7, %v8694_v27  ;;  %v884_v27 = vmul.f32 %v9145_v38, %v9145_v38 }
 0x518   :  { %v898_v4 = vpop.xlane.xlu0 %897 }
 0x519   :  { %6694 = vrsqrt.f32 %v1275_v9  ;;  %v1179_v15 = vmul.f32 0.015625, %v898_v4  ;;  %v9166_v12 = vadd.f32 %v8877_v46, %v213_v16  ;;  %v9185_v46 = vadd.f32 %v8881_v6, %v127_v10 }
 0x51a   :  { %6696 = vrsqrt.f32 %v1362_v57 }
 0x51b   :  { %v1276_v17 = vadd.f32 1e-06, %v1179_v15  ;;  %v885_v57 = vmul.f32 %v9166_v12, %v9166_v12  ;;  %v799_v6 = vmul.f32 %v9185_v46, %v9185_v46 }
 0x51d   :  { %6698 = vrsqrt.f32 %v1276_v17  ;;  %v1172_v15 = vsel %vm886_vm0, %v885_v57, 0.0  ;;  %v914_v17 = vsel %vm886_vm0, %v799_v6, 0.0  ;;  %v6582_v57 = vld [vmem:[%s12689_s1 + $0x6c] ss:$16 sps:$4 sm:$0xff]   ;;  %v6580_v6 = vld [vmem:[%s12689_s1 + $0x68] ss:$16 sps:$4 sm:$0xff]  }
 0x51e   :  { %2472 = vmatprep.subr.bf16.mxu1 %v6582_v57  ;;  %v128_v57 = vmul.f32 0.7, %v8764_v45 }
 0x51f   :  { %2473 = vmatpush1.bf16.msra.mxu1 %v6580_v6 }
 0x522   :  { %v6693_v56 = vpop.eup %6692 }
 0x523   :  { %v1553_v47 = vmul.f32 %v6693_v56, %v8946_v34  ;;  %v9203_v56 = vld [vmem:[%s12688_s0 + $0xc0] sm:$0xff] }
 0x524   :  { %v238_v41 = vmul.f32 0.1, %v9203_v56 }
 0x525   :  { %v9152_v9 = vmul.f32 %v8843_v61, %v1553_v47 }
 0x526   :  { %v6695_v1 = vpop.eup %6694 }
 0x527   :  { %v6697_v60 = vpop.eup %6696  ;;  %v1467_v0 = vmul.f32 %v6695_v1, %v8951_v14  ;;  %13029 = vst [vmem:[#allocation68_spill] sm:$0xff] %v9152_v9  ;;  %v9169_v14 = vadd.f32 %v8879_v7, %v126_v55  ;;  %v1169_v7 = vsel %vm886_vm0, %v884_v27, 0.0  ;;  %v9206_v1 = vpop.permute.xlu1 %442  ;;  %v9214_v55 = vld [vmem:[%s12688_s0 + $0xc8] sm:$0xff] }
 0x528   :  { %v1554_v54 = vmul.f32 %v6697_v60, %v8956_v39 }
 0x529   :  { %v9172_v60 = vmul.f32 %v8843_v61, %v1467_v0  ;;  %v798_v47 = vmul.f32 %v9169_v14, %v9169_v14 }
 0x52a   :  { %v6699_v62 = vpop.eup %6698  ;;  %v9155_v63 = vmul.f32 %v8843_v61, %v1554_v54  ;;  %v9209_v54 = vpop.permute.xlu0 %444 }
 0x52b   :  { %v1468_v34 = vmul.f32 %v6699_v62, %v8965_v19  ;;  %13032 = vst [vmem:[#allocation71_spill] sm:$0xff] %v9172_v60  ;;  %v911_v4 = vsel %vm886_vm0, %v798_v47, 0.0 }
 0x52c   :  { %13030 = vst [vmem:[#allocation69_spill] sm:$0xff] %v9155_v63  ;;  %v9161_v39 = vpack.c.bf16 %v9155_v63, %v9152_v9  ;;  %v130_v9 = vmul.f32 0.7, %v8813_v58 }
 0x52d   :  { %v9175_v19 = vmul.f32 %v8843_v61, %v1468_v34  ;;  %v239_v34 = vmul.f32 0.1, %v9214_v55 }
 0x52e   :  { %13031 = vst [vmem:[#allocation70_spill] sm:$0xff] %v9161_v39  ;;  %6294 = vmatmul.mubr.msk.bf16.gmra.mxu1 %vm886_vm0, %v9161_v39 }
 0x52f   :  { %13033 = vst [vmem:[#allocation72_spill] sm:$0xff] %v9175_v19  ;;  %v9181_v33 = vpack.c.bf16 %v9175_v19, %v9172_v60  ;;  %2433 = vmatprep.mubr.bf16.mxu1 %v12989_v5  ;;  %v139_v60 = vmul.f32 0.7, %v9062_v26 }
 0x531   :  { %6251 = vmatmul.mubr.msk.bf16.gmra.mxu0 %vm886_vm0, %v9181_v33 }
 0x532   :  { %1170 = vadd.xlane.f32.xlu1 %v1169_v7  ;;  %2003 = vmatprep.mubr.bf16.mxu0 %v12989_v5 }
 0x536   :  { %912 = vadd.xlane.f32.xlu1 %v911_v4  ;;  %1173 = vadd.xlane.f32.xlu0 %v1172_v15 }
 0x53a   :  { %915 = vadd.xlane.f32.xlu0 %v914_v17 }
 0x547   :  { %454 = vrot.lane.b32.xlu1 %v238_v41, %s7787_s26 }
 0x549   :  { %v1159_v16 = vpop.xlane.xlu1 %1158 }
 0x54a   :  { %v1266_v0 = vmul.f32 0.015625, %v1159_v16  ;;  %v6585_v16 = vld [vmem:[%s12689_s1 + $0x4c] ss:$16 sps:$4 sm:$0xff]  }
 0x54b   :  { %2474 = vmatprep.subr.bf16.mxu1 %v6585_v16  ;;  %v129_v16 = vmul.f32 0.7, %v8759_v49 }
 0x54c   :  { %v1363_v62 = vadd.f32 1e-06, %v1266_v0 }
 0x54d   :  { %v901_v10 = vpop.xlane.xlu1 %900  ;;  %v1162_v27 = vpop.xlane.xlu0 %1161 }
 0x54e   :  { %v1180_v7 = vmul.f32 0.015625, %v901_v10  ;;  %v1267_v47 = vmul.f32 0.015625, %v1162_v27  ;;  %6700 = vrsqrt.f32 %v1363_v62  ;;  %v6583_v62 = vld [vmem:[%s12689_s1 + $0x48] ss:$16 sps:$4 sm:$0xff]   ;;  %v6591_v27 = vld [vmem:[%s12689_s1 + $0xc] ss:$16 sps:$4 sm:$0xff]  }
 0x54f   :  { %2475 = vmatpush1.bf16.msra.mxu1 %v6583_v62  ;;  %v6586_v10 = vld [vmem:[%s12689_s1 + $0x28] ss:$16 sps:$4 sm:$0xff]  }
 0x550   :  { %v1277_v4 = vadd.f32 1e-06, %v1180_v7  ;;  %v1364_v15 = vadd.f32 1e-06, %v1267_v47  ;;  %456 = vrot.lane.b32.xlu0 %v239_v34, %s7787_s26  ;;  %v6588_v34 = vld [vmem:[%s12689_s1 + $0x2c] ss:$16 sps:$4 sm:$0xff]  }
 0x551   :  { %v904_v17 = vpop.xlane.xlu0 %903  ;;  %2476 = vmatprep.subr.bf16.mxu1 %v6588_v34  ;;  %v6589_v47 = vld [vmem:[%s12689_s1 + $0x8] ss:$16 sps:$4 sm:$0xff]  }
 0x552   :  { %6702 = vrsqrt.f32 %v1277_v4  ;;  %v1181_v41 = vmul.f32 0.015625, %v904_v17 }
 0x553   :  { %6704 = vrsqrt.f32 %v1364_v15  ;;  %2477 = vmatpush1.bf16.msra.mxu1 %v6586_v10 }
 0x554   :  { %v1278_v0 = vadd.f32 1e-06, %v1181_v41  ;;  %2478 = vmatprep.subr.bf16.mxu1 %v6591_v27  ;;  %v9246_v41 = vadd.f32 %v8939_v24, %v128_v57  ;;  %v9262_v24 = vadd.f32 %v8942_v28, %v129_v16 }
 0x556   :  { %6706 = vrsqrt.f32 %v1278_v0  ;;  %v801_v27 = vmul.f32 %v9262_v24, %v9262_v24 }
 0x557   :  { %2479 = vmatpush1.bf16.msra.mxu1 %v6589_v47  ;;  %v9289_v47 = vld [vmem:[%s12688_s0 + $0xd0] sm:$0xff] }
 0x558   :  { %v240_v57 = vmul.f32 0.1, %v9289_v47 }
 0x55b   :  { %v6701_v7 = vpop.eup %6700 }
 0x55c   :  { %v1555_v15 = vmul.f32 %v6701_v7, %v9007_v43  ;;  %v920_v7 = vsel %vm886_vm0, %v801_v27, 0.0 }
 0x55e   :  { %v9251_v34 = vmul.f32 %v8843_v61, %v1555_v15  ;;  %v9298_v15 = vld [vmem:[%s12688_s0 + $0xd8] sm:$0xff] }
 0x55f   :  { %v6703_v4 = vpop.eup %6702 }
 0x560   :  { %v6705_v6 = vpop.eup %6704  ;;  %v1469_v0 = vmul.f32 %v6703_v4, %v9020_v20  ;;  %13034 = vst [vmem:[#allocation73_spill] sm:$0xff] %v9251_v34  ;;  %v800_v20 = vmul.f32 %v9246_v41, %v9246_v41  ;;  %v9293_v4 = vpop.permute.xlu1 %446 }
 0x561   :  { %v1556_v17 = vmul.f32 %v6705_v6, %v9017_v11  ;;  %v241_v6 = vmul.f32 0.1, %v9298_v15 }
 0x562   :  { %v9265_v49 = vmul.f32 %v8843_v61, %v1469_v0  ;;  %v917_v28 = vsel %vm886_vm0, %v800_v20, 0.0 }
 0x563   :  { %v6707_v62 = vpop.eup %6706  ;;  %v9254_v45 = vmul.f32 %v8843_v61, %v1556_v17  ;;  %v9301_v17 = vpop.permute.xlu0 %448 }
 0x564   :  { %v1470_v10 = vmul.f32 %v6707_v62, %v9033_v59  ;;  %13037 = vst [vmem:[#allocation76_spill] sm:$0xff] %v9265_v49 }
 0x565   :  { %13035 = vst [vmem:[#allocation74_spill] sm:$0xff] %v9254_v45  ;;  %v9259_v43 = vpack.c.bf16 %v9254_v45, %v9251_v34 }
 0x566   :  { %v9268_v11 = vmul.f32 %v8843_v61, %v1470_v10 }
 0x567   :  { %13036 = vst [vmem:[#allocation75_spill] sm:$0xff] %v9259_v43  ;;  %6295 = vmatmul.mubr.msk.bf16.gmra.mxu1 %vm886_vm0, %v9259_v43 }
 0x568   :  { %13038 = vst [vmem:[#allocation77_spill] sm:$0xff] %v9268_v11  ;;  %v9276_v59 = vpack.c.bf16 %v9268_v11, %v9265_v49  ;;  %2443 = vmatprep.mubr.bf16.mxu1 %v12989_v5  ;;  %v138_v49 = vmul.f32 0.7, %v9051_v50 }
 0x56a   :  { %6252 = vmatmul.mubr.msk.bf16.gmra.mxu0 %vm886_vm0, %v9276_v59  ;;  %v9562_v19 = vadd.f32 %v9293_v4, %v138_v49 }
 0x56b   :  { %918 = vadd.xlane.f32.xlu1 %v917_v28  ;;  %2013 = vmatprep.mubr.bf16.mxu0 %v12989_v5 }
 0x56c   :  { %v810_v25 = vmul.f32 %v9562_v19, %v9562_v19 }
 0x56f   :  { %921 = vadd.xlane.f32.xlu0 %v920_v7 }
 0x57c   :  { %458 = vrot.lane.b32.xlu1 %v240_v57, %s7787_s26 }
 0x582   :  { %v1165_v16 = vpop.xlane.xlu1 %1164 }
 0x583   :  { %v1268_v0 = vmul.f32 0.015625, %v1165_v16  ;;  %v9306_v16 = vadd.f32 %v8994_v29, %v130_v9 }
 0x585   :  { %v1365_v62 = vadd.f32 1e-06, %v1268_v0  ;;  %460 = vrot.lane.b32.xlu0 %v241_v6, %s7787_s26  ;;  %v131_v6 = vmul.f32 0.7, %v8808_v53 }
 0x586   :  { %v907_v10 = vpop.xlane.xlu1 %906  ;;  %v1168_v20 = vpop.xlane.xlu0 %1167 }
 0x587   :  { %v1182_v28 = vmul.f32 0.015625, %v907_v10  ;;  %v1269_v27 = vmul.f32 0.015625, %v1168_v20  ;;  %6708 = vrsqrt.f32 %v1365_v62 }
 0x589   :  { %v1279_v7 = vadd.f32 1e-06, %v1182_v28  ;;  %v1366_v57 = vadd.f32 1e-06, %v1269_v27  ;;  %v9312_v28 = vadd.f32 %v9002_v48, %v131_v6  ;;  %v9351_v27 = vld [vmem:[%s12688_s0 + $0xe0] sm:$0xff] }
 0x58a   :  { %v910_v45 = vpop.xlane.xlu0 %909 }
 0x58b   :  { %6710 = vrsqrt.f32 %v1279_v7  ;;  %v1183_v34 = vmul.f32 0.015625, %v910_v45  ;;  %v803_v45 = vmul.f32 %v9312_v28, %v9312_v28  ;;  %v242_v7 = vmul.f32 0.1, %v9351_v27 }
 0x58c   :  { %6712 = vrsqrt.f32 %v1366_v57  ;;  %v9358_v57 = vld [vmem:[%s12688_s0 + $0xe8] sm:$0xff] }
 0x58d   :  { %v1280_v63 = vadd.f32 1e-06, %v1183_v34  ;;  %v243_v6 = vmul.f32 0.1, %v9358_v57 }
 0x58f   :  { %6714 = vrsqrt.f32 %v1280_v63  ;;  %v802_v63 = vmul.f32 %v9306_v16, %v9306_v16 }
 0x591   :  { %v923_v48 = vsel %vm886_vm0, %v802_v63, 0.0 }
 0x594   :  { %v6709_v11 = vpop.eup %6708 }
 0x595   :  { %v1557_v10 = vmul.f32 %v6709_v11, %v9070_v51  ;;  %v926_v11 = vsel %vm886_vm0, %v803_v45, 0.0 }
 0x597   :  { %v9318_v29 = vmul.f32 %v8843_v61, %v1557_v10  ;;  %v9364_v10 = vpop.permute.xlu0 %452 }
 0x598   :  { %v6711_v0 = vpop.eup %6710 }
 0x599   :  { %v6713_v62 = vpop.eup %6712  ;;  %v1471_v58 = vmul.f32 %v6711_v0, %v9093_v8  ;;  %13039 = vst [vmem:[#allocation78_spill] sm:$0xff] %v9318_v29  ;;  %v9361_v0 = vpop.permute.xlu1 %450 }
 0x59a   :  { %v1558_v20 = vmul.f32 %v6713_v62, %v9090_v32 }
 0x59b   :  { %v9330_v9 = vmul.f32 %v8843_v61, %v1471_v58 }
 0x59c   :  { %v6715_v34 = vpop.eup %6714  ;;  %v9321_v53 = vmul.f32 %v8843_v61, %v1558_v20 }
 0x59d   :  { %v1472_v51 = vmul.f32 %v6715_v34, %v9109_v37  ;;  %13042 = vst [vmem:[#allocation81_spill] sm:$0xff] %v9330_v9 }
 0x59e   :  { %13040 = vst [vmem:[#allocation79_spill] sm:$0xff] %v9321_v53  ;;  %v9326_v32 = vpack.c.bf16 %v9321_v53, %v9318_v29 }
 0x59f   :  { %v9333_v8 = vmul.f32 %v8843_v61, %v1472_v51 }
 0x5a0   :  { %13041 = vst [vmem:[#allocation80_spill] sm:$0xff] %v9326_v32  ;;  %6296 = vmatmul.mubr.msk.bf16.gmra.mxu1 %vm886_vm0, %v9326_v32  ;;  %924 = vadd.xlane.f32.xlu1 %v923_v48  ;;  %v141_v32 = vmul.f32 0.7, %v9138_v44 }
 0x5a1   :  { %13043 = vst [vmem:[#allocation82_spill] sm:$0xff] %v9333_v8  ;;  %v9341_v37 = vpack.c.bf16 %v9333_v8, %v9330_v9  ;;  %2453 = vmatprep.mubr.bf16.mxu1 %v12989_v5  ;;  %v132_v8 = vmul.f32 0.7, %v8869_v30 }
 0x5a2   :  { %v9622_v43 = vadd.f32 %v9364_v10, %v141_v32 }
 0x5a3   :  { %6253 = vmatmul.mubr.msk.bf16.gmra.mxu0 %vm886_vm0, %v9341_v37 }
 0x5a4   :  { %927 = vadd.xlane.f32.xlu0 %v926_v11  ;;  %2023 = vmatprep.mubr.bf16.mxu0 %v12989_v5  ;;  %v813_v52 = vmul.f32 %v9622_v43, %v9622_v43 }
 0x5a6   :  { %v956_v32 = vsel %vm886_vm0, %v813_v52, 0.0 }
 0x5b1   :  { %462 = vrot.lane.b32.xlu1 %v242_v7, %s7787_s26 }
 0x5ba   :  { %464 = vrot.lane.b32.xlu0 %v243_v6, %s7787_s26  ;;  %v9368_v6 = vadd.f32 %v9054_v42, %v132_v8 }
 0x5bb   :  { %v1171_v62 = vpop.xlane.xlu1 %1170 }
 0x5bc   :  { %v1270_v20 = vmul.f32 0.015625, %v1171_v62  ;;  %v13044_v62 = vld [vmem:[#allocation53_spill] sm:$0xff] }
 0x5be   :  { %v1367_v63 = vadd.f32 1e-06, %v1270_v20  ;;  %v133_v20 = vmul.f32 0.7, %v13044_v62 }
 0x5bf   :  { %v913_v58 = vpop.xlane.xlu1 %912  ;;  %v1174_v34 = vpop.xlane.xlu0 %1173 }
 0x5c0   :  { %v1184_v51 = vmul.f32 0.015625, %v913_v58  ;;  %v1271_v48 = vmul.f32 0.015625, %v1174_v34  ;;  %6716 = vrsqrt.f32 %v1367_v63  ;;  %v9372_v58 = vadd.f32 %v9057_v2, %v133_v20  ;;  %v9420_v20 = vld [vmem:[%s12688_s0 + $0xf8] sm:$0xff] }
 0x5c1   :  { %v804_v63 = vmul.f32 %v9368_v6, %v9368_v6 }
 0x5c2   :  { %v1281_v45 = vadd.f32 1e-06, %v1184_v51  ;;  %v1368_v11 = vadd.f32 1e-06, %v1271_v48  ;;  %v805_v42 = vmul.f32 %v9372_v58, %v9372_v58 }
 0x5c3   :  { %v916_v7 = vpop.xlane.xlu0 %915  ;;  %v929_v30 = vsel %vm886_vm0, %v804_v63, 0.0  ;;  %v245_v63 = vmul.f32 0.1, %v9420_v20 }
 0x5c4   :  { %6718 = vrsqrt.f32 %v1281_v45  ;;  %v1185_v53 = vmul.f32 0.015625, %v916_v7 }
 0x5c5   :  { %6720 = vrsqrt.f32 %v1368_v11 }
 0x5c6   :  { %v1282_v29 = vadd.f32 1e-06, %v1185_v53 }
 0x5c8   :  { %6722 = vrsqrt.f32 %v1282_v29 }
 0x5cd   :  { %v6717_v9 = vpop.eup %6716 }
 0x5ce   :  { %v1559_v51 = vmul.f32 %v6717_v9, %v9145_v38  ;;  %v932_v9 = vsel %vm886_vm0, %v805_v42, 0.0 }
 0x5d0   :  { %v9383_v2 = vmul.f32 %v8843_v61, %v1559_v51 }
 0x5d1   :  { %v6719_v34 = vpop.eup %6718 }
 0x5d2   :  { %v6721_v48 = vpop.eup %6720  ;;  %v1473_v29 = vmul.f32 %v6719_v34, %v9169_v14  ;;  %13045 = vst [vmem:[#allocation53_spill] sm:$0xff] %v9383_v2  ;;  %v9432_v34 = vpop.permute.xlu0 %456 }
 0x5d3   :  { %v1560_v53 = vmul.f32 %v6721_v48, %v9166_v12  ;;  %v9434_v48 = vpop.f32.mrf.mxu1 }
 0x5d4   :  { %v9395_v11 = vmul.f32 %v8843_v61, %v1473_v29  ;;  %13050 = vst [vmem:[#allocation87_spill] sm:$0xff] %v9434_v48 }
 0x5d5   :  { %v6723_v8 = vpop.eup %6722  ;;  %930 = vadd.xlane.f32.xlu1 %v929_v30  ;;  %v9386_v45 = vmul.f32 %v8843_v61, %v1560_v53  ;;  %v9436_v42 = vpop.f32.mrf.mxu1 }
 0x5d6   :  { %v1474_v38 = vmul.f32 %v6723_v8, %v9185_v46  ;;  %13048 = vst [vmem:[#allocation85_spill] sm:$0xff] %v9395_v11  ;;  %v9410_v46 = vld [vmem:[%s12688_s0 + $0xf0] sm:$0xff]  ;;  %13051 = vst [vmem:[#allocation88_spill] sm:$0xff] %v9436_v42 }
 0x5d7   :  { %13046 = vst [vmem:[#allocation83_spill] sm:$0xff] %v9386_v45  ;;  %v9391_v12 = vpack.c.bf16 %v9386_v45, %v9383_v2  ;;  %v244_v62 = vmul.f32 0.1, %v9410_v46  ;;  %v9441_v8 = vpop.f32.mrf.mxu1  ;;  %v136_v2 = vmul.f32 0.7, %v8990_v23 }
 0x5d8   :  { %v9398_v14 = vmul.f32 %v8843_v61, %v1474_v38  ;;  %13052 = vst [vmem:[#allocation89_spill] sm:$0xff] %v9441_v8  ;;  %v134_v38 = vmul.f32 0.7, %v8929_v36 }
 0x5d9   :  { %13047 = vst [vmem:[#allocation84_spill] sm:$0xff] %v9391_v12  ;;  %6297 = vmatmul.mubr.msk.bf16.gmra.mxu1 %vm886_vm0, %v9391_v12  ;;  %933 = vadd.xlane.f32.xlu0 %v932_v9  ;;  %v9444_v9 = vpop.f32.mrf.mxu1  ;;  %v9616_v12 = vadd.f32 %v9361_v0, %v140_v35 }
 0x5da   :  { %13049 = vst [vmem:[#allocation86_spill] sm:$0xff] %v9398_v14  ;;  %v1667_v7 = vpack.c.bf16 %v9398_v14, %v9395_v11  ;;  %2496 = vmatprep.mubr.bf16.mxu1 %v12989_v5  ;;  %13053 = vst [vmem:[#allocation90_spill] sm:$0xff] %v9444_v9 }
 0x5dc   :  { %6254 = vmatmul.mubr.msk.bf16.gmra.mxu0 %vm886_vm0, %v1667_v7 }
 0x5dd   :  { %2033 = vmatprep.mubr.bf16.mxu0 %v12989_v5 }
 0x5e1   :  { %6298 = vmatmul.mubr.msk.bf16.vlgmr.msra.gmra.mxu1 %vm886_vm0, %v9106_v13  ;;  %v9427_v13 = vpop.permute.xlu1 %454 }
 0x5e2   :  { %2506 = vmatprep.mubr.bf16.mxu1 %v12989_v5 }
 0x5e6   :  { %466 = vrot.lane.b32.xlu1 %v244_v62, %s7787_s26  ;;  %v9447_v62 = vadd.f32 %v9130_v40, %v134_v38 }
 0x5e8   :  { %v806_v36 = vmul.f32 %v9447_v62, %v9447_v62 }
 0x5e9   :  { %6299 = vmatmul.mubr.msk.bf16.gmra.mxu1 %vm886_vm0, %v9181_v33 }
 0x5ea   :  { %2516 = vmatprep.mubr.bf16.mxu1 %v12989_v5  ;;  %v935_v40 = vsel %vm886_vm0, %v806_v36, 0.0 }
 0x5ef   :  { %468 = vrot.lane.b32.xlu0 %v245_v63, %s7787_s26  ;;  %v135_v63 = vmul.f32 0.7, %v8936_v21 }
 0x5f1   :  { %6300 = vmatmul.mubr.msk.bf16.gmra.mxu1 %vm886_vm0, %v9276_v59 }
 0x5f2   :  { %2526 = vmatprep.mubr.bf16.mxu1 %v12989_v5 }
 0x5f4   :  { %v919_v51 = vpop.xlane.xlu1 %918 }
 0x5f5   :  { %v1186_v53 = vmul.f32 0.015625, %v919_v51  ;;  %v9455_v51 = vadd.f32 %v9133_v31, %v135_v63 }
 0x5f7   :  { %v1283_v33 = vadd.f32 1e-06, %v1186_v53  ;;  %v807_v21 = vmul.f32 %v9455_v51, %v9455_v51 }
 0x5f8   :  { %v922_v30 = vpop.xlane.xlu0 %921 }
 0x5f9   :  { %6724 = vrsqrt.f32 %v1283_v33  ;;  %6301 = vmatmul.mubr.msk.bf16.gmra.mxu1 %vm886_vm0, %v9341_v37  ;;  %v1187_v29 = vmul.f32 0.015625, %v922_v30  ;;  %v9452_v37 = vpop.f32.mrf.mxu1  ;;  %v938_v31 = vsel %vm886_vm0, %v807_v21, 0.0 }
 0x5fa   :  { %2536 = vmatprep.mubr.bf16.mxu1 %v12989_v5  ;;  %13054 = vst [vmem:[#allocation91_spill] sm:$0xff] %v9452_v37 }
 0x5fb   :  { %v1284_v59 = vadd.f32 1e-06, %v1187_v29  ;;  %v9459_v33 = vpop.f32.mrf.mxu1 }
 0x5fc   :  { %13055 = vst [vmem:[#allocation92_spill] sm:$0xff] %v9459_v33 }
 0x5fd   :  { %6726 = vrsqrt.f32 %v1284_v59  ;;  %v9466_v59 = vpop.f32.mrf.mxu1 }
 0x5fe   :  { %13056 = vst [vmem:[#allocation93_spill] sm:$0xff] %v9466_v59 }
 0x5ff   :  { %v9477_v45 = vpop.f32.mrf.mxu1 }
 0x600   :  { %13059 = vst [vmem:[#allocation96_spill] sm:$0xff] %v9477_v45 }
 0x601   :  { %6302 = vmatmul.mubr.msk.bf16.gmra.mxu1 %vm886_vm0, %v1667_v7 }
 0x602   :  { %2546 = vmatprep.mubr.bf16.mxu1 %v12989_v5 }
 0x606   :  { %v6725_v53 = vpop.eup %6724 }
 0x607   :  { %v1475_v7 = vmul.f32 %v6725_v53, %v9246_v41  ;;  %v9486_v41 = vld [vmem:[%s12688_s0 + $0x100] sm:$0xff] }
 0x609   :  { %v9470_v38 = vmul.f32 %v8843_v61, %v1475_v7  ;;  %v9499_v7 = vpop.permute.xlu0 %460 }
 0x60a   :  { %v6727_v30 = vpop.eup %6726  ;;  %936 = vadd.xlane.f32.xlu1 %v935_v40  ;;  %v9497_v40 = vpop.permute.xlu1 %458 }
 0x60b   :  { %v1476_v29 = vmul.f32 %v6727_v30, %v9262_v24  ;;  %13057 = vst [vmem:[#allocation94_spill] sm:$0xff] %v9470_v38  ;;  %v9493_v24 = vld [vmem:[%s12688_s0 + $0x108] sm:$0xff] }
 0x60c   :  { %v247_v53 = vmul.f32 0.1, %v9493_v24 }
 0x60d   :  { %v9473_v63 = vmul.f32 %v8843_v61, %v1476_v29  ;;  %v246_v61 = vmul.f32 0.1, %v9486_v41 }
 0x60e   :  { %939 = vadd.xlane.f32.xlu0 %v938_v31 }
 0x60f   :  { %13058 = vst [vmem:[#allocation95_spill] sm:$0xff] %v9473_v63  ;;  %v1668_v36 = vpack.c.bf16 %v9473_v63, %v9470_v38  ;;  %v9503_v63 = vadd.f32 %v9206_v1, %v136_v2  ;;  %v137_v38 = vmul.f32 0.7, %v8999_v18 }
 0x611   :  { %6255 = vmatmul.mubr.msk.bf16.gmra.mxu0 %vm886_vm0, %v1668_v36  ;;  %6303 = vmatmul.mubr.msk.bf16.gmra.mxu1 %vm886_vm0, %v1668_v36  ;;  %v808_v14 = vmul.f32 %v9503_v63, %v9503_v63 }
 0x612   :  { %2043 = vmatprep.mubr.bf16.mxu0 %v12989_v5  ;;  %2556 = vmatprep.mubr.bf16.mxu1 %v12989_v5 }
 0x61b   :  { %470 = vrot.lane.b32.xlu1 %v246_v61, %s7787_s26 }
 0x624   :  { %472 = vrot.lane.b32.xlu0 %v247_v53, %s7787_s26  ;;  %v9507_v53 = vadd.f32 %v9209_v54, %v137_v38 }
 0x626   :  { %v809_v23 = vmul.f32 %v9507_v53, %v9507_v53 }
 0x628   :  { %v944_v2 = vsel %vm886_vm0, %v809_v23, 0.0  ;;  %v9552_v23 = vld [vmem:[%s12688_s0 + $0x118] sm:$0xff] }
 0x629   :  { %v925_v21 = vpop.xlane.xlu1 %924 }
 0x62a   :  { %v1188_v30 = vmul.f32 0.015625, %v925_v21  ;;  %v9511_v21 = vpop.f32.mrf.mxu1 }
 0x62b   :  { %13060 = vst [vmem:[#allocation97_spill] sm:$0xff] %v9511_v21 }
 0x62c   :  { %v1285_v29 = vadd.f32 1e-06, %v1188_v30 }
 0x62d   :  { %v928_v31 = vpop.xlane.xlu0 %927 }
 0x62e   :  { %6728 = vrsqrt.f32 %v1285_v29  ;;  %v1189_v36 = vmul.f32 0.015625, %v928_v31  ;;  %v941_v29 = vsel %vm886_vm0, %v808_v14, 0.0  ;;  %v9516_v31 = vpop.f32.mrf.mxu1  ;;  %v9526_v14 = vld [vmem:[%s12691_s3] ss:$0 sm:$0xff] }
 0x62f   :  { %13061 = vst [vmem:[#allocation98_spill] sm:$0xff] %v9516_v31 }
 0x630   :  { %v1286_v61 = vadd.f32 1e-06, %v1189_v36  ;;  %v9521_v38 = vpop.f32.mrf.mxu1 }
 0x631   :  { %13062 = vst [vmem:[#allocation99_spill] sm:$0xff] %v9521_v38 }
 0x632   :  { %6730 = vrsqrt.f32 %v1286_v61 }
 0x63b   :  { %v6729_v30 = vpop.eup %6728 }
 0x63c   :  { %v1477_v1 = vmul.f32 %v6729_v30, %v9306_v16  ;;  %v9545_v30 = vld [vmem:[%s12688_s0 + $0x110] sm:$0xff] }
 0x63e   :  { %v9529_v36 = vmul.f32 %v9526_v14, %v1477_v1  ;;  %v249_v1 = vmul.f32 0.1, %v9552_v23 }
 0x63f   :  { %942 = vadd.xlane.f32.xlu1 %v941_v29  ;;  %v6731_v18 = vpop.eup %6730  ;;  %v248_v29 = vmul.f32 0.1, %v9545_v30 }
 0x640   :  { %v1478_v54 = vmul.f32 %v6731_v18, %v9312_v28  ;;  %13063 = vst [vmem:[#allocation100_spill] sm:$0xff] %v9529_v36  ;;  %v9536_v28 = vpop.f32.mrf.mxu1  ;;  %v9556_v18 = vpop.permute.xlu1 %462 }
 0x641   :  { %13065 = vst [vmem:[#allocation102_spill] sm:$0xff] %v9536_v28 }
 0x642   :  { %v9532_v61 = vmul.f32 %v9526_v14, %v1478_v54 }
 0x643   :  { %945 = vadd.xlane.f32.xlu0 %v944_v2  ;;  %v9558_v2 = vpop.permute.xlu0 %464 }
 0x644   :  { %13064 = vst [vmem:[#allocation101_spill] sm:$0xff] %v9532_v61  ;;  %v1669_v16 = vpack.c.bf16 %v9532_v61, %v9529_v36 }
 0x646   :  { %6256 = vmatmul.mubr.msk.bf16.gmra.mxu0 %vm886_vm0, %v1669_v16  ;;  %6304 = vmatmul.mubr.msk.bf16.gmra.mxu1 %vm886_vm0, %v1669_v16 }
 0x647   :  { %2053 = vmatprep.mubr.bf16.mxu0 %v12989_v5  ;;  %2566 = vmatprep.mubr.bf16.mxu1 %v12989_v5 }
 0x650   :  { %474 = vrot.lane.b32.xlu1 %v248_v29, %s7787_s26 }
 0x659   :  { %476 = vrot.lane.b32.xlu0 %v249_v1, %s7787_s26  ;;  %v9566_v1 = vadd.f32 %v9301_v17, %v139_v60 }
 0x65b   :  { %v811_v50 = vmul.f32 %v9566_v1, %v9566_v1 }
 0x65d   :  { %v950_v4 = vsel %vm886_vm0, %v811_v50, 0.0 }
 0x65e   :  { %v931_v54 = vpop.xlane.xlu1 %930 }
 0x65f   :  { %v1190_v16 = vmul.f32 0.015625, %v931_v54  ;;  %v9570_v54 = vpop.f32.mrf.mxu1 }
 0x660   :  { %13066 = vst [vmem:[#allocation103_spill] sm:$0xff] %v9570_v54 }
 0x661   :  { %v1287_v61 = vadd.f32 1e-06, %v1190_v16 }
 0x662   :  { %v934_v36 = vpop.xlane.xlu0 %933 }
 0x663   :  { %6732 = vrsqrt.f32 %v1287_v61  ;;  %v1191_v11 = vmul.f32 0.015625, %v934_v36  ;;  %v947_v36 = vsel %vm886_vm0, %v810_v25, 0.0 }
 0x665   :  { %v1288_v29 = vadd.f32 1e-06, %v1191_v11  ;;  %v9575_v11 = vpop.f32.mrf.mxu1 }
 0x666   :  { %13067 = vst [vmem:[#allocation104_spill] sm:$0xff] %v9575_v11 }
 0x667   :  { %6734 = vrsqrt.f32 %v1288_v29  ;;  %v9580_v17 = vpop.f32.mrf.mxu1 }
 0x668   :  { %13068 = vst [vmem:[#allocation105_spill] sm:$0xff] %v9580_v17 }
 0x670   :  { %v6733_v16 = vpop.eup %6732 }
 0x671   :  { %v1479_v49 = vmul.f32 %v6733_v16, %v9368_v6  ;;  %v9599_v6 = vld [vmem:[%s12688_s0 + $0x120] sm:$0xff]  ;;  %v9606_v16 = vld [vmem:[%s12688_s0 + $0x128] sm:$0xff] }
 0x672   :  { %v251_v50 = vmul.f32 0.1, %v9606_v16 }
 0x673   :  { %v9583_v61 = vmul.f32 %v9526_v14, %v1479_v49  ;;  %v9610_v49 = vpop.permute.xlu1 %466 }
 0x674   :  { %948 = vadd.xlane.f32.xlu1 %v947_v36  ;;  %v6735_v26 = vpop.eup %6734  ;;  %v9590_v36 = vpop.f32.mrf.mxu1 }
 0x675   :  { %v1480_v60 = vmul.f32 %v6735_v26, %v9372_v58  ;;  %13069 = vst [vmem:[#allocation106_spill] sm:$0xff] %v9583_v61  ;;  %13071 = vst [vmem:[#allocation108_spill] sm:$0xff] %v9590_v36  ;;  %v250_v58 = vmul.f32 0.1, %v9599_v6  ;;  %v9612_v26 = vpop.permute.xlu0 %468 }
 0x677   :  { %v9586_v25 = vmul.f32 %v9526_v14, %v1480_v60 }
 0x678   :  { %951 = vadd.xlane.f32.xlu0 %v950_v4 }
 0x679   :  { %13070 = vst [vmem:[#allocation107_spill] sm:$0xff] %v9586_v25  ;;  %v1670_v29 = vpack.c.bf16 %v9586_v25, %v9583_v61 }
 0x67b   :  { %6257 = vmatmul.mubr.msk.bf16.gmra.mxu0 %vm886_vm0, %v1670_v29  ;;  %6305 = vmatmul.mubr.msk.bf16.gmra.mxu1 %vm886_vm0, %v1670_v29 }
 0x67c   :  { %2063 = vmatprep.mubr.bf16.mxu0 %v12989_v5  ;;  %2576 = vmatprep.mubr.bf16.mxu1 %v12989_v5 }
 0x685   :  { %478 = vrot.lane.b32.xlu1 %v250_v58, %s7787_s26 }
 0x68e   :  { %480 = vrot.lane.b32.xlu0 %v251_v50, %s7787_s26  ;;  %v9619_v50 = vpop.f32.mrf.mxu1 }
 0x68f   :  { %13072 = vst [vmem:[#allocation109_spill] sm:$0xff] %v9619_v50 }
 0x693   :  { %v937_v60 = vpop.xlane.xlu1 %936 }
 0x694   :  { %v1192_v4 = vmul.f32 0.015625, %v937_v60  ;;  %v812_v60 = vmul.f32 %v9616_v12, %v9616_v12 }
 0x696   :  { %v1289_v29 = vadd.f32 1e-06, %v1192_v4 }
 0x697   :  { %v940_v25 = vpop.xlane.xlu0 %939  ;;  %v9664_v52 = vpop.permute.xlu1 %470 }
 0x698   :  { %6736 = vrsqrt.f32 %v1289_v29  ;;  %v1193_v61 = vmul.f32 0.015625, %v940_v25  ;;  %v9626_v29 = vpop.f32.mrf.mxu1 }
 0x699   :  { %13073 = vst [vmem:[#allocation110_spill] sm:$0xff] %v9626_v29 }
 0x69a   :  { %v1290_v58 = vadd.f32 1e-06, %v1193_v61  ;;  %v953_v61 = vsel %vm886_vm0, %v812_v60, 0.0  ;;  %v9633_v25 = vpop.f32.mrf.mxu1 }
 0x69b   :  { %13074 = vst [vmem:[#allocation111_spill] sm:$0xff] %v9633_v25  ;;  %v143_v25 = vmul.f32 0.7, %v9214_v55 }
 0x69c   :  { %6738 = vrsqrt.f32 %v1290_v58  ;;  %v9644_v29 = vpop.f32.mrf.mxu1 }
 0x69d   :  { %13077 = vst [vmem:[#allocation114_spill] sm:$0xff] %v9644_v29  ;;  %v9676_v39 = vadd.f32 %v9432_v34, %v143_v25 }
 0x6a5   :  { %v6737_v4 = vpop.eup %6736 }
 0x6a6   :  { %v1481_v35 = vmul.f32 %v6737_v4, %v9447_v62  ;;  %v9653_v62 = vld [vmem:[%s12688_s0 + $0x130] sm:$0xff]  ;;  %v9660_v4 = vld [vmem:[%s12688_s0 + $0x138] sm:$0xff] }
 0x6a8   :  { %v9637_v10 = vmul.f32 %v9526_v14, %v1481_v35  ;;  %v9666_v35 = vpop.permute.xlu0 %472 }
 0x6a9   :  { %v6739_v0 = vpop.eup %6738  ;;  %954 = vadd.xlane.f32.xlu1 %v953_v61  ;;  %v253_v61 = vmul.f32 0.1, %v9660_v4 }
 0x6aa   :  { %v1482_v44 = vmul.f32 %v6739_v0, %v9455_v51  ;;  %13075 = vst [vmem:[#allocation112_spill] sm:$0xff] %v9637_v10  ;;  %v252_v51 = vmul.f32 0.1, %v9653_v62 }
 0x6ac   :  { %v9640_v58 = vmul.f32 %v9526_v14, %v1482_v44 }
 0x6ad   :  { %957 = vadd.xlane.f32.xlu0 %v956_v32 }
 0x6ae   :  { %13076 = vst [vmem:[#allocation113_spill] sm:$0xff] %v9640_v58  ;;  %v1671_v60 = vpack.c.bf16 %v9640_v58, %v9637_v10  ;;  %v142_v10 = vmul.f32 0.7, %v9203_v56  ;;  %v815_v56 = vmul.f32 %v9676_v39, %v9676_v39 }
 0x6b0   :  { %6258 = vmatmul.mubr.msk.bf16.gmra.mxu0 %vm886_vm0, %v1671_v60  ;;  %6306 = vmatmul.mubr.msk.bf16.gmra.mxu1 %vm886_vm0, %v1671_v60  ;;  %v9670_v29 = vadd.f32 %v9427_v13, %v142_v10  ;;  %v962_v34 = vsel %vm886_vm0, %v815_v56, 0.0 }
 0x6b1   :  { %2073 = vmatprep.mubr.bf16.mxu0 %v12989_v5  ;;  %2586 = vmatprep.mubr.bf16.mxu1 %v12989_v5 }
 0x6ba   :  { %482 = vrot.lane.b32.xlu1 %v252_v51, %s7787_s26 }
 0x6c3   :  { %484 = vrot.lane.b32.xlu0 %v253_v61, %s7787_s26  ;;  %v9673_v61 = vpop.f32.mrf.mxu1 }
 0x6c4   :  { %13078 = vst [vmem:[#allocation115_spill] sm:$0xff] %v9673_v61 }
 0x6c8   :  { %v943_v0 = vpop.xlane.xlu1 %942 }
 0x6c9   :  { %v1194_v44 = vmul.f32 0.015625, %v943_v0  ;;  %v814_v0 = vmul.f32 %v9670_v29, %v9670_v29 }
 0x6cb   :  { %v1291_v32 = vadd.f32 1e-06, %v1194_v44 }
 0x6cc   :  { %v946_v60 = vpop.xlane.xlu0 %945  ;;  %v9718_v56 = vpop.permute.xlu1 %474 }
 0x6cd   :  { %6740 = vrsqrt.f32 %v1291_v32  ;;  %v1195_v58 = vmul.f32 0.015625, %v946_v60  ;;  %v9680_v32 = vpop.f32.mrf.mxu1 }
 0x6ce   :  { %13079 = vst [vmem:[#allocation116_spill] sm:$0xff] %v9680_v32 }
 0x6cf   :  { %v1292_v51 = vadd.f32 1e-06, %v1195_v58  ;;  %v959_v58 = vsel %vm886_vm0, %v814_v0, 0.0  ;;  %v9687_v60 = vpop.f32.mrf.mxu1 }
 0x6d0   :  { %13080 = vst [vmem:[#allocation117_spill] sm:$0xff] %v9687_v60  ;;  %v145_v60 = vmul.f32 0.7, %v9298_v15 }
 0x6d1   :  { %6742 = vrsqrt.f32 %v1292_v51  ;;  %v9698_v32 = vpop.f32.mrf.mxu1 }
 0x6d2   :  { %13083 = vst [vmem:[#allocation120_spill] sm:$0xff] %v9698_v32  ;;  %v9730_v61 = vadd.f32 %v9499_v7, %v145_v60 }
 0x6da   :  { %v6741_v44 = vpop.eup %6740 }
 0x6db   :  { %v1483_v13 = vmul.f32 %v6741_v44, %v9503_v63  ;;  %v9707_v63 = vld [vmem:[%s12688_s0 + $0x140] sm:$0xff]  ;;  %v9714_v44 = vld [vmem:[%s12688_s0 + $0x148] sm:$0xff] }
 0x6dd   :  { %v9691_v25 = vmul.f32 %v9526_v14, %v1483_v13  ;;  %v9720_v13 = vpop.permute.xlu0 %476 }
 0x6de   :  { %v6743_v10 = vpop.eup %6742  ;;  %960 = vadd.xlane.f32.xlu1 %v959_v58  ;;  %v255_v58 = vmul.f32 0.1, %v9714_v44 }
 0x6df   :  { %v1484_v55 = vmul.f32 %v6743_v10, %v9507_v53  ;;  %13081 = vst [vmem:[#allocation118_spill] sm:$0xff] %v9691_v25  ;;  %v254_v53 = vmul.f32 0.1, %v9707_v63 }
 0x6e1   :  { %v9694_v51 = vmul.f32 %v9526_v14, %v1484_v55 }
 0x6e2   :  { %963 = vadd.xlane.f32.xlu0 %v962_v34 }
 0x6e3   :  { %13082 = vst [vmem:[#allocation119_spill] sm:$0xff] %v9694_v51  ;;  %v1672_v0 = vpack.c.bf16 %v9694_v51, %v9691_v25  ;;  %v144_v25 = vmul.f32 0.7, %v9289_v47  ;;  %v817_v47 = vmul.f32 %v9730_v61, %v9730_v61 }
 0x6e5   :  { %6259 = vmatmul.mubr.msk.bf16.gmra.mxu0 %vm886_vm0, %v1672_v0  ;;  %6307 = vmatmul.mubr.msk.bf16.gmra.mxu1 %vm886_vm0, %v1672_v0  ;;  %v9724_v32 = vadd.f32 %v9497_v40, %v144_v25  ;;  %v968_v7 = vsel %vm886_vm0, %v817_v47, 0.0 }
 0x6e6   :  { %2083 = vmatprep.mubr.bf16.mxu0 %v12989_v5  ;;  %2596 = vmatprep.mubr.bf16.mxu1 %v12989_v5 }
 0x6ef   :  { %486 = vrot.lane.b32.xlu1 %v254_v53, %s7787_s26 }
 0x6f8   :  { %488 = vrot.lane.b32.xlu0 %v255_v58, %s7787_s26  ;;  %v9727_v58 = vpop.f32.mrf.mxu1 }
 0x6f9   :  { %13084 = vst [vmem:[#allocation121_spill] sm:$0xff] %v9727_v58 }
 0x6fd   :  { %v949_v10 = vpop.xlane.xlu1 %948 }
 0x6fe   :  { %v1196_v55 = vmul.f32 0.015625, %v949_v10  ;;  %v816_v10 = vmul.f32 %v9724_v32, %v9724_v32 }
 0x700   :  { %v1293_v34 = vadd.f32 1e-06, %v1196_v55 }
 0x701   :  { %v952_v0 = vpop.xlane.xlu0 %951  ;;  %v9772_v47 = vpop.permute.xlu1 %478 }
 0x702   :  { %6744 = vrsqrt.f32 %v1293_v34  ;;  %v1197_v51 = vmul.f32 0.015625, %v952_v0  ;;  %v9734_v34 = vpop.f32.mrf.mxu1 }
 0x703   :  { %13085 = vst [vmem:[#allocation122_spill] sm:$0xff] %v9734_v34 }
 0x704   :  { %v1294_v53 = vadd.f32 1e-06, %v1197_v51  ;;  %v965_v51 = vsel %vm886_vm0, %v816_v10, 0.0  ;;  %v9741_v0 = vpop.f32.mrf.mxu1 }
 0x705   :  { %13086 = vst [vmem:[#allocation123_spill] sm:$0xff] %v9741_v0 }
 0x706   :  { %6746 = vrsqrt.f32 %v1294_v53  ;;  %v9752_v34 = vpop.f32.mrf.mxu1 }
 0x707   :  { %13089 = vst [vmem:[#allocation126_spill] sm:$0xff] %v9752_v34 }
 0x708   :  { %v9777_v34 = vpop.f32.mrf.mxu1 }
 0x709   :  { %13090 = vst [vmem:[#allocation127_spill] sm:$0xff] %v9777_v34  ;;  %v149_v34 = vmul.f32 0.7, %v9420_v20 }
 0x70a   :  { %v9783_v58 = vpop.f32.mrf.mxu1 }
 0x70b   :  { %13091 = vst [vmem:[#allocation128_spill] sm:$0xff] %v9783_v58 }
 0x70f   :  { %v6745_v55 = vpop.eup %6744 }
 0x710   :  { %v1485_v40 = vmul.f32 %v6745_v55, %v9562_v19  ;;  %v9761_v19 = vld [vmem:[%s12688_s0 + $0x150] sm:$0xff]  ;;  %v9768_v55 = vld [vmem:[%s12688_s0 + $0x158] sm:$0xff] }
 0x712   :  { %v9745_v60 = vmul.f32 %v9526_v14, %v1485_v40  ;;  %v9774_v40 = vpop.permute.xlu0 %480 }
 0x713   :  { %v6747_v25 = vpop.eup %6746  ;;  %966 = vadd.xlane.f32.xlu1 %v965_v51  ;;  %v257_v51 = vmul.f32 0.1, %v9768_v55 }
 0x714   :  { %v1486_v15 = vmul.f32 %v6747_v25, %v9566_v1  ;;  %13087 = vst [vmem:[#allocation124_spill] sm:$0xff] %v9745_v60  ;;  %v256_v1 = vmul.f32 0.1, %v9761_v19 }
 0x716   :  { %v9748_v53 = vmul.f32 %v9526_v14, %v1486_v15 }
 0x717   :  { %969 = vadd.xlane.f32.xlu0 %v968_v7 }
 0x718   :  { %13088 = vst [vmem:[#allocation125_spill] sm:$0xff] %v9748_v53  ;;  %v1673_v10 = vpack.c.bf16 %v9748_v53, %v9745_v60  ;;  %v146_v60 = vmul.f32 0.7, %v9351_v27 }
 0x71a   :  { %6260 = vmatmul.mubr.msk.bf16.gmra.mxu0 %vm886_vm0, %v1673_v10  ;;  %6308 = vmatmul.mubr.msk.bf16.gmra.mxu1 %vm886_vm0, %v1673_v10  ;;  %v9780_v0 = vadd.f32 %v9556_v18, %v146_v60 }
 0x71b   :  { %2093 = vmatprep.mubr.bf16.mxu0 %v12989_v5  ;;  %2606 = vmatprep.mubr.bf16.mxu1 %v12989_v5 }
 0x724   :  { %490 = vrot.lane.b32.xlu1 %v256_v1, %s7787_s26 }
 0x72d   :  { %492 = vrot.lane.b32.xlu0 %v257_v51, %s7787_s26  ;;  %v147_v51 = vmul.f32 0.7, %v9358_v57 }
 0x72f   :  { %v9786_v50 = vadd.f32 %v9558_v2, %v147_v51 }
 0x732   :  { %v955_v25 = vpop.xlane.xlu1 %954 }
 0x733   :  { %v1198_v15 = vmul.f32 0.015625, %v955_v25  ;;  %v818_v25 = vmul.f32 %v9780_v0, %v9780_v0 }
 0x735   :  { %v1295_v7 = vadd.f32 1e-06, %v1198_v15  ;;  %v971_v27 = vsel %vm886_vm0, %v818_v25, 0.0 }
 0x736   :  { %v958_v10 = vpop.xlane.xlu0 %957 }
 0x737   :  { %6748 = vrsqrt.f32 %v1295_v7  ;;  %v1199_v53 = vmul.f32 0.015625, %v958_v10  ;;  %v819_v7 = vmul.f32 %v9786_v50, %v9786_v50 }
 0x739   :  { %v1296_v1 = vadd.f32 1e-06, %v1199_v53  ;;  %v9790_v53 = vpop.f32.mrf.mxu1  ;;  %v974_v2 = vsel %vm886_vm0, %v819_v7, 0.0 }
 0x73a   :  { %13092 = vst [vmem:[#allocation129_spill] sm:$0xff] %v9790_v53 }
 0x73b   :  { %6750 = vrsqrt.f32 %v1296_v1  ;;  %v9797_v10 = vpop.f32.mrf.mxu1 }
 0x73c   :  { %13093 = vst [vmem:[#allocation130_spill] sm:$0xff] %v9797_v10 }
 0x73d   :  { %v9806_v25 = vpop.f32.mrf.mxu1 }
 0x73e   :  { %13096 = vst [vmem:[#allocation133_spill] sm:$0xff] %v9806_v25 }
 0x744   :  { %v6749_v15 = vpop.eup %6748 }
 0x745   :  { %v1487_v18 = vmul.f32 %v6749_v15, %v9616_v12  ;;  %v9819_v15 = vld [vmem:[%s12688_s0 + $0x160] sm:$0xff] }
 0x746   :  { %v258_v7 = vmul.f32 0.1, %v9819_v15 }
 0x747   :  { %v9801_v1 = vmul.f32 %v9526_v14, %v1487_v18 }
 0x748   :  { %v6751_v60 = vpop.eup %6750  ;;  %972 = vadd.xlane.f32.xlu1 %v971_v27 }
 0x749   :  { %v1488_v57 = vmul.f32 %v6751_v60, %v9622_v43  ;;  %13094 = vst [vmem:[#allocation131_spill] sm:$0xff] %v9801_v1  ;;  %v9812_v43 = vpop.f32.mrf.mxu1 }
 0x74a   :  { %13097 = vst [vmem:[#allocation134_spill] sm:$0xff] %v9812_v43 }
 0x74b   :  { %v9804_v51 = vmul.f32 %v9526_v14, %v1488_v57  ;;  %v9821_v27 = vpop.f32.mrf.mxu1  ;;  %v9832_v57 = vld [vmem:[%s12688_s0 + $0x168] sm:$0xff] }
 0x74c   :  { %975 = vadd.xlane.f32.xlu0 %v974_v2  ;;  %13098 = vst [vmem:[#allocation135_spill] sm:$0xff] %v9821_v27 }
 0x74d   :  { %13095 = vst [vmem:[#allocation132_spill] sm:$0xff] %v9804_v51  ;;  %v1674_v12 = vpack.c.bf16 %v9804_v51, %v9801_v1  ;;  %v9824_v18 = vpop.f32.mrf.mxu1  ;;  %v9840_v1 = vpop.permute.xlu1 %482 }
 0x74e   :  { %13099 = vst [vmem:[#allocation136_spill] sm:$0xff] %v9824_v18 }
 0x74f   :  { %6261 = vmatmul.mubr.msk.bf16.gmra.mxu0 %vm886_vm0, %v1674_v12  ;;  %6309 = vmatmul.mubr.msk.bf16.gmra.mxu1 %vm886_vm0, %v1674_v12  ;;  %v9827_v60 = vpop.f32.mrf.mxu1  ;;  %v259_v12 = vmul.f32 0.1, %v9832_v57 }
 0x750   :  { %2103 = vmatprep.mubr.bf16.mxu0 %v12989_v5  ;;  %2616 = vmatprep.mubr.bf16.mxu1 %v12989_v5  ;;  %13100 = vst [vmem:[#allocation137_spill] sm:$0xff] %v9827_v60 }
 0x751   :  { %v9834_v2 = vpop.f32.mrf.mxu1 }
 0x752   :  { %13101 = vst [vmem:[#allocation138_spill] sm:$0xff] %v9834_v2 }
 0x753   :  { %v9837_v51 = vpop.f32.mrf.mxu1 }
 0x754   :  { %13102 = vst [vmem:[#allocation139_spill] sm:$0xff] %v9837_v51  ;;  %v148_v51 = vmul.f32 0.7, %v9410_v46 }
 0x755   :  { %v9842_v18 = vpop.f32.mrf.mxu1 }
 0x756   :  { %13103 = vst [vmem:[#allocation140_spill] sm:$0xff] %v9842_v18  ;;  %v9854_v18 = vadd.f32 %v9610_v49, %v148_v51 }
 0x757   :  { %v9846_v43 = vpop.f32.mrf.mxu1 }
 0x758   :  { %13104 = vst [vmem:[#allocation141_spill] sm:$0xff] %v9846_v43 }
 0x759   :  { %494 = vrot.lane.b32.xlu1 %v258_v7, %s7787_s26  ;;  %v9844_v7 = vpop.permute.xlu0 %484  ;;  %v9848_v53 = vpop.f32.mrf.mxu1 }
 0x75a   :  { %13105 = vst [vmem:[#allocation142_spill] sm:$0xff] %v9848_v53  ;;  %v152_v53 = vmul.f32 0.7, %v9545_v30 }
 0x762   :  { %496 = vrot.lane.b32.xlu0 %v259_v12, %s7787_s26  ;;  %v9851_v12 = vpop.f32.mrf.mxu1 }
 0x763   :  { %13106 = vst [vmem:[#allocation143_spill] sm:$0xff] %v9851_v12 }
 0x767   :  { %v961_v60 = vpop.xlane.xlu1 %960 }
 0x768   :  { %v1200_v27 = vmul.f32 0.015625, %v961_v60  ;;  %v9857_v60 = vpop.f32.mrf.mxu1 }
 0x769   :  { %13107 = vst [vmem:[#allocation144_spill] sm:$0xff] %v9857_v60 }
 0x76a   :  { %v1297_v25 = vadd.f32 1e-06, %v1200_v27  ;;  %v9859_v43 = vpop.f32.mrf.mxu1 }
 0x76b   :  { %v964_v10 = vpop.xlane.xlu0 %963  ;;  %13108 = vst [vmem:[#allocation145_spill] sm:$0xff] %v9859_v43 }
 0x76c   :  { %6752 = vrsqrt.f32 %v1297_v25  ;;  %v1201_v2 = vmul.f32 0.015625, %v964_v10  ;;  %v9862_v25 = vadd.f32 %v9612_v26, %v149_v34  ;;  %v820_v10 = vmul.f32 %v9854_v18, %v9854_v18  ;;  %v9866_v46 = vpop.f32.mrf.mxu1 }
 0x76d   :  { %13109 = vst [vmem:[#allocation146_spill] sm:$0xff] %v9866_v46 }
 0x76e   :  { %v1298_v58 = vadd.f32 1e-06, %v1201_v2  ;;  %v821_v49 = vmul.f32 %v9862_v25, %v9862_v25  ;;  %v9873_v43 = vpop.f32.mrf.mxu1 }
 0x76f   :  { %13110 = vst [vmem:[#allocation147_spill] sm:$0xff] %v9873_v43 }
 0x770   :  { %6754 = vrsqrt.f32 %v1298_v58  ;;  %v977_v58 = vsel %vm886_vm0, %v820_v10, 0.0  ;;  %v980_v26 = vsel %vm886_vm0, %v821_v49, 0.0  ;;  %v9884_v60 = vpop.f32.mrf.mxu1 }
 0x771   :  { %13113 = vst [vmem:[#allocation150_spill] sm:$0xff] %v9884_v60 }
 0x779   :  { %v6753_v27 = vpop.eup %6752 }
 0x77a   :  { %v1489_v20 = vmul.f32 %v6753_v27, %v9670_v29  ;;  %v9895_v29 = vld [vmem:[%s12688_s0 + $0x170] sm:$0xff] }
 0x77c   :  { %v9877_v34 = vmul.f32 %v9526_v14, %v1489_v20  ;;  %v9906_v20 = vld [vmem:[%s12688_s0 + $0x178] sm:$0xff] }
 0x77d   :  { %v6755_v51 = vpop.eup %6754  ;;  %978 = vadd.xlane.f32.xlu1 %v977_v58  ;;  %v260_v58 = vmul.f32 0.1, %v9895_v29 }
 0x77e   :  { %v1490_v2 = vmul.f32 %v6755_v51, %v9676_v39  ;;  %13111 = vst [vmem:[#allocation148_spill] sm:$0xff] %v9877_v34  ;;  %v9888_v39 = vpop.f32.mrf.mxu1 }
 0x77f   :  { %13114 = vst [vmem:[#allocation151_spill] sm:$0xff] %v9888_v39 }
 0x780   :  { %v9880_v46 = vmul.f32 %v9526_v14, %v1490_v2  ;;  %v9897_v27 = vpop.f32.mrf.mxu1 }
 0x781   :  { %981 = vadd.xlane.f32.xlu0 %v980_v26  ;;  %13115 = vst [vmem:[#allocation152_spill] sm:$0xff] %v9897_v27  ;;  %v261_v26 = vmul.f32 0.1, %v9906_v20  ;;  %v9918_v27 = vpop.permute.xlu0 %488 }
 0x782   :  { %13112 = vst [vmem:[#allocation149_spill] sm:$0xff] %v9880_v46  ;;  %v1675_v10 = vpack.c.bf16 %v9880_v46, %v9877_v34  ;;  %v9900_v49 = vpop.f32.mrf.mxu1  ;;  %v487_v46 = vpop.permute.xlu1 %486 }
 0x783   :  { %13116 = vst [vmem:[#allocation153_spill] sm:$0xff] %v9900_v49 }
 0x784   :  { %6262 = vmatmul.mubr.msk.bf16.gmra.mxu0 %vm886_vm0, %v1675_v10  ;;  %6310 = vmatmul.mubr.msk.bf16.gmra.mxu1 %vm886_vm0, %v1675_v10  ;;  %v9908_v51 = vpop.f32.mrf.mxu1 }
 0x785   :  { %2113 = vmatprep.mubr.bf16.mxu0 %v12989_v5  ;;  %2626 = vmatprep.mubr.bf16.mxu1 %v12989_v5  ;;  %13117 = vst [vmem:[#allocation154_spill] sm:$0xff] %v9908_v51 }
 0x786   :  { %v9910_v2 = vpop.f32.mrf.mxu1 }
 0x787   :  { %13118 = vst [vmem:[#allocation155_spill] sm:$0xff] %v9910_v2 }
 0x788   :  { %v9913_v10 = vpop.f32.mrf.mxu1 }
 0x789   :  { %13119 = vst [vmem:[#allocation156_spill] sm:$0xff] %v9913_v10  ;;  %v150_v10 = vmul.f32 0.7, %v9486_v41  ;;  %v153_v41 = vmul.f32 0.7, %v9552_v23 }
 0x78a   :  { %v9916_v34 = vpop.f32.mrf.mxu1 }
 0x78b   :  { %13120 = vst [vmem:[#allocation157_spill] sm:$0xff] %v9916_v34  ;;  %v151_v34 = vmul.f32 0.7, %v9493_v24 }
 0x78c   :  { %v9920_v60 = vpop.f32.mrf.mxu1 }
 0x78d   :  { %13121 = vst [vmem:[#allocation158_spill] sm:$0xff] %v9920_v60 }
 0x78e   :  { %498 = vrot.lane.b32.xlu1 %v260_v58, %s7787_s26  ;;  %v9922_v2 = vpop.f32.mrf.mxu1 }
 0x78f   :  { %13122 = vst [vmem:[#allocation159_spill] sm:$0xff] %v9922_v2 }
 0x797   :  { %500 = vrot.lane.b32.xlu0 %v261_v26, %s7787_s26  ;;  %v9925_v26 = vpop.f32.mrf.mxu1 }
 0x798   :  { %13123 = vst [vmem:[#allocation160_spill] sm:$0xff] %v9925_v26 }
 0x79c   :  { %v967_v58 = vpop.xlane.xlu1 %966 }
 0x79d   :  { %v1202_v49 = vmul.f32 0.015625, %v967_v58  ;;  %v9930_v58 = vadd.f32 %v9664_v52, %v150_v10 }
 0x79f   :  { %v1299_v39 = vadd.f32 1e-06, %v1202_v49  ;;  %v9932_v49 = vpop.f32.mrf.mxu1  ;;  %v822_v24 = vmul.f32 %v9930_v58, %v9930_v58 }
 0x7a0   :  { %v970_v43 = vpop.xlane.xlu0 %969  ;;  %13124 = vst [vmem:[#allocation161_spill] sm:$0xff] %v9932_v49 }
 0x7a1   :  { %6756 = vrsqrt.f32 %v1299_v39  ;;  %v1203_v51 = vmul.f32 0.015625, %v970_v43  ;;  %v9935_v39 = vadd.f32 %v9666_v35, %v151_v34  ;;  %v9938_v43 = vadd.f32 %v9718_v56, %v152_v53  ;;  %v9944_v30 = vpop.f32.mrf.mxu1 }
 0x7a2   :  { %13125 = vst [vmem:[#allocation162_spill] sm:$0xff] %v9944_v30  ;;  %v9951_v35 = vadd.f32 %v9720_v13, %v153_v41  ;;  %v155_v56 = vmul.f32 0.7, %v9606_v16  ;;  %v156_v53 = vmul.f32 0.7, %v9653_v62  ;;  %v983_v34 = vsel %vm886_vm0, %v822_v24, 0.0 }
 0x7a3   :  { %v1300_v12 = vadd.f32 1e-06, %v1203_v51  ;;  %v823_v52 = vmul.f32 %v9935_v39, %v9935_v39  ;;  %v9948_v10 = vpop.f32.mrf.mxu1  ;;  %v824_v23 = vmul.f32 %v9938_v43, %v9938_v43 }
 0x7a4   :  { %13126 = vst [vmem:[#allocation163_spill] sm:$0xff] %v9948_v10  ;;  %v157_v10 = vmul.f32 0.7, %v9660_v4  ;;  %v9968_v26 = vadd.f32 %v9774_v40, %v155_v56  ;;  %v160_v56 = vmul.f32 0.7, %v9761_v19 }
 0x7a5   :  { %6758 = vrsqrt.f32 %v1300_v12  ;;  %v154_v12 = vmul.f32 0.7, %v9599_v6  ;;  %v986_v13 = vsel %vm886_vm0, %v823_v52, 0.0  ;;  %v9965_v41 = vpop.f32.mrf.mxu1  ;;  %v989_v62 = vsel %vm886_vm0, %v824_v23, 0.0 }
 0x7a6   :  { %13127 = vst [vmem:[#allocation164_spill] sm:$0xff] %v9965_v41  ;;  %v9990_v24 = vadd.f32 %v9844_v7, %v157_v10  ;;  %v491_v10 = vpop.permute.xlu1 %490 }
 0x7a7   :  { %v9957_v6 = vadd.f32 %v9772_v47, %v154_v12  ;;  %v158_v47 = vmul.f32 0.7, %v9707_v63  ;;  %v9975_v12 = vadd.f32 %v9840_v1, %v156_v53  ;;  %v159_v1 = vmul.f32 0.7, %v9714_v44  ;;  %v6592_v44 = vld [vmem:[%s12690_s2 + $0x38] sm:$0xff]  }
 0x7a8   :  { %4738 = vmatpush1.bf16.msra.mxu0 %v6592_v44 }
 0x7a9   :  { %v826_v40 = vmul.f32 %v9957_v6, %v9957_v6  ;;  %v9996_v52 = vadd.f32 %v487_v46, %v158_v47  ;;  %v828_v7 = vmul.f32 %v9975_v12, %v9975_v12  ;;  %v161_v46 = vmul.f32 0.7, %v9768_v55  ;;  %4739 = vmatprep.subr.bf16.mxu0 %v12989_v5 }
 0x7aa   :  { %v10021_v47 = vadd.f32 %v491_v10, %v160_v56 }
 0x7ab   :  { %v995_v23 = vsel %vm886_vm0, %v826_v40, 0.0  ;;  %v830_v55 = vmul.f32 %v9996_v52, %v9996_v52  ;;  %v493_v40 = vpop.permute.xlu0 %492 }
 0x7ae   :  { %v6757_v51 = vpop.eup %6756 }
 0x7af   :  { %v1491_v30 = vmul.f32 %v6757_v51, %v9724_v32  ;;  %v825_v32 = vmul.f32 %v9951_v35, %v9951_v35 }
 0x7b1   :  { %v9978_v4 = vmul.f32 %v9526_v14, %v1491_v30  ;;  %v992_v51 = vsel %vm886_vm0, %v825_v32, 0.0  ;;  %v827_v30 = vmul.f32 %v9968_v26, %v9968_v26 }
 0x7b2   :  { %v6759_v49 = vpop.eup %6758  ;;  %984 = vadd.xlane.f32.xlu1 %v983_v34  ;;  %v829_v34 = vmul.f32 %v9990_v24, %v9990_v24 }
 0x7b3   :  { %v1492_v16 = vmul.f32 %v6759_v49, %v9730_v61  ;;  %13128 = vst [vmem:[#allocation165_spill] sm:$0xff] %v9978_v4  ;;  %v9987_v49 = vpop.f32.mrf.mxu1  ;;  %v998_v53 = vsel %vm886_vm0, %v827_v30, 0.0 }
 0x7b4   :  { %13130 = vst [vmem:[#allocation167_spill] sm:$0xff] %v9987_v49 }
 0x7b5   :  { %v9981_v61 = vmul.f32 %v9526_v14, %v1492_v16  ;;  %v10009_v19 = vpop.f32.mrf.mxu1  ;;  %v10019_v16 = vadd.f32 %v9918_v27, %v159_v1  ;;  %v1007_v27 = vsel %vm886_vm0, %v830_v55, 0.0  ;;  %v832_v1 = vmul.f32 %v10021_v47, %v10021_v47 }
 0x7b6   :  { %990 = vadd.xlane.f32.xlu1 %v989_v62  ;;  %987 = vadd.xlane.f32.xlu0 %v986_v13  ;;  %13131 = vst [vmem:[#allocation168_spill] sm:$0xff] %v10009_v19  ;;  %v6593_v13 = vld [vmem:[%s12690_s2 + $0x30] sm:$0xff]   ;;  %v1001_v62 = vsel %vm886_vm0, %v828_v7, 0.0 }
 0x7b7   :  { %13129 = vst [vmem:[#allocation166_spill] sm:$0xff] %v9981_v61  ;;  %v1676_v63 = vpack.c.bf16 %v9981_v61, %v9978_v4  ;;  %v10027_v32 = vpop.f32.mrf.mxu1  ;;  %4740 = vmatpush1.bf16.msra.mxu0 %v6593_v13  ;;  %v831_v30 = vmul.f32 %v10019_v16, %v10019_v16 }
 0x7b8   :  { %13132 = vst [vmem:[#allocation169_spill] sm:$0xff] %v10027_v32  ;;  %4741 = vmatprep.subr.bf16.mxu0 %v12989_v5 }
 0x7b9   :  { %6263 = vmatmul.mubr.msk.bf16.gmra.mxu0 %vm886_vm0, %v1676_v63  ;;  %6311 = vmatmul.mubr.msk.bf16.gmra.mxu1 %vm886_vm0, %v1676_v63  ;;  %v1004_v63 = vsel %vm886_vm0, %v829_v34, 0.0  ;;  %v10038_v56 = vpop.f32.mrf.mxu1  ;;  %v1010_v7 = vsel %vm886_vm0, %v831_v30, 0.0 }
 0x7ba   :  { %996 = vadd.xlane.f32.xlu1 %v995_v23  ;;  %993 = vadd.xlane.f32.xlu0 %v992_v51  ;;  %v10030_v51 = vadd.f32 %v493_v40, %v161_v46  ;;  %13133 = vst [vmem:[#allocation170_spill] sm:$0xff] %v10038_v56  ;;  %v1013_v23 = vsel %vm886_vm0, %v832_v1, 0.0  ;;  %v162_v40 = vmul.f32 0.7, %v9819_v15 }
 0x7bb   :  { %2123 = vmatprep.mubr.bf16.mxu0 %v12989_v5  ;;  %2636 = vmatprep.mubr.bf16.mxu1 %v12989_v5  ;;  %v10044_v44 = vpop.f32.mrf.mxu1 }
 0x7bc   :  { %v833_v10 = vmul.f32 %v10030_v51, %v10030_v51  ;;  %13134 = vst [vmem:[#allocation171_spill] sm:$0xff] %v10044_v44 }
 0x7be   :  { %1002 = vadd.xlane.f32.xlu1 %v1001_v62  ;;  %999 = vadd.xlane.f32.xlu0 %v998_v53  ;;  %v1016_v46 = vsel %vm886_vm0, %v833_v10, 0.0  ;;  %v10047_v53 = vpop.f32.mrf.mxu1  ;;  %v163_v10 = vmul.f32 0.7, %v9832_v57 }
 0x7bf   :  { %13135 = vst [vmem:[#allocation172_spill] sm:$0xff] %v10047_v53 }
 0x7c0   :  { %v10049_v34 = vpop.f32.mrf.mxu1 }
 0x7c1   :  { %13136 = vst [vmem:[#allocation173_spill] sm:$0xff] %v10049_v34 }
 0x7c2   :  { %1008 = vadd.xlane.f32.xlu1 %v1007_v27  ;;  %1005 = vadd.xlane.f32.xlu0 %v1004_v63  ;;  %v10051_v13 = vpop.f32.mrf.mxu1 }
 0x7c3   :  { %13137 = vst [vmem:[#allocation174_spill] sm:$0xff] %v10051_v13 }
 0x7c4   :  { %v10054_v63 = vpop.f32.mrf.mxu1 }
 0x7c5   :  { %13138 = vst [vmem:[#allocation175_spill] sm:$0xff] %v10054_v63 }
 0x7c6   :  { %1014 = vadd.xlane.f32.xlu1 %v1013_v23  ;;  %1011 = vadd.xlane.f32.xlu0 %v1010_v7  ;;  %v10061_v13 = vpop.f32.mrf.mxu1 }
 0x7c7   :  { %13139 = vst [vmem:[#allocation176_spill] sm:$0xff] %v10061_v13 }
 0x7c8   :  { %v10066_v4 = vpop.f32.mrf.mxu1 }
 0x7c9   :  { %13140 = vst [vmem:[#allocation177_spill] sm:$0xff] %v10066_v4 }
 0x7ca   :  { %1017 = vadd.xlane.f32.xlu0 %v1016_v46 }
 0x7d1   :  { %v973_v62 = vpop.xlane.xlu1 %972 }
 0x7d2   :  { %v1204_v55 = vmul.f32 0.015625, %v973_v62 }
 0x7d4   :  { %v1301_v27 = vadd.f32 1e-06, %v1204_v55 }
 0x7d5   :  { %v495_v1 = vpop.permute.xlu1 %494  ;;  %v976_v30 = vpop.xlane.xlu0 %975 }
 0x7d6   :  { %6760 = vrsqrt.f32 %v1301_v27  ;;  %v10056_v23 = vadd.f32 %v495_v1, %v162_v40  ;;  %v1205_v7 = vmul.f32 0.015625, %v976_v30  ;;  %v10071_v27 = vpop.f32.mrf.mxu1 }
 0x7d7   :  { %13141 = vst [vmem:[#allocation178_spill] sm:$0xff] %v10071_v27 }
 0x7d8   :  { %v1302_v46 = vadd.f32 1e-06, %v1205_v7  ;;  %v834_v61 = vmul.f32 %v10056_v23, %v10056_v23  ;;  %v10073_v30 = vpop.f32.mrf.mxu1 }
 0x7d9   :  { %v497_v62 = vpop.permute.xlu0 %496  ;;  %13142 = vst [vmem:[#allocation179_spill] sm:$0xff] %v10073_v30 }
 0x7da   :  { %6762 = vrsqrt.f32 %v1302_v46  ;;  %v10063_v15 = vadd.f32 %v497_v62, %v163_v10  ;;  %v1019_v55 = vsel %vm886_vm0, %v834_v61, 0.0  ;;  %v10076_v46 = vpop.f32.mrf.mxu1  ;;  %v6594_v61 = vld [vmem:[%s12690_s2 + $0x28] sm:$0xff]  }
 0x7db   :  { %1020 = vadd.xlane.f32.xlu1 %v1019_v55  ;;  %13143 = vst [vmem:[#allocation180_spill] sm:$0xff] %v10076_v46  ;;  %4742 = vmatpush1.bf16.msra.mxu0 %v6594_v61 }
 0x7dc   :  { %v835_v40 = vmul.f32 %v10063_v15, %v10063_v15  ;;  %v10082_v55 = vpop.f32.mrf.mxu1  ;;  %4743 = vmatprep.subr.bf16.mxu0 %v12989_v5 }
 0x7dd   :  { %13144 = vst [vmem:[#allocation181_spill] sm:$0xff] %v10082_v55 }
 0x7de   :  { %v1022_v57 = vsel %vm886_vm0, %v835_v40, 0.0 }
 0x7df   :  { %1023 = vadd.xlane.f32.xlu0 %v1022_v57 }
 0x7e3   :  { %v6761_v1 = vpop.eup %6760 }
 0x7e4   :  { %v1493_v7 = vmul.f32 %v6761_v1, %v9780_v0  ;;  %v10093_v1 = vpop.f32.mrf.mxu1 }
 0x7e5   :  { %13147 = vst [vmem:[#allocation184_spill] sm:$0xff] %v10093_v1 }
 0x7e6   :  { %v10085_v40 = vmul.f32 %v9526_v14, %v1493_v7  ;;  %v10102_v7 = vpop.f32.mrf.mxu1 }
 0x7e7   :  { %v6763_v10 = vpop.eup %6762  ;;  %13148 = vst [vmem:[#allocation185_spill] sm:$0xff] %v10102_v7 }
 0x7e8   :  { %v1494_v62 = vmul.f32 %v6763_v10, %v9786_v50  ;;  %13145 = vst [vmem:[#allocation182_spill] sm:$0xff] %v10085_v40  ;;  %v6595_v50 = vld [vmem:[%s12690_s2 + $0x20] sm:$0xff]   ;;  %v6596_v10 = vld [vmem:[%s12690_s2 + $0x18] sm:$0xff]   ;;  %v10108_v61 = vpop.f32.mrf.mxu1 }
 0x7e9   :  { %4744 = vmatpush1.bf16.msra.mxu0 %v6595_v50  ;;  %13149 = vst [vmem:[#allocation186_spill] sm:$0xff] %v10108_v61  ;;  %v6598_v50 = vld [vmem:[%s12690_s2 + $0x8] sm:$0xff]  }
 0x7ea   :  { %v10088_v57 = vmul.f32 %v9526_v14, %v1494_v62  ;;  %4745 = vmatprep.subr.bf16.mxu0 %v12989_v5  ;;  %v6597_v62 = vld [vmem:[%s12690_s2 + $0x10] sm:$0xff]  }
 0x7ec   :  { %13146 = vst [vmem:[#allocation183_spill] sm:$0xff] %v10088_v57  ;;  %v1677_v0 = vpack.c.bf16 %v10088_v57, %v10085_v40 }
 0x7ed   :  { %4746 = vmatpush1.bf16.msra.mxu0 %v6596_v10 }
 0x7ee   :  { %6264 = vmatmul.mubr.msk.bf16.gmra.mxu0 %vm886_vm0, %v1677_v0  ;;  %6312 = vmatmul.mubr.msk.bf16.gmra.mxu1 %vm886_vm0, %v1677_v0  ;;  %v10113_v0 = vpop.f32.mrf.mxu1 }
 0x7ef   :  { %2133 = vmatprep.mubr.bf16.mxu0 %v12989_v5  ;;  %2646 = vmatprep.mubr.bf16.mxu1 %v12989_v5  ;;  %13150 = vst [vmem:[#allocation187_spill] sm:$0xff] %v10113_v0 }
 0x7f0   :  { %4747 = vmatprep.subr.bf16.mxu0 %v12989_v5  ;;  %v10119_v1 = vpop.f32.mrf.mxu1 }
 0x7f1   :  { %4748 = vmatpush1.bf16.msra.mxu0 %v6597_v62  ;;  %13151 = vst [vmem:[#allocation188_spill] sm:$0xff] %v10119_v1  ;;  %v164_v62 = vmul.f32 0.7, %v9895_v29 }
 0x7f2   :  { %4749 = vmatprep.subr.bf16.mxu0 %v12989_v5  ;;  %v10122_v61 = vpop.f32.mrf.mxu1 }
 0x7f3   :  { %13152 = vst [vmem:[#allocation189_spill] sm:$0xff] %v10122_v61  ;;  %v165_v61 = vmul.f32 0.7, %v9906_v20 }
 0x7f4   :  { %v10125_v10 = vpop.f32.mrf.mxu1 }
 0x7f5   :  { %4750 = vmatpush1.bf16.msra.mxu0 %v6598_v50  ;;  %13153 = vst [vmem:[#allocation190_spill] sm:$0xff] %v10125_v10 }
 0x7f6   :  { %4751 = vmatprep.subr.bf16.mxu0 %v12989_v5  ;;  %v10127_v57 = vpop.f32.mrf.mxu1 }
 0x7f7   :  { %13154 = vst [vmem:[#allocation191_spill] sm:$0xff] %v10127_v57 }
 0x7f8   :  { %v10130_v46 = vpop.f32.mrf.mxu1 }
 0x7f9   :  { %13155 = vst [vmem:[#allocation192_spill] sm:$0xff] %v10130_v46 }
 0x7fa   :  { %v10135_v13 = vpop.f32.mrf.mxu1 }
 0x7fb   :  { %13156 = vst [vmem:[#allocation193_spill] sm:$0xff] %v10135_v13 }
 0x7fc   :  { %v10142_v46 = vpop.f32.mrf.mxu1 }
 0x7fd   :  { %13157 = vst [vmem:[#allocation194_spill] sm:$0xff] %v10142_v46 }
 0x806   :  { %v979_v0 = vpop.xlane.xlu1 %978 }
 0x807   :  { %v1206_v7 = vmul.f32 0.015625, %v979_v0 }
 0x809   :  { %v1303_v40 = vadd.f32 1e-06, %v1206_v7 }
 0x80a   :  { %v499_v55 = vpop.permute.xlu1 %498  ;;  %v982_v1 = vpop.xlane.xlu0 %981 }
 0x80b   :  { %6764 = vrsqrt.f32 %v1303_v40  ;;  %v10132_v27 = vadd.f32 %v499_v55, %v164_v62  ;;  %v1207_v50 = vmul.f32 0.015625, %v982_v1  ;;  %v10146_v40 = vpop.f32.mrf.mxu1 }
 0x80c   :  { %13158 = vst [vmem:[#allocation195_spill] sm:$0xff] %v10146_v40  ;;  %v6606_v40 = vld [vmem:[%s12690_s2 + $0x48] sm:$0xff]  }
 0x80d   :  { %v1304_v10 = vadd.f32 1e-06, %v1207_v50  ;;  %v836_v57 = vmul.f32 %v10132_v27, %v10132_v27  ;;  %v10149_v1 = vpop.f32.mrf.mxu1 }
 0x80e   :  { %v501_v0 = vpop.permute.xlu0 %500  ;;  %13159 = vst [vmem:[#allocation196_spill] sm:$0xff] %v10149_v1 }
 0x80f   :  { %6766 = vrsqrt.f32 %v1304_v10  ;;  %v10139_v29 = vadd.f32 %v501_v0, %v165_v61  ;;  %v1025_v7 = vsel %vm886_vm0, %v836_v57, 0.0  ;;  %v10151_v50 = vpop.f32.mrf.mxu1  ;;  %v6599_v57 = vld [vmem:[%s12690_s2] sm:$0xff]   ;;  %v10157_v0 = vpop.f32.mrf.mxu0 }
 0x810   :  { %1026 = vadd.xlane.f32.xlu1 %v1025_v7  ;;  %13160 = vst [vmem:[#allocation197_spill] sm:$0xff] %v10151_v50  ;;  %4752 = vmatpush1.bf16.msra.mxu0 %v6599_v57 }
 0x811   :  { %v837_v55 = vmul.f32 %v10139_v29, %v10139_v29  ;;  %4753 = vmatprep.subr.bf16.mxu0 %v12989_v5 }
 0x813   :  { %v1028_v20 = vsel %vm886_vm0, %v837_v55, 0.0  ;;  %v10161_v55 = vpop.f32.mrf.mxu1 }
 0x814   :  { %1029 = vadd.xlane.f32.xlu0 %v1028_v20  ;;  %13161 = vst [vmem:[#allocation198_spill] sm:$0xff] %v10161_v55 }
 0x815   :  { %v10174_v46 = vpop.f32.mrf.mxu1 }
 0x816   :  { %13164 = vst [vmem:[#allocation201_spill] sm:$0xff] %v10174_v46 }
 0x817   :  { %v10188_v57 = vpop.f32.mrf.mxu1 }
 0x818   :  { %v6765_v62 = vpop.eup %6764  ;;  %13165 = vst [vmem:[#allocation202_spill] sm:$0xff] %v10188_v57 }
 0x819   :  { %v1495_v61 = vmul.f32 %v6765_v62, %v9854_v18  ;;  %v6600_v18 = vld [vmem:[%s12690_s2 + $0x78] sm:$0xff]   ;;  %v10172_v62 = vpop.f32.mrf.mxu0 }
 0x81a   :  { %4754 = vmatpush2.bf16.msra.mxu0 %v6600_v18  ;;  %v10196_v18 = vpop.f32.mrf.mxu1 }
 0x81b   :  { %v10164_v20 = vmul.f32 %v9526_v14, %v1495_v61  ;;  %4755 = vmatprep.subr.bf16.mxu0 %v12989_v5  ;;  %v10184_v61 = vpop.f32.mrf.mxu0  ;;  %13166 = vst [vmem:[#allocation203_spill] sm:$0xff] %v10196_v18  ;;  %v6604_v18 = vld [vmem:[%s12690_s2 + $0x58] sm:$0xff]  }
 0x81c   :  { %v6767_v10 = vpop.eup %6766 }
 0x81d   :  { %v1496_v7 = vmul.f32 %v6767_v10, %v9862_v25  ;;  %13162 = vst [vmem:[#allocation199_spill] sm:$0xff] %v10164_v20  ;;  %v6602_v10 = vld [vmem:[%s12690_s2 + $0x68] sm:$0xff]  }
 0x81f   :  { %v10167_v1 = vmul.f32 %v9526_v14, %v1496_v7  ;;  %v6601_v14 = vld [vmem:[%s12690_s2 + $0x70] sm:$0xff]   ;;  %v10194_v7 = vpop.f32.mrf.mxu0 }
 0x820   :  { %4756 = vmatpush2.bf16.msra.mxu0 %v6601_v14  ;;  %v10204_v14 = vpop.f32.mrf.mxu1 }
 0x821   :  { %13163 = vst [vmem:[#allocation200_spill] sm:$0xff] %v10167_v1  ;;  %v1678_v25 = vpack.c.bf16 %v10167_v1, %v10164_v20  ;;  %4757 = vmatprep.subr.bf16.mxu0 %v12989_v5  ;;  %v10201_v55 = vpop.f32.mrf.mxu0  ;;  %13167 = vst [vmem:[#allocation204_spill] sm:$0xff] %v10204_v14  ;;  %v6605_v14 = vld [vmem:[%s12690_s2 + $0x50] sm:$0xff]  }
 0x823   :  { %6265 = vmatmul.mubr.msk.bf16.gmra.mxu0 %vm886_vm0, %v1678_v25  ;;  %6313 = vmatmul.mubr.msk.bf16.gmra.mxu1 %vm886_vm0, %v1678_v25  ;;  %v6603_v25 = vld [vmem:[%s12690_s2 + $0x60] sm:$0xff]   ;;  %v10206_v57 = vpop.f32.mrf.mxu0 }
 0x824   :  { %2143 = vmatprep.mubr.bf16.mxu0 %v12989_v5  ;;  %2656 = vmatprep.mubr.bf16.mxu1 %v12989_v5 }
 0x825   :  { %4758 = vmatpush2.bf16.msra.mxu0 %v6602_v10  ;;  %v10212_v10 = vpop.f32.mrf.mxu1  ;;  %v10214_v46 = vpop.f32.mrf.mxu0 }
 0x826   :  { %4759 = vmatprep.subr.bf16.mxu0 %v12989_v5 }
 0x827   :  { %v10222_v50 = vpop.f32.mrf.mxu0 }
 0x829   :  { %4760 = vmatpush2.bf16.msra.mxu0 %v6603_v25  ;;  %v10220_v25 = vpop.f32.mrf.mxu1 }
 0x82a   :  { %4761 = vmatprep.subr.bf16.mxu0 %v12989_v5 }
 0x82b   :  { %v10230_v13 = vpop.f32.mrf.mxu1 }
 0x82d   :  { %4762 = vmatpush2.bf16.msra.mxu0 %v6604_v18  ;;  %v10228_v18 = vpop.f32.mrf.mxu0  ;;  %v10238_v4 = vpop.f32.mrf.mxu1 }
 0x82e   :  { %4763 = vmatprep.subr.bf16.mxu0 %v12989_v5  ;;  %13168 = vst [vmem:[#allocation205_spill] sm:$0xff] %v10228_v18 }
 0x82f   :  { %v10236_v20 = vpop.f32.mrf.mxu0  ;;  %v10242_v44 = vpop.f32.mrf.mxu1 }
 0x831   :  { %4764 = vmatpush2.bf16.msra.mxu0 %v6605_v14  ;;  %v6607_v14 = vld [vmem:[%s12690_s2 + $0x40] sm:$0xff]   ;;  %v10240_v34 = vpop.f32.mrf.mxu0 }
 0x832   :  { %4765 = vmatprep.subr.bf16.mxu0 %v12989_v5 }
 0x833   :  { %v10244_v41 = vpop.f32.mrf.mxu0 }
 0x835   :  { %4766 = vmatpush2.bf16.msra.mxu0 %v6606_v40 }
 0x836   :  { %4767 = vmatprep.subr.bf16.mxu0 %v12989_v5 }
 0x839   :  { %4768 = vmatpush2.bf16.msra.mxu0 %v6607_v14  ;;  %v10248_v14 = vpop.f32.mrf.mxu0 }
 0x83b   :  { %v985_v1 = vpop.xlane.xlu1 %984 }
 0x83c   :  { %v1208_v30 = vmul.f32 0.015625, %v985_v1  ;;  %v10246_v1 = vpop.f32.mrf.mxu1 }
 0x83e   :  { %v1305_v53 = vadd.f32 1e-06, %v1208_v30 }
 0x83f   :  { %v991_v56 = vpop.xlane.xlu1 %990  ;;  %v988_v63 = vpop.xlane.xlu0 %987 }
 0x840   :  { %v1210_v19 = vmul.f32 0.015625, %v991_v56  ;;  %v1209_v40 = vmul.f32 0.015625, %v988_v63  ;;  %6768 = vrsqrt.f32 %v1305_v53  ;;  %v10250_v63 = vpop.f32.mrf.mxu1  ;;  %v10252_v53 = vpop.f32.mrf.mxu0 }
 0x841   :  { %13169 = vst [vmem:[#allocation206_spill] sm:$0xff] %v10252_v53 }
 0x842   :  { %v1306_v32 = vadd.f32 1e-06, %v1209_v40  ;;  %v1307_v2 = vadd.f32 1e-06, %v1210_v19  ;;  %v10254_v19 = vpop.f32.mrf.mxu1 }
 0x843   :  { %v994_v49 = vpop.xlane.xlu0 %993  ;;  %v997_v30 = vpop.xlane.xlu1 %996 }
 0x844   :  { %v1211_v60 = vmul.f32 0.015625, %v994_v49  ;;  %6770 = vrsqrt.f32 %v1306_v32  ;;  %v1212_v11 = vmul.f32 0.015625, %v997_v30  ;;  %v10256_v32 = vpop.f32.mrf.mxu0  ;;  %v10258_v38 = vpop.f32.mrf.mxu1 }
 0x845   :  { %6772 = vrsqrt.f32 %v1307_v2  ;;  %13170 = vst [vmem:[#allocation207_spill] sm:$0xff] %v10258_v38 }
 0x846   :  { %v1308_v36 = vadd.f32 1e-06, %v1211_v60  ;;  %v1309_v49 = vadd.f32 1e-06, %v1212_v11  ;;  %v10261_v30 = vpop.f32.mrf.mxu0  ;;  %v10266_v45 = vpop.f32.mrf.mxu1 }
 0x847   :  { %v1000_v17 = vpop.xlane.xlu0 %999  ;;  %v1003_v28 = vpop.xlane.xlu1 %1002  ;;  %13171 = vst [vmem:[#allocation208_spill] sm:$0xff] %v10261_v30 }
 0x848   :  { %v1213_v56 = vmul.f32 0.015625, %v1000_v17  ;;  %6774 = vrsqrt.f32 %v1308_v36  ;;  %v1214_v17 = vmul.f32 0.015625, %v1003_v28  ;;  %v10264_v22 = vpop.f32.mrf.mxu0  ;;  %v10284_v59 = vpop.f32.mrf.mxu1 }
 0x849   :  { %13172 = vst [vmem:[#allocation209_spill] sm:$0xff] %v10264_v22  ;;  %13175 = vst [vmem:[#allocation212_spill] sm:$0xff] %v10284_v59 }
 0x84a   :  { %v1310_v40 = vadd.f32 1e-06, %v1213_v56 }
 0x84b   :  { %v1006_v3 = vpop.xlane.xlu0 %1005 }
 0x84c   :  { %6776 = vrsqrt.f32 %v1310_v40  ;;  %v1215_v60 = vmul.f32 0.015625, %v1006_v3  ;;  %v1311_v40 = vadd.f32 1e-06, %v1214_v17  ;;  %v10271_v3 = vld [vmem:[%s12691_s3] ss:$0 sm:$0xff] }
 0x84d   :  { %v6769_v54 = vpop.eup %6768  ;;  %6778 = vrsqrt.f32 %v1309_v49 }
 0x84e   :  { %v1497_v2 = vmul.f32 %v6769_v54, %v9930_v58  ;;  %v1312_v56 = vadd.f32 1e-06, %v1215_v60 }
 0x84f   :  { %v1012_v11 = vpop.xlane.xlu0 %1011 }
 0x850   :  { %v10274_v28 = vmul.f32 %v10271_v3, %v1497_v2  ;;  %6780 = vrsqrt.f32 %v1312_v56  ;;  %v1217_v49 = vmul.f32 0.015625, %v1012_v11 }
 0x851   :  { %v6771_v36 = vpop.eup %6770  ;;  %6782 = vrsqrt.f32 %v1311_v40  ;;  %v10296_v40 = vpop.f32.mrf.mxu1 }
 0x852   :  { %v1498_v31 = vmul.f32 %v6771_v36, %v9935_v39  ;;  %v6773_v21 = vpop.eup %6772  ;;  %13173 = vst [vmem:[#allocation210_spill] sm:$0xff] %v10274_v28  ;;  %v1009_v39 = vpop.xlane.xlu1 %1008  ;;  %v1314_v2 = vadd.f32 1e-06, %v1217_v49 }
 0x853   :  { %v10282_v36 = vpop.f32.mrf.mxu0  ;;  %v1216_v33 = vmul.f32 0.015625, %v1009_v39  ;;  %v10306_v37 = vpop.f32.mrf.mxu1 }
 0x854   :  { %v10277_v54 = vmul.f32 %v10271_v3, %v1498_v31  ;;  %v1499_v31 = vmul.f32 %v6773_v21, %v9938_v43  ;;  %6784 = vrsqrt.f32 %v1314_v2  ;;  %13179 = vst [vmem:[#allocation216_spill] sm:$0xff] %v10306_v37 }
 0x855   :  { %v6775_v58 = vpop.eup %6774  ;;  %v10294_v11 = vpop.f32.mrf.mxu0  ;;  %v1313_v39 = vadd.f32 1e-06, %v1216_v33 }
 0x856   :  { %13174 = vst [vmem:[#allocation211_spill] sm:$0xff] %v10277_v54  ;;  %v1679_v60 = vpack.c.bf16 %v10277_v54, %v10274_v28  ;;  %v1500_v17 = vmul.f32 %v6775_v58, %v9951_v35  ;;  %13177 = vst [vmem:[#allocation214_spill] sm:$0xff] %v10294_v11  ;;  %v1018_v58 = vpop.xlane.xlu0 %1017  ;;  %v10299_v54 = vmul.f32 %v10271_v3, %v1499_v31  ;;  %v1015_v21 = vpop.xlane.xlu1 %1014 }
 0x857   :  { %v1219_v43 = vmul.f32 0.015625, %v1018_v58  ;;  %v10304_v28 = vpop.f32.mrf.mxu0  ;;  %6786 = vrsqrt.f32 %v1313_v39  ;;  %v1218_v9 = vmul.f32 0.015625, %v1015_v21  ;;  %v10318_v58 = vpop.f32.mrf.mxu1 }
 0x858   :  { %6266 = vmatmul.mubr.msk.bf16.gmra.mxu0 %vm886_vm0, %v1679_v60  ;;  %6314 = vmatmul.mubr.msk.bf16.gmra.mxu1 %vm886_vm0, %v1679_v60  ;;  %v10292_v56 = vmul.f32 %v10271_v3, %v1500_v17  ;;  %13178 = vst [vmem:[#allocation215_spill] sm:$0xff] %v10299_v54  ;;  %13181 = vst [vmem:[#allocation218_spill] sm:$0xff] %v10318_v58 }
 0x859   :  { %2153 = vmatprep.mubr.bf16.mxu0 %v12989_v5  ;;  %2666 = vmatprep.mubr.bf16.mxu1 %v12989_v5  ;;  %v6777_v35 = vpop.eup %6776  ;;  %v10311_v31 = vpop.f32.mrf.mxu0  ;;  %v1316_v2 = vadd.f32 1e-06, %v1219_v43  ;;  %v1315_v39 = vadd.f32 1e-06, %v1218_v9 }
 0x85a   :  { %13176 = vst [vmem:[#allocation213_spill] sm:$0xff] %v10292_v56  ;;  %v6779_v60 = vpop.eup %6778  ;;  %v1680_v49 = vpack.c.bf16 %v10292_v56, %v10299_v54  ;;  %v1502_v17 = vmul.f32 %v6777_v35, %v9968_v26 }
 0x85b   :  { %v1501_v33 = vmul.f32 %v6779_v60, %v9957_v6  ;;  %v10323_v56 = vpop.f32.mrf.mxu0  ;;  %6788 = vrsqrt.f32 %v1316_v2 }
 0x85c   :  { %v10316_v26 = vmul.f32 %v10271_v3, %v1502_v17  ;;  %v10328_v17 = vpop.f32.mrf.mxu1  ;;  %6790 = vrsqrt.f32 %v1315_v39 }
 0x85d   :  { %v6781_v35 = vpop.eup %6780  ;;  %v10321_v21 = vmul.f32 %v10271_v3, %v1501_v33  ;;  %13183 = vst [vmem:[#allocation220_spill] sm:$0xff] %v10328_v17  ;;  %v10333_v42 = vpop.f32.mrf.mxu0 }
 0x85e   :  { %13180 = vst [vmem:[#allocation217_spill] sm:$0xff] %v10316_v26  ;;  %v1504_v43 = vmul.f32 %v6781_v35, %v9990_v24  ;;  %v10340_v39 = vpop.f32.mrf.mxu1 }
 0x85f   :  { %13182 = vst [vmem:[#allocation219_spill] sm:$0xff] %v10321_v21  ;;  %v1681_v60 = vpack.c.bf16 %v10316_v26, %v10321_v21  ;;  %13185 = vst [vmem:[#allocation222_spill] sm:$0xff] %v10340_v39 }
 0x860   :  { %6267 = vmatmul.mubr.msk.bf16.gmra.mxu0 %vm886_vm0, %v1680_v49  ;;  %6315 = vmatmul.mubr.msk.bf16.gmra.mxu1 %vm886_vm0, %v1680_v49  ;;  %v6783_v49 = vpop.eup %6782  ;;  %v10338_v24 = vmul.f32 %v10271_v3, %v1504_v43  ;;  %v10352_v43 = vpop.f32.mrf.mxu1 }
 0x861   :  { %2163 = vmatprep.mubr.bf16.mxu0 %v12989_v5  ;;  %2676 = vmatprep.mubr.bf16.mxu1 %v12989_v5  ;;  %v1503_v33 = vmul.f32 %v6783_v49, %v9975_v12  ;;  %v6785_v35 = vpop.eup %6784  ;;  %13188 = vst [vmem:[#allocation225_spill] sm:$0xff] %v10352_v43 }
 0x862   :  { %13184 = vst [vmem:[#allocation221_spill] sm:$0xff] %v10338_v24  ;;  %v1506_v49 = vmul.f32 %v6785_v35, %v10019_v16  ;;  %v10364_v35 = vpop.f32.mrf.mxu1 }
 0x863   :  { %v10343_v26 = vmul.f32 %v10271_v3, %v1503_v33  ;;  %13190 = vst [vmem:[#allocation227_spill] sm:$0xff] %v10364_v35  ;;  %v6352_v35 = vmul.f32 -1.442695, %v10214_v46 }
 0x864   :  { %v1021_v6 = vpop.xlane.xlu1 %1020  ;;  %v10360_v33 = vmul.f32 %v10271_v3, %v1506_v49 }
 0x865   :  { %v1220_v8 = vmul.f32 0.015625, %v1021_v6  ;;  %13186 = vst [vmem:[#allocation223_spill] sm:$0xff] %v10343_v26  ;;  %v1682_v12 = vpack.c.bf16 %v10338_v24, %v10343_v26  ;;  %v10374_v26 = vpop.f32.mrf.mxu1 }
 0x866   :  { %13189 = vst [vmem:[#allocation226_spill] sm:$0xff] %v10360_v33  ;;  %13192 = vst [vmem:[#allocation229_spill] sm:$0xff] %v10374_v26 }
 0x867   :  { %v1317_v6 = vadd.f32 1e-06, %v1220_v8 }
 0x868   :  { %v1024_v54 = vpop.xlane.xlu0 %1023  ;;  %6268 = vmatmul.mubr.msk.bf16.gmra.mxu0 %vm886_vm0, %v1681_v60  ;;  %6316 = vmatmul.mubr.msk.bf16.gmra.mxu1 %vm886_vm0, %v1681_v60  ;;  %v10345_v60 = vpop.f32.mrf.mxu0 }
 0x869   :  { %v1221_v9 = vmul.f32 0.015625, %v1024_v54  ;;  %2173 = vmatprep.mubr.bf16.mxu0 %v12989_v5  ;;  %2686 = vmatprep.mubr.bf16.mxu1 %v12989_v5  ;;  %v6787_v54 = vpop.eup %6786  ;;  %13187 = vst [vmem:[#allocation224_spill] sm:$0xff] %v10345_v60 }
 0x86a   :  { %v1505_v8 = vmul.f32 %v6787_v54, %v9996_v52 }
 0x86b   :  { %v1318_v2 = vadd.f32 1e-06, %v1221_v9  ;;  %v10350_v9 = vpop.f32.mrf.mxu0 }
 0x86d   :  { %6792 = vrsqrt.f32 %v1318_v2  ;;  %v6789_v2 = vpop.eup %6788  ;;  %v10362_v16 = vpop.f32.mrf.mxu0 }
 0x86e   :  { %6794 = vrsqrt.f32 %v1317_v6  ;;  %v10367_v6 = vmul.f32 %v10271_v3, %v1505_v8  ;;  %v6791_v24 = vpop.eup %6790  ;;  %v1508_v52 = vmul.f32 %v6789_v2, %v10030_v51  ;;  %v10386_v51 = vpop.f32.mrf.mxu1 }
 0x86f   :  { %v10372_v54 = vpop.f32.mrf.mxu0  ;;  %v1507_v49 = vmul.f32 %v6791_v24, %v10021_v47  ;;  %13194 = vst [vmem:[#allocation231_spill] sm:$0xff] %v10386_v51 }
 0x870   :  { %6269 = vmatmul.mubr.msk.bf16.gmra.mxu0 %vm886_vm0, %v1682_v12  ;;  %6317 = vmatmul.mubr.msk.bf16.gmra.mxu1 %vm886_vm0, %v1682_v12  ;;  %13191 = vst [vmem:[#allocation228_spill] sm:$0xff] %v10367_v6  ;;  %v1683_v12 = vpack.c.bf16 %v10360_v33, %v10367_v6  ;;  %v10382_v8 = vmul.f32 %v10271_v3, %v1508_v52 }
 0x871   :  { %2183 = vmatprep.mubr.bf16.mxu0 %v12989_v5  ;;  %2696 = vmatprep.mubr.bf16.mxu1 %v12989_v5  ;;  %v10384_v6 = vpop.f32.mrf.mxu0  ;;  %v10389_v2 = vmul.f32 %v10271_v3, %v1507_v49  ;;  %v6347_v49 = vmul.f32 -1.442695, %v10172_v62 }
 0x872   :  { %13193 = vst [vmem:[#allocation230_spill] sm:$0xff] %v10382_v8 }
 0x873   :  { %13195 = vst [vmem:[#allocation232_spill] sm:$0xff] %v10389_v2  ;;  %v10391_v48 = vpop.f32.mrf.mxu0  ;;  %v1684_v47 = vpack.c.bf16 %v10382_v8, %v10389_v2  ;;  %6796 = vpow2.f32 %v6347_v49  ;;  %v6348_v49 = vmul.f32 -1.442695, %v10184_v61 }
 0x875   :  { %v10401_v43 = vpop.f32.mrf.mxu0 }
 0x878   :  { %6270 = vmatmul.mubr.msk.bf16.gmra.mxu0 %vm886_vm0, %v1683_v12  ;;  %6318 = vmatmul.mubr.msk.bf16.gmra.mxu1 %vm886_vm0, %v1683_v12  ;;  %v10393_v12 = vpop.f32.mrf.mxu1 }
 0x879   :  { %2193 = vmatprep.mubr.bf16.mxu0 %v12989_v5  ;;  %2706 = vmatprep.mubr.bf16.mxu1 %v12989_v5  ;;  %13196 = vst [vmem:[#allocation233_spill] sm:$0xff] %v10393_v12 }
 0x87a   :  { %v6793_v33 = vpop.eup %6792  ;;  %v10406_v12 = vpop.f32.mrf.mxu1 }
 0x87b   :  { %v6795_v21 = vpop.eup %6794  ;;  %v1510_v24 = vmul.f32 %v6793_v33, %v10063_v15  ;;  %13197 = vst [vmem:[#allocation234_spill] sm:$0xff] %v10406_v12  ;;  %v6349_v15 = vmul.f32 -1.442695, %v10194_v7 }
 0x87c   :  { %v1509_v52 = vmul.f32 %v6795_v21, %v10056_v23  ;;  %v10417_v23 = vpop.f32.mrf.mxu1 }
 0x87d   :  { %v10409_v8 = vmul.f32 %v10271_v3, %v1510_v24  ;;  %13200 = vst [vmem:[#allocation237_spill] sm:$0xff] %v10417_v23  ;;  %6798 = vpow2.f32 %v6349_v15  ;;  %v6350_v15 = vmul.f32 -1.442695, %v10201_v55 }
 0x87e   :  { %v10413_v33 = vmul.f32 %v10271_v3, %v1509_v52  ;;  %v6346_v52 = vmul.f32 -1.442695, %v10157_v0  ;;  %v10428_v2 = vpop.f32.mrf.mxu1 }
 0x87f   :  { %13198 = vst [vmem:[#allocation235_spill] sm:$0xff] %v10409_v8  ;;  %13201 = vst [vmem:[#allocation238_spill] sm:$0xff] %v10428_v2 }
 0x880   :  { %6271 = vmatmul.mubr.msk.bf16.gmra.mxu0 %vm886_vm0, %v1684_v47  ;;  %6319 = vmatmul.mubr.msk.bf16.gmra.mxu1 %vm886_vm0, %v1684_v47  ;;  %13199 = vst [vmem:[#allocation236_spill] sm:$0xff] %v10413_v33  ;;  %v10415_v47 = vpop.f32.mrf.mxu0  ;;  %v1685_v21 = vpack.c.bf16 %v10409_v8, %v10413_v33  ;;  %v10434_v8 = vpop.f32.mrf.mxu1  ;;  %6800 = vpow2.f32 %v6346_v52  ;;  %v6353_v33 = vmul.f32 -1.442695, %v10222_v50  ;;  %v6357_v52 = vmul.f32 -1.442695, %v10244_v41 }
 0x881   :  { %2203 = vmatprep.mubr.bf16.mxu0 %v12989_v5  ;;  %2716 = vmatprep.mubr.bf16.mxu1 %v12989_v5  ;;  %13203 = vst [vmem:[#allocation240_spill] sm:$0xff] %v10434_v8  ;;  %6802 = vpow2.f32 %v6348_v49  ;;  %v6797_v2 = vpop.eup %6796  ;;  %v6355_v8 = vmul.f32 -1.442695, %v10236_v20 }
 0x882   :  { %v10423_v24 = vpop.f32.mrf.mxu0  ;;  %6804 = vpow2.f32 %v6350_v15  ;;  %v10440_v26 = vpop.f32.mrf.mxu1  ;;  %v3554_v49 = vadd.f32 1.0, %v6797_v2 }
 0x883   :  { %13205 = vst [vmem:[#allocation242_spill] sm:$0xff] %v10440_v26 }
 0x884   :  { %v10431_v23 = vpop.f32.mrf.mxu0  ;;  %v10446_v17 = vpop.f32.mrf.mxu1 }
 0x885   :  { %13202 = vst [vmem:[#allocation239_spill] sm:$0xff] %v10431_v23  ;;  %13207 = vst [vmem:[#allocation244_spill] sm:$0xff] %v10446_v17  ;;  %v6356_v17 = vmul.f32 -1.442695, %v10240_v34 }
 0x886   :  { %v10438_v12 = vpop.f32.mrf.mxu0 }
 0x887   :  { %13204 = vst [vmem:[#allocation241_spill] sm:$0xff] %v10438_v12 }
 0x888   :  { %6272 = vmatmul.mubr.msk.bf16.gmra.mxu0 %vm886_vm0, %v1685_v21  ;;  %6320 = vmatmul.mubr.msk.bf16.gmra.mxu1 %vm886_vm0, %v1685_v21  ;;  %v6351_v21 = vmul.f32 -1.442695, %v10206_v57  ;;  %v10443_v37 = vpop.f32.mrf.mxu0 }
 0x889   :  { %2213 = vmatprep.mubr.bf16.mxu0 %v12989_v5  ;;  %2726 = vmatprep.mubr.bf16.mxu1 %v12989_v5  ;;  %13206 = vst [vmem:[#allocation243_spill] sm:$0xff] %v10443_v37 }
 0x88a   :  { %6806 = vpow2.f32 %v6351_v21  ;;  %v6799_v51 = vpop.eup %6798  ;;  %v10449_v15 = vpop.f32.mrf.mxu0  ;;  %v6354_v21 = vmul.f32 -1.442695, %v10228_v18 }
 0x88b   :  { %6808 = vpow2.f32 %v6353_v33  ;;  %v3556_v23 = vadd.f32 1.0, %v6799_v51  ;;  %v10452_v33 = vpop.f32.mrf.mxu1 }
 0x88c   :  { %6810 = vpow2.f32 %v6352_v35  ;;  %13208 = vst [vmem:[#allocation245_spill] sm:$0xff] %v10452_v33  ;;  %v10454_v37 = vpop.f32.mrf.mxu0  ;;  %v6359_v35 = vmul.f32 -1.442695, %v10252_v53 }
 0x88d   :  { %6812 = vpow2.f32 %v6355_v8  ;;  %13209 = vst [vmem:[#allocation246_spill] sm:$0xff] %v10454_v37  ;;  %v10457_v38 = vpop.f32.mrf.mxu1  ;;  %v6801_v2 = vpop.eup %6800  ;;  %v6361_v8 = vmul.f32 -1.442695, %v10261_v30 }
 0x88e   :  { %6814 = vpow2.f32 %v6357_v52  ;;  %13210 = vst [vmem:[#allocation247_spill] sm:$0xff] %v10457_v38  ;;  %v6803_v39 = vpop.eup %6802  ;;  %v10461_v52 = vpop.f32.mrf.mxu0  ;;  %v3553_v37 = vadd.f32 1.0, %v6801_v2  ;;  %v6360_v2 = vmul.f32 -1.442695, %v10256_v32 }
 0x88f   :  { %6816 = vrcp.f32 %v3554_v49  ;;  %v6805_v59 = vpop.eup %6804  ;;  %13211 = vst [vmem:[#allocation248_spill] sm:$0xff] %v10461_v52  ;;  %v10463_v18 = vpop.f32.mrf.mxu1 }
 0x890   :  { %6818 = vrcp.f32 %v3556_v23  ;;  %13212 = vst [vmem:[#allocation249_spill] sm:$0xff] %v10463_v18  ;;  %v3555_v23 = vadd.f32 1.0, %v6803_v39  ;;  %v10465_v12 = vpop.f32.mrf.mxu0 }
 0x891   :  { %6820 = vpow2.f32 %v6354_v21  ;;  %13213 = vst [vmem:[#allocation250_spill] sm:$0xff] %v10465_v12  ;;  %v10467_v52 = vpop.f32.mrf.mxu1 }
 0x892   :  { %13214 = vst [vmem:[#allocation251_spill] sm:$0xff] %v10467_v52 }
 0x897   :  { %v6807_v49 = vpop.eup %6806 }
 0x898   :  { %v6809_v38 = vpop.eup %6808  ;;  %v3558_v21 = vadd.f32 1.0, %v6807_v49 }
 0x899   :  { %v1027_v26 = vpop.xlane.xlu1 %1026  ;;  %v3560_v30 = vadd.f32 1.0, %v6809_v38  ;;  %v10475_v38 = vpop.f32.mrf.mxu1 }
 0x89a   :  { %v1222_v58 = vmul.f32 0.015625, %v1027_v26  ;;  %13215 = vst [vmem:[#allocation252_spill] sm:$0xff] %v10475_v38  ;;  %v6364_v38 = vmul.f32 -1.442695, %v10294_v11 }
 0x89c   :  { %v1319_v51 = vadd.f32 1e-06, %v1222_v58  ;;  %v3557_v58 = vadd.f32 1.0, %v6805_v59  ;;  %v6363_v59 = vmul.f32 -1.442695, %v10282_v36 }
 0x89d   :  { %v1030_v33 = vpop.xlane.xlu0 %1029 }
 0x89e   :  { %6822 = vrsqrt.f32 %v1319_v51  ;;  %v1223_v26 = vmul.f32 0.015625, %v1030_v33  ;;  %v6358_v33 = vmul.f32 -1.442695, %v10248_v14 }
 0x89f   :  { %6824 = vpow2.f32 %v6356_v17  ;;  %v6811_v17 = vpop.eup %6810 }
 0x8a0   :  { %6826 = vpow2.f32 %v6359_v35  ;;  %v1320_v53 = vadd.f32 1e-06, %v1223_v26  ;;  %v6813_v39 = vpop.eup %6812  ;;  %v10472_v35 = vpop.f32.mrf.mxu0 }
 0x8a1   :  { %6828 = vpow2.f32 %v6361_v8  ;;  %v6815_v51 = vpop.eup %6814  ;;  %v3559_v8 = vadd.f32 1.0, %v6811_v17 }
 0x8a2   :  { %6830 = vrsqrt.f32 %v1320_v53  ;;  %v6817_v53 = vpop.eup %6816  ;;  %v10477_v26 = vpop.f32.mrf.mxu0  ;;  %v3564_v52 = vadd.f32 1.0, %v6815_v51 }
 0x8a3   :  { %6832 = vrcp.f32 %v3553_v37  ;;  %v6365_v37 = vmul.f32 -1.442695, %v10304_v28  ;;  %13216 = vst [vmem:[#allocation253_spill] sm:$0xff] %v10477_v26  ;;  %v6819_v49 = vpop.eup %6818 }
 0x8a4   :  { %6834 = vrcp.f32 %v3555_v23  ;;  %v3562_v23 = vadd.f32 1.0, %v6813_v39  ;;  %v10483_v17 = vpop.f32.mrf.mxu0  ;;  %v6369_v39 = vmul.f32 -1.442695, %v10345_v60 }
 0x8a5   :  { %6836 = vrcp.f32 %v3557_v58  ;;  %v10479_v58 = vpop.f32.mrf.mxu1  ;;  %13218 = vst [vmem:[#allocation255_spill] sm:$0xff] %v10483_v17 }
 0x8a6   :  { %6838 = vrcp.f32 %v3558_v21  ;;  %13217 = vst [vmem:[#allocation254_spill] sm:$0xff] %v10479_v58  ;;  %v6821_v21 = vpop.eup %6820  ;;  %v10491_v17 = vpop.f32.mrf.mxu0 }
 0x8a7   :  { %6840 = vrcp.f32 %v3560_v30  ;;  %v6362_v30 = vmul.f32 -1.442695, %v10264_v22  ;;  %v3561_v26 = vadd.f32 1.0, %v6821_v21 }
 0x8a8   :  { %6842 = vpow2.f32 %v6358_v33 }
 0x8a9   :  { %6844 = vpow2.f32 %v6360_v2  ;;  %v10486_v2 = vpop.f32.mrf.mxu1 }
 0x8aa   :  { %6846 = vpow2.f32 %v6363_v59  ;;  %13219 = vst [vmem:[#allocation256_spill] sm:$0xff] %v10486_v2  ;;  %v4130_v2 = vmul.f32 %v6817_v53, %v10172_v62  ;;  %v6366_v62 = vmul.f32 -1.442695, %v10311_v31  ;;  %v6368_v53 = vmul.f32 -1.442695, %v10333_v42 }
 0x8ab   :  { %v6823_v18 = vpop.eup %6822  ;;  %6848 = vpow2.f32 %v6365_v37  ;;  %v4132_v37 = vmul.f32 %v6819_v49, %v10194_v7 }
 0x8ac   :  { %v6825_v12 = vpop.eup %6824  ;;  %6850 = vrcp.f32 %v3559_v8  ;;  %v1511_v59 = vmul.f32 %v6823_v18, %v10132_v27  ;;  %v6367_v8 = vmul.f32 -1.442695, %v10323_v56  ;;  %v10496_v27 = vpop.f32.mrf.mxu1  ;;  %v4322_v49 = vmul.f32 %v4130_v2, %v10220_v25 }
 0x8ad   :  { %v6827_v33 = vpop.eup %6826  ;;  %6852 = vrcp.f32 %v3562_v23  ;;  %v3563_v11 = vadd.f32 1.0, %v6825_v12 }
 0x8ae   :  { %v6829_v58 = vpop.eup %6828  ;;  %6854 = vrcp.f32 %v3564_v52  ;;  %v3566_v21 = vadd.f32 1.0, %v6827_v33  ;;  %v4324_v52 = vmul.f32 %v4132_v37, %v10238_v4  ;;  %v10501_v12 = vmul.f32 %v10271_v3, %v1511_v59 }
 0x8af   :  { %v6831_v51 = vpop.eup %6830  ;;  %6856 = vpow2.f32 %v6362_v30  ;;  %v3568_v18 = vadd.f32 1.0, %v6829_v58  ;;  %v10509_v30 = vpop.f32.mrf.mxu0 }
 0x8b0   :  { %v6833_v22 = vpop.eup %6832  ;;  %6858 = vpow2.f32 %v6364_v38  ;;  %v1512_v23 = vmul.f32 %v6831_v51, %v10139_v29  ;;  %13220 = vst [vmem:[#allocation257_spill] sm:$0xff] %v10501_v12  ;;  %v4514_v33 = vpack.c.bf16 %v4324_v52, %v4322_v49 }
 0x8b1   :  { %v6835_v60 = vpop.eup %6834  ;;  %6860 = vpow2.f32 %v6369_v39  ;;  %v10514_v39 = vpop.f32.mrf.mxu1 }
 0x8b2   :  { %v10498_v7 = vpop.eup %6836  ;;  %6862 = vrcp.f32 %v3561_v26  ;;  %v10504_v38 = vmul.f32 %v10271_v3, %v1512_v23  ;;  %v6373_v3 = vmul.f32 -1.442695, %v10384_v6  ;;  %v4131_v2 = vmul.f32 %v6835_v60, %v10184_v61  ;;  %v10518_v59 = vpop.f32.mrf.mxu0 }
 0x8b3   :  { %v6839_v29 = vpop.eup %6838  ;;  %6864 = vpow2.f32 %v6367_v8  ;;  %v6371_v8 = vmul.f32 -1.442695, %v10362_v16  ;;  %v10524_v23 = vpop.f32.mrf.mxu1  ;;  %v4129_v60 = vmul.f32 %v6833_v22, %v10157_v0 }
 0x8b4   :  { %13221 = vst [vmem:[#allocation258_spill] sm:$0xff] %v10504_v38  ;;  %v6841_v4 = vpop.eup %6840  ;;  %6866 = vrcp.f32 %v3563_v11  ;;  %v1686_v26 = vpack.c.bf16 %v10504_v38, %v10501_v12  ;;  %v6370_v11 = vmul.f32 -1.442695, %v10350_v9  ;;  %13222 = vst [vmem:[#allocation259_spill] sm:$0xff] %v10524_v23  ;;  %v4323_v52 = vmul.f32 %v4131_v2, %v10230_v13  ;;  %v10532_v38 = vpop.f32.mrf.mxu0 }
 0x8b5   :  { %v6843_v58 = vpop.eup %6842  ;;  %6868 = vrcp.f32 %v3566_v21  ;;  %v4136_v37 = vmul.f32 %v6841_v4, %v10222_v50  ;;  %v4134_v49 = vmul.f32 %v6839_v29, %v10206_v57  ;;  %v10535_v13 = vpop.f32.mrf.mxu1  ;;  %v6375_v2 = vmul.f32 -1.442695, %v10401_v43 }
 0x8b6   :  { %v6845_v25 = vpop.eup %6844  ;;  %6870 = vrcp.f32 %v3568_v18  ;;  %6273 = vmatmul.mubr.msk.bf16.gmra.mxu0 %vm886_vm0, %v1686_v26  ;;  %6321 = vmatmul.mubr.msk.bf16.gmra.mxu1 %vm886_vm0, %v1686_v26  ;;  %v3565_v21 = vadd.f32 1.0, %v6843_v58 }
 0x8b7   :  { %v6847_v51 = vpop.eup %6846  ;;  %6872 = vpow2.f32 %v6366_v62  ;;  %4769 = vmatprep.mubr.bf16.mxu0 %v4514_v33  ;;  %2736 = vmatprep.mubr.bf16.mxu1 %v12989_v5  ;;  %v3567_v26 = vadd.f32 1.0, %v6845_v25  ;;  %v4328_v50 = vmul.f32 %v4136_v37, %v10254_v19  ;;  %v4321_v33 = vmul.f32 %v4129_v60, %v10212_v10 }
 0x8b8   :  { %v6849_v61 = vpop.eup %6848  ;;  %6874 = vpow2.f32 %v6368_v53  ;;  %v3570_v4 = vadd.f32 1.0, %v6847_v51  ;;  %v4326_v0 = vmul.f32 %v4134_v49, %v10246_v1  ;;  %v6372_v19 = vmul.f32 -1.442695, %v10372_v54  ;;  %v10541_v1 = vpop.f32.mrf.mxu0 }
 0x8b9   :  { %v6851_v18 = vpop.eup %6850  ;;  %6876 = vpow2.f32 %v6373_v3  ;;  %v3572_v22 = vadd.f32 1.0, %v6849_v61  ;;  %v4513_v57 = vpack.c.bf16 %v4323_v52, %v4321_v33  ;;  %v6377_v10 = vmul.f32 -1.442695, %v10423_v24  ;;  %v10546_v61 = vpop.f32.mrf.mxu1 }
 0x8ba   :  { %v6853_v62 = vpop.eup %6852  ;;  %6878 = vpow2.f32 %v6370_v11  ;;  %v4516_v58 = vpack.c.bf16 %v4328_v50, %v4326_v0  ;;  %v4135_v25 = vmul.f32 %v6851_v18, %v10214_v46  ;;  %v13223_v11 = vld [vmem:[#allocation7_spill] sm:$0xff]  ;;  %v4133_v60 = vmul.f32 %v10498_v7, %v10201_v55  ;;  %v10556_v33 = vpop.f32.mrf.mxu0 }
 0x8bb   :  { %v6855_v12 = vpop.eup %6854  ;;  %6880 = vpow2.f32 %v6371_v8  ;;  %13224 = vst [vmem:[#allocation7_spill] sm:$0xff] %v10546_v61  ;;  %v4138_v49 = vmul.f32 %v6853_v62, %v10236_v20  ;;  %v6376_v62 = vmul.f32 -1.442695, %v10415_v47  ;;  %v13258_v61 = vld [vmem:[#allocation234_spill] sm:$0xff] }
 0x8bc   :  { %v6857_v53 = vpop.eup %6856  ;;  %6882 = vrcp.f32 %v3565_v21  ;;  %v4140_v37 = vmul.f32 %v6855_v12, %v10244_v41  ;;  %v4327_v52 = vmul.f32 %v4135_v25, %v10250_v63  ;;  %v4325_v50 = vmul.f32 %v4133_v60, %v10242_v44  ;;  %v10562_v0 = vpop.f32.mrf.mxu0 }
 0x8bd   :  { %v6859_v29 = vpop.eup %6858  ;;  %6884 = vrcp.f32 %v3567_v26  ;;  %v3569_v8 = vadd.f32 1.0, %v6857_v53  ;;  %v4330_v63 = vmul.f32 %v4138_v49, %v10266_v45 }
 0x8be   :  { %v6861_v3 = vpop.eup %6860  ;;  %6886 = vrcp.f32 %v3570_v4  ;;  %6322 = vmatmul.mubr.msk.bf16.gmra.mxu1 %vm886_vm0, %v13223_v11  ;;  %4770 = vmatmul.mubr.bf16.vlgmr.msra.gmra.mxu0 %v4513_v57  ;;  %v3571_v21 = vadd.f32 1.0, %v6859_v29  ;;  %v4332_v41 = vmul.f32 %v4140_v37, %v10296_v40  ;;  %v6374_v4 = vmul.f32 -1.442695, %v10391_v48 }
 0x8bf   :  { %v6863_v51 = vpop.eup %6862  ;;  %6888 = vrcp.f32 %v3572_v22  ;;  %4777 = vmatprep.mubr.bf16.mxu0 %v4516_v58  ;;  %2746 = vmatprep.mubr.bf16.mxu1 %v12989_v5  ;;  %v3576_v12 = vadd.f32 1.0, %v6861_v3  ;;  %v10559_v22 = vpop.f32.mrf.mxu1  ;;  %v4515_v40 = vpack.c.bf16 %v4327_v52, %v4325_v50  ;;  %v6381_v57 = vmul.f32 -1.442695, %v10449_v15  ;;  %v13226_v58 = vld [vmem:[#allocation241_spill] sm:$0xff]  ;;  %v13227_v3 = vld [vmem:[#allocation10_spill] sm:$0xff] }
 0x8c0   :  { %v6865_v46 = vpop.eup %6864  ;;  %6890 = vpow2.f32 %v6372_v19  ;;  %v4518_v53 = vpack.c.bf16 %v4332_v41, %v4330_v63  ;;  %v13231_v41 = vld [vmem:[#allocation206_spill] sm:$0xff] }
 0x8c1   :  { %v6867_v18 = vpop.eup %6866  ;;  %6892 = vpow2.f32 %v6377_v10  ;;  %v3574_v7 = vadd.f32 1.0, %v6865_v46  ;;  %v10565_v19 = vpop.f32.mrf.mxu1  ;;  %v6379_v10 = vmul.f32 -1.442695, %v13226_v58  ;;  %v13229_v46 = vld [vmem:[#allocation205_spill] sm:$0xff]  ;;  %v13232_v50 = vld [vmem:[#allocation222_spill] sm:$0xff] }
 0x8c2   :  { %v6869_v26 = vpop.eup %6868  ;;  %6894 = vpow2.f32 %v6375_v2  ;;  %13225 = vst [vmem:[#allocation260_spill] sm:$0xff] %v10565_v19  ;;  %v4139_v45 = vmul.f32 %v6867_v18, %v10240_v34  ;;  %v13228_v2 = vld [vmem:[#allocation208_spill] sm:$0xff]  ;;  %v4137_v60 = vmul.f32 %v6863_v51, %v13229_v46  ;;  %v10575_v18 = vpop.f32.mrf.mxu0 }
 0x8c3   :  { %v6871_v55 = vpop.eup %6870  ;;  %6896 = vrcp.f32 %v3569_v8  ;;  %v10579_v63 = vpop.f32.mrf.mxu1 }
 0x8c4   :  { %v6873_v20 = vpop.eup %6872  ;;  %6898 = vrcp.f32 %v3571_v21  ;;  %v4144_v11 = vmul.f32 %v6871_v55, %v13228_v2  ;;  %v13230_v21 = vld [vmem:[#allocation212_spill] sm:$0xff]  ;;  %13233 = vst [vmem:[#allocation241_spill] sm:$0xff] %v10579_v63  ;;  %v13250_v63 = vld [vmem:[#allocation214_spill] sm:$0xff] }
 0x8c5   :  { %v6875_v44 = vpop.eup %6874  ;;  %6900 = vrcp.f32 %v3576_v12  ;;  %v3573_v37 = vadd.f32 1.0, %v6873_v20  ;;  %v4331_v34 = vmul.f32 %v4139_v45, %v13230_v21  ;;  %v4142_v12 = vmul.f32 %v6869_v26, %v13231_v41  ;;  %v13234_v20 = vld [vmem:[#allocation207_spill] sm:$0xff]  ;;  %v13235_v45 = vld [vmem:[#allocation218_spill] sm:$0xff]  ;;  %v13239_v41 = vld [vmem:[#allocation13_spill] sm:$0xff] }
 0x8c6   :  { %v6877_v29 = vpop.eup %6876  ;;  %6902 = vpow2.f32 %v6374_v4  ;;  %6323 = vmatmul.mubr.msk.bf16.gmra.mxu1 %vm886_vm0, %v13227_v3  ;;  %4778 = vmatmul.mubr.bf16.gmra.mxu0 %v4515_v40  ;;  %v3575_v52 = vadd.f32 1.0, %v6875_v44  ;;  %v4336_v4 = vmul.f32 %v4144_v11, %v13232_v50  ;;  %v4329_v40 = vmul.f32 %v4137_v60, %v13234_v20  ;;  %v13236_v26 = vld [vmem:[#allocation243_spill] sm:$0xff]  ;;  %v10584_v11 = vpop.f32.mrf.mxu0 }
 0x8c7   :  { %v6879_v25 = vpop.eup %6878  ;;  %6904 = vrcp.f32 %v3574_v7  ;;  %4785 = vmatprep.mubr.bf16.mxu0 %v4518_v53  ;;  %2756 = vmatprep.mubr.bf16.mxu1 %v12989_v5  ;;  %v3580_v55 = vadd.f32 1.0, %v6877_v29  ;;  %v4334_v44 = vmul.f32 %v4142_v12, %v13235_v45  ;;  %v6380_v46 = vmul.f32 -1.442695, %v13236_v26  ;;  %v10587_v60 = vpop.f32.mrf.mxu1  ;;  %v13240_v12 = vld [vmem:[#allocation248_spill] sm:$0xff] }
 0x8c8   :  { %v6881_v8 = vpop.eup %6880  ;;  %6906 = vpow2.f32 %v6376_v62  ;;  %v3577_v53 = vadd.f32 1.0, %v6879_v25  ;;  %v4517_v2 = vpack.c.bf16 %v4331_v34, %v4329_v40  ;;  %v6385_v21 = vmul.f32 -1.442695, %v10472_v35  ;;  %13237 = vst [vmem:[#allocation10_spill] sm:$0xff] %v10587_v60  ;;  %v10598_v40 = vpop.f32.mrf.mxu0 }
 0x8c9   :  { %v6883_v49 = vpop.eup %6882  ;;  %6908 = vpow2.f32 %v6381_v57  ;;  %v3578_v62 = vadd.f32 1.0, %v6881_v8  ;;  %v4520_v29 = vpack.c.bf16 %v4336_v4, %v4334_v44  ;;  %v6383_v50 = vmul.f32 -1.442695, %v13240_v12  ;;  %v13242_v44 = vld [vmem:[#allocation231_spill] sm:$0xff] }
 0x8ca   :  { %v6885_v7 = vpop.eup %6884  ;;  %6910 = vpow2.f32 %v6379_v10 }
 0x8cb   :  { %v6887_v51 = vpop.eup %6886  ;;  %6912 = vrcp.f32 %v3573_v37  ;;  %v4143_v25 = vmul.f32 %v6885_v7, %v10256_v32  ;;  %v13238_v37 = vld [vmem:[#allocation239_spill] sm:$0xff]  ;;  %v13241_v32 = vld [vmem:[#allocation220_spill] sm:$0xff] }
 0x8cc   :  { %v6889_v3 = vpop.eup %6888  ;;  %6914 = vrcp.f32 %v3575_v52  ;;  %v6378_v8 = vmul.f32 -1.442695, %v13238_v37  ;;  %v4146_v45 = vmul.f32 %v6887_v51, %v10282_v36 }
 0x8cd   :  { %v6891_v57 = vpop.eup %6890  ;;  %6916 = vrcp.f32 %v3580_v55  ;;  %v4148_v52 = vmul.f32 %v6889_v3, %v10304_v28  ;;  %v4141_v55 = vmul.f32 %v6883_v49, %v10248_v14  ;;  %v4335_v7 = vmul.f32 %v4143_v25, %v13241_v32  ;;  %v10602_v3 = vpop.f32.mrf.mxu1  ;;  %v13246_v25 = vld [vmem:[#allocation246_spill] sm:$0xff] }
 0x8ce   :  { %v6893_v10 = vpop.eup %6892  ;;  %6918 = vrcp.f32 %v3577_v53  ;;  %6324 = vmatmul.mubr.msk.bf16.gmra.mxu1 %vm886_vm0, %v13239_v41  ;;  %4786 = vmatmul.mubr.bf16.gmra.mxu0 %v4517_v2  ;;  %v3579_v20 = vadd.f32 1.0, %v6891_v57  ;;  %13243 = vst [vmem:[#allocation208_spill] sm:$0xff] %v10602_v3  ;;  %v10605_v14 = vpop.f32.mrf.mxu0  ;;  %v6382_v32 = vmul.f32 -1.442695, %v13246_v25 }
 0x8cf   :  { %v6895_v34 = vpop.eup %6894  ;;  %6920 = vrcp.f32 %v3578_v62  ;;  %4793 = vmatprep.mubr.bf16.mxu0 %v4520_v29  ;;  %2766 = vmatprep.mubr.bf16.mxu1 %v12989_v5  ;;  %v4340_v28 = vmul.f32 %v4148_v52, %v13242_v44  ;;  %v3584_v62 = vadd.f32 1.0, %v6893_v10  ;;  %v13244_v29 = vld [vmem:[#allocation216_spill] sm:$0xff]  ;;  %v10609_v36 = vpop.f32.mrf.mxu1 }
 0x8d0   :  { %v6897_v4 = vpop.eup %6896  ;;  %6922 = vpow2.f32 %v6380_v46  ;;  %v4333_v41 = vmul.f32 %v4141_v55, %v13244_v29  ;;  %v3582_v19 = vadd.f32 1.0, %v6895_v34  ;;  %v13245_v46 = vld [vmem:[#allocation227_spill] sm:$0xff]  ;;  %13247 = vst [vmem:[#allocation205_spill] sm:$0xff] %v10609_v36  ;;  %v13249_v55 = vld [vmem:[#allocation224_spill] sm:$0xff] }
 0x8d1   :  { %v6899_v53 = vpop.eup %6898  ;;  %6924 = vpow2.f32 %v6385_v21  ;;  %v4338_v57 = vmul.f32 %v4146_v45, %v13245_v46  ;;  %v13248_v21 = vld [vmem:[#allocation250_spill] sm:$0xff]  ;;  %v13251_v36 = vld [vmem:[#allocation16_spill] sm:$0xff] }
 0x8d2   :  { %v6901_v2 = vpop.eup %6900  ;;  %6926 = vpow2.f32 %v6378_v8  ;;  %v4519_v10 = vpack.c.bf16 %v4335_v7, %v4333_v41  ;;  %v6384_v52 = vmul.f32 -1.442695, %v13248_v21  ;;  %v6389_v8 = vmul.f32 -1.442695, %v10509_v30  ;;  %v13255_v41 = vld [vmem:[#allocation229_spill] sm:$0xff] }
 0x8d3   :  { %v6903_v49 = vpop.eup %6902  ;;  %6928 = vpow2.f32 %v6383_v50  ;;  %v4522_v60 = vpack.c.bf16 %v4340_v28, %v4338_v57  ;;  %v4152_v34 = vmul.f32 %v6901_v2, %v13249_v55  ;;  %v4147_v45 = vmul.f32 %v6899_v53, %v13250_v63  ;;  %v10615_v50 = vpop.f32.mrf.mxu0  ;;  %v13252_v28 = vld [vmem:[#allocation255_spill] sm:$0xff]  ;;  %v13254_v53 = vld [vmem:[#allocation209_spill] sm:$0xff] }
 0x8d4   :  { %v6905_v51 = vpop.eup %6904  ;;  %6930 = vrcp.f32 %v3579_v20  ;;  %v3581_v46 = vadd.f32 1.0, %v6903_v49  ;;  %v6387_v2 = vmul.f32 -1.442695, %v13252_v28 }
 0x8d5   :  { %v6907_v44 = vpop.eup %6906  ;;  %6932 = vrcp.f32 %v3584_v62  ;;  %v4150_v20 = vmul.f32 %v6905_v51, %v10323_v56  ;;  %v10621_v62 = vpop.f32.mrf.mxu1  ;;  %v4339_v49 = vmul.f32 %v4147_v45, %v13255_v41 }
 0x8d6   :  { %v6909_v29 = vpop.eup %6908  ;;  %6934 = vrcp.f32 %v3582_v19  ;;  %6325 = vmatmul.mubr.msk.bf16.gmra.mxu1 %vm886_vm0, %v13251_v36  ;;  %4794 = vmatmul.mubr.bf16.gmra.mxu0 %v4519_v10  ;;  %13253 = vst [vmem:[#allocation212_spill] sm:$0xff] %v10621_v62  ;;  %v4145_v19 = vmul.f32 %v6897_v4, %v13254_v53  ;;  %v3583_v57 = vadd.f32 1.0, %v6907_v44  ;;  %v13256_v10 = vld [vmem:[#allocation238_spill] sm:$0xff]  ;;  %v13259_v4 = vld [vmem:[#allocation253_spill] sm:$0xff] }
 0x8d7   :  { %v6911_v7 = vpop.eup %6910  ;;  %6936 = vpow2.f32 %v6382_v32  ;;  %4801 = vmatprep.mubr.bf16.mxu0 %v4522_v60  ;;  %2776 = vmatprep.mubr.bf16.mxu1 %v12989_v5  ;;  %v4344_v55 = vmul.f32 %v4152_v34, %v13256_v10  ;;  %v3588_v23 = vadd.f32 1.0, %v6909_v29  ;;  %v13257_v32 = vld [vmem:[#allocation225_spill] sm:$0xff]  ;;  %v10628_v60 = vpop.f32.mrf.mxu0  ;;  %v4342_v28 = vmul.f32 %v4150_v20, %v13258_v61 }
 0x8d8   :  { %v6913_v63 = vpop.eup %6912  ;;  %6938 = vpow2.f32 %v6384_v52  ;;  %v4337_v51 = vmul.f32 %v4145_v19, %v13257_v32  ;;  %v3586_v62 = vadd.f32 1.0, %v6911_v7  ;;  %v6386_v53 = vmul.f32 -1.442695, %v13259_v4  ;;  %v10632_v44 = vpop.f32.mrf.mxu1 }
 0x8d9   :  { %v6915_v36 = vpop.eup %6914  ;;  %6940 = vpow2.f32 %v6389_v8  ;;  %13260 = vst [vmem:[#allocation206_spill] sm:$0xff] %v10632_v44  ;;  %v6388_v8 = vmul.f32 -1.442695, %v10491_v17  ;;  %v6393_v19 = vmul.f32 -1.442695, %v10556_v33  ;;  %v4149_v20 = vmul.f32 %v6913_v63, %v10311_v31  ;;  %v10640_v41 = vpop.f32.mrf.mxu0 }
 0x8da   :  { %v6917_v56 = vpop.eup %6916  ;;  %6942 = vrcp.f32 %v3581_v46  ;;  %v4521_v45 = vpack.c.bf16 %v4339_v49, %v4337_v51  ;;  %v4151_v34 = vmul.f32 %v6915_v36, %v10333_v42  ;;  %v4524_v46 = vpack.c.bf16 %v4344_v55, %v4342_v28  ;;  %v13261_v49 = vld [vmem:[#allocation19_spill] sm:$0xff]  ;;  %v13263_v55 = vld [vmem:[#allocation245_spill] sm:$0xff] }
 0x8db   :  { %v6919_v3 = vpop.eup %6918  ;;  %6944 = vpow2.f32 %v6387_v2  ;;  %v4156_v7 = vmul.f32 %v6917_v56, %v10384_v6  ;;  %v6390_v2 = vmul.f32 -1.442695, %v10518_v59  ;;  %v6391_v6 = vmul.f32 -1.442695, %v10532_v38  ;;  %v10650_v36 = vpop.f32.mrf.mxu0 }
 0x8dc   :  { %v6921_v52 = vpop.eup %6920  ;;  %6946 = vrcp.f32 %v3583_v57 }
 0x8dd   :  { %v6923_v29 = vpop.eup %6922  ;;  %6948 = vrcp.f32 %v3588_v23  ;;  %v4154_v28 = vmul.f32 %v6921_v52, %v10362_v16  ;;  %v10646_v23 = vpop.f32.mrf.mxu1  ;;  %v4348_v56 = vmul.f32 %v4156_v7, %v13263_v55  ;;  %v6392_v7 = vmul.f32 -1.442695, %v10541_v1 }
 0x8de   :  { %v6925_v61 = vpop.eup %6924  ;;  %6950 = vrcp.f32 %v3586_v62  ;;  %6326 = vmatmul.mubr.msk.bf16.gmra.mxu1 %vm886_vm0, %v13261_v49  ;;  %4802 = vmatmul.mubr.bf16.gmra.mxu0 %v4521_v45  ;;  %v13262_v62 = vld [vmem:[#allocation237_spill] sm:$0xff]  ;;  %v3587_v57 = vadd.f32 1.0, %v6923_v29  ;;  %v13265_v49 = vld [vmem:[#allocation242_spill] sm:$0xff] }
 0x8df   :  { %v6927_v42 = vpop.eup %6926  ;;  %6952 = vpow2.f32 %v6386_v53  ;;  %4809 = vmatprep.mubr.bf16.mxu0 %v4524_v46  ;;  %2786 = vmatprep.mubr.bf16.mxu1 %v12989_v5  ;;  %v4343_v63 = vmul.f32 %v4151_v34, %v13262_v62  ;;  %v3592_v32 = vadd.f32 1.0, %v6925_v61  ;;  %v10653_v16 = vpop.f32.mrf.mxu1  ;;  %v13264_v53 = vld [vmem:[#allocation233_spill] sm:$0xff]  ;;  %v4346_v44 = vmul.f32 %v4154_v28, %v13265_v49 }
 0x8e0   :  { %v6929_v31 = vpop.eup %6928  ;;  %6954 = vpow2.f32 %v6388_v8  ;;  %v4341_v52 = vmul.f32 %v4149_v20, %v13264_v53  ;;  %v3585_v45 = vadd.f32 1.0, %v6927_v42  ;;  %v6397_v42 = vmul.f32 -1.442695, %v10598_v40 }
 0x8e1   :  { %v6931_v10 = vpop.eup %6930  ;;  %6956 = vpow2.f32 %v6393_v19  ;;  %v3590_v34 = vadd.f32 1.0, %v6929_v31  ;;  %v10659_v19 = vpop.f32.mrf.mxu0  ;;  %v4526_v55 = vpack.c.bf16 %v4348_v56, %v4346_v44  ;;  %v13266_v31 = vld [vmem:[#allocation22_spill] sm:$0xff] }
 0x8e2   :  { %v6933_v51 = vpop.eup %6932  ;;  %6958 = vpow2.f32 %v6390_v2  ;;  %v4523_v29 = vpack.c.bf16 %v4343_v63, %v4341_v52  ;;  %v4155_v62 = vmul.f32 %v6931_v10, %v10372_v54  ;;  %v10662_v2 = vpop.f32.mrf.mxu1  ;;  %v6395_v54 = vmul.f32 -1.442695, %v10575_v18  ;;  %v13267_v10 = vld [vmem:[#allocation244_spill] sm:$0xff] }
 0x8e3   :  { %v6935_v46 = vpop.eup %6934  ;;  %6960 = vpow2.f32 %v6391_v6  ;;  %v4160_v20 = vmul.f32 %v6933_v51, %v10423_v24  ;;  %v4153_v6 = vmul.f32 %v6919_v3, %v10350_v9  ;;  %v10672_v9 = vpop.f32.mrf.mxu0  ;;  %v13268_v51 = vld [vmem:[#allocation252_spill] sm:$0xff] }
 0x8e4   :  { %v6937_v8 = vpop.eup %6936  ;;  %6962 = vrcp.f32 %v3587_v57  ;;  %v4158_v44 = vmul.f32 %v6935_v46, %v10401_v43  ;;  %v4347_v56 = vmul.f32 %v4155_v62, %v13267_v10  ;;  %v13269_v46 = vld [vmem:[#allocation240_spill] sm:$0xff] }
 0x8e5   :  { %v6939_v61 = vpop.eup %6938  ;;  %6964 = vrcp.f32 %v3592_v32  ;;  %v3589_v57 = vadd.f32 1.0, %v6937_v8  ;;  %v4352_v53 = vmul.f32 %v4160_v20, %v13268_v51  ;;  %v4345_v49 = vmul.f32 %v4153_v6, %v13269_v46 }
 0x8e6   :  { %v6941_v28 = vpop.eup %6940  ;;  %6966 = vrcp.f32 %v3585_v45  ;;  %6327 = vmatmul.mubr.msk.bf16.gmra.mxu1 %vm886_vm0, %v13266_v31  ;;  %4810 = vmatmul.mubr.bf16.gmra.mxu0 %v4523_v29  ;;  %v3591_v32 = vadd.f32 1.0, %v6939_v61  ;;  %v10675_v45 = vpop.f32.mrf.mxu1  ;;  %v13270_v29 = vld [vmem:[#allocation249_spill] sm:$0xff]  ;;  %v6396_v20 = vmul.f32 -1.442695, %v10584_v11 }
 0x8e7   :  { %v6943_v63 = vpop.eup %6942  ;;  %6968 = vrcp.f32 %v3590_v34  ;;  %4817 = vmatprep.mubr.bf16.mxu0 %v4526_v55  ;;  %2796 = vmatprep.mubr.bf16.mxu1 %v12989_v5  ;;  %v3596_v52 = vadd.f32 1.0, %v6941_v28  ;;  %v6394_v34 = vmul.f32 -1.442695, %v10562_v0  ;;  %v4350_v62 = vmul.f32 %v4158_v44, %v13270_v29  ;;  %v10682_v28 = vpop.f32.mrf.mxu0 }
 0x8e8   :  { %v6945_v24 = vpop.eup %6944  ;;  %6970 = vpow2.f32 %v6392_v7  ;;  %v4525_v55 = vpack.c.bf16 %v4347_v56, %v4345_v49  ;;  %v6401_v44 = vmul.f32 -1.442695, %v10640_v41 }
 0x8e9   :  { %v6947_v3 = vpop.eup %6946  ;;  %6972 = vpow2.f32 %v6397_v42  ;;  %v3594_v7 = vadd.f32 1.0, %v6945_v24  ;;  %v4528_v10 = vpack.c.bf16 %v4352_v53, %v4350_v62  ;;  %v4157_v24 = vmul.f32 %v6943_v63, %v10391_v48  ;;  %v10690_v56 = vpop.f32.mrf.mxu0  ;;  %v13272_v63 = vld [vmem:[#allocation251_spill] sm:$0xff] }
 0x8ea   :  { %v6949_v43 = vpop.eup %6948  ;;  %6974 = vpow2.f32 %v6395_v54  ;;  %v4159_v31 = vmul.f32 %v6947_v3, %v10415_v47  ;;  %v10685_v54 = vpop.f32.mrf.mxu1  ;;  %v6399_v47 = vmul.f32 -1.442695, %v10615_v50  ;;  %v13273_v62 = vld [vmem:[#allocation247_spill] sm:$0xff] }
 0x8eb   :  { %v6951_v8 = vpop.eup %6950  ;;  %6976 = vrcp.f32 %v3589_v57  ;;  %v4164_v6 = vmul.f32 %v6949_v43, %v10449_v15 }
 0x8ec   :  { %v6953_v61 = vpop.eup %6952  ;;  %6978 = vrcp.f32 %v3591_v32  ;;  %v13271_v32 = vld [vmem:[#allocation25_spill] sm:$0xff]  ;;  %v4162_v15 = vmul.f32 %v6951_v8, %v13226_v58  ;;  %v10695_v53 = vpop.f32.mrf.mxu1  ;;  %v4349_v58 = vmul.f32 %v4157_v24, %v13273_v62 }
 0x8ed   :  { %v6955_v42 = vpop.eup %6954  ;;  %6980 = vrcp.f32 %v3596_v52  ;;  %v3593_v51 = vadd.f32 1.0, %v6953_v61  ;;  %v4351_v52 = vmul.f32 %v4159_v31, %v13272_v63  ;;  %v4356_v49 = vmul.f32 %v4164_v6, %v10514_v39  ;;  %v13275_v63 = vld [vmem:[#allocation28_spill] sm:$0xff] }
 0x8ee   :  { %v6957_v57 = vpop.eup %6956  ;;  %6982 = vpow2.f32 %v6394_v34  ;;  %6328 = vmatmul.mubr.msk.bf16.gmra.mxu1 %vm886_vm0, %v13271_v32  ;;  %4818 = vmatmul.mubr.bf16.gmra.mxu0 %v4525_v55  ;;  %v3595_v43 = vadd.f32 1.0, %v6955_v42  ;;  %v13274_v55 = vld [vmem:[#allocation256_spill] sm:$0xff]  ;;  %v10704_v31 = vpop.f32.mrf.mxu1  ;;  %v6400_v6 = vmul.f32 -1.442695, %v10628_v60 }
 0x8ef   :  { %v6959_v3 = vpop.eup %6958  ;;  %6984 = vrcp.f32 %v3594_v7  ;;  %4825 = vmatprep.mubr.bf16.mxu0 %v4528_v10  ;;  %2806 = vmatprep.mubr.bf16.mxu1 %v12989_v5  ;;  %v3600_v34 = vadd.f32 1.0, %v6957_v57  ;;  %v10701_v7 = vpop.f32.mrf.mxu0  ;;  %v4354_v10 = vmul.f32 %v4162_v15, %v13274_v55  ;;  %v4527_v42 = vpack.c.bf16 %v4351_v52, %v4349_v58 }
 0x8f0   :  { %v6961_v48 = vpop.eup %6960  ;;  %6986 = vpow2.f32 %v6396_v20  ;;  %v3597_v8 = vadd.f32 1.0, %v6959_v3 }
 0x8f1   :  { %v6963_v46 = vpop.eup %6962  ;;  %6988 = vpow2.f32 %v6401_v44  ;;  %v3598_v32 = vadd.f32 1.0, %v6961_v48  ;;  %v4530_v57 = vpack.c.bf16 %v4356_v49, %v4354_v10  ;;  %v10712_v48 = vpop.f32.mrf.mxu0 }
 0x8f2   :  { %v6965_v29 = vpop.eup %6964  ;;  %6990 = vpow2.f32 %v6399_v47  ;;  %v4163_v39 = vmul.f32 %v6963_v46, %v13236_v26  ;;  %v6405_v47 = vmul.f32 -1.442695, %v10682_v28 }
 0x8f3   :  { %v6967_v61 = vpop.eup %6966  ;;  %6992 = vrcp.f32 %v3593_v51  ;;  %v4168_v24 = vmul.f32 %v6965_v29, %v10472_v35  ;;  %v6398_v51 = vmul.f32 -1.442695, %v10605_v14  ;;  %v10717_v35 = vpop.f32.mrf.mxu1 }
 0x8f4   :  { %v6969_v20 = vpop.eup %6968  ;;  %6994 = vrcp.f32 %v3595_v43  ;;  %v4161_v15 = vmul.f32 %v6967_v61, %v13238_v37  ;;  %v6403_v43 = vmul.f32 -1.442695, %v10659_v19  ;;  %v4355_v46 = vmul.f32 %v4163_v39, %v10496_v27  ;;  %v10724_v55 = vpop.f32.mrf.mxu0 }
 0x8f5   :  { %v6971_v44 = vpop.eup %6970  ;;  %6996 = vrcp.f32 %v3600_v34  ;;  %v4166_v52 = vmul.f32 %v6969_v20, %v13240_v12  ;;  %v4360_v29 = vmul.f32 %v4168_v24, %v10559_v22  ;;  %v13276_v12 = vld [vmem:[#allocation254_spill] sm:$0xff]  ;;  %v10727_v20 = vpop.f32.mrf.mxu1  ;;  %v6404_v27 = vmul.f32 -1.442695, %v10672_v9 }
 0x8f6   :  { %v6973_v3 = vpop.eup %6972  ;;  %6998 = vrcp.f32 %v3597_v8  ;;  %6329 = vmatmul.mubr.msk.bf16.gmra.mxu1 %vm886_vm0, %v13275_v63  ;;  %4826 = vmatmul.mubr.bf16.gmra.mxu0 %v4527_v42  ;;  %v3599_v49 = vadd.f32 1.0, %v6971_v44  ;;  %v4353_v8 = vmul.f32 %v4161_v15, %v13276_v12  ;;  %v13277_v63 = vld [vmem:[#allocation31_spill] sm:$0xff] }
 0x8f7   :  { %v6975_v26 = vpop.eup %6974  ;;  %7000 = vrcp.f32 %v3598_v32  ;;  %4833 = vmatprep.mubr.bf16.mxu0 %v4530_v57  ;;  %2816 = vmatprep.mubr.bf16.mxu1 %v12989_v5  ;;  %v3604_v62 = vadd.f32 1.0, %v6973_v3  ;;  %v4358_v32 = vmul.f32 %v4166_v52, %v10535_v13  ;;  %v6409_v13 = vmul.f32 -1.442695, %v10724_v55 }
 0x8f8   :  { %v6977_v37 = vpop.eup %6976  ;;  %7002 = vpow2.f32 %v6400_v6  ;;  %v3602_v61 = vadd.f32 1.0, %v6975_v26  ;;  %v4529_v39 = vpack.c.bf16 %v4355_v46, %v4353_v8  ;;  %v6402_v6 = vmul.f32 -1.442695, %v10650_v36  ;;  %v13278_v26 = vld [vmem:[#allocation255_spill] sm:$0xff] }
 0x8f9   :  { %v6979_v34 = vpop.eup %6978  ;;  %7004 = vpow2.f32 %v6405_v47  ;;  %v4532_v57 = vpack.c.bf16 %v4360_v29, %v4358_v32  ;;  %v10733_v47 = vpop.f32.mrf.mxu1  ;;  %v4165_v15 = vmul.f32 %v6977_v37, %v13246_v25  ;;  %v13279_v46 = vld [vmem:[#allocation7_spill] sm:$0xff]  ;;  %v13280_v37 = vld [vmem:[#allocation208_spill] sm:$0xff] }
 0x8fa   :  { %v6981_v58 = vpop.eup %6980  ;;  %7006 = vpow2.f32 %v6398_v51  ;;  %v4167_v22 = vmul.f32 %v6979_v34, %v13248_v21  ;;  %v13281_v8 = vld [vmem:[#allocation259_spill] sm:$0xff] }
 0x8fb   :  { %v6983_v10 = vpop.eup %6982  ;;  %7008 = vpow2.f32 %v6403_v43  ;;  %v4172_v24 = vmul.f32 %v6981_v58, %v10509_v30  ;;  %v6407_v30 = vmul.f32 -1.442695, %v10701_v7  ;;  %v10744_v58 = vpop.f32.mrf.mxu1 }
 0x8fc   :  { %v6985_v42 = vpop.eup %6984  ;;  %7010 = vrcp.f32 %v3599_v49  ;;  %v3601_v51 = vadd.f32 1.0, %v6983_v10  ;;  %v4359_v49 = vmul.f32 %v4167_v22, %v13279_v46  ;;  %v13285_v46 = vld [vmem:[#allocation34_spill] sm:$0xff] }
 0x8fd   :  { %v6987_v44 = vpop.eup %6986  ;;  %7012 = vrcp.f32 %v3604_v62  ;;  %v4170_v52 = vmul.f32 %v6985_v42, %v13278_v26  ;;  %v4364_v29 = vmul.f32 %v4172_v24, %v13280_v37  ;;  %v13284_v26 = vld [vmem:[#allocation88_spill] sm:$0xff]  ;;  %v13287_v37 = vld [vmem:[#allocation10_spill] sm:$0xff] }
 0x8fe   :  { %v6989_v3 = vpop.eup %6988  ;;  %7014 = vrcp.f32 %v3602_v61  ;;  %6330 = vmatmul.mubr.msk.bf16.gmra.mxu1 %vm886_vm0, %v13277_v63  ;;  %4834 = vmatmul.mubr.bf16.gmra.mxu0 %v4529_v39  ;;  %v3603_v34 = vadd.f32 1.0, %v6987_v44  ;;  %v4357_v61 = vmul.f32 %v4165_v15, %v13281_v8  ;;  %v6408_v39 = vmul.f32 -1.442695, %v10712_v48  ;;  %v10752_v15 = vpop.f32.mrf.mxu1 }
 0x8ff   :  { %v6991_v21 = vpop.eup %6990  ;;  %7016 = vpow2.f32 %v6404_v27  ;;  %4841 = vmatprep.mubr.bf16.mxu0 %v4532_v57  ;;  %2826 = vmatprep.mubr.bf16.mxu1 %v12989_v5  ;;  %v3608_v62 = vadd.f32 1.0, %v6989_v3  ;;  %v13282_v27 = vld [vmem:[#allocation241_spill] sm:$0xff] }
 0x900   :  { %v6993_v43 = vpop.eup %6992  ;;  %7018 = vpow2.f32 %v6402_v6  ;;  %v3606_v10 = vadd.f32 1.0, %v6991_v21  ;;  %v4362_v42 = vmul.f32 %v4170_v52, %v13282_v27  ;;  %v13283_v6 = vld [vmem:[#allocation87_spill] sm:$0xff]  ;;  %v4531_v57 = vpack.c.bf16 %v4359_v49, %v4357_v61  ;;  %v13286_v49 = vld [vmem:[#allocation89_spill] sm:$0xff]  ;;  %v10764_v8 = vpop.f32.mrf.mxu1 }
 0x901   :  { %v6995_v25 = vpop.eup %6994  ;;  %7020 = vpow2.f32 %v6409_v13  ;;  %v6442_v44 = vmul.f32 -1.442695, %v13283_v6  ;;  %v6443_v52 = vmul.f32 -1.442695, %v13284_v26 }
 0x902   :  { %v6997_v12 = vpop.eup %6996  ;;  %7022 = vrcp.f32 %v3601_v51  ;;  %v4171_v24 = vmul.f32 %v6995_v25, %v10491_v17  ;;  %v4534_v13 = vpack.c.bf16 %v4364_v29, %v4362_v42  ;;  %v6406_v51 = vmul.f32 -1.442695, %v10690_v56 }
 0x903   :  { %v6999_v32 = vpop.eup %6998  ;;  %7024 = vpow2.f32 %v6407_v30  ;;  %v4176_v63 = vmul.f32 %v6997_v12, %v10556_v33  ;;  %v4169_v30 = vmul.f32 %v6993_v43, %v13259_v4 }
 0x904   :  { %v7001_v22 = vpop.eup %7000  ;;  %7026 = vrcp.f32 %v3603_v34  ;;  %v6444_v34 = vmul.f32 -1.442695, %v13286_v49  ;;  %v4363_v29 = vmul.f32 %v4171_v24, %v13287_v37 }
 0x905   :  { %v7003_v3 = vpop.eup %7002  ;;  %7028 = vrcp.f32 %v3608_v62  ;;  %v4174_v33 = vmul.f32 %v7001_v22, %v10532_v38  ;;  %v4368_v43 = vmul.f32 %v4176_v63, %v10646_v23  ;;  %v13290_v63 = vld [vmem:[#allocation90_spill] sm:$0xff] }
 0x906   :  { %v7005_v21 = vpop.eup %7004  ;;  %7030 = vrcp.f32 %v3606_v10  ;;  %6331 = vmatmul.mubr.msk.bf16.gmra.mxu1 %vm886_vm0, %v13285_v46  ;;  %4842 = vmatmul.mubr.bf16.gmra.mxu0 %v4531_v57  ;;  %v3607_v62 = vadd.f32 1.0, %v7003_v3  ;;  %v13288_v10 = vld [vmem:[#allocation260_spill] sm:$0xff]  ;;  %v10768_v57 = vpop.f32.mrf.mxu1  ;;  %v13291_v46 = vld [vmem:[#allocation91_spill] sm:$0xff] }
 0x907   :  { %v7007_v17 = vpop.eup %7006  ;;  %7032 = vpow2.f32 %v6408_v39  ;;  %4849 = vmatprep.mubr.bf16.mxu0 %v4534_v13  ;;  %2836 = vmatprep.mubr.bf16.mxu1 %v12989_v5  ;;  %v3612_v12 = vadd.f32 1.0, %v7005_v21  ;;  %v4361_v38 = vmul.f32 %v4169_v30, %v13288_v10  ;;  %v13289_v39 = vld [vmem:[#allocation212_spill] sm:$0xff]  ;;  %v13294_v10 = vld [vmem:[#allocation205_spill] sm:$0xff] }
 0x908   :  { %v7009_v25 = vpop.eup %7008  ;;  %7034 = vpow2.f32 %v6442_v44  ;;  %v3605_v27 = vadd.f32 1.0, %v7007_v17  ;;  %v4366_v22 = vmul.f32 %v4174_v33, %v13289_v39  ;;  %v6446_v17 = vmul.f32 -1.442695, %v13291_v46  ;;  %v13292_v33 = vld [vmem:[#allocation37_spill] sm:$0xff] }
 0x909   :  { %v7011_v4 = vpop.eup %7010  ;;  %7036 = vpow2.f32 %v6406_v51  ;;  %v3610_v44 = vadd.f32 1.0, %v7009_v25  ;;  %v4533_v3 = vpack.c.bf16 %v4363_v29, %v4361_v38  ;;  %v6445_v51 = vmul.f32 -1.442695, %v13290_v63  ;;  %v10778_v29 = vpop.f32.mrf.mxu1 }
 0x90a   :  { %v7013_v61 = vpop.eup %7012  ;;  %7038 = vpow2.f32 %v6443_v52  ;;  %v4175_v23 = vmul.f32 %v7011_v4, %v10541_v1  ;;  %v4536_v21 = vpack.c.bf16 %v4368_v43, %v4366_v22 }
 0x90b   :  { %v7015_v42 = vpop.eup %7014  ;;  %7040 = vpow2.f32 %v6444_v34  ;;  %v4180_v52 = vmul.f32 %v7013_v61, %v10598_v40  ;;  %v4173_v34 = vmul.f32 %v6999_v32, %v10518_v59  ;;  %v10785_v39 = vpop.f32.mrf.mxu1 }
 0x90c   :  { %v7017_v24 = vpop.eup %7016  ;;  %7042 = vrcp.f32 %v3607_v62  ;;  %v4178_v1 = vmul.f32 %v7015_v42, %v10575_v18  ;;  %v13293_v62 = vld [vmem:[#allocation206_spill] sm:$0xff] }
 0x90d   :  { %v7019_v13 = vpop.eup %7018  ;;  %7044 = vrcp.f32 %v3612_v12  ;;  %v3611_v37 = vadd.f32 1.0, %v7017_v24  ;;  %v4367_v4 = vmul.f32 %v4175_v23, %v13293_v62  ;;  %v4372_v32 = vmul.f32 %v4180_v52, %v10685_v54 }
 0x90e   :  { %v7021_v30 = vpop.eup %7020  ;;  %7046 = vrcp.f32 %v3605_v27  ;;  %6332 = vmatmul.mubr.msk.bf16.gmra.mxu1 %vm886_vm0, %v13292_v33  ;;  %4850 = vmatmul.mubr.bf16.gmra.mxu0 %v4533_v3  ;;  %v3609_v43 = vadd.f32 1.0, %v7019_v13  ;;  %v4365_v18 = vmul.f32 %v4173_v34, %v13294_v10  ;;  %v4370_v27 = vmul.f32 %v4178_v1, %v10662_v2  ;;  %v13296_v13 = vld [vmem:[#allocation93_spill] sm:$0xff]  ;;  %v13297_v2 = vld [vmem:[#allocation96_spill] sm:$0xff] }
 0x90f   :  { %v7023_v25 = vpop.eup %7022  ;;  %7048 = vrcp.f32 %v3610_v44  ;;  %4857 = vmatprep.mubr.bf16.mxu0 %v4536_v21  ;;  %2846 = vmatprep.mubr.bf16.mxu1 %v12989_v5  ;;  %v3616_v12 = vadd.f32 1.0, %v7021_v30  ;;  %v13295_v44 = vld [vmem:[#allocation92_spill] sm:$0xff] }
 0x910   :  { %v7025_v40 = vpop.eup %7024  ;;  %7050 = vpow2.f32 %v6445_v51  ;;  %v6447_v24 = vmul.f32 -1.442695, %v13295_v44  ;;  %v4535_v3 = vpack.c.bf16 %v4367_v4, %v4365_v18  ;;  %v6448_v51 = vmul.f32 -1.442695, %v13296_v13  ;;  %v13298_v33 = vld [vmem:[#allocation40_spill] sm:$0xff] }
 0x911   :  { %v7027_v59 = vpop.eup %7026  ;;  %7052 = vpow2.f32 %v6446_v17  ;;  %v3614_v42 = vadd.f32 1.0, %v7025_v40  ;;  %v4538_v21 = vpack.c.bf16 %v4372_v32, %v4370_v27  ;;  %v6449_v17 = vmul.f32 -1.442695, %v13297_v2  ;;  %v10796_v40 = vpop.f32.mrf.mxu1 }
 0x912   :  { %v7029_v61 = vpop.eup %7028  ;;  %7054 = vrcp.f32 %v3611_v37  ;;  %v4179_v23 = vmul.f32 %v7027_v59, %v10584_v11  ;;  %v4177_v34 = vmul.f32 %v7023_v25, %v10562_v0 }
 0x913   :  { %v7031_v38 = vpop.eup %7030  ;;  %7056 = vrcp.f32 %v3609_v43  ;;  %v4184_v52 = vmul.f32 %v7029_v61, %v10640_v41 }
 0x914   :  { %v7033_v22 = vpop.eup %7032  ;;  %7058 = vrcp.f32 %v3616_v12  ;;  %v4182_v11 = vmul.f32 %v7031_v38, %v10615_v50  ;;  %v4371_v62 = vmul.f32 %v4179_v23, %v10675_v45  ;;  %v4369_v32 = vmul.f32 %v4177_v34, %v10653_v16 }
 0x915   :  { %v7035_v54 = vpop.eup %7034  ;;  %7060 = vrcp.f32 %v3614_v42  ;;  %v3615_v37 = vadd.f32 1.0, %v7033_v22  ;;  %v4376_v0 = vmul.f32 %v4184_v52, %v10727_v20  ;;  %v13299_v52 = vld [vmem:[#allocation43_spill] sm:$0xff] }
 0x916   :  { %v7037_v30 = vpop.eup %7036  ;;  %6333 = vmatmul.mubr.msk.bf16.gmra.mxu1 %vm886_vm0, %v13298_v33  ;;  %4858 = vmatmul.mubr.bf16.gmra.mxu0 %v4535_v3  ;;  %7062 = vpow2.f32 %v6447_v24  ;;  %v3649_v10 = vadd.f32 1.0, %v7035_v54  ;;  %v4374_v18 = vmul.f32 %v4182_v11, %v10704_v31  ;;  %v4537_v27 = vpack.c.bf16 %v4371_v62, %v4369_v32 }
 0x917   :  { %v7039_v1 = vpop.eup %7038  ;;  %4865 = vmatprep.mubr.bf16.mxu0 %v4538_v21  ;;  %2856 = vmatprep.mubr.bf16.mxu1 %v12989_v5  ;;  %7064 = vpow2.f32 %v6448_v51  ;;  %v3613_v25 = vadd.f32 1.0, %v7037_v30 }
 0x918   :  { %v7041_v41 = vpop.eup %7040  ;;  %v10801_v43 = vpop.f32.mrf.mxu0  ;;  %7066 = vpow2.f32 %v6449_v17  ;;  %v3650_v24 = vadd.f32 1.0, %v7039_v1  ;;  %v4540_v16 = vpack.c.bf16 %v4376_v0, %v4374_v18 }
 0x919   :  { %v7043_v4 = vpop.eup %7042  ;;  %v10803_v59 = vpop.f32.mrf.mxu1  ;;  %v6410_v12 = vmul.f32 -1.442695, %v10801_v43  ;;  %7068 = vrcp.f32 %v3615_v37  ;;  %v3651_v30 = vadd.f32 1.0, %v7041_v41 }
 0x91a   :  { %v7045_v50 = vpop.eup %7044  ;;  %v10808_v45 = vpop.f32.mrf.mxu0  ;;  %v4183_v42 = vmul.f32 %v7043_v4, %v10628_v60 }
 0x91b   :  { %v7047_v61 = vpop.eup %7046  ;;  %v10810_v38 = vpop.f32.mrf.mxu1  ;;  %7070 = vpow2.f32 %v6410_v12  ;;  %v6411_v22 = vmul.f32 -1.442695, %v10808_v45  ;;  %v4188_v3 = vmul.f32 %v7045_v50, %v10682_v28 }
 0x91c   :  { %v7049_v20 = vpop.eup %7048  ;;  %7072 = vrcp.f32 %v3613_v25  ;;  %v10815_v23 = vpop.f32.mrf.mxu0  ;;  %v4181_v51 = vmul.f32 %v7047_v61, %v10605_v14  ;;  %v4375_v33 = vmul.f32 %v4183_v42, %v10717_v35 }
 0x91d   :  { %v10817_v31 = vpop.f32.mrf.mxu1  ;;  %v7051_v54 = vpop.eup %7050  ;;  %7074 = vpow2.f32 %v6411_v22  ;;  %v6412_v21 = vmul.f32 -1.442695, %v10815_v23  ;;  %v4186_v28 = vmul.f32 %v7049_v20, %v10659_v19  ;;  %v4380_v37 = vmul.f32 %v4188_v3, %v10764_v8 }
 0x91e   :  { %6334 = vmatmul.mubr.msk.bf16.gmra.mxu1 %vm886_vm0, %v13299_v52  ;;  %4866 = vmatmul.mubr.bf16.gmra.mxu0 %v4537_v27  ;;  %v7053_v60 = vpop.eup %7052  ;;  %7076 = vrcp.f32 %v3649_v10  ;;  %v10824_v17 = vpop.f32.mrf.mxu0  ;;  %v4373_v4 = vmul.f32 %v4181_v51, %v10695_v53  ;;  %v3652_v25 = vadd.f32 1.0, %v7051_v54 }
 0x91f   :  { %v10826_v34 = vpop.f32.mrf.mxu1  ;;  %4873 = vmatprep.mubr.bf16.mxu0 %v4540_v16  ;;  %2866 = vmatprep.mubr.bf16.mxu1 %v12989_v5  ;;  %v7055_v14 = vpop.eup %7054  ;;  %7078 = vpow2.f32 %v6412_v21  ;;  %v6413_v1 = vmul.f32 -1.442695, %v10824_v17  ;;  %v4378_v35 = vmul.f32 %v4186_v28, %v10744_v58  ;;  %v3653_v53 = vadd.f32 1.0, %v7053_v60  ;;  %v13300_v16 = vld [vmem:[#allocation46_spill] sm:$0xff] }
 0x920   :  { %v7057_v11 = vpop.eup %7056  ;;  %7080 = vrcp.f32 %v3650_v24  ;;  %v10832_v41 = vpop.f32.mrf.mxu0  ;;  %v4187_v50 = vmul.f32 %v7055_v14, %v10672_v9  ;;  %v4539_v61 = vpack.c.bf16 %v4375_v33, %v4373_v4 }
 0x921   :  { %v10834_v19 = vpop.f32.mrf.mxu1  ;;  %v7059_v62 = vpop.eup %7058  ;;  %7082 = vpow2.f32 %v6413_v1  ;;  %v6414_v0 = vmul.f32 -1.442695, %v10832_v41  ;;  %v4185_v20 = vmul.f32 %v7057_v11, %v10650_v36  ;;  %v4542_v27 = vpack.c.bf16 %v4380_v37, %v4378_v35  ;;  %v13301_v36 = vld [vmem:[#allocation97_spill] sm:$0xff] }
 0x922   :  { %7084 = vrcp.f32 %v3651_v30  ;;  %v10840_v32 = vpop.f32.mrf.mxu0  ;;  %v7061_v8 = vpop.eup %7060  ;;  %v4192_v42 = vmul.f32 %v7059_v62, %v10724_v55  ;;  %v6450_v54 = vmul.f32 -1.442695, %v13301_v36  ;;  %v4379_v55 = vmul.f32 %v4187_v50, %v10752_v15 }
 0x923   :  { %v10842_v12 = vpop.f32.mrf.mxu1  ;;  %7086 = vpow2.f32 %v6414_v0  ;;  %v6415_v10 = vmul.f32 -1.442695, %v10840_v32  ;;  %v10845_v18 = vpop.eup %7062  ;;  %v4190_v51 = vmul.f32 %v7061_v8, %v10701_v7  ;;  %v4377_v14 = vmul.f32 %v4185_v20, %v10733_v47 }
 0x924   :  { %v10849_v58 = vpop.f32.mrf.mxu0  ;;  %v10853_v22 = vpop.eup %7064  ;;  %v4384_v33 = vmul.f32 %v4192_v42, %v10796_v40 }
 0x925   :  { %v10851_v9 = vpop.f32.mrf.mxu1  ;;  %7088 = vpow2.f32 %v6415_v10  ;;  %v6416_v24 = vmul.f32 -1.442695, %v10849_v58  ;;  %v10858_v3 = vpop.eup %7066  ;;  %v4541_v4 = vpack.c.bf16 %v4379_v55, %v4377_v14  ;;  %v4382_v0 = vmul.f32 %v4190_v51, %v10778_v29 }
 0x926   :  { %6335 = vmatmul.mubr.msk.bf16.gmra.mxu1 %vm886_vm0, %v13300_v16  ;;  %4874 = vmatmul.mubr.bf16.gmra.mxu0 %v4539_v61  ;;  %7090 = vrcp.f32 %v3652_v25  ;;  %v10863_v21 = vpop.f32.mrf.mxu0  ;;  %v7069_v60 = vpop.eup %7068 }
 0x927   :  { %v10865_v52 = vpop.f32.mrf.mxu1  ;;  %4881 = vmatprep.mubr.bf16.mxu0 %v4542_v27  ;;  %2876 = vmatprep.mubr.bf16.mxu1 %v12989_v5  ;;  %7092 = vpow2.f32 %v6416_v24  ;;  %v6417_v30 = vmul.f32 -1.442695, %v10863_v21  ;;  %v4191_v40 = vmul.f32 %v7069_v60, %v10712_v48  ;;  %v4544_v10 = vpack.c.bf16 %v4384_v33, %v4382_v0  ;;  %v13303_v24 = vld [vmem:[#allocation49_spill] sm:$0xff] }
 0x928   :  { %v7071_v28 = vpop.eup %7070  ;;  %7094 = vrcp.f32 %v3653_v53  ;;  %v10871_v15 = vpop.f32.mrf.mxu0 }
 0x929   :  { %v10873_v7 = vpop.f32.mrf.mxu1  ;;  %v7073_v1 = vpop.eup %7072  ;;  %v3617_v11 = vadd.f32 1.0, %v7071_v28  ;;  %7096 = vpow2.f32 %v6417_v30  ;;  %v6418_v37 = vmul.f32 -1.442695, %v10871_v15 }
 0x92a   :  { %v7075_v62 = vpop.eup %7074  ;;  %7098 = vpow2.f32 %v6450_v54  ;;  %v10877_v25 = vpop.f32.mrf.mxu0  ;;  %v4189_v29 = vmul.f32 %v7073_v1, %v10690_v56  ;;  %v4383_v56 = vmul.f32 %v4191_v40, %v10785_v39 }
 0x92b   :  { %v10879_v35 = vpop.f32.mrf.mxu1  ;;  %v10881_v47 = vpop.eup %7076  ;;  %7100 = vrcp.f32 %v3617_v11  ;;  %v3618_v50 = vadd.f32 1.0, %v7075_v62  ;;  %v6419_v8 = vmul.f32 -1.442695, %v10877_v25 }
 0x92c   :  { %v7079_v61 = vpop.eup %7078  ;;  %7102 = vpow2.f32 %v6418_v37  ;;  %v10885_v53 = vpop.f32.mrf.mxu0  ;;  %v4381_v14 = vmul.f32 %v4189_v29, %v10768_v57  ;;  %v13305_v29 = vld [vmem:[#allocation52_spill] sm:$0xff] }
 0x92d   :  { %v10887_v20 = vpop.eup %7080  ;;  %7104 = vrcp.f32 %v3618_v50  ;;  %v3619_v27 = vadd.f32 1.0, %v7079_v61  ;;  %v6420_v42 = vmul.f32 -1.442695, %v10885_v53  ;;  %v10893_v16 = vpop.f32.mrf.mxu1 }
 0x92e   :  { %13302 = vst [vmem:[#allocation222_spill] sm:$0xff] %v10887_v20  ;;  %6336 = vmatmul.mubr.msk.bf16.gmra.mxu1 %vm886_vm0, %v13303_v24  ;;  %4882 = vmatmul.mubr.bf16.gmra.mxu0 %v4541_v4  ;;  %v7083_v48 = vpop.eup %7082  ;;  %7106 = vpow2.f32 %v6419_v8  ;;  %v10895_v54 = vpop.f32.mrf.mxu0  ;;  %v4543_v4 = vpack.c.bf16 %v4383_v56, %v4381_v14 }
 0x92f   :  { %4889 = vmatprep.mubr.bf16.mxu0 %v4544_v10  ;;  %2886 = vmatprep.mubr.bf16.mxu1 %v12989_v5  ;;  %v10898_v55 = vpop.eup %7084  ;;  %7108 = vrcp.f32 %v3619_v27  ;;  %v3620_v51 = vadd.f32 1.0, %v7083_v48  ;;  %v6421_v60 = vmul.f32 -1.442695, %v10895_v54  ;;  %v10906_v37 = vpop.f32.mrf.mxu1 }
 0x930   :  { %v7087_v30 = vpop.eup %7086  ;;  %7110 = vpow2.f32 %v6420_v42  ;;  %v10902_v28 = vpop.f32.mrf.mxu0 }
 0x931   :  { %7112 = vrcp.f32 %v3620_v51  ;;  %v3621_v33 = vadd.f32 1.0, %v7087_v30  ;;  %v6422_v1 = vmul.f32 -1.442695, %v10902_v28  ;;  %v10920_v42 = vpop.f32.mrf.mxu1 }
 0x932   :  { %v7089_v11 = vpop.eup %7088  ;;  %7114 = vpow2.f32 %v6421_v60  ;;  %v10908_v62 = vpop.f32.mrf.mxu0 }
 0x933   :  { %v10910_v39 = vpop.eup %7090  ;;  %7116 = vrcp.f32 %v3621_v33  ;;  %v3622_v0 = vadd.f32 1.0, %v7089_v11  ;;  %v6423_v40 = vmul.f32 -1.442695, %v10908_v62 }
 0x934   :  { %13304 = vst [vmem:[#allocation207_spill] sm:$0xff] %v10910_v39  ;;  %v7093_v50 = vpop.eup %7092  ;;  %7118 = vpow2.f32 %v6422_v1  ;;  %v10913_v57 = vpop.f32.mrf.mxu0 }
 0x935   :  { %v10915_v8 = vpop.eup %7094  ;;  %7120 = vrcp.f32 %v3622_v0  ;;  %v3623_v61 = vadd.f32 1.0, %v7093_v50  ;;  %v6424_v10 = vmul.f32 -1.442695, %v10913_v57 }
 0x936   :  { %6337 = vmatmul.mubr.msk.bf16.gmra.mxu1 %vm886_vm0, %v13305_v29  ;;  %4890 = vmatmul.mubr.bf16.gmra.mxu0 %v4543_v4  ;;  %v7097_v27 = vpop.eup %7096  ;;  %7122 = vpow2.f32 %v6423_v40  ;;  %v10922_v24 = vpop.f32.mrf.mxu0 }
 0x937   :  { %2896 = vmatprep.mubr.bf16.mxu1 %v12989_v5  ;;  %v10925_v48 = vpop.eup %7098  ;;  %7124 = vrcp.f32 %v3623_v61  ;;  %v3624_v56 = vadd.f32 1.0, %v7097_v27  ;;  %v6425_v51 = vmul.f32 -1.442695, %v10922_v24  ;;  %v10931_v4 = vpop.f32.mrf.mxu1 }
 0x938   :  { %v7101_v60 = vpop.eup %7100  ;;  %7126 = vpow2.f32 %v6424_v10  ;;  %v10928_v30 = vpop.f32.mrf.mxu0 }
 0x939   :  { %v7103_v14 = vpop.eup %7102  ;;  %7128 = vrcp.f32 %v3624_v56  ;;  %v6426_v33 = vmul.f32 -1.442695, %v10928_v30 }
 0x93a   :  { %v7105_v1 = vpop.eup %7104  ;;  %v3625_v11 = vadd.f32 1.0, %v7103_v14  ;;  %7130 = vpow2.f32 %v6425_v51  ;;  %v10933_v0 = vpop.f32.mrf.mxu0  ;;  %v13306_v51 = vld [vmem:[#allocation56_spill] sm:$0xff] }
 0x93b   :  { %v7107_v40 = vpop.eup %7106  ;;  %7132 = vpow2.f32 %v6426_v33  ;;  %v6427_v50 = vmul.f32 -1.442695, %v10933_v0  ;;  %v4194_v56 = vmul.f32 %v7105_v1, %v10808_v45  ;;  %v4193_v33 = vmul.f32 %v7101_v60, %v10801_v43  ;;  %v13307_v1 = vld [vmem:[#allocation98_spill] sm:$0xff] }
 0x93c   :  { %v7109_v61 = vpop.eup %7108  ;;  %7134 = vrcp.f32 %v3625_v11  ;;  %v3626_v10 = vadd.f32 1.0, %v7107_v40  ;;  %v10936_v29 = vpop.f32.mrf.mxu0 }
 0x93d   :  { %v7111_v27 = vpop.eup %7110  ;;  %v4195_v44 = vmul.f32 %v7109_v61, %v10815_v23  ;;  %7136 = vpow2.f32 %v6427_v50  ;;  %v6428_v14 = vmul.f32 -1.442695, %v10936_v29  ;;  %v10944_v11 = vpop.f32.mrf.mxu1  ;;  %v6451_v23 = vmul.f32 -1.442695, %v13307_v1 }
 0x93e   :  { %6338 = vmatmul.mubr.msk.bf16.gmra.mxu1 %vm886_vm0, %v13306_v51  ;;  %v7113_v2 = vpop.eup %7112  ;;  %7138 = vrcp.f32 %v3626_v10  ;;  %v3627_v39 = vadd.f32 1.0, %v7111_v27  ;;  %v10946_v40 = vpop.f32.mrf.mxu0  ;;  %v4386_v27 = vmul.f32 %v4194_v56, %v10810_v38  ;;  %v4385_v1 = vmul.f32 %v4193_v33, %v10803_v59 }
 0x93f   :  { %2906 = vmatprep.mubr.bf16.mxu1 %v12989_v5  ;;  %v7115_v45 = vpop.eup %7114  ;;  %v4196_v50 = vmul.f32 %v7113_v2, %v10824_v17  ;;  %7140 = vpow2.f32 %v6428_v14  ;;  %v6429_v61 = vmul.f32 -1.442695, %v10946_v40  ;;  %v4387_v63 = vmul.f32 %v4195_v44, %v10817_v31  ;;  %v10958_v17 = vpop.f32.mrf.mxu1 }
 0x940   :  { %v7117_v51 = vpop.eup %7116  ;;  %7142 = vrcp.f32 %v3627_v39  ;;  %v3628_v43 = vadd.f32 1.0, %v7115_v45  ;;  %v10953_v60 = vpop.f32.mrf.mxu0 }
 0x941   :  { %v7119_v10 = vpop.eup %7118  ;;  %v4388_v20 = vmul.f32 %v4196_v50, %v10826_v34  ;;  %7144 = vpow2.f32 %v6429_v61  ;;  %v6430_v14 = vmul.f32 -1.442695, %v10953_v60  ;;  %v4545_v56 = vpack.c.bf16 %v4387_v63, %v4385_v1  ;;  %v10972_v1 = vpop.f32.mrf.mxu1 }
 0x942   :  { %v7121_v26 = vpop.eup %7120  ;;  %7146 = vrcp.f32 %v3628_v43  ;;  %v3629_v2 = vadd.f32 1.0, %v7119_v10  ;;  %v10961_v44 = vpop.f32.mrf.mxu0  ;;  %v13308_v10 = vld [vmem:[#allocation59_spill] sm:$0xff] }
 0x943   :  { %v7123_v31 = vpop.eup %7122  ;;  %7148 = vpow2.f32 %v6451_v23  ;;  %v4546_v39 = vpack.c.bf16 %v4388_v20, %v4386_v27  ;;  %v6431_v45 = vmul.f32 -1.442695, %v10961_v44  ;;  %v4198_v33 = vmul.f32 %v7121_v26, %v10840_v32 }
 0x944   :  { %v7125_v38 = vpop.eup %7124  ;;  %7150 = vrcp.f32 %v3629_v2  ;;  %v3630_v34 = vadd.f32 1.0, %v7123_v31  ;;  %v10964_v50 = vpop.f32.mrf.mxu0  ;;  %v4197_v23 = vmul.f32 %v7117_v51, %v10832_v41 }
 0x945   :  { %v7127_v59 = vpop.eup %7126  ;;  %v4199_v61 = vmul.f32 %v7125_v38, %v10849_v58  ;;  %7152 = vpow2.f32 %v6430_v14  ;;  %v6432_v43 = vmul.f32 -1.442695, %v10964_v50  ;;  %4897 = vmatprep.mubr.bf16.mxu0 %v4546_v39  ;;  %v4390_v39 = vmul.f32 %v4198_v33, %v10842_v12 }
 0x946   :  { %6339 = vmatmul.mubr.msk.bf16.gmra.mxu1 %vm886_vm0, %v13308_v10  ;;  %v7129_v20 = vpop.eup %7128  ;;  %7154 = vrcp.f32 %v3630_v34  ;;  %v3631_v63 = vadd.f32 1.0, %v7127_v59  ;;  %v10974_v27 = vpop.f32.mrf.mxu0  ;;  %4898 = vmatmul.mubr.bf16.gmra.mxu0 %v4545_v56 }
 0x947   :  { %2916 = vmatprep.mubr.bf16.mxu1 %v12989_v5  ;;  %v7131_v26 = vpop.eup %7130  ;;  %v4200_v32 = vmul.f32 %v7129_v20, %v10863_v21  ;;  %7156 = vpow2.f32 %v6431_v45  ;;  %v4391_v2 = vmul.f32 %v4199_v61, %v10851_v9  ;;  %v6433_v41 = vmul.f32 -1.442695, %v10974_v27  ;;  %v10985_v45 = vpop.f32.mrf.mxu1 }
 0x948   :  { %v7133_v58 = vpop.eup %7132  ;;  %7158 = vrcp.f32 %v3631_v63  ;;  %v3632_v14 = vadd.f32 1.0, %v7131_v26  ;;  %v10980_v51 = vpop.f32.mrf.mxu0  ;;  %v4389_v21 = vmul.f32 %v4197_v23, %v10834_v19  ;;  %v13309_v23 = vld [vmem:[#allocation62_spill] sm:$0xff] }
 0x949   :  { %v7135_v31 = vpop.eup %7134  ;;  %v4392_v38 = vmul.f32 %v4200_v32, %v10865_v52  ;;  %v3633_v56 = vadd.f32 1.0, %v7133_v58  ;;  %7160 = vpow2.f32 %v6432_v43  ;;  %v6434_v9 = vmul.f32 -1.442695, %v10980_v51 }
 0x94a   :  { %v7137_v34 = vpop.eup %7136  ;;  %7162 = vrcp.f32 %v3632_v14  ;;  %v10988_v59 = vpop.f32.mrf.mxu0  ;;  %v4547_v12 = vpack.c.bf16 %v4391_v2, %v4389_v21 }
 0x94b   :  { %v7139_v61 = vpop.eup %7138  ;;  %v4548_v10 = vpack.c.bf16 %v4392_v38, %v4390_v39  ;;  %7164 = vrcp.f32 %v3633_v56  ;;  %v3634_v20 = vadd.f32 1.0, %v7137_v34  ;;  %v6435_v52 = vmul.f32 -1.442695, %v10988_v59  ;;  %v10997_v14 = vpop.f32.mrf.mxu1 }
 0x94c   :  { %v7141_v63 = vpop.eup %7140  ;;  %7166 = vpow2.f32 %v6433_v41  ;;  %v10991_v33 = vpop.f32.mrf.mxu0  ;;  %v4202_v32 = vmul.f32 %v7139_v61, %v10877_v25  ;;  %v4201_v38 = vmul.f32 %v7135_v31, %v10871_v15 }
 0x94d   :  { %v7143_v43 = vpop.eup %7142  ;;  %7168 = vrcp.f32 %v3634_v20  ;;  %v3635_v19 = vadd.f32 1.0, %v7141_v63  ;;  %4905 = vmatprep.mubr.bf16.mxu0 %v4548_v10  ;;  %v6436_v2 = vmul.f32 -1.442695, %v10991_v33  ;;  %v13311_v10 = vld [vmem:[#allocation102_spill] sm:$0xff] }
 0x94e   :  { %6340 = vmatmul.mubr.msk.bf16.gmra.mxu1 %vm886_vm0, %v13309_v23  ;;  %v7145_v26 = vpop.eup %7144  ;;  %v4203_v58 = vmul.f32 %v7143_v43, %v10885_v53  ;;  %7170 = vpow2.f32 %v6434_v9  ;;  %v11000_v41 = vpop.f32.mrf.mxu0  ;;  %4906 = vmatmul.mubr.bf16.gmra.mxu0 %v4547_v12  ;;  %v13310_v53 = vld [vmem:[#allocation99_spill] sm:$0xff]  ;;  %v6453_v20 = vmul.f32 -1.442695, %v13311_v10  ;;  %v4394_v31 = vmul.f32 %v4202_v32, %v10879_v35 }
 0x94f   :  { %2926 = vmatprep.mubr.bf16.mxu1 %v12989_v5  ;;  %v7147_v39 = vpop.eup %7146  ;;  %7172 = vrcp.f32 %v3635_v19  ;;  %v3636_v56 = vadd.f32 1.0, %v7145_v26  ;;  %v6437_v34 = vmul.f32 -1.442695, %v11000_v41  ;;  %v6452_v21 = vmul.f32 -1.442695, %v13310_v53  ;;  %v13312_v43 = vld [vmem:[#allocation103_spill] sm:$0xff]  ;;  %v11014_v23 = vpop.f32.mrf.mxu1 }
 0x950   :  { %v11005_v25 = vpop.eup %7148  ;;  %v4204_v9 = vmul.f32 %v7147_v39, %v10895_v54  ;;  %7174 = vpow2.f32 %v6435_v52  ;;  %v4395_v63 = vmul.f32 %v4203_v58, %v10893_v16  ;;  %v6454_v15 = vmul.f32 -1.442695, %v13312_v43  ;;  %v13313_v43 = vld [vmem:[#allocation65_spill] sm:$0xff] }
 0x951   :  { %v7151_v61 = vpop.eup %7150  ;;  %7176 = vrcp.f32 %v3636_v56  ;;  %v4393_v54 = vmul.f32 %v4201_v38, %v10873_v7  ;;  %v13314_v38 = vld [vmem:[#allocation104_spill] sm:$0xff] }
 0x952   :  { %v7153_v12 = vpop.eup %7152  ;;  %v4396_v19 = vmul.f32 %v4204_v9, %v10906_v37  ;;  %7178 = vpow2.f32 %v6436_v2  ;;  %v11021_v2 = vpop.f32.mrf.mxu1 }
 0x953   :  { %v7155_v26 = vpop.eup %7154  ;;  %v3637_v52 = vadd.f32 1.0, %v7153_v12  ;;  %7180 = vpow2.f32 %v6437_v34  ;;  %v4549_v58 = vpack.c.bf16 %v4395_v63, %v4393_v54  ;;  %v6455_v34 = vmul.f32 -1.442695, %v13314_v38  ;;  %v13315_v12 = vld [vmem:[#allocation105_spill] sm:$0xff] }
 0x954   :  { %v7157_v39 = vpop.eup %7156  ;;  %7182 = vpow2.f32 %v6452_v21  ;;  %v4550_v10 = vpack.c.bf16 %v4396_v19, %v4394_v31  ;;  %v4206_v37 = vmul.f32 %v7155_v26, %v10908_v62  ;;  %v4205_v21 = vmul.f32 %v7151_v61, %v10902_v28  ;;  %v11032_v61 = vpop.f32.mrf.mxu1 }
 0x955   :  { %v7159_v16 = vpop.eup %7158  ;;  %7184 = vpow2.f32 %v6453_v20  ;;  %v3638_v56 = vadd.f32 1.0, %v7157_v39 }
 0x956   :  { %6341 = vmatmul.mubr.msk.bf16.gmra.mxu1 %vm886_vm0, %v13313_v43  ;;  %v7161_v35 = vpop.eup %7160  ;;  %7186 = vpow2.f32 %v6454_v15  ;;  %v4207_v32 = vmul.f32 %v7159_v16, %v10913_v57  ;;  %4913 = vmatprep.mubr.bf16.mxu0 %v4550_v10  ;;  %v6456_v57 = vmul.f32 -1.442695, %v13315_v12  ;;  %v13316_v15 = vld [vmem:[#allocation108_spill] sm:$0xff]  ;;  %v4398_v19 = vmul.f32 %v4206_v37, %v10931_v4  ;;  %v13318_v37 = vld [vmem:[#allocation70_spill] sm:$0xff] }
 0x957   :  { %2936 = vmatprep.mubr.bf16.mxu1 %v12989_v5  ;;  %v7163_v7 = vpop.eup %7162  ;;  %7188 = vrcp.f32 %v3637_v52  ;;  %v3639_v9 = vadd.f32 1.0, %v7161_v35  ;;  %4914 = vmatmul.mubr.bf16.gmra.mxu0 %v4549_v58  ;;  %v6457_v31 = vmul.f32 -1.442695, %v13316_v15  ;;  %v4397_v39 = vmul.f32 %v4205_v21, %v10920_v42 }
 0x958   :  { %v7165_v20 = vpop.eup %7164  ;;  %v4208_v63 = vmul.f32 %v7163_v7, %v10922_v24  ;;  %7190 = vrcp.f32 %v3638_v56  ;;  %v4399_v43 = vmul.f32 %v4207_v32, %v10944_v11  ;;  %v13317_v24 = vld [vmem:[#allocation109_spill] sm:$0xff]  ;;  %v11040_v7 = vpop.f32.mrf.mxu1 }
 0x959   :  { %v7167_v62 = vpop.eup %7166  ;;  %7192 = vrcp.f32 %v3639_v9  ;;  %v6458_v52 = vmul.f32 -1.442695, %v13317_v24  ;;  %v4209_v21 = vmul.f32 %v7165_v20, %v10928_v30  ;;  %v3655_v30 = vadd.f32 1.0, %v10853_v22  ;;  %v13321_v22 = vld [vmem:[#allocation75_spill] sm:$0xff] }
 0x95a   :  { %v7169_v10 = vpop.eup %7168  ;;  %v4400_v28 = vmul.f32 %v4208_v63, %v10958_v17  ;;  %v3640_v26 = vadd.f32 1.0, %v7167_v62  ;;  %7194 = vpow2.f32 %v6455_v34  ;;  %v4551_v35 = vpack.c.bf16 %v4399_v43, %v4397_v39  ;;  %v13319_v63 = vld [vmem:[#allocation110_spill] sm:$0xff]  ;;  %v2714_v20 = vpop.f32.mrf.mxu1 }
 0x95b   :  { %v7171_v54 = vpop.eup %7170  ;;  %v4210_v11 = vmul.f32 %v7169_v10, %v10933_v0  ;;  %v3654_v0 = vadd.f32 1.0, %v10845_v18  ;;  %v6459_v62 = vmul.f32 -1.442695, %v13319_v63  ;;  %v13363_v63 = vld [vmem:[#allocation90_spill] sm:$0xff] }
 0x95c   :  { %v7173_v16 = vpop.eup %7172  ;;  %v4552_v58 = vpack.c.bf16 %v4400_v28, %v4398_v19  ;;  %7196 = vrcp.f32 %v3640_v26  ;;  %v3641_v17 = vadd.f32 1.0, %v7171_v54  ;;  %v3656_v26 = vadd.f32 1.0, %v10858_v3 }
 0x95d   :  { %v7175_v56 = vpop.eup %7174  ;;  %7198 = vpow2.f32 %v6456_v57  ;;  %v4211_v4 = vmul.f32 %v7173_v16, %v10936_v29  ;;  %v4402_v57 = vmul.f32 %v4210_v11, %v10985_v45  ;;  %v4401_v54 = vmul.f32 %v4209_v21, %v10972_v1  ;;  %v11058_v1 = vpop.f32.mrf.mxu1 }
 0x95e   :  { %6342 = vmatmul.mubr.msk.bf16.gmra.mxu1 %vm886_vm0, %v13318_v37  ;;  %v7177_v32 = vpop.eup %7176  ;;  %7200 = vpow2.f32 %v6457_v31  ;;  %v3642_v34 = vadd.f32 1.0, %v7175_v56  ;;  %4921 = vmatprep.mubr.bf16.mxu0 %v4552_v58  ;;  %v3658_v3 = vadd.f32 1.0, %v11005_v25 }
 0x95f   :  { %2946 = vmatprep.mubr.bf16.mxu1 %v12989_v5  ;;  %v7179_v42 = vpop.eup %7178  ;;  %7202 = vpow2.f32 %v6458_v52  ;;  %v4212_v29 = vmul.f32 %v7177_v32, %v10946_v40  ;;  %4922 = vmatmul.mubr.bf16.gmra.mxu0 %v4551_v35  ;;  %v4403_v31 = vmul.f32 %v4211_v4, %v10997_v14  ;;  %v3657_v14 = vadd.f32 1.0, %v10925_v48 }
 0x960   :  { %v7181_v9 = vpop.eup %7180  ;;  %7204 = vrcp.f32 %v3642_v34  ;;  %v3643_v43 = vadd.f32 1.0, %v7179_v42  ;;  %v13322_v42 = vld [vmem:[#allocation114_spill] sm:$0xff] }
 0x961   :  { %v7183_v10 = vpop.eup %7182  ;;  %v4404_v19 = vmul.f32 %v4212_v29, %v11014_v23  ;;  %7206 = vrcp.f32 %v3641_v17  ;;  %v3644_v18 = vadd.f32 1.0, %v7181_v9  ;;  %v13320_v23 = vld [vmem:[#allocation111_spill] sm:$0xff]  ;;  %v4553_v58 = vpack.c.bf16 %v4403_v31, %v4401_v54  ;;  %v2720_v29 = vpop.f32.mrf.mxu1 }
 0x962   :  { %v7185_v28 = vpop.eup %7184  ;;  %7208 = vrcp.f32 %v3643_v43  ;;  %v6460_v16 = vmul.f32 -1.442695, %v13320_v23  ;;  %v3659_v56 = vadd.f32 1.0, %v7183_v10 }
 0x963   :  { %v7187_v40 = vpop.eup %7186  ;;  %v4554_v45 = vpack.c.bf16 %v4404_v19, %v4402_v57  ;;  %7210 = vrcp.f32 %v3644_v18  ;;  %v3660_v4 = vadd.f32 1.0, %v7185_v28  ;;  %v13325_v18 = vld [vmem:[#allocation117_spill] sm:$0xff]  ;;  %v2722_v54 = vpop.f32.mrf.mxu1 }
 0x964   :  { %v7189_v52 = vpop.eup %7188  ;;  %7212 = vrcp.f32 %v3654_v0  ;;  %v3661_v32 = vadd.f32 1.0, %v7187_v40  ;;  %v6461_v0 = vmul.f32 -1.442695, %v13322_v42  ;;  %v6464_v28 = vmul.f32 -1.442695, %v13325_v18 }
 0x965   :  { %v7191_v39 = vpop.eup %7190  ;;  %7214 = vpow2.f32 %v6459_v62  ;;  %4929 = vmatprep.mubr.bf16.mxu0 %v4554_v45  ;;  %v4213_v34 = vmul.f32 %v7189_v52, %v10953_v60 }
 0x966   :  { %6343 = vmatmul.mubr.msk.bf16.gmra.mxu1 %vm886_vm0, %v13321_v22  ;;  %v7193_v11 = vpop.eup %7192  ;;  %7216 = vrcp.f32 %v3655_v30  ;;  %v4214_v17 = vmul.f32 %v7191_v39, %v10961_v44  ;;  %v13324_v44 = vld [vmem:[#allocation116_spill] sm:$0xff] }
 0x967   :  { %2956 = vmatprep.mubr.bf16.mxu1 %v12989_v5  ;;  %7218 = vrcp.f32 %v3656_v26  ;;  %v4215_v48 = vmul.f32 %v7193_v11, %v10964_v50  ;;  %4930 = vmatmul.mubr.bf16.gmra.mxu0 %v4553_v58  ;;  %v7195_v35 = vpop.eup %7194  ;;  %v13323_v50 = vld [vmem:[#allocation115_spill] sm:$0xff]  ;;  %v6463_v10 = vmul.f32 -1.442695, %v13324_v44  ;;  %v13326_v30 = vld [vmem:[#allocation80_spill] sm:$0xff] }
 0x968   :  { %7220 = vrcp.f32 %v3657_v14  ;;  %v6462_v62 = vmul.f32 -1.442695, %v13323_v50  ;;  %v4406_v31 = vmul.f32 %v4214_v17, %v11032_v61  ;;  %v3662_v26 = vadd.f32 1.0, %v7195_v35  ;;  %v13327_v61 = vld [vmem:[#allocation120_spill] sm:$0xff]  ;;  %v2724_v35 = vpop.f32.mrf.mxu1 }
 0x969   :  { %v7197_v37 = vpop.eup %7196  ;;  %7222 = vpow2.f32 %v6460_v16  ;;  %v4407_v57 = vmul.f32 %v4215_v48, %v11040_v7 }
 0x96a   :  { %v7199_v25 = vpop.eup %7198  ;;  %7224 = vrcp.f32 %v3658_v3  ;;  %v4216_v21 = vmul.f32 %v7197_v37, %v10974_v27  ;;  %v4405_v27 = vmul.f32 %v4213_v34, %v11021_v2  ;;  %v13328_v2 = vld [vmem:[#allocation121_spill] sm:$0xff] }
 0x96b   :  { %v7201_v9 = vpop.eup %7200  ;;  %7226 = vrcp.f32 %v3659_v56  ;;  %v6466_v16 = vmul.f32 -1.442695, %v13328_v2  ;;  %v3663_v11 = vadd.f32 1.0, %v7199_v25 }
 0x96c   :  { %v7203_v43 = vpop.eup %7202  ;;  %7228 = vrcp.f32 %v3660_v4  ;;  %v4408_v60 = vmul.f32 %v4216_v21, %v2714_v20  ;;  %v6465_v20 = vmul.f32 -1.442695, %v13327_v61  ;;  %v4555_v52 = vpack.c.bf16 %v4407_v57, %v4405_v27 }
 0x96d   :  { %v7205_v19 = vpop.eup %7204  ;;  %7230 = vrcp.f32 %v3661_v32  ;;  %v3664_v48 = vadd.f32 1.0, %v7201_v9  ;;  %v13329_v9 = vld [vmem:[#allocation84_spill] sm:$0xff] }
 0x96e   :  { %6344 = vmatmul.mubr.msk.bf16.gmra.mxu1 %vm886_vm0, %v13326_v30  ;;  %v7207_v40 = vpop.eup %7206  ;;  %7232 = vpow2.f32 %v6461_v0  ;;  %v4556_v7 = vpack.c.bf16 %v4408_v60, %v4406_v31  ;;  %v4218_v14 = vmul.f32 %v7205_v19, %v10988_v59  ;;  %v3665_v59 = vadd.f32 1.0, %v7203_v43  ;;  %v13330_v43 = vld [vmem:[#allocation122_spill] sm:$0xff] }
 0x96f   :  { %2966 = vmatprep.mubr.bf16.mxu1 %v12989_v5  ;;  %v7209_v45 = vpop.eup %7208  ;;  %7234 = vpow2.f32 %v6462_v62  ;;  %v4217_v5 = vmul.f32 %v7207_v40, %v10980_v51 }
 0x970   :  { %v7211_v39 = vpop.eup %7210  ;;  %7236 = vpow2.f32 %v6463_v10  ;;  %v4219_v58 = vmul.f32 %v7209_v45, %v10991_v33  ;;  %4937 = vmatprep.mubr.bf16.mxu0 %v4556_v7  ;;  %v4410_v17 = vmul.f32 %v4218_v14, %v2720_v29  ;;  %v6467_v10 = vmul.f32 -1.442695, %v13330_v43 }
 0x971   :  { %v11079_v22 = vpop.eup %7212  ;;  %7238 = vpow2.f32 %v6464_v28  ;;  %v4220_v3 = vmul.f32 %v7211_v39, %v11000_v41  ;;  %4938 = vmatmul.mubr.bf16.gmra.mxu0 %v4555_v52  ;;  %v4409_v41 = vmul.f32 %v4217_v5, %v11058_v1 }
 0x972   :  { %v7215_v56 = vpop.eup %7214  ;;  %7240 = vrcp.f32 %v3662_v26  ;;  %v4411_v33 = vmul.f32 %v4219_v58, %v2722_v54  ;;  %v13332_v58 = vld [vmem:[#allocation126_spill] sm:$0xff] }
 0x973   :  { %v11083_v4 = vpop.eup %7216  ;;  %7242 = vpow2.f32 %v6465_v20  ;;  %v4412_v37 = vmul.f32 %v4220_v3, %v2724_v35  ;;  %v3666_v51 = vadd.f32 1.0, %v7215_v56  ;;  %v13331_v20 = vld [vmem:[#allocation123_spill] sm:$0xff] }
 0x974   :  { %v11085_v32 = vpop.eup %7218  ;;  %7244 = vpow2.f32 %v6466_v16  ;;  %v4557_v31 = vpack.c.bf16 %v4411_v33, %v4409_v41  ;;  %v6468_v52 = vmul.f32 -1.442695, %v13331_v20  ;;  %v13333_v56 = vld [vmem:[#allocation127_spill] sm:$0xff]  ;;  %v13334_v33 = vld [vmem:[#allocation66_spill] sm:$0xff]  ;;  %v4225_v41 = vmul.f32 %v10881_v47, %v13283_v6 }
 0x975   :  { %v11087_v34 = vpop.eup %7220  ;;  %7246 = vrcp.f32 %v3663_v11  ;;  %v4558_v25 = vpack.c.bf16 %v4412_v37, %v4410_v17  ;;  %v6469_v11 = vmul.f32 -1.442695, %v13332_v58 }
 0x976   :  { %v11090_v0 = vpop.f32.mrf.mxu0  ;;  %v11092_v21 = vpop.f32.mrf.mxu1  ;;  %6345 = vmatmul.mubr.msk.bf16.gmra.mxu1 %vm886_vm0, %v13329_v9  ;;  %7248 = vrcp.f32 %v3664_v48  ;;  %v6470_v48 = vmul.f32 -1.442695, %v13333_v56 }
 0x977   :  { %v7223_v29 = vpop.eup %7222  ;;  %v6438_v62 = vmul.f32 -1.442695, %v11090_v0  ;;  %7250 = vrcp.f32 %v3665_v59  ;;  %4945 = vmatprep.mubr.bf16.mxu0 %v4558_v25 }
 0x978   :  { %v11097_v57 = vpop.eup %7224  ;;  %v11100_v1 = vpop.f32.mrf.mxu0  ;;  %v3667_v30 = vadd.f32 1.0, %v7223_v29 }
 0x979   :  { %v11102_v60 = vpop.f32.mrf.mxu1  ;;  %v11104_v19 = vpop.eup %7226  ;;  %7252 = vpow2.f32 %v6438_v62  ;;  %v6439_v28 = vmul.f32 -1.442695, %v11100_v1  ;;  %4946 = vmatmul.mubr.bf16.gmra.mxu0 %v4557_v31 }
 0x97a   :  { %v11107_v27 = vpop.eup %7228  ;;  %7254 = vrcp.f32 %v3666_v51  ;;  %v11109_v40 = vpop.f32.mrf.mxu0 }
 0x97b   :  { %v11111_v26 = vpop.f32.mrf.mxu1  ;;  %v11113_v7 = vpop.eup %7230  ;;  %7256 = vpow2.f32 %v6439_v28  ;;  %v6440_v54 = vmul.f32 -1.442695, %v11109_v40 }
 0x97c   :  { %v7233_v45 = vpop.eup %7232  ;;  %7258 = vpow2.f32 %v6467_v10  ;;  %v11117_v14 = vpop.f32.mrf.mxu0  ;;  %v4227_v10 = vmul.f32 %v10898_v55, %v13286_v49 }
 0x97d   :  { %v11119_v39 = vpop.f32.mrf.mxu1  ;;  %v7235_v16 = vpop.eup %7234  ;;  %7260 = vpow2.f32 %v6440_v54  ;;  %v6441_v5 = vmul.f32 -1.442695, %v11117_v14  ;;  %v3668_v25 = vadd.f32 1.0, %v7233_v45 }
 0x97e   :  { %v7237_v3 = vpop.eup %7236  ;;  %7262 = vrcp.f32 %v3667_v30  ;;  %v4771_v35 = vpop.f32.mrf.mxu0  ;;  %v3669_v31 = vadd.f32 1.0, %v7235_v16 }
 0x97f   :  { %v2738_v59 = vpop.f32.mrf.mxu1  ;;  %v7239_v17 = vpop.eup %7238  ;;  %7264 = vpow2.f32 %v6441_v5  ;;  %v11125_v37 = vadd.f32 %v4771_v35, %v13334_v33  ;;  %v3670_v54 = vadd.f32 1.0, %v7237_v3  ;;  %v13336_v33 = vld [vmem:[#allocation67_spill] sm:$0xff] }
 0x980   :  { %v11127_v51 = vpop.eup %7240  ;;  %7266 = vpow2.f32 %v6468_v52  ;;  %v4773_v29 = vpop.f32.mrf.mxu0  ;;  %v3671_v5 = vadd.f32 1.0, %v7239_v17  ;;  %v11139_v45 = vmul.f32 %v4225_v41, %v2738_v59 }
 0x981   :  { %13335 = vst [vmem:[#allocation218_spill] sm:$0xff] %v11125_v37  ;;  %v11131_v9 = vpop.f32.mrf.mxu1  ;;  %v7243_v62 = vpop.eup %7242  ;;  %7268 = vpow2.f32 %v6469_v11  ;;  %v5250_v28 = vmul.f32 %v11125_v37, %v11125_v37 }
 0x982   :  { %v7245_v30 = vpop.eup %7244  ;;  %7270 = vpow2.f32 %v6470_v48  ;;  %v4774_v6 = vpop.f32.mrf.mxu0  ;;  %v3672_v16 = vadd.f32 1.0, %v7243_v62 }
 0x983   :  { %v2742_v35 = vpop.f32.mrf.mxu1  ;;  %v11137_v47 = vpop.eup %7246  ;;  %v11144_v29 = vadd.f32 %v4774_v6, %v13336_v33  ;;  %v5346_v49 = vsel %vm886_vm0, %v5250_v28, 0.0  ;;  %7272 = vrcp.f32 %v3668_v25  ;;  %v3673_v59 = vadd.f32 1.0, %v7245_v30  ;;  %v13338_v28 = vld [vmem:[#allocation128_spill] sm:$0xff]  ;;  %v13340_v33 = vld [vmem:[#allocation71_spill] sm:$0xff] }
 0x984   :  { %v11141_v52 = vmul.f32 %v4227_v10, %v2742_v35  ;;  %v11147_v55 = vpop.eup %7248  ;;  %5347 = vadd.xlane.f32.xlu1 %v5346_v49  ;;  %v4776_v3 = vpop.f32.mrf.mxu0  ;;  %7274 = vrcp.f32 %v3669_v31  ;;  %v6471_v35 = vmul.f32 -1.442695, %v13338_v28  ;;  %v4229_v30 = vmul.f32 %v10915_v8, %v13291_v46  ;;  %v13342_v46 = vld [vmem:[#allocation129_spill] sm:$0xff] }
 0x985   :  { %13337 = vst [vmem:[#allocation243_spill] sm:$0xff] %v11144_v29  ;;  %v11149_v11 = vpop.f32.mrf.mxu1  ;;  %v11151_v48 = vpop.eup %7250  ;;  %v5251_v41 = vmul.f32 %v11144_v29, %v11144_v29  ;;  %7276 = vrcp.f32 %v3670_v54  ;;  %v4231_v28 = vmul.f32 %v11083_v4, %v13296_v13  ;;  %v6472_v8 = vmul.f32 -1.442695, %v13342_v46  ;;  %v13343_v13 = vld [vmem:[#allocation72_spill] sm:$0xff] }
 0x986   :  { %v7253_v10 = vpop.eup %7252  ;;  %v4779_v62 = vpop.f32.mrf.mxu0  ;;  %7278 = vrcp.f32 %v3671_v5 }
 0x987   :  { %v2748_v25 = vpop.f32.mrf.mxu1  ;;  %v11158_v6 = vpop.eup %7254  ;;  %v11161_v49 = vadd.f32 %v4779_v62, %v13340_v33  ;;  %7280 = vrcp.f32 %v3672_v16  ;;  %v3645_v3 = vadd.f32 1.0, %v7253_v10  ;;  %v5349_v54 = vsel %vm886_vm0, %v5251_v41, 0.0 }
 0x988   :  { %13339 = vst [vmem:[#allocation239_spill] sm:$0xff] %v11158_v6  ;;  %v7257_v31 = vpop.eup %7256  ;;  %v4781_v29 = vpop.f32.mrf.mxu0  ;;  %7282 = vrcp.f32 %v3673_v59  ;;  %5350 = vadd.xlane.f32.xlu0 %v5349_v54  ;;  %v11173_v16 = vmul.f32 %v4229_v30, %v2748_v25  ;;  %v13345_v54 = vld [vmem:[#allocation130_spill] sm:$0xff] }
 0x989   :  { %13341 = vst [vmem:[#allocation13_spill] sm:$0xff] %v11161_v49  ;;  %v11165_v17 = vpop.f32.mrf.mxu1  ;;  %v7259_v37 = vpop.eup %7258  ;;  %v3646_v5 = vadd.f32 1.0, %v7257_v31  ;;  %v5252_v62 = vmul.f32 %v11161_v49, %v11161_v49  ;;  %7284 = vpow2.f32 %v6471_v35  ;;  %v6473_v49 = vmul.f32 -1.442695, %v13345_v54 }
 0x98a   :  { %v7261_v33 = vpop.eup %7260  ;;  %v4782_v43 = vpop.f32.mrf.mxu0  ;;  %v3674_v31 = vadd.f32 1.0, %v7259_v37  ;;  %v13346_v37 = vld [vmem:[#allocation133_spill] sm:$0xff]  ;;  %v4235_v54 = vmul.f32 %v11104_v19, %v13310_v53 }
 0x98b   :  { %v2752_v10 = vpop.f32.mrf.mxu1  ;;  %v11175_v41 = vpop.eup %7262  ;;  %7286 = vrcp.f32 %v3646_v5  ;;  %v3647_v29 = vadd.f32 1.0, %v7261_v33  ;;  %v11180_v4 = vadd.f32 %v4782_v43, %v13343_v13  ;;  %v5352_v25 = vsel %vm886_vm0, %v5252_v62, 0.0  ;;  %v13347_v62 = vld [vmem:[#allocation76_spill] sm:$0xff]  ;;  %v13354_v53 = vld [vmem:[#allocation77_spill] sm:$0xff] }
 0x98c   :  { %v11177_v58 = vmul.f32 %v4231_v28, %v2752_v10  ;;  %v7265_v59 = vpop.eup %7264  ;;  %7288 = vrcp.f32 %v3645_v3  ;;  %v4784_v30 = vpop.f32.mrf.mxu0  ;;  %5353 = vadd.xlane.f32.xlu1 %v5352_v25  ;;  %v6474_v33 = vmul.f32 -1.442695, %v13346_v37 }
 0x98d   :  { %13344 = vst [vmem:[#allocation248_spill] sm:$0xff] %v11180_v4  ;;  %v11183_v35 = vpop.f32.mrf.mxu1  ;;  %v7267_v44 = vpop.eup %7266  ;;  %7290 = vrcp.f32 %v3647_v29  ;;  %v3648_v61 = vadd.f32 1.0, %v7265_v59  ;;  %v5253_v43 = vmul.f32 %v11180_v4, %v11180_v4  ;;  %v4233_v59 = vmul.f32 %v11087_v34, %v13301_v36  ;;  %v13350_v36 = vld [vmem:[#allocation134_spill] sm:$0xff] }
 0x98e   :  { %v7269_v5 = vpop.eup %7268  ;;  %7292 = vpow2.f32 %v6472_v8  ;;  %v4787_v10 = vpop.f32.mrf.mxu0  ;;  %v3675_v28 = vadd.f32 1.0, %v7267_v44  ;;  %v6475_v44 = vmul.f32 -1.442695, %v13350_v36 }
 0x98f   :  { %v2758_v3 = vpop.f32.mrf.mxu1  ;;  %v7271_v13 = vpop.eup %7270  ;;  %7294 = vrcp.f32 %v3648_v61  ;;  %v11192_v30 = vadd.f32 %v4787_v10, %v13347_v62  ;;  %v5355_v29 = vsel %vm886_vm0, %v5253_v43, 0.0  ;;  %v3676_v61 = vadd.f32 1.0, %v7269_v5 }
 0x990   :  { %7296 = vrcp.f32 %v3674_v31  ;;  %5356 = vadd.xlane.f32.xlu0 %v5355_v29  ;;  %v4789_v8 = vpop.f32.mrf.mxu0  ;;  %v11199_v25 = vpop.eup %7272  ;;  %v3677_v62 = vadd.f32 1.0, %v7271_v13  ;;  %v13356_v13 = vld [vmem:[#allocation135_spill] sm:$0xff] }
 0x991   :  { %13348 = vst [vmem:[#allocation220_spill] sm:$0xff] %v11192_v30  ;;  %v11197_v4 = vpop.f32.mrf.mxu1  ;;  %13349 = vst [vmem:[#allocation231_spill] sm:$0xff] %v11199_v25  ;;  %7298 = vpow2.f32 %v6473_v49  ;;  %v5254_v10 = vmul.f32 %v11192_v30, %v11192_v30  ;;  %v11205_v43 = vpop.eup %7274  ;;  %v11210_v8 = vmul.f32 %v4233_v59, %v2758_v3  ;;  %v13358_v3 = vld [vmem:[#allocation136_spill] sm:$0xff]  ;;  %v13364_v59 = vld [vmem:[#allocation207_spill] sm:$0xff] }
 0x992   :  { %7300 = vpow2.f32 %v6474_v33  ;;  %v4790_v31 = vpop.f32.mrf.mxu0  ;;  %v11208_v29 = vpop.eup %7276  ;;  %v6476_v33 = vmul.f32 -1.442695, %v13356_v13 }
 0x993   :  { %v2762_v34 = vpop.f32.mrf.mxu1  ;;  %13351 = vst [vmem:[#allocation216_spill] sm:$0xff] %v11208_v29  ;;  %13352 = vst [vmem:[#allocation227_spill] sm:$0xff] %v11210_v8  ;;  %v11215_v19 = vadd.f32 %v4790_v31, %v13354_v53  ;;  %v5358_v49 = vsel %vm886_vm0, %v5254_v10, 0.0  ;;  %v11218_v5 = vpop.eup %7278  ;;  %7302 = vrcp.f32 %v3675_v28  ;;  %v13359_v28 = vld [vmem:[#allocation88_spill] sm:$0xff]  ;;  %v13360_v31 = vld [vmem:[#allocation222_spill] sm:$0xff]  ;;  %v4228_v8 = vmul.f32 %v13364_v59, %v13363_v63 }
 0x994   :  { %v11212_v37 = vmul.f32 %v4235_v54, %v2762_v34  ;;  %5359 = vadd.xlane.f32.xlu1 %v5358_v49  ;;  %v4792_v36 = vpop.f32.mrf.mxu0  ;;  %v11223_v6 = vpop.eup %7280  ;;  %7304 = vrcp.f32 %v3676_v61  ;;  %v6477_v54 = vmul.f32 -1.442695, %v13358_v3  ;;  %v4226_v53 = vmul.f32 %v13360_v31, %v13359_v28  ;;  %v13361_v29 = vld [vmem:[#allocation137_spill] sm:$0xff]  ;;  %v13362_v61 = vld [vmem:[#allocation103_spill] sm:$0xff] }
 0x995   :  { %13355 = vst [vmem:[#allocation250_spill] sm:$0xff] %v11215_v19  ;;  %v11221_v30 = vpop.f32.mrf.mxu1  ;;  %13357 = vst [vmem:[#allocation224_spill] sm:$0xff] %v11223_v6  ;;  %v5255_v10 = vmul.f32 %v11215_v19, %v11215_v19  ;;  %v11230_v34 = vpop.eup %7282  ;;  %7306 = vrcp.f32 %v3677_v62  ;;  %v6478_v49 = vmul.f32 -1.442695, %v13361_v29  ;;  %v4237_v3 = vmul.f32 %v11113_v7, %v13362_v61  ;;  %v13367_v62 = vld [vmem:[#allocation138_spill] sm:$0xff] }
 0x996   :  { %13353 = vst [vmem:[#allocation246_spill] sm:$0xff] %v11212_v37  ;;  %v4795_v13 = vpop.f32.mrf.mxu0  ;;  %v7285_v6 = vpop.eup %7284  ;;  %7308 = vpow2.f32 %v6475_v44  ;;  %v13365_v37 = vld [vmem:[#allocation81_spill] sm:$0xff]  ;;  %v4239_v28 = vmul.f32 %v11137_v47, %v13315_v12  ;;  %v6479_v31 = vmul.f32 -1.442695, %v13367_v62  ;;  %v4241_v44 = vmul.f32 %v11151_v48, %v13317_v24 }
 0x997   :  { %v2768_v36 = vpop.f32.mrf.mxu1  ;;  %v11240_v19 = vadd.f32 %v4795_v13, %v13365_v37  ;;  %7310 = vpow2.f32 %v6476_v33  ;;  %v5361_v42 = vsel %vm886_vm0, %v5255_v10, 0.0  ;;  %v4243_v63 = vmul.f32 %v11175_v41, %v13320_v23  ;;  %v13368_v13 = vld [vmem:[#allocation139_spill] sm:$0xff]  ;;  %v13369_v41 = vld [vmem:[#allocation82_spill] sm:$0xff] }
 0x998   :  { %v7287_v25 = vpop.eup %7286  ;;  %v4797_v46 = vpop.f32.mrf.mxu0  ;;  %7312 = vpow2.f32 %v6477_v54  ;;  %5362 = vadd.xlane.f32.xlu0 %v5361_v42  ;;  %v3678_v47 = vadd.f32 1.0, %v7285_v6  ;;  %v6480_v33 = vmul.f32 -1.442695, %v13368_v13  ;;  %v11255_v59 = vmul.f32 %v4237_v3, %v2768_v36  ;;  %v13371_v6 = vld [vmem:[#allocation140_spill] sm:$0xff] }
 0x999   :  { %13366 = vst [vmem:[#allocation214_spill] sm:$0xff] %v11240_v19  ;;  %v11245_v29 = vpop.f32.mrf.mxu1  ;;  %v7289_v7 = vpop.eup %7288  ;;  %v5256_v37 = vmul.f32 %v11240_v19, %v11240_v19  ;;  %7314 = vpow2.f32 %v6478_v49  ;;  %v4222_v24 = vmul.f32 %v7287_v25, %v11100_v1  ;;  %v6481_v49 = vmul.f32 -1.442695, %v13371_v6  ;;  %v13372_v1 = vld [vmem:[#allocation141_spill] sm:$0xff] }
 0x99a   :  { %v7291_v12 = vpop.eup %7290  ;;  %v4798_v10 = vpop.f32.mrf.mxu0  ;;  %7316 = vpow2.f32 %v6479_v31  ;;  %v4221_v19 = vmul.f32 %v7289_v7, %v11090_v0  ;;  %v13373_v7 = vld [vmem:[#allocation142_spill] sm:$0xff] }
 0x99b   :  { %v2772_v46 = vpop.f32.mrf.mxu1  ;;  %v7293_v61 = vpop.eup %7292  ;;  %v4223_v48 = vmul.f32 %v7291_v12, %v11109_v40  ;;  %v11262_v54 = vadd.f32 %v4798_v10, %v13369_v41  ;;  %v5364_v36 = vsel %vm886_vm0, %v5256_v37, 0.0  ;;  %v6482_v40 = vmul.f32 -1.442695, %v13372_v1 }
 0x99c   :  { %v11259_v23 = vmul.f32 %v4239_v28, %v2772_v46  ;;  %v7295_v42 = vpop.eup %7294  ;;  %v4800_v62 = vpop.f32.mrf.mxu0  ;;  %5365 = vadd.xlane.f32.xlu1 %v5364_v36  ;;  %v3679_v0 = vadd.f32 1.0, %v7293_v61  ;;  %v6483_v46 = vmul.f32 -1.442695, %v13373_v7  ;;  %7318 = vpow2.f32 %v6480_v33  ;;  %v13374_v28 = vld [vmem:[#allocation85_spill] sm:$0xff] }
 0x99d   :  { %13370 = vst [vmem:[#allocation16_spill] sm:$0xff] %v11262_v54  ;;  %v11266_v3 = vpop.f32.mrf.mxu1  ;;  %v11269_v13 = vpop.eup %7296  ;;  %v4224_v25 = vmul.f32 %v7295_v42, %v11117_v14  ;;  %v5257_v31 = vmul.f32 %v11262_v54, %v11262_v54  ;;  %v4415_v37 = vmul.f32 %v4223_v48, %v11111_v26  ;;  %v4420_v62 = vmul.f32 %v4228_v8, %v11149_v11 }
 0x99e   :  { %v7299_v12 = vpop.eup %7298  ;;  %v4803_v41 = vpop.f32.mrf.mxu0  ;;  %v4414_v14 = vmul.f32 %v4222_v24, %v11102_v60  ;;  %7320 = vpow2.f32 %v6481_v49  ;;  %v4413_v61 = vmul.f32 %v4221_v19, %v11092_v21  ;;  %v4418_v36 = vmul.f32 %v4226_v53, %v11131_v9 }
 0x99f   :  { %v2778_v10 = vpop.f32.mrf.mxu1  ;;  %v7301_v6 = vpop.eup %7300  ;;  %v4416_v42 = vmul.f32 %v4224_v25, %v11119_v39  ;;  %v11283_v1 = vadd.f32 %v4803_v41, %v13374_v28  ;;  %v5367_v26 = vsel %vm886_vm0, %v5257_v31, 0.0  ;;  %v3680_v33 = vadd.f32 1.0, %v7299_v12 }
 0x9a0   :  { %v4805_v11 = vpop.f32.mrf.mxu0  ;;  %v11290_v8 = vpop.eup %7302  ;;  %7322 = vpow2.f32 %v6482_v40  ;;  %5368 = vadd.xlane.f32.xlu0 %v5367_v26  ;;  %v3681_v48 = vadd.f32 1.0, %v7301_v6  ;;  %v4559_v21 = vpack.c.bf16 %v4415_v37, %v4413_v61  ;;  %v4562_v9 = vpack.c.bf16 %v4420_v62, %v4418_v36  ;;  %v13376_v40 = vld [vmem:[#allocation86_spill] sm:$0xff]  ;;  %v13378_v6 = vld [vmem:[#allocation143_spill] sm:$0xff]  ;;  %v13379_v37 = vld [vmem:[#allocation96_spill] sm:$0xff] }
 0x9a1   :  { %13375 = vst [vmem:[#allocation209_spill] sm:$0xff] %v11283_v1  ;;  %v11287_v54 = vpop.f32.mrf.mxu1  ;;  %v4560_v60 = vpack.c.bf16 %v4416_v42, %v4414_v14  ;;  %v5258_v39 = vmul.f32 %v11283_v1, %v11283_v1  ;;  %v11294_v24 = vpop.eup %7304  ;;  %7324 = vpow2.f32 %v6483_v46  ;;  %v11298_v25 = vmul.f32 %v4241_v44, %v2778_v10  ;;  %v13380_v10 = vld [vmem:[#allocation144_spill] sm:$0xff]  ;;  %v13382_v11 = vld [vmem:[#allocation145_spill] sm:$0xff] }
 0x9a2   :  { %v4806_v53 = vpop.f32.mrf.mxu0  ;;  %v11296_v49 = vpop.eup %7306  ;;  %7326 = vrcp.f32 %v3678_v47  ;;  %v6484_v46 = vmul.f32 -1.442695, %v13378_v6  ;;  %v4232_v62 = vmul.f32 %v11085_v32, %v13379_v37  ;;  %v6485_v42 = vmul.f32 -1.442695, %v13380_v10  ;;  %v13381_v26 = vld [vmem:[#allocation92_spill] sm:$0xff] }
 0x9a3   :  { %v2782_v19 = vpop.f32.mrf.mxu1  ;;  %v11303_v31 = vadd.f32 %v4806_v53, %v13376_v40  ;;  %4953 = vmatprep.mubr.bf16.mxu0 %v4560_v60  ;;  %v5370_v12 = vsel %vm886_vm0, %v5258_v39, 0.0  ;;  %v7309_v41 = vpop.eup %7308  ;;  %7328 = vrcp.f32 %v3679_v0  ;;  %v4230_v32 = vmul.f32 %v11079_v22, %v13381_v26  ;;  %v13383_v53 = vld [vmem:[#allocation94_spill] sm:$0xff] }
 0x9a4   :  { %v11300_v28 = vmul.f32 %v4243_v63, %v2782_v19  ;;  %5371 = vadd.xlane.f32.xlu1 %v5370_v12  ;;  %v4808_v44 = vpop.f32.mrf.mxu0  ;;  %4954 = vmatmul.mubr.bf16.gmra.mxu0 %v4559_v21  ;;  %v7311_v63 = vpop.eup %7310  ;;  %7330 = vrcp.f32 %v3680_v33  ;;  %v6486_v60 = vmul.f32 -1.442695, %v13382_v11  ;;  %v4424_v39 = vmul.f32 %v4232_v62, %v11183_v35 }
 0x9a5   :  { %13377 = vst [vmem:[#allocation229_spill] sm:$0xff] %v11303_v31  ;;  %v11309_v14 = vpop.f32.mrf.mxu1  ;;  %v5259_v47 = vmul.f32 %v11303_v31, %v11303_v31  ;;  %4961 = vmatprep.mubr.bf16.mxu0 %v4562_v9  ;;  %v7313_v36 = vpop.eup %7312  ;;  %7332 = vrcp.f32 %v3681_v48  ;;  %v4245_v9 = vmul.f32 %v11205_v43, %v13323_v50  ;;  %v3682_v37 = vadd.f32 1.0, %v7309_v41  ;;  %v13420_v31 = vld [vmem:[#allocation135_spill] sm:$0xff] }
 0x9a6   :  { %v4811_v0 = vpop.f32.mrf.mxu0  ;;  %v7315_v19 = vpop.eup %7314  ;;  %7334 = vpow2.f32 %v6484_v46  ;;  %v4422_v22 = vmul.f32 %v4230_v32, %v11165_v17  ;;  %v4247_v48 = vmul.f32 %v11218_v5, %v13325_v18  ;;  %v3683_v44 = vadd.f32 1.0, %v7311_v63  ;;  %v13385_v32 = vld [vmem:[#allocation95_spill] sm:$0xff] }
 0x9a7   :  { %v2788_v21 = vpop.f32.mrf.mxu1  ;;  %v11321_v40 = vadd.f32 %v4811_v0, %v13383_v53  ;;  %v5373_v12 = vsel %vm886_vm0, %v5259_v47, 0.0  ;;  %v7317_v62 = vpop.eup %7316  ;;  %7336 = vpow2.f32 %v6485_v42  ;;  %v3684_v26 = vadd.f32 1.0, %v7313_v36  ;;  %v13387_v42 = vld [vmem:[#allocation102_spill] sm:$0xff] }
 0x9a8   :  { %5374 = vadd.xlane.f32.xlu0 %v5373_v12  ;;  %v4813_v35 = vpop.f32.mrf.mxu0  ;;  %v3685_v0 = vadd.f32 1.0, %v7315_v19  ;;  %7338 = vpow2.f32 %v6486_v60  ;;  %v4564_v50 = vpack.c.bf16 %v4424_v39, %v4422_v22  ;;  %v11333_v17 = vmul.f32 %v4245_v9, %v2788_v21  ;;  %v13389_v12 = vld [vmem:[#allocation146_spill] sm:$0xff] }
 0x9a9   :  { %13384 = vst [vmem:[#allocation238_spill] sm:$0xff] %v11321_v40  ;;  %v11327_v33 = vpop.f32.mrf.mxu1  ;;  %v5260_v47 = vmul.f32 %v11321_v40, %v11321_v40  ;;  %v7319_v5 = vpop.eup %7318  ;;  %7340 = vrcp.f32 %v3682_v37  ;;  %v3686_v63 = vadd.f32 1.0, %v7317_v62  ;;  %v4236_v36 = vmul.f32 %v11107_v27, %v13387_v42  ;;  %v13390_v35 = vld [vmem:[#allocation98_spill] sm:$0xff]  ;;  %v13419_v40 = vld [vmem:[#allocation157_spill] sm:$0xff] }
 0x9aa   :  { %v4814_v41 = vpop.f32.mrf.mxu0  ;;  %v13388_v39 = vpack.c.bf16 %v11141_v52, %v11139_v45  ;;  %7342 = vrcp.f32 %v3683_v44  ;;  %v6487_v9 = vmul.f32 -1.442695, %v13389_v12  ;;  %v4234_v62 = vmul.f32 %v11097_v57, %v13390_v35  ;;  %v13435_v12 = vld [vmem:[#allocation162_spill] sm:$0xff] }
 0x9ab   :  { %v2792_v43 = vpop.f32.mrf.mxu1  ;;  %v11338_v53 = vadd.f32 %v4814_v41, %v13385_v32  ;;  %v5376_v18 = vsel %vm886_vm0, %v5260_v47, 0.0  ;;  %v7321_v21 = vpop.eup %7320  ;;  %7344 = vrcp.f32 %v3684_v26  ;;  %v4428_v45 = vmul.f32 %v4236_v36, %v11221_v30  ;;  %v13392_v41 = vld [vmem:[#allocation100_spill] sm:$0xff] }
 0x9ac   :  { %v11335_v46 = vmul.f32 %v4247_v48, %v2792_v43  ;;  %5377 = vadd.xlane.f32.xlu1 %v5376_v18  ;;  %v4816_v60 = vpop.f32.mrf.mxu0  ;;  %4962 = vmatmul.mubr.bf16.gmra.mxu0 %v13388_v39  ;;  %v13391_v48 = vld [vmem:[#allocation147_spill] sm:$0xff]  ;;  %7346 = vrcp.f32 %v3685_v0  ;;  %v3687_v42 = vadd.f32 1.0, %v7319_v5  ;;  %v4426_v57 = vmul.f32 %v4234_v62, %v11197_v4 }
 0x9ad   :  { %13386 = vst [vmem:[#allocation225_spill] sm:$0xff] %v11338_v53  ;;  %v11343_v19 = vpop.f32.mrf.mxu1  ;;  %v5261_v37 = vmul.f32 %v11338_v53, %v11338_v53  ;;  %4969 = vmatprep.mubr.bf16.mxu0 %v4564_v50  ;;  %v7323_v27 = vpop.eup %7322  ;;  %v6488_v47 = vmul.f32 -1.442695, %v13391_v48  ;;  %v4249_v50 = vmul.f32 %v11230_v34, %v13328_v2  ;;  %7348 = vrcp.f32 %v3686_v63 }
 0x9ae   :  { %v4819_v44 = vpop.f32.mrf.mxu0  ;;  %v7325_v43 = vpop.eup %7324  ;;  %v4251_v0 = vmul.f32 %v11290_v8, %v13331_v20  ;;  %v3688_v60 = vadd.f32 1.0, %v7321_v21  ;;  %7350 = vpow2.f32 %v6487_v9  ;;  %v3689_v2 = vadd.f32 1.0, %v7323_v27  ;;  %v13396_v9 = vld [vmem:[#allocation150_spill] sm:$0xff] }
 0x9af   :  { %v2798_v52 = vpop.f32.mrf.mxu1  ;;  %v11358_v32 = vadd.f32 %v4819_v44, %v13392_v41  ;;  %v5379_v18 = vsel %vm886_vm0, %v5261_v37, 0.0  ;;  %v11366_v36 = vpop.eup %7326  ;;  %v3690_v34 = vadd.f32 1.0, %v7325_v43  ;;  %7352 = vpow2.f32 %v6488_v47  ;;  %v13394_v41 = vld [vmem:[#allocation101_spill] sm:$0xff] }
 0x9b0   :  { %5380 = vadd.xlane.f32.xlu0 %v5379_v18  ;;  %v4821_v30 = vpop.f32.mrf.mxu0  ;;  %v7329_v37 = vpop.eup %7328  ;;  %v4566_v5 = vpack.c.bf16 %v4428_v45, %v4426_v57  ;;  %v11374_v62 = vmul.f32 %v4249_v50, %v2798_v52  ;;  %7354 = vrcp.f32 %v3687_v42  ;;  %v6489_v27 = vmul.f32 -1.442695, %v13396_v9  ;;  %v13398_v50 = vld [vmem:[#allocation151_spill] sm:$0xff] }
 0x9b1   :  { %13393 = vst [vmem:[#allocation234_spill] sm:$0xff] %v11358_v32  ;;  %v11364_v26 = vpop.f32.mrf.mxu1  ;;  %v5262_v39 = vmul.f32 %v11358_v32, %v11358_v32  ;;  %v11372_v35 = vpop.eup %7330  ;;  %v4240_v47 = vmul.f32 %v11147_v55, %v13316_v15  ;;  %v13397_v43 = vpack.c.bf16 %v11177_v58, %v11173_v16  ;;  %7356 = vrcp.f32 %v3688_v60  ;;  %v13416_v32 = vld [vmem:[#allocation112_spill] sm:$0xff]  ;;  %v13436_v9 = vld [vmem:[#allocation139_spill] sm:$0xff] }
 0x9b2   :  { %v4822_v63 = vpop.f32.mrf.mxu0  ;;  %v11382_v21 = vpop.eup %7332  ;;  %v6490_v57 = vmul.f32 -1.442695, %v13398_v50  ;;  %v4238_v55 = vmul.f32 %v11127_v51, %v13314_v38  ;;  %7358 = vrcp.f32 %v3689_v2 }
 0x9b3   :  { %v2802_v4 = vpop.f32.mrf.mxu1  ;;  %v11379_v20 = vadd.f32 %v4822_v63, %v13394_v41  ;;  %v5382_v8 = vsel %vm886_vm0, %v5262_v39, 0.0  ;;  %v7335_v18 = vpop.eup %7334  ;;  %v4432_v58 = vmul.f32 %v4240_v47, %v11266_v3  ;;  %7360 = vrcp.f32 %v3690_v34  ;;  %v13400_v63 = vld [vmem:[#allocation106_spill] sm:$0xff]  ;;  %v13402_v47 = vld [vmem:[#allocation129_spill] sm:$0xff] }
 0x9b4   :  { %v11376_v44 = vmul.f32 %v4251_v0, %v2802_v4  ;;  %5383 = vadd.xlane.f32.xlu1 %v5382_v8  ;;  %v4824_v52 = vpop.f32.mrf.mxu0  ;;  %4970 = vmatmul.mubr.bf16.gmra.mxu0 %v13397_v43  ;;  %v7337_v15 = vpop.eup %7336  ;;  %v13399_v0 = vld [vmem:[#allocation153_spill] sm:$0xff]  ;;  %7362 = vpow2.f32 %v6489_v27  ;;  %v4430_v38 = vmul.f32 %v4238_v55, %v11245_v29  ;;  %v4255_v34 = vmul.f32 %v7329_v37, %v13402_v47  ;;  %v13404_v37 = vld [vmem:[#allocation107_spill] sm:$0xff] }
 0x9b5   :  { %13395 = vst [vmem:[#allocation253_spill] sm:$0xff] %v11379_v20  ;;  %v11387_v45 = vpop.f32.mrf.mxu1  ;;  %v5263_v30 = vmul.f32 %v11379_v20, %v11379_v20  ;;  %4977 = vmatprep.mubr.bf16.mxu0 %v4566_v5  ;;  %v6492_v39 = vmul.f32 -1.442695, %v13399_v0  ;;  %v7339_v4 = vpop.eup %7338  ;;  %v4253_v5 = vmul.f32 %v11296_v49, %v13333_v56  ;;  %v3691_v52 = vadd.f32 1.0, %v7335_v18  ;;  %v13403_v56 = vld [vmem:[#allocation152_spill] sm:$0xff] }
 0x9b6   :  { %v4827_v60 = vpop.f32.mrf.mxu0  ;;  %v11410_v2 = vpop.eup %7340  ;;  %v3692_v43 = vadd.f32 1.0, %v7337_v15  ;;  %7364 = vpow2.f32 %v6490_v57  ;;  %v6491_v49 = vmul.f32 -1.442695, %v13403_v56  ;;  %v4568_v27 = vpack.c.bf16 %v4432_v58, %v4430_v38  ;;  %v13408_v58 = vld [vmem:[#allocation231_spill] sm:$0xff] }
 0x9b7   :  { %v2808_v16 = vpop.f32.mrf.mxu1  ;;  %v11402_v41 = vadd.f32 %v4827_v60, %v13400_v63  ;;  %v5385_v8 = vsel %vm886_vm0, %v5263_v30, 0.0  ;;  %v7343_v60 = vpop.eup %7342  ;;  %v3693_v63 = vadd.f32 1.0, %v7339_v4  ;;  %7366 = vpow2.f32 %v6492_v39  ;;  %v13406_v4 = vld [vmem:[#allocation154_spill] sm:$0xff] }
 0x9b8   :  { %5386 = vadd.xlane.f32.xlu0 %v5385_v8  ;;  %v4829_v3 = vpop.f32.mrf.mxu0  ;;  %v11416_v55 = vpop.eup %7344  ;;  %v11418_v8 = vmul.f32 %v4253_v5, %v2808_v16  ;;  %7368 = vrcp.f32 %v3691_v52  ;;  %v6493_v42 = vmul.f32 -1.442695, %v13406_v4  ;;  %v13407_v39 = vld [vmem:[#allocation114_spill] sm:$0xff] }
 0x9b9   :  { %13401 = vst [vmem:[#allocation19_spill] sm:$0xff] %v11402_v41  ;;  %v11408_v51 = vpop.f32.mrf.mxu1  ;;  %v5264_v30 = vmul.f32 %v11402_v41, %v11402_v41  ;;  %v11426_v47 = vpop.eup %7346  ;;  %v4244_v38 = vmul.f32 %v13408_v58, %v13407_v39  ;;  %v13409_v5 = vld [vmem:[#allocation246_spill] sm:$0xff]  ;;  %7370 = vrcp.f32 %v3692_v43  ;;  %v13415_v41 = vld [vmem:[#allocation156_spill] sm:$0xff] }
 0x9ba   :  { %v4830_v18 = vpop.f32.mrf.mxu0  ;;  %v13413_v58 = vld [vmem:[#allocation110_spill] sm:$0xff]  ;;  %7372 = vrcp.f32 %v3693_v63 }
 0x9bb   :  { %v2812_v29 = vpop.f32.mrf.mxu1  ;;  %v11423_v15 = vadd.f32 %v4830_v18, %v13404_v37  ;;  %v5388_v57 = vsel %vm886_vm0, %v5264_v30, 0.0  ;;  %v11436_v18 = vpop.eup %7348  ;;  %v13412_v30 = vld [vmem:[#allocation155_spill] sm:$0xff]  ;;  %7374 = vpow2.f32 %v6491_v49  ;;  %v4259_v49 = vmul.f32 %v7343_v60, %v13420_v31  ;;  %v13422_v31 = vld [vmem:[#allocation113_spill] sm:$0xff] }
 0x9bc   :  { %v11420_v3 = vmul.f32 %v4255_v34, %v2812_v29  ;;  %5389 = vadd.xlane.f32.xlu1 %v5388_v57  ;;  %v4832_v16 = vpop.f32.mrf.mxu0  ;;  %v13410_v34 = vld [vmem:[#allocation227_spill] sm:$0xff]  ;;  %v6494_v37 = vmul.f32 -1.442695, %v13412_v30  ;;  %v7351_v39 = vpop.eup %7350  ;;  %7376 = vpow2.f32 %v6493_v42 }
 0x9bd   :  { %13405 = vst [vmem:[#allocation237_spill] sm:$0xff] %v11423_v15  ;;  %v11431_v22 = vpop.f32.mrf.mxu1  ;;  %v13411_v29 = vpack.c.bf16 %v13409_v5, %v13410_v34  ;;  %v5265_v61 = vmul.f32 %v11423_v15, %v11423_v15  ;;  %v13414_v57 = vld [vmem:[#allocation239_spill] sm:$0xff]  ;;  %v6495_v5 = vmul.f32 -1.442695, %v13415_v41  ;;  %v4436_v34 = vmul.f32 %v4244_v38, %v11309_v14  ;;  %v7353_v20 = vpop.eup %7352  ;;  %v13418_v15 = vld [vmem:[#allocation133_spill] sm:$0xff] }
 0x9be   :  { %v4242_v16 = vmul.f32 %v13414_v57, %v13413_v58  ;;  %v4835_v43 = vpop.f32.mrf.mxu0  ;;  %v6496_v58 = vmul.f32 -1.442695, %v13419_v40  ;;  %v7355_v38 = vpop.eup %7354  ;;  %7378 = vpow2.f32 %v6494_v37  ;;  %v3695_v42 = vadd.f32 1.0, %v7353_v20 }
 0x9bf   :  { %4978 = vmatmul.mubr.bf16.gmra.mxu0 %v13411_v29  ;;  %v2818_v29 = vpop.f32.mrf.mxu1  ;;  %v11448_v53 = vadd.f32 %v4835_v43, %v13416_v32  ;;  %v5391_v52 = vsel %vm886_vm0, %v5265_v61, 0.0  ;;  %v13421_v32 = vld [vmem:[#allocation158_spill] sm:$0xff]  ;;  %v11461_v1 = vpop.eup %7356  ;;  %7380 = vpow2.f32 %v6495_v5  ;;  %v13425_v5 = vld [vmem:[#allocation120_spill] sm:$0xff] }
 0x9c0   :  { %4985 = vmatprep.mubr.bf16.mxu0 %v4568_v27  ;;  %v4257_v27 = vmul.f32 %v11382_v21, %v13418_v15  ;;  %v4434_v63 = vmul.f32 %v4242_v16, %v11287_v54  ;;  %5392 = vadd.xlane.f32.xlu0 %v5391_v52  ;;  %v4837_v14 = vpop.f32.mrf.mxu0  ;;  %v6497_v43 = vmul.f32 -1.442695, %v13421_v32  ;;  %v3694_v21 = vadd.f32 1.0, %v7351_v39  ;;  %v11463_v41 = vpop.eup %7358  ;;  %v13424_v39 = vld [vmem:[#allocation159_spill] sm:$0xff] }
 0x9c1   :  { %13417 = vst [vmem:[#allocation245_spill] sm:$0xff] %v11448_v53  ;;  %v11455_v57 = vpop.f32.mrf.mxu1  ;;  %v5266_v61 = vmul.f32 %v11448_v53, %v11448_v53  ;;  %v11473_v53 = vpop.eup %7360  ;;  %7382 = vpow2.f32 %v6496_v58  ;;  %v6498_v20 = vmul.f32 -1.442695, %v13424_v39 }
 0x9c2   :  { %v4570_v15 = vpack.c.bf16 %v4436_v34, %v4434_v63  ;;  %v4838_v16 = vpop.f32.mrf.mxu0  ;;  %v11465_v52 = vmul.f32 %v4257_v27, %v2818_v29  ;;  %v13426_v34 = vld [vmem:[#allocation224_spill] sm:$0xff]  ;;  %v13427_v27 = vpack.c.bf16 %v11259_v23, %v11255_v59  ;;  %7384 = vpow2.f32 %v6497_v43 }
 0x9c3   :  { %v2822_v54 = vpop.f32.mrf.mxu1  ;;  %v11470_v60 = vadd.f32 %v4838_v16, %v13422_v31  ;;  %v5394_v37 = vsel %vm886_vm0, %v5266_v61, 0.0  ;;  %v4248_v63 = vmul.f32 %v13426_v34, %v13425_v5  ;;  %v13429_v5 = vld [vmem:[#allocation116_spill] sm:$0xff]  ;;  %7386 = vrcp.f32 %v3694_v21 }
 0x9c4   :  { %v11467_v14 = vmul.f32 %v4259_v49, %v2822_v54  ;;  %5395 = vadd.xlane.f32.xlu1 %v5394_v37  ;;  %v4840_v29 = vpop.f32.mrf.mxu0  ;;  %v7363_v49 = vpop.eup %7362  ;;  %v13428_v54 = vld [vmem:[#allocation160_spill] sm:$0xff]  ;;  %7388 = vrcp.f32 %v3695_v42  ;;  %v4263_v42 = vmul.f32 %v7355_v38, %v13436_v9  ;;  %v13437_v9 = vld [vmem:[#allocation119_spill] sm:$0xff] }
 0x9c5   :  { %13423 = vst [vmem:[#allocation233_spill] sm:$0xff] %v11470_v60  ;;  %v11478_v32 = vpop.f32.mrf.mxu1  ;;  %v6499_v61 = vmul.f32 -1.442695, %v13428_v54  ;;  %v5267_v16 = vmul.f32 %v11470_v60, %v11470_v60  ;;  %v7365_v31 = vpop.eup %7364  ;;  %v13430_v34 = vld [vmem:[#allocation216_spill] sm:$0xff]  ;;  %v13431_v29 = vld [vmem:[#allocation161_spill] sm:$0xff]  ;;  %v4440_v59 = vmul.f32 %v4248_v63, %v11343_v19  ;;  %v13432_v54 = vld [vmem:[#allocation118_spill] sm:$0xff]  ;;  %7390 = vpow2.f32 %v6498_v20 }
 0x9c6   :  { %v4246_v37 = vmul.f32 %v13430_v34, %v13429_v5  ;;  %v6500_v56 = vmul.f32 -1.442695, %v13431_v29  ;;  %v4843_v43 = vpop.f32.mrf.mxu0  ;;  %v13434_v60 = vld [vmem:[#allocation137_spill] sm:$0xff]  ;;  %v6501_v5 = vmul.f32 -1.442695, %v13435_v12  ;;  %v3696_v29 = vadd.f32 1.0, %v7363_v49 }
 0x9c7   :  { %4986 = vmatmul.mubr.bf16.gmra.mxu0 %v13427_v27  ;;  %v2828_v23 = vpop.f32.mrf.mxu1  ;;  %v7367_v27 = vpop.eup %7366  ;;  %v11493_v4 = vadd.f32 %v4843_v43, %v13432_v54  ;;  %v5397_v58 = vsel %vm886_vm0, %v5267_v16, 0.0  ;;  %7392 = vpow2.f32 %v6499_v61 }
 0x9c8   :  { %4993 = vmatprep.mubr.bf16.mxu0 %v4570_v15  ;;  %v4261_v15 = vmul.f32 %v11426_v47, %v13434_v60  ;;  %v4438_v21 = vmul.f32 %v4246_v37, %v11327_v33  ;;  %5398 = vadd.xlane.f32.xlu0 %v5397_v58  ;;  %v4845_v19 = vpop.f32.mrf.mxu0  ;;  %v7369_v63 = vpop.eup %7368  ;;  %v3697_v47 = vadd.f32 1.0, %v7365_v31  ;;  %v3699_v60 = vadd.f32 1.0, %v7367_v27  ;;  %v13440_v27 = vld [vmem:[#allocation126_spill] sm:$0xff] }
 0x9c9   :  { %13433 = vst [vmem:[#allocation242_spill] sm:$0xff] %v11493_v4  ;;  %v11500_v34 = vpop.f32.mrf.mxu1  ;;  %v5268_v54 = vmul.f32 %v11493_v4, %v11493_v4  ;;  %v11505_v16 = vpop.eup %7370  ;;  %7394 = vpow2.f32 %v6500_v56  ;;  %v13439_v4 = vld [vmem:[#allocation163_spill] sm:$0xff]  ;;  %v4252_v56 = vmul.f32 %v11294_v24, %v13440_v27 }
 0x9ca   :  { %v4572_v20 = vpack.c.bf16 %v4440_v59, %v4438_v21  ;;  %v4846_v33 = vpop.f32.mrf.mxu0  ;;  %v11507_v37 = vpop.eup %7372  ;;  %v11509_v58 = vmul.f32 %v4261_v15, %v2828_v23  ;;  %7396 = vpow2.f32 %v6501_v5  ;;  %v6502_v31 = vmul.f32 -1.442695, %v13439_v4 }
 0x9cb   :  { %v2832_v43 = vpop.f32.mrf.mxu1  ;;  %v11514_v38 = vadd.f32 %v4846_v33, %v13437_v9  ;;  %v5400_v49 = vsel %vm886_vm0, %v5268_v54, 0.0  ;;  %v7375_v61 = vpop.eup %7374  ;;  %v13441_v23 = vpack.c.bf16 %v11300_v28, %v11298_v25  ;;  %7398 = vrcp.f32 %v3696_v29  ;;  %v13443_v33 = vld [vmem:[#allocation122_spill] sm:$0xff] }
 0x9cc   :  { %v11511_v19 = vmul.f32 %v4263_v42, %v2832_v43  ;;  %5401 = vadd.xlane.f32.xlu1 %v5400_v49  ;;  %v4848_v21 = vpop.f32.mrf.mxu0  ;;  %v7377_v15 = vpop.eup %7376  ;;  %v13442_v42 = vld [vmem:[#allocation164_spill] sm:$0xff]  ;;  %v4250_v9 = vmul.f32 %v11269_v13, %v13443_v33  ;;  %7400 = vrcp.f32 %v3697_v47  ;;  %v13444_v49 = vld [vmem:[#allocation167_spill] sm:$0xff]  ;;  %v4444_v25 = vmul.f32 %v4252_v56, %v11387_v45 }
 0x9cd   :  { %13438 = vst [vmem:[#allocation22_spill] sm:$0xff] %v11514_v38  ;;  %v11520_v59 = vpop.f32.mrf.mxu1  ;;  %v6503_v43 = vmul.f32 -1.442695, %v13442_v42  ;;  %v5269_v54 = vmul.f32 %v11514_v38, %v11514_v38  ;;  %v7379_v24 = vpop.eup %7378  ;;  %v6504_v27 = vmul.f32 -1.442695, %v13444_v49  ;;  %7402 = vrcp.f32 %v3699_v60  ;;  %v13447_v38 = vld [vmem:[#allocation141_spill] sm:$0xff] }
 0x9ce   :  { %v4851_v29 = vpop.f32.mrf.mxu0  ;;  %v7381_v21 = vpop.eup %7380  ;;  %v3698_v12 = vadd.f32 1.0, %v7375_v61  ;;  %7404 = vpow2.f32 %v6502_v31  ;;  %v4442_v13 = vmul.f32 %v4250_v9, %v11364_v26  ;;  %v4267_v33 = vmul.f32 %v7369_v63, %v13378_v6  ;;  %v13448_v9 = vld [vmem:[#allocation125_spill] sm:$0xff] }
 0x9cf   :  { %4994 = vmatmul.mubr.bf16.gmra.mxu0 %v13441_v23  ;;  %v2838_v28 = vpop.f32.mrf.mxu1  ;;  %v13445_v23 = vld [vmem:[#allocation124_spill] sm:$0xff]  ;;  %v5403_v5 = vsel %vm886_vm0, %v5269_v54, 0.0  ;;  %v7383_v56 = vpop.eup %7382  ;;  %v3700_v60 = vadd.f32 1.0, %v7377_v15  ;;  %7406 = vpow2.f32 %v6503_v43  ;;  %v3702_v49 = vadd.f32 1.0, %v7381_v21 }
 0x9d0   :  { %5001 = vmatprep.mubr.bf16.mxu0 %v4572_v20  ;;  %v11535_v42 = vadd.f32 %v4851_v29, %v13445_v23  ;;  %v4265_v20 = vmul.f32 %v11463_v41, %v13447_v38  ;;  %5404 = vadd.xlane.f32.xlu0 %v5403_v5  ;;  %v4853_v45 = vpop.f32.mrf.mxu0  ;;  %v7385_v54 = vpop.eup %7384  ;;  %v3701_v23 = vadd.f32 1.0, %v7379_v24  ;;  %7408 = vpow2.f32 %v6504_v27  ;;  %v13450_v24 = vld [vmem:[#allocation130_spill] sm:$0xff] }
 0x9d1   :  { %v11541_v47 = vpop.f32.mrf.mxu1  ;;  %v4574_v41 = vpack.c.bf16 %v4444_v25, %v4442_v13  ;;  %v11546_v26 = vpop.eup %7386  ;;  %7410 = vrcp.f32 %v3698_v12  ;;  %v3703_v43 = vadd.f32 1.0, %v7383_v56  ;;  %v4256_v27 = vmul.f32 %v11372_v35, %v13450_v24  ;;  %v13452_v35 = vld [vmem:[#allocation128_spill] sm:$0xff] }
 0x9d2   :  { %13446 = vst [vmem:[#allocation244_spill] sm:$0xff] %v11535_v42  ;;  %v5270_v29 = vmul.f32 %v11535_v42, %v11535_v42  ;;  %v4854_v61 = vpop.f32.mrf.mxu0  ;;  %v11548_v31 = vmul.f32 %v4265_v20, %v2838_v28  ;;  %v7389_v15 = vpop.eup %7388  ;;  %v13451_v28 = vpack.c.bf16 %v11335_v46, %v11333_v17  ;;  %7412 = vrcp.f32 %v3700_v60  ;;  %v13459_v45 = vld [vmem:[#allocation136_spill] sm:$0xff] }
 0x9d3   :  { %v2842_v38 = vpop.f32.mrf.mxu1  ;;  %v11553_v6 = vadd.f32 %v4854_v61, %v13448_v9  ;;  %v7391_v20 = vpop.eup %7390  ;;  %v3704_v13 = vadd.f32 1.0, %v7385_v54  ;;  %7414 = vrcp.f32 %v3701_v23  ;;  %v4448_v17 = vmul.f32 %v4256_v27, %v11431_v22  ;;  %v13454_v54 = vld [vmem:[#allocation131_spill] sm:$0xff] }
 0x9d4   :  { %v11550_v5 = vmul.f32 %v4267_v33, %v2842_v38  ;;  %v5406_v63 = vsel %vm886_vm0, %v5270_v29, 0.0  ;;  %v4856_v21 = vpop.f32.mrf.mxu0  ;;  %v7393_v56 = vpop.eup %7392  ;;  %v4254_v33 = vmul.f32 %v11366_v36, %v13452_v35  ;;  %v13453_v29 = vld [vmem:[#allocation169_spill] sm:$0xff]  ;;  %7416 = vrcp.f32 %v3702_v49  ;;  %v13456_v49 = vld [vmem:[#allocation171_spill] sm:$0xff] }
 0x9d5   :  { %13449 = vst [vmem:[#allocation252_spill] sm:$0xff] %v11553_v6  ;;  %v11558_v25 = vpop.f32.mrf.mxu1  ;;  %5407 = vadd.xlane.f32.xlu1 %v5406_v63  ;;  %v5271_v12 = vmul.f32 %v11553_v6, %v11553_v6  ;;  %v6506_v38 = vmul.f32 -1.442695, %v13453_v29  ;;  %7418 = vrcp.f32 %v3703_v43  ;;  %v3705_v24 = vadd.f32 1.0, %v7391_v20 }
 0x9d6   :  { %v4859_v61 = vpop.f32.mrf.mxu0  ;;  %v7395_v60 = vpop.eup %7394  ;;  %v4446_v36 = vmul.f32 %v4254_v33, %v11408_v51  ;;  %v4271_v21 = vmul.f32 %v7389_v15, %v13391_v48  ;;  %7420 = vrcp.f32 %v3704_v13  ;;  %v13457_v48 = vld [vmem:[#allocation132_spill] sm:$0xff] }
 0x9d7   :  { %5002 = vmatmul.mubr.bf16.gmra.mxu0 %v13451_v28  ;;  %v2848_v46 = vpop.f32.mrf.mxu1  ;;  %v11572_v9 = vadd.f32 %v4859_v61, %v13454_v54  ;;  %v5409_v63 = vsel %vm886_vm0, %v5271_v12, 0.0  ;;  %v7397_v27 = vpop.eup %7396  ;;  %v6508_v28 = vmul.f32 -1.442695, %v13456_v49  ;;  %7422 = vpow2.f32 %v6506_v38 }
 0x9d8   :  { %5009 = vmatprep.mubr.bf16.mxu0 %v4574_v41  ;;  %v4269_v41 = vmul.f32 %v11507_v37, %v13382_v11  ;;  %5410 = vadd.xlane.f32.xlu0 %v5409_v63  ;;  %v4861_v22 = vpop.f32.mrf.mxu0  ;;  %v11584_v35 = vpop.eup %7398  ;;  %v3706_v11 = vadd.f32 1.0, %v7393_v56  ;;  %v3707_v37 = vadd.f32 1.0, %v7395_v60  ;;  %v4576_v43 = vpack.c.bf16 %v4448_v17, %v4446_v36 }
 0x9d9   :  { %13455 = vst [vmem:[#allocation240_spill] sm:$0xff] %v11572_v9  ;;  %v11578_v23 = vpop.f32.mrf.mxu1  ;;  %v5272_v12 = vmul.f32 %v11572_v9, %v11572_v9  ;;  %v7401_v33 = vpop.eup %7400  ;;  %7424 = vrcp.f32 %v3705_v24  ;;  %v3708_v22 = vadd.f32 1.0, %v7397_v27  ;;  %v4260_v56 = vmul.f32 %v11416_v55, %v13459_v45  ;;  %v13462_v45 = vld [vmem:[#allocation134_spill] sm:$0xff] }
 0x9da   :  { %v4862_v20 = vpop.f32.mrf.mxu0  ;;  %v11586_v61 = vmul.f32 %v4269_v41, %v2848_v46  ;;  %v7403_v63 = vpop.eup %7402  ;;  %v13460_v46 = vpack.c.bf16 %v11376_v44, %v11374_v62  ;;  %v13461_v41 = vld [vmem:[#allocation168_spill] sm:$0xff]  ;;  %7426 = vpow2.f32 %v6508_v28  ;;  %v4258_v27 = vmul.f32 %v11410_v2, %v13462_v45 }
 0x9db   :  { %v2852_v51 = vpop.f32.mrf.mxu1  ;;  %v11591_v15 = vadd.f32 %v4862_v20, %v13457_v48  ;;  %v5412_v13 = vsel %vm886_vm0, %v5272_v12, 0.0  ;;  %v7405_v60 = vpop.eup %7404  ;;  %v6505_v36 = vmul.f32 -1.442695, %v13461_v41  ;;  %7428 = vrcp.f32 %v3706_v11  ;;  %v13463_v12 = vld [vmem:[#allocation173_spill] sm:$0xff]  ;;  %v13464_v28 = vld [vmem:[#allocation148_spill] sm:$0xff] }
 0x9dc   :  { %v11588_v54 = vmul.f32 %v4271_v21, %v2852_v51  ;;  %5413 = vadd.xlane.f32.xlu1 %v5412_v13  ;;  %v4864_v17 = vpop.f32.mrf.mxu0  ;;  %v7407_v55 = vpop.eup %7406  ;;  %v6510_v51 = vmul.f32 -1.442695, %v13463_v12  ;;  %v4452_v62 = vmul.f32 %v4260_v56, %v11478_v32  ;;  %7430 = vrcp.f32 %v3707_v37 }
 0x9dd   :  { %13458 = vst [vmem:[#allocation249_spill] sm:$0xff] %v11591_v15  ;;  %v11596_v38 = vpop.f32.mrf.mxu1  ;;  %v5273_v24 = vmul.f32 %v11591_v15, %v11591_v15  ;;  %v7409_v48 = vpop.eup %7408  ;;  %7432 = vrcp.f32 %v3708_v22  ;;  %v4450_v2 = vmul.f32 %v4258_v27, %v11455_v57  ;;  %v4275_v37 = vmul.f32 %v7403_v63, %v13399_v0  ;;  %v13467_v15 = vld [vmem:[#allocation149_spill] sm:$0xff] }
 0x9de   :  { %v4867_v20 = vpop.f32.mrf.mxu0  ;;  %v11619_v56 = vpop.eup %7410  ;;  %v3709_v45 = vadd.f32 1.0, %v7405_v60  ;;  %7434 = vpow2.f32 %v6505_v36  ;;  %v13469_v36 = vld [vmem:[#allocation170_spill] sm:$0xff] }
 0x9df   :  { %5010 = vmatmul.mubr.bf16.gmra.mxu0 %v13460_v46  ;;  %v2858_v44 = vpop.f32.mrf.mxu1  ;;  %v11611_v13 = vadd.f32 %v4867_v20, %v13464_v28  ;;  %v5415_v17 = vsel %vm886_vm0, %v5273_v24, 0.0  ;;  %v13466_v46 = vld [vmem:[#allocation175_spill] sm:$0xff]  ;;  %v11624_v20 = vpop.eup %7412  ;;  %7436 = vpow2.f32 %v6510_v51  ;;  %v4578_v22 = vpack.c.bf16 %v4452_v62, %v4450_v2 }
 0x9e0   :  { %5017 = vmatprep.mubr.bf16.mxu0 %v4576_v43  ;;  %v4273_v43 = vmul.f32 %v7401_v33, %v13398_v50  ;;  %v6512_v21 = vmul.f32 -1.442695, %v13466_v46  ;;  %5416 = vadd.xlane.f32.xlu0 %v5415_v17  ;;  %v4869_v32 = vpop.f32.mrf.mxu0  ;;  %v3710_v50 = vadd.f32 1.0, %v7407_v55  ;;  %v3711_v33 = vadd.f32 1.0, %v7409_v48  ;;  %v7415_v28 = vpop.eup %7414  ;;  %v13470_v55 = vld [vmem:[#allocation140_spill] sm:$0xff] }
 0x9e1   :  { %13465 = vst [vmem:[#allocation25_spill] sm:$0xff] %v11611_v13  ;;  %v11617_v11 = vpop.f32.mrf.mxu1  ;;  %v5274_v24 = vmul.f32 %v11611_v13, %v11611_v13  ;;  %v11634_v60 = vpop.eup %7416  ;;  %v6507_v13 = vmul.f32 -1.442695, %v13469_v36  ;;  %v4264_v51 = vmul.f32 %v11461_v1, %v13470_v55  ;;  %v13471_v48 = vpack.c.bf16 %v11420_v3, %v11418_v8 }
 0x9e2   :  { %v4870_v27 = vpop.f32.mrf.mxu0  ;;  %v11626_v17 = vmul.f32 %v4273_v43, %v2858_v44  ;;  %7438 = vpow2.f32 %v6512_v21  ;;  %v13472_v43 = vld [vmem:[#allocation172_spill] sm:$0xff] }
 0x9e3   :  { %v2862_v57 = vpop.f32.mrf.mxu1  ;;  %v11631_v0 = vadd.f32 %v4870_v27, %v13467_v15  ;;  %v5418_v63 = vsel %vm886_vm0, %v5274_v24, 0.0  ;;  %v7419_v15 = vpop.eup %7418  ;;  %7440 = vrcp.f32 %v3709_v45  ;;  %v6509_v2 = vmul.f32 -1.442695, %v13472_v43  ;;  %v13473_v24 = vld [vmem:[#allocation138_spill] sm:$0xff]  ;;  %v13474_v27 = vld [vmem:[#allocation177_spill] sm:$0xff] }
 0x9e4   :  { %v11628_v32 = vmul.f32 %v4275_v37, %v2862_v57  ;;  %5419 = vadd.xlane.f32.xlu1 %v5418_v63  ;;  %v4872_v44 = vpop.f32.mrf.mxu0  ;;  %v11649_v1 = vpop.eup %7420  ;;  %v4262_v57 = vmul.f32 %v11436_v18, %v13473_v24  ;;  %7442 = vrcp.f32 %v3710_v50  ;;  %v6514_v8 = vmul.f32 -1.442695, %v13474_v27 }
 0x9e5   :  { %13468 = vst [vmem:[#allocation251_spill] sm:$0xff] %v11631_v0  ;;  %v11639_v62 = vpop.f32.mrf.mxu1  ;;  %v5275_v21 = vmul.f32 %v11631_v0, %v11631_v0  ;;  %v4456_v3 = vmul.f32 %v4264_v51, %v11520_v59  ;;  %v7423_v55 = vpop.eup %7422  ;;  %7444 = vrcp.f32 %v3711_v33  ;;  %v13475_v44 = vld [vmem:[#allocation165_spill] sm:$0xff]  ;;  %v13477_v0 = vld [vmem:[#allocation174_spill] sm:$0xff]  ;;  %v4279_v24 = vmul.f32 %v7419_v15, %v13419_v40  ;;  %v13478_v33 = vld [vmem:[#allocation179_spill] sm:$0xff] }
 0x9e6   :  { %v4875_v63 = vpop.f32.mrf.mxu0  ;;  %7446 = vpow2.f32 %v6507_v13  ;;  %v6511_v9 = vmul.f32 -1.442695, %v13477_v0  ;;  %v4454_v18 = vmul.f32 %v4262_v57, %v11500_v34  ;;  %v7425_v51 = vpop.eup %7424  ;;  %v13479_v13 = vld [vmem:[#allocation176_spill] sm:$0xff]  ;;  %v13480_v40 = vld [vmem:[#allocation166_spill] sm:$0xff] }
 0x9e7   :  { %5018 = vmatmul.mubr.bf16.gmra.mxu0 %v13471_v48  ;;  %v2868_v45 = vpop.f32.mrf.mxu1  ;;  %v11656_v48 = vadd.f32 %v4875_v63, %v13475_v44  ;;  %v5421_v37 = vsel %vm886_vm0, %v5275_v21, 0.0  ;;  %7448 = vpow2.f32 %v6509_v2  ;;  %v6516_v63 = vmul.f32 -1.442695, %v13478_v33  ;;  %v7427_v44 = vpop.eup %7426 }
 0x9e8   :  { %5025 = vmatprep.mubr.bf16.mxu0 %v4578_v22  ;;  %v4277_v22 = vmul.f32 %v7415_v28, %v13412_v30  ;;  %5422 = vadd.xlane.f32.xlu0 %v5421_v37  ;;  %v4877_v59 = vpop.f32.mrf.mxu0  ;;  %v3713_v30 = vadd.f32 1.0, %v7423_v55  ;;  %v6513_v28 = vmul.f32 -1.442695, %v13479_v13  ;;  %7450 = vpow2.f32 %v6514_v8  ;;  %v11669_v42 = vpop.eup %7428  ;;  %v13482_v55 = vld [vmem:[#allocation178_spill] sm:$0xff] }
 0x9e9   :  { %13476 = vst [vmem:[#allocation247_spill] sm:$0xff] %v11656_v48  ;;  %v11662_v50 = vpop.f32.mrf.mxu1  ;;  %v5276_v21 = vmul.f32 %v11656_v48, %v11656_v48  ;;  %v4580_v6 = vpack.c.bf16 %v4456_v3, %v4454_v18  ;;  %v7431_v48 = vpop.eup %7430  ;;  %7452 = vpow2.f32 %v6511_v9  ;;  %v6515_v0 = vmul.f32 -1.442695, %v13482_v55 }
 0x9ea   :  { %v4878_v57 = vpop.f32.mrf.mxu0  ;;  %v11671_v37 = vmul.f32 %v4277_v22, %v2868_v45  ;;  %v4268_v8 = vmul.f32 %v11505_v16, %v13380_v10  ;;  %v13483_v45 = vpack.c.bf16 %v11467_v14, %v11465_v52  ;;  %v11687_v22 = vpop.eup %7432  ;;  %7454 = vpow2.f32 %v6516_v63  ;;  %v13485_v63 = vld [vmem:[#allocation182_spill] sm:$0xff] }
 0x9eb   :  { %v2872_v34 = vpop.f32.mrf.mxu1  ;;  %v11676_v15 = vadd.f32 %v4878_v57, %v13480_v40  ;;  %v5424_v2 = vsel %vm886_vm0, %v5276_v21, 0.0  ;;  %v7435_v10 = vpop.eup %7434  ;;  %v4266_v16 = vmul.f32 %v11473_v53, %v13373_v7  ;;  %7456 = vpow2.f32 %v6513_v28 }
 0x9ec   :  { %v11673_v59 = vmul.f32 %v4279_v24, %v2872_v34  ;;  %5425 = vadd.xlane.f32.xlu1 %v5424_v2  ;;  %v4880_v18 = vpop.f32.mrf.mxu0  ;;  %v3715_v24 = vadd.f32 1.0, %v7427_v44  ;;  %v13484_v34 = vld [vmem:[#allocation181_spill] sm:$0xff]  ;;  %v4460_v52 = vmul.f32 %v4268_v8, %v11558_v25  ;;  %v7437_v44 = vpop.eup %7436  ;;  %7458 = vrcp.f32 %v3713_v30 }
 0x9ed   :  { %13481 = vst [vmem:[#allocation256_spill] sm:$0xff] %v11676_v15  ;;  %v11682_v3 = vpop.f32.mrf.mxu1  ;;  %v5277_v21 = vmul.f32 %v11676_v15, %v11676_v15  ;;  %v6518_v57 = vmul.f32 -1.442695, %v13484_v34  ;;  %7460 = vpow2.f32 %v6515_v0  ;;  %v4458_v7 = vmul.f32 %v4266_v16, %v11541_v47  ;;  %v13488_v8 = vld [vmem:[#allocation161_spill] sm:$0xff] }
 0x9ee   :  { %v4883_v40 = vpop.f32.mrf.mxu0  ;;  %v4283_v15 = vmul.f32 %v7431_v48, %v13488_v8  ;;  %7462 = vrcp.f32 %v3715_v24  ;;  %v13489_v30 = vld [vmem:[#allocation185_spill] sm:$0xff]  ;;  %v3717_v0 = vadd.f32 1.0, %v7437_v44  ;;  %v13490_v48 = vld [vmem:[#allocation183_spill] sm:$0xff] }
 0x9ef   :  { %5026 = vmatmul.mubr.bf16.gmra.mxu0 %v13483_v45  ;;  %v2878_v14 = vpop.f32.mrf.mxu1  ;;  %v11698_v2 = vadd.f32 %v4883_v40, %v13485_v63  ;;  %v5427_v18 = vsel %vm886_vm0, %v5277_v21, 0.0  ;;  %v13487_v45 = vld [vmem:[#allocation180_spill] sm:$0xff]  ;;  %v7439_v28 = vpop.eup %7438  ;;  %v6520_v40 = vmul.f32 -1.442695, %v13489_v30  ;;  %7464 = vpow2.f32 %v6518_v57 }
 0x9f0   :  { %5033 = vmatprep.mubr.bf16.mxu0 %v4580_v6  ;;  %v4281_v6 = vmul.f32 %v7425_v51, %v13424_v39  ;;  %v6517_v9 = vmul.f32 -1.442695, %v13487_v45  ;;  %5428 = vadd.xlane.f32.xlu0 %v5427_v18  ;;  %v4885_v25 = vpop.f32.mrf.mxu0  ;;  %v7441_v63 = vpop.eup %7440  ;;  %v3712_v39 = vadd.f32 1.0, %v7435_v10  ;;  %v4582_v51 = vpack.c.bf16 %v4460_v52, %v4458_v7  ;;  %v13492_v10 = vld [vmem:[#allocation150_spill] sm:$0xff] }
 0x9f1   :  { %13486 = vst [vmem:[#allocation28_spill] sm:$0xff] %v11698_v2  ;;  %v11704_v53 = vpop.f32.mrf.mxu1  ;;  %v5278_v21 = vmul.f32 %v11698_v2, %v11698_v2  ;;  %v11710_v16 = vpop.eup %7442  ;;  %v3719_v2 = vadd.f32 1.0, %v7439_v28  ;;  %v4272_v57 = vmul.f32 %v11584_v35, %v13492_v10  ;;  %v13495_v28 = vld [vmem:[#allocation146_spill] sm:$0xff] }
 0x9f2   :  { %v4886_v47 = vpop.f32.mrf.mxu0  ;;  %v11712_v18 = vmul.f32 %v4281_v6, %v2878_v14  ;;  %v7445_v55 = vpop.eup %7444  ;;  %7466 = vpow2.f32 %v6517_v9  ;;  %v13493_v14 = vpack.c.bf16 %v11511_v19, %v11509_v58  ;;  %v13494_v6 = vld [vmem:[#allocation184_spill] sm:$0xff] }
 0x9f3   :  { %v2882_v45 = vpop.f32.mrf.mxu1  ;;  %v11717_v24 = vadd.f32 %v4886_v47, %v13490_v48  ;;  %v5430_v8 = vsel %vm886_vm0, %v5278_v21, 0.0  ;;  %7468 = vpow2.f32 %v6520_v40  ;;  %v4270_v21 = vmul.f32 %v11546_v26, %v13495_v28  ;;  %v13496_v47 = vld [vmem:[#allocation187_spill] sm:$0xff] }
 0x9f4   :  { %v11714_v25 = vmul.f32 %v4283_v15, %v2882_v45  ;;  %5431 = vadd.xlane.f32.xlu1 %v5430_v8  ;;  %v4888_v44 = vpop.f32.mrf.mxu0  ;;  %v7447_v15 = vpop.eup %7446  ;;  %v6519_v45 = vmul.f32 -1.442695, %v13494_v6  ;;  %7470 = vrcp.f32 %v3712_v39  ;;  %v6522_v48 = vmul.f32 -1.442695, %v13496_v47  ;;  %v13497_v40 = vld [vmem:[#allocation199_spill] sm:$0xff] }
 0x9f5   :  { %13491 = vst [vmem:[#allocation254_spill] sm:$0xff] %v11717_v24  ;;  %v11722_v52 = vpop.f32.mrf.mxu1  ;;  %v5279_v9 = vmul.f32 %v11717_v24, %v11717_v24  ;;  %v7449_v35 = vpop.eup %7448  ;;  %v4464_v58 = vmul.f32 %v4272_v57, %v11596_v38  ;;  %7472 = vrcp.f32 %v3717_v0  ;;  %v3714_v7 = vadd.f32 1.0, %v7447_v15  ;;  %v13499_v57 = vld [vmem:[#allocation167_spill] sm:$0xff]  ;;  %v13500_v0 = vld [vmem:[#allocation189_spill] sm:$0xff] }
 0x9f6   :  { %v4891_v8 = vpop.f32.mrf.mxu0  ;;  %v7451_v10 = vpop.eup %7450  ;;  %7474 = vrcp.f32 %v3719_v2  ;;  %v4462_v26 = vmul.f32 %v4270_v21, %v11578_v23  ;;  %v4287_v24 = vmul.f32 %v7445_v55, %v13499_v57  ;;  %v6524_v6 = vmul.f32 -1.442695, %v13500_v0  ;;  %v13502_v0 = vld [vmem:[#allocation154_spill] sm:$0xff] }
 0x9f7   :  { %5034 = vmatmul.mubr.bf16.gmra.mxu0 %v13493_v14  ;;  %v2888_v19 = vpop.f32.mrf.mxu1  ;;  %v11737_v44 = vadd.f32 %v4891_v8, %v13497_v40  ;;  %v5433_v14 = vsel %vm886_vm0, %v5279_v9, 0.0  ;;  %v7453_v38 = vpop.eup %7452  ;;  %7476 = vpow2.f32 %v6519_v45  ;;  %v3716_v40 = vadd.f32 1.0, %v7449_v35 }
 0x9f8   :  { %5041 = vmatprep.mubr.bf16.mxu0 %v4582_v51  ;;  %v4285_v51 = vmul.f32 %v7441_v63, %v13439_v4  ;;  %5434 = vadd.xlane.f32.xlu0 %v5433_v14  ;;  %v4893_v28 = vpop.f32.mrf.mxu0  ;;  %v7455_v9 = vpop.eup %7454  ;;  %v3721_v4 = vadd.f32 1.0, %v7451_v10  ;;  %7478 = vpow2.f32 %v6522_v48  ;;  %v4584_v2 = vpack.c.bf16 %v4464_v58, %v4462_v26 }
 0x9f9   :  { %13498 = vst [vmem:[#allocation31_spill] sm:$0xff] %v11737_v44  ;;  %v11742_v39 = vpop.f32.mrf.mxu1  ;;  %v5280_v8 = vmul.f32 %v11737_v44, %v11737_v44  ;;  %v7457_v15 = vpop.eup %7456  ;;  %v13501_v28 = vld [vmem:[#allocation200_spill] sm:$0xff]  ;;  %7480 = vrcp.f32 %v3714_v7  ;;  %v3718_v44 = vadd.f32 1.0, %v7453_v38  ;;  %v4276_v35 = vmul.f32 %v11624_v20, %v13502_v0 }
 0x9fa   :  { %v4894_v23 = vpop.f32.mrf.mxu0  ;;  %v11748_v21 = vmul.f32 %v4285_v51, %v2888_v19  ;;  %v7459_v57 = vpop.eup %7458  ;;  %v13503_v19 = vpack.c.bf16 %v11550_v5, %v11548_v31  ;;  %v3723_v10 = vadd.f32 1.0, %v7455_v9  ;;  %7482 = vpow2.f32 %v6524_v6 }
 0x9fb   :  { %v2892_v63 = vpop.f32.mrf.mxu1  ;;  %v11753_v55 = vadd.f32 %v4894_v23, %v13501_v28  ;;  %v5436_v45 = vsel %vm886_vm0, %v5280_v8, 0.0  ;;  %7484 = vrcp.f32 %v3716_v40  ;;  %v3720_v20 = vadd.f32 1.0, %v7457_v15  ;;  %v13504_v8 = vld [vmem:[#allocation152_spill] sm:$0xff]  ;;  %v13505_v15 = vld [vmem:[#allocation191_spill] sm:$0xff] }
 0x9fc   :  { %v11750_v14 = vmul.f32 %v4287_v24, %v2892_v63  ;;  %5437 = vadd.xlane.f32.xlu1 %v5436_v45  ;;  %v4896_v58 = vpop.f32.mrf.mxu0  ;;  %v7461_v24 = vpop.eup %7460  ;;  %v4274_v63 = vmul.f32 %v11619_v56, %v13504_v8  ;;  %7486 = vrcp.f32 %v3721_v4  ;;  %v4468_v31 = vmul.f32 %v4276_v35, %v11639_v62  ;;  %v13506_v62 = vld [vmem:[#allocation193_spill] sm:$0xff] }
 0x9fd   :  { %v11758_v48 = vpop.f32.mrf.mxu1  ;;  %v5281_v7 = vmul.f32 %v11753_v55, %v11753_v55  ;;  %v7463_v26 = vpop.eup %7462  ;;  %v4289_v6 = vmul.f32 %v7459_v57, %v13453_v29  ;;  %7488 = vrcp.f32 %v3718_v44  ;;  %v3722_v9 = vadd.f32 1.0, %v7461_v24 }
 0x9fe   :  { %v7465_v0 = vpop.eup %7464  ;;  %v4291_v40 = vmul.f32 %v7463_v26, %v13456_v49  ;;  %7490 = vrcp.f32 %v3723_v10  ;;  %v6526_v28 = vmul.f32 -1.442695, %v13505_v15  ;;  %v4466_v56 = vmul.f32 %v4274_v63, %v11617_v11  ;;  %v13509_v63 = vld [vmem:[#allocation186_spill] sm:$0xff] }
 0x9ff   :  { %5042 = vmatmul.mubr.bf16.gmra.mxu0 %v13503_v19  ;;  %v2898_v38 = vpop.f32.mrf.mxu1  ;;  %v5439_v5 = vsel %vm886_vm0, %v5281_v7, 0.0  ;;  %7492 = vrcp.f32 %v3720_v20  ;;  %v6528_v45 = vmul.f32 -1.442695, %v13506_v62  ;;  %v3725_v29 = vadd.f32 1.0, %v7465_v0  ;;  %v13508_v20 = vld [vmem:[#allocation158_spill] sm:$0xff] }
 0xa00   :  { %5049 = vmatprep.mubr.bf16.mxu0 %v4584_v2  ;;  %5440 = vadd.xlane.f32.xlu0 %v5439_v5  ;;  %v7467_v2 = vpop.eup %7466  ;;  %v4586_v44 = vpack.c.bf16 %v4468_v31, %v4466_v56  ;;  %v11778_v57 = vmul.f32 %v4289_v6, %v2898_v38  ;;  %7494 = vrcp.f32 %v3722_v9  ;;  %v13507_v11 = vpack.c.bf16 %v11588_v54, %v11586_v61  ;;  %v13510_v9 = vld [vmem:[#allocation156_spill] sm:$0xff]  ;;  %v13512_v56 = vld [vmem:[#allocation195_spill] sm:$0xff] }
 0xa01   :  { %v11772_v23 = vpop.f32.mrf.mxu1  ;;  %v7469_v4 = vpop.eup %7468  ;;  %v3724_v49 = vadd.f32 1.0, %v7467_v2  ;;  %7496 = vpow2.f32 %v6526_v28  ;;  %v4280_v0 = vmul.f32 %v11649_v1, %v13508_v20  ;;  %v6521_v31 = vmul.f32 -1.442695, %v13509_v63  ;;  %v13511_v54 = vld [vmem:[#allocation160_spill] sm:$0xff] }
 0xa02   :  { %v7471_v58 = vpop.eup %7470  ;;  %v3727_v26 = vadd.f32 1.0, %v7469_v4  ;;  %7498 = vpow2.f32 %v6528_v45  ;;  %v4278_v61 = vmul.f32 %v11634_v60, %v13510_v9  ;;  %v11796_v2 = vmul.f32 %v11669_v42, %v13511_v54  ;;  %v13514_v42 = vld [vmem:[#allocation197_spill] sm:$0xff] }
 0xa03   :  { %v2902_v35 = vpop.f32.mrf.mxu1  ;;  %v7473_v24 = vpop.eup %7472  ;;  %7500 = vrcp.f32 %v3725_v29  ;;  %v4472_v1 = vmul.f32 %v4280_v0, %v11682_v3  ;;  %v6530_v4 = vmul.f32 -1.442695, %v13512_v56  ;;  %v6532_v20 = vmul.f32 -1.442695, %v13514_v42 }
 0xa04   :  { %v11780_v19 = vmul.f32 %v4291_v40, %v2902_v35  ;;  %v7475_v7 = vpop.eup %7474  ;;  %v4293_v28 = vmul.f32 %v7473_v24, %v13463_v12  ;;  %7502 = vrcp.f32 %v3724_v49  ;;  %v13513_v35 = vld [vmem:[#allocation210_spill] sm:$0xff]  ;;  %v4470_v29 = vmul.f32 %v4278_v61, %v11662_v50  ;;  %v13516_v61 = vld [vmem:[#allocation164_spill] sm:$0xff] }
 0xa05   :  { %v11782_v10 = vpop.f32.mrf.mxu1  ;;  %v7477_v8 = vpop.eup %7476  ;;  %v4295_v60 = vmul.f32 %v7475_v7, %v13466_v46  ;;  %7504 = vrcp.f32 %v3727_v26  ;;  %v13515_v12 = vld [vmem:[#allocation162_spill] sm:$0xff] }
 0xa06   :  { %v7479_v6 = vpop.eup %7478  ;;  %v4899_v40 = vpop.f32.mrf.mxu0  ;;  %v3726_v9 = vadd.f32 1.0, %v7477_v8  ;;  %7506 = vpow2.f32 %v6521_v31  ;;  %v4284_v24 = vmul.f32 %v11687_v22, %v13515_v12  ;;  %v4588_v38 = vpack.c.bf16 %v4472_v1, %v4470_v29  ;;  %v13517_v31 = vld [vmem:[#allocation211_spill] sm:$0xff] }
 0xa07   :  { %5050 = vmatmul.mubr.bf16.gmra.mxu0 %v13507_v11  ;;  %v2908_v5 = vpop.f32.mrf.mxu1  ;;  %v11802_v45 = vadd.f32 %v4899_v40, %v13513_v35  ;;  %v7481_v11 = vpop.eup %7480  ;;  %v3729_v35 = vadd.f32 1.0, %v7479_v6  ;;  %v11819_v8 = vmul.f32 %v11710_v16, %v13516_v61  ;;  %7508 = vpow2.f32 %v6530_v4 }
 0xa08   :  { %5057 = vmatprep.mubr.bf16.mxu0 %v4586_v44  ;;  %v4901_v3 = vpop.f32.mrf.mxu0  ;;  %v7483_v0 = vpop.eup %7482  ;;  %v11813_v46 = vmul.f32 %v4293_v28, %v2908_v5  ;;  %v13519_v5 = vpack.c.bf16 %v11628_v32, %v11626_v17  ;;  %7510 = vpow2.f32 %v6532_v20  ;;  %v4288_v28 = vmul.f32 %v7471_v58, %v13461_v41 }
 0xa09   :  { %v11804_v44 = vpop.f32.mrf.mxu1  ;;  %v5282_v49 = vmul.f32 %v11802_v45, %v11802_v45  ;;  %v7485_v40 = vpop.eup %7484  ;;  %v3731_v1 = vadd.f32 1.0, %v7483_v0  ;;  %7512 = vrcp.f32 %v3726_v9  ;;  %v4476_v58 = vmul.f32 %v4284_v24, %v11722_v52 }
 0xa0a   :  { %v4902_v26 = vpop.f32.mrf.mxu0  ;;  %v7487_v50 = vpop.eup %7486  ;;  %7514 = vrcp.f32 %v3729_v35  ;;  %v13523_v35 = vld [vmem:[#allocation188_spill] sm:$0xff] }
 0xa0b   :  { %v2912_v54 = vpop.f32.mrf.mxu1  ;;  %v11822_v22 = vadd.f32 %v4902_v26, %v13517_v31  ;;  %v5442_v12 = vsel %vm886_vm0, %v5282_v49, 0.0  ;;  %v7489_v6 = vpop.eup %7488  ;;  %v4297_v41 = vmul.f32 %v7487_v50, %v13474_v27  ;;  %v11841_v49 = vmul.f32 %v7485_v40, %v13472_v43  ;;  %v13520_v26 = vld [vmem:[#allocation201_spill] sm:$0xff]  ;;  %v13524_v50 = vld [vmem:[#allocation174_spill] sm:$0xff] }
 0xa0c   :  { %v11815_v7 = vmul.f32 %v4295_v60, %v2912_v54  ;;  %5443 = vadd.xlane.f32.xlu1 %v5442_v12  ;;  %v4904_v4 = vpop.f32.mrf.mxu0  ;;  %v7491_v29 = vpop.eup %7490  ;;  %v11834_v54 = vmul.f32 %v7481_v11, %v13469_v36  ;;  %v6534_v61 = vmul.f32 -1.442695, %v13520_v26  ;;  %v13521_v11 = vld [vmem:[#allocation215_spill] sm:$0xff]  ;;  %v6523_v52 = vmul.f32 -1.442695, %v13523_v35 }
 0xa0d   :  { %13518 = vst [vmem:[#allocation255_spill] sm:$0xff] %v11822_v22  ;;  %v11824_v3 = vpop.f32.mrf.mxu1  ;;  %v5348_v60 = vpop.xlane.xlu1 %5347  ;;  %v5283_v17 = vmul.f32 %v11822_v22, %v11822_v22  ;;  %v4299_v27 = vmul.f32 %v7491_v29, %v13478_v33  ;;  %7516 = vrcp.f32 %v3731_v1  ;;  %v4474_v43 = vmul.f32 %v11796_v2, %v11704_v53 }
 0xa0e   :  { %v5634_v32 = vmul.f32 0.015625, %v5348_v60  ;;  %v7493_v20 = vpop.eup %7492  ;;  %v11857_v4 = vmul.f32 %v7489_v6, %v13524_v50  ;;  %v13525_v60 = vld [vmem:[#allocation203_spill] sm:$0xff]  ;;  %v13527_v50 = vld [vmem:[#allocation213_spill] sm:$0xff] }
 0xa0f   :  { %5058 = vmatmul.mubr.bf16.gmra.mxu0 %v13519_v5  ;;  %v2918_v0 = vpop.f32.mrf.mxu1  ;;  %v5445_v12 = vsel %vm886_vm0, %v5283_v17, 0.0  ;;  %v11850_v5 = vpop.eup %7494 }
 0xa10   :  { %5065 = vmatprep.mubr.bf16.mxu0 %v4588_v38  ;;  %v4907_v38 = vpop.f32.mrf.mxu0  ;;  %v5731_v36 = vadd.f32 1e-06, %v5634_v32  ;;  %5446 = vadd.xlane.f32.xlu0 %v5445_v12  ;;  %v7497_v40 = vpop.eup %7496  ;;  %v6536_v32 = vmul.f32 -1.442695, %v13525_v60  ;;  %v11862_v1 = vmul.f32 %v4297_v41, %v2918_v0 }
 0xa11   :  { %v11845_v9 = vadd.f32 %v4907_v38, %v13521_v11  ;;  %v11847_v31 = vpop.f32.mrf.mxu1  ;;  %v5351_v38 = vpop.xlane.xlu0 %5350  ;;  %v4590_v11 = vpack.c.bf16 %v4476_v58, %v4474_v43  ;;  %v13529_v58 = vpack.c.bf16 %v11673_v59, %v11671_v37  ;;  %v3733_v41 = vadd.f32 1.0, %v7497_v40  ;;  %v13530_v40 = vld [vmem:[#allocation192_spill] sm:$0xff] }
 0xa12   :  { %v4909_v24 = vpop.f32.mrf.mxu0  ;;  %7518 = vrsqrt.f32 %v5731_v36  ;;  %v7499_v29 = vpop.eup %7498  ;;  %v5635_v16 = vmul.f32 0.015625, %v5351_v38 }
 0xa13   :  { %13522 = vst [vmem:[#allocation7_spill] sm:$0xff] %v11845_v9  ;;  %v5284_v17 = vmul.f32 %v11845_v9, %v11845_v9  ;;  %v2922_v33 = vpop.f32.mrf.mxu1  ;;  %v7501_v12 = vpop.eup %7500  ;;  %v13526_v24 = vld [vmem:[#allocation190_spill] sm:$0xff]  ;;  %7520 = vpow2.f32 %v6534_v61 }
 0xa14   :  { %v11864_v53 = vmul.f32 %v4299_v27, %v2922_v33  ;;  %v4910_v2 = vpop.f32.mrf.mxu0  ;;  %v6525_v6 = vmul.f32 -1.442695, %v13526_v24  ;;  %v7503_v0 = vpop.eup %7502  ;;  %7522 = vpow2.f32 %v6523_v52  ;;  %v5732_v27 = vadd.f32 1e-06, %v5635_v16 }
 0xa15   :  { %v11868_v51 = vadd.f32 %v4910_v2, %v13527_v50  ;;  %v11870_v36 = vpop.f32.mrf.mxu1  ;;  %v5448_v9 = vsel %vm886_vm0, %v5284_v17, 0.0  ;;  %v7505_v38 = vpop.eup %7504  ;;  %v3735_v33 = vadd.f32 1.0, %v7499_v29  ;;  %7524 = vpow2.f32 %v6536_v32 }
 0xa16   :  { %5449 = vadd.xlane.f32.xlu1 %v5448_v9  ;;  %v4912_v61 = vpop.f32.mrf.mxu0  ;;  %v4480_v2 = vmul.f32 %v4288_v28, %v11758_v48  ;;  %v5354_v37 = vpop.xlane.xlu1 %5353  ;;  %v4301_v52 = vmul.f32 %v7501_v12, %v13484_v34  ;;  %v11883_v16 = vmul.f32 %v7493_v20, %v13479_v13  ;;  %7526 = vrsqrt.f32 %v5732_v27  ;;  %v13531_v13 = vld [vmem:[#allocation219_spill] sm:$0xff]  ;;  %v13533_v27 = vld [vmem:[#allocation194_spill] sm:$0xff] }
 0xa17   :  { %13528 = vst [vmem:[#allocation208_spill] sm:$0xff] %v11868_v51  ;;  %5066 = vmatmul.mubr.bf16.gmra.mxu0 %v13529_v58  ;;  %v5285_v17 = vmul.f32 %v11868_v51, %v11868_v51  ;;  %v2928_v59 = vpop.f32.mrf.mxu1  ;;  %v7507_v50 = vpop.eup %7506  ;;  %v5636_v9 = vmul.f32 0.015625, %v5354_v37  ;;  %7528 = vpow2.f32 %v6525_v6  ;;  %v4478_v32 = vmul.f32 %v11819_v8, %v11742_v39 }
 0xa18   :  { %5073 = vmatprep.mubr.bf16.mxu0 %v4590_v11  ;;  %v6527_v11 = vmul.f32 -1.442695, %v13530_v40  ;;  %v4915_v48 = vpop.f32.mrf.mxu0  ;;  %v7509_v58 = vpop.eup %7508  ;;  %v4303_v61 = vmul.f32 %v7505_v38, %v13489_v30  ;;  %7530 = vrcp.f32 %v3733_v41  ;;  %v6529_v37 = vmul.f32 -1.442695, %v13533_v27 }
 0xa19   :  { %v11888_v28 = vpop.f32.mrf.mxu1  ;;  %v5451_v29 = vsel %vm886_vm0, %v5285_v17, 0.0  ;;  %v5733_v34 = vadd.f32 1e-06, %v5636_v9  ;;  %v11893_v20 = vadd.f32 %v4915_v48, %v13531_v13  ;;  %v5357_v12 = vpop.xlane.xlu0 %5356  ;;  %7532 = vrcp.f32 %v3735_v33  ;;  %v13534_v9 = vld [vmem:[#allocation178_spill] sm:$0xff] }
 0xa1a   :  { %5452 = vadd.xlane.f32.xlu0 %v5451_v29  ;;  %v7511_v6 = vpop.eup %7510  ;;  %v4592_v39 = vpack.c.bf16 %v4480_v2, %v4478_v32  ;;  %v4917_v8 = vpop.f32.mrf.mxu0  ;;  %v5637_v43 = vmul.f32 0.015625, %v5357_v12  ;;  %v11898_v17 = vmul.f32 %v4301_v52, %v2928_v59  ;;  %v11906_v33 = vmul.f32 %v11850_v5, %v13534_v9 }
 0xa1b   :  { %13532 = vst [vmem:[#allocation259_spill] sm:$0xff] %v11893_v20  ;;  %v2932_v51 = vpop.f32.mrf.mxu1  ;;  %v11896_v22 = vpop.eup %7512  ;;  %7534 = vrsqrt.f32 %v5733_v34  ;;  %v5286_v30 = vmul.f32 %v11893_v20, %v11893_v20  ;;  %v3737_v2 = vadd.f32 1.0, %v7509_v58  ;;  %v13535_v59 = vpack.c.bf16 %v11714_v25, %v11712_v18  ;;  %v13538_v58 = vld [vmem:[#allocation180_spill] sm:$0xff] }
 0xa1c   :  { %v11902_v41 = vmul.f32 %v4303_v61, %v2932_v51  ;;  %v7515_v38 = vpop.eup %7514  ;;  %7536 = vpow2.f32 %v6527_v11  ;;  %v5734_v32 = vadd.f32 1e-06, %v5637_v43  ;;  %v4918_v48 = vpop.f32.mrf.mxu0  ;;  %v3739_v52 = vadd.f32 1.0, %v7511_v6  ;;  %v13536_v61 = vld [vmem:[#allocation217_spill] sm:$0xff]  ;;  %v13543_v51 = vld [vmem:[#allocation198_spill] sm:$0xff] }
 0xa1d   :  { %v11908_v29 = vpop.f32.mrf.mxu1  ;;  %v11916_v34 = vadd.f32 %v4918_v48, %v13536_v61  ;;  %v5454_v5 = vsel %vm886_vm0, %v5286_v30, 0.0  ;;  %v5360_v13 = vpop.xlane.xlu1 %5359  ;;  %v3728_v43 = vadd.f32 1.0, %v7507_v50  ;;  %v11920_v12 = vmul.f32 %v7503_v0, %v13538_v58  ;;  %v13539_v50 = vld [vmem:[#allocation196_spill] sm:$0xff] }
 0xa1e   :  { %v7517_v11 = vpop.eup %7516  ;;  %7538 = vrsqrt.f32 %v5734_v32  ;;  %5455 = vadd.xlane.f32.xlu1 %v5454_v5  ;;  %v4920_v18 = vpop.f32.mrf.mxu0  ;;  %v5638_v25 = vmul.f32 0.015625, %v5360_v13  ;;  %v4305_v9 = vmul.f32 %v7515_v38, %v13496_v47  ;;  %v4484_v48 = vmul.f32 %v11841_v49, %v11782_v10  ;;  %v13540_v32 = vld [vmem:[#allocation218_spill] sm:$0xff]  ;;  %v13541_v49 = vld [vmem:[#allocation223_spill] sm:$0xff] }
 0xa1f   :  { %5074 = vmatmul.mubr.bf16.gmra.mxu0 %v13535_v59  ;;  %13537 = vst [vmem:[#allocation241_spill] sm:$0xff] %v11916_v34  ;;  %v2938_v6 = vpop.f32.mrf.mxu1  ;;  %v7519_v8 = vpop.eup %7518  ;;  %7540 = vpow2.f32 %v6529_v37  ;;  %v5287_v0 = vmul.f32 %v11916_v34, %v11916_v34  ;;  %v6531_v30 = vmul.f32 -1.442695, %v13539_v50  ;;  %v4482_v10 = vmul.f32 %v11834_v54, %v11772_v23 }
 0xa20   :  { %5081 = vmatprep.mubr.bf16.mxu0 %v4592_v39  ;;  %v11928_v39 = vld [vmem:[%s12692_s4] ss:$0 sm:$0xff]  ;;  %7542 = vrcp.f32 %v3737_v2  ;;  %v5923_v59 = vmul.f32 %v7519_v8, %v13540_v32  ;;  %v5735_v61 = vadd.f32 1e-06, %v5638_v25  ;;  %v4923_v5 = vpop.f32.mrf.mxu0  ;;  %v7521_v37 = vpop.eup %7520  ;;  %v6533_v34 = vmul.f32 -1.442695, %v13543_v51 }
 0xa21   :  { %v11934_v47 = vpop.f32.mrf.mxu1  ;;  %7544 = vrcp.f32 %v3739_v52  ;;  %v11939_v38 = vadd.f32 %v4923_v5, %v13541_v49  ;;  %v5457_v13 = vsel %vm886_vm0, %v5287_v0, 0.0  ;;  %v7523_v58 = vpop.eup %7522  ;;  %v13542_v2 = vld [vmem:[#allocation189_spill] sm:$0xff]  ;;  %v4594_v20 = vpack.c.bf16 %v4484_v48, %v4482_v10  ;;  %v13545_v48 = vld [vmem:[#allocation243_spill] sm:$0xff] }
 0xa22   :  { %v4307_v18 = vmul.f32 %v7517_v11, %v13542_v2  ;;  %v6025_v25 = vmul.f32 %v11928_v39, %v5923_v59  ;;  %7546 = vrsqrt.f32 %v5735_v61  ;;  %5458 = vadd.xlane.f32.xlu0 %v5457_v13  ;;  %v4925_v8 = vpop.f32.mrf.mxu0  ;;  %v5363_v32 = vpop.xlane.xlu0 %5362  ;;  %v3741_v49 = vadd.f32 1.0, %v7521_v37 }
 0xa23   :  { %v7525_v52 = vpop.eup %7524  ;;  %7548 = vrcp.f32 %v3728_v43  ;;  %v5288_v23 = vmul.f32 %v11939_v38, %v11939_v38  ;;  %v5639_v54 = vmul.f32 0.015625, %v5363_v32  ;;  %v2942_v5 = vpop.f32.mrf.mxu1  ;;  %v11948_v11 = vmul.f32 %v4305_v9, %v2938_v6  ;;  %v13546_v8 = vld [vmem:[#allocation221_spill] sm:$0xff] }
 0xa24   :  { %v7527_v0 = vpop.eup %7526  ;;  %7550 = vpow2.f32 %v6531_v30  ;;  %6121 = vst.msk [vmem:[#allocation2] sm:$0xff] %vm886_vm0, %v6025_v25  ;;  %v11950_v59 = vmul.f32 %v4307_v18, %v2942_v5  ;;  %v4926_v61 = vpop.f32.mrf.mxu0  ;;  %v13544_v13 = vpack.c.bf16 %v11750_v14, %v11748_v21  ;;  %v3743_v9 = vadd.f32 1.0, %v7525_v52 }
 0xa25   :  { %v7529_v43 = vpop.eup %7528  ;;  %v5924_v10 = vmul.f32 %v7527_v0, %v13545_v48  ;;  %v5736_v2 = vadd.f32 1e-06, %v5639_v54  ;;  %v11957_v32 = vadd.f32 %v4926_v61, %v13546_v8  ;;  %v11959_v30 = vpop.f32.mrf.mxu1  ;;  %v5460_v37 = vsel %vm886_vm0, %v5288_v23, 0.0  ;;  %v13547_v48 = vld [vmem:[#allocation13_spill] sm:$0xff] }
 0xa26   :  { %v7531_v6 = vpop.eup %7530  ;;  %7552 = vpow2.f32 %v6533_v34  ;;  %v4488_v18 = vmul.f32 %v11883_v16, %v11824_v3  ;;  %v4601_v21 = vpack.c.bf16 %v11950_v59, %v11948_v11  ;;  %5461 = vadd.xlane.f32.xlu1 %v5460_v37  ;;  %v4928_v14 = vpop.f32.mrf.mxu0  ;;  %v3730_v52 = vadd.f32 1.0, %v7523_v58 }
 0xa27   :  { %5082 = vmatmul.mubr.bf16.gmra.mxu0 %v13544_v13  ;;  %v5366_v25 = vpop.xlane.xlu1 %5365  ;;  %v7533_v54 = vpop.eup %7532  ;;  %v6026_v5 = vmul.f32 %v11928_v39, %v5924_v10  ;;  %7554 = vrsqrt.f32 %v5736_v2  ;;  %v5289_v23 = vmul.f32 %v11957_v32, %v11957_v32  ;;  %v3732_v61 = vadd.f32 1.0, %v7529_v43  ;;  %v13548_v2 = vld [vmem:[#allocation228_spill] sm:$0xff] }
 0xa28   :  { %5089 = vmatprep.mubr.bf16.mxu0 %v4594_v20  ;;  %v5640_v20 = vmul.f32 0.015625, %v5366_v25  ;;  %v2948_v0 = vpop.f32.mrf.mxu1  ;;  %v7535_v34 = vpop.eup %7534  ;;  %7556 = vrcp.f32 %v3741_v49  ;;  %v4486_v3 = vmul.f32 %v11857_v4, %v11804_v44  ;;  %v4309_v58 = vmul.f32 %v7531_v6, %v13505_v15 }
 0xa29   :  { %v4931_v16 = vpop.f32.mrf.mxu0  ;;  %v7537_v13 = vpop.eup %7536  ;;  %6122 = vst.msk [vmem:[#allocation2 + $0x8] sm:$0xff] %vm886_vm0, %v6026_v5  ;;  %v5925_v8 = vmul.f32 %v7535_v34, %v13547_v48  ;;  %v5463_v25 = vsel %vm886_vm0, %v5289_v23, 0.0  ;;  %v4311_v49 = vmul.f32 %v7533_v54, %v13506_v62  ;;  %7558 = vrcp.f32 %v3743_v9  ;;  %v13549_v23 = vld [vmem:[#allocation248_spill] sm:$0xff] }
 0xa2a   :  { %v5737_v10 = vadd.f32 1e-06, %v5640_v20  ;;  %v11974_v37 = vadd.f32 %v4931_v16, %v13548_v2  ;;  %v11976_v14 = vpop.f32.mrf.mxu1  ;;  %v4596_v44 = vpack.c.bf16 %v4488_v18, %v4486_v3  ;;  %5464 = vadd.xlane.f32.xlu0 %v5463_v25  ;;  %v5369_v43 = vpop.xlane.xlu0 %5368  ;;  %v11985_v6 = vmul.f32 %v4309_v58, %v2948_v0  ;;  %v13551_v3 = vld [vmem:[#allocation204_spill] sm:$0xff]  ;;  %v13552_v25 = vld [vmem:[#allocation226_spill] sm:$0xff] }
 0xa2b   :  { %v4933_v4 = vpop.f32.mrf.mxu0  ;;  %v7539_v5 = vpop.eup %7538  ;;  %v6027_v34 = vmul.f32 %v11928_v39, %v5925_v8  ;;  %v5641_v16 = vmul.f32 0.015625, %v5369_v43  ;;  %v13550_v18 = vpack.c.bf16 %v11780_v19, %v11778_v57  ;;  %v6537_v8 = vmul.f32 -1.442695, %v13551_v3 }
 0xa2c   :  { %7560 = vrsqrt.f32 %v5737_v10  ;;  %v5290_v20 = vmul.f32 %v11974_v37, %v11974_v37  ;;  %v2952_v48 = vpop.f32.mrf.mxu1  ;;  %v7541_v2 = vpop.eup %7540  ;;  %v5926_v15 = vmul.f32 %v7539_v5, %v13549_v23  ;;  %v4492_v23 = vmul.f32 %v11920_v12, %v11870_v36 }
 0xa2d   :  { %7562 = vrcp.f32 %v3732_v61  ;;  %v11987_v62 = vmul.f32 %v4311_v49, %v2952_v48  ;;  %v4934_v9 = vpop.f32.mrf.mxu0  ;;  %v7543_v54 = vpop.eup %7542  ;;  %6123 = vst.msk [vmem:[#allocation2 + $0x10] sm:$0xff] %vm886_vm0, %v6027_v34  ;;  %v5738_v10 = vadd.f32 1e-06, %v5641_v16  ;;  %v13553_v16 = vld [vmem:[#allocation202_spill] sm:$0xff]  ;;  %v4490_v36 = vmul.f32 %v11906_v33, %v11847_v31 }
 0xa2e   :  { %v11995_v4 = vadd.f32 %v4934_v9, %v13552_v25  ;;  %v11997_v61 = vpop.f32.mrf.mxu1  ;;  %v5466_v0 = vsel %vm886_vm0, %v5290_v20, 0.0  ;;  %v5372_v58 = vpop.xlane.xlu1 %5371  ;;  %7564 = vrcp.f32 %v3730_v52  ;;  %v6028_v57 = vmul.f32 %v11928_v39, %v5926_v15 }
 0xa2f   :  { %5090 = vmatmul.mubr.bf16.gmra.mxu0 %v13550_v18  ;;  %v7545_v49 = vpop.eup %7544  ;;  %5467 = vadd.xlane.f32.xlu1 %v5466_v0  ;;  %v4936_v43 = vpop.f32.mrf.mxu0  ;;  %v5642_v5 = vmul.f32 0.015625, %v5372_v58  ;;  %v6535_v48 = vmul.f32 -1.442695, %v13553_v16  ;;  %7566 = vrsqrt.f32 %v5738_v10  ;;  %v3734_v9 = vadd.f32 1.0, %v7537_v13  ;;  %v13554_v18 = vld [vmem:[#allocation220_spill] sm:$0xff] }
 0xa30   :  { %5097 = vmatprep.mubr.bf16.mxu0 %v4596_v44  ;;  %v7547_v34 = vpop.eup %7546  ;;  %v5291_v44 = vmul.f32 %v11995_v4, %v11995_v4  ;;  %v2958_v20 = vpop.f32.mrf.mxu1  ;;  %v3736_v15 = vadd.f32 1.0, %v7541_v2  ;;  %6124 = vst.msk [vmem:[#allocation2 + $0x18] sm:$0xff] %vm886_vm0, %v6028_v57  ;;  %v4313_v43 = vmul.f32 %v7543_v54, %v13512_v56  ;;  %7568 = vpow2.f32 %v6537_v8  ;;  %v13555_v54 = vld [vmem:[#allocation232_spill] sm:$0xff] }
 0xa31   :  { %v7549_v52 = vpop.eup %7548  ;;  %v5927_v25 = vmul.f32 %v7547_v34, %v13554_v18  ;;  %v5739_v0 = vadd.f32 1e-06, %v5642_v5  ;;  %v5375_v19 = vpop.xlane.xlu0 %5374  ;;  %v4315_v13 = vmul.f32 %v7545_v49, %v13514_v42  ;;  %v4598_v56 = vpack.c.bf16 %v4492_v23, %v4490_v36 }
 0xa32   :  { %v7551_v58 = vpop.eup %7550  ;;  %v12013_v12 = vpop.f32.mrf.mxu1  ;;  %v5469_v10 = vsel %vm886_vm0, %v5291_v44, 0.0  ;;  %v5643_v5 = vmul.f32 0.015625, %v5375_v19  ;;  %v12022_v44 = vmul.f32 %v4313_v43, %v2958_v20  ;;  %v13556_v19 = vpack.c.bf16 %v11815_v7, %v11813_v46  ;;  %v13558_v43 = vld [vmem:[#allocation184_spill] sm:$0xff] }
 0xa33   :  { %v6029_v2 = vmul.f32 %v11928_v39, %v5927_v25  ;;  %7570 = vrsqrt.f32 %v5739_v0  ;;  %v4939_v57 = vpop.f32.mrf.mxu0  ;;  %5470 = vadd.xlane.f32.xlu0 %v5469_v10  ;;  %v7553_v34 = vpop.eup %7552  ;;  %v4304_v23 = vmul.f32 %v7549_v52, %v13509_v63  ;;  %v13557_v25 = vld [vmem:[#allocation250_spill] sm:$0xff]  ;;  %v4302_v10 = vmul.f32 %v11896_v22, %v13558_v43 }
 0xa34   :  { %7572 = vpow2.f32 %v6535_v48  ;;  %v12019_v8 = vadd.f32 %v4939_v57, %v13555_v54  ;;  %v2962_v31 = vpop.f32.mrf.mxu1  ;;  %v7555_v33 = vpop.eup %7554  ;;  %v5740_v49 = vadd.f32 1e-06, %v5643_v5 }
 0xa35   :  { %7574 = vrcp.f32 %v3734_v9  ;;  %6125 = vst.msk [vmem:[#allocation2 + $0x20] sm:$0xff] %vm886_vm0, %v6029_v2  ;;  %v4941_v42 = vpop.f32.mrf.mxu0  ;;  %v12024_v18 = vmul.f32 %v4315_v13, %v2962_v31  ;;  %v7557_v48 = vpop.eup %7556  ;;  %v5928_v0 = vmul.f32 %v7555_v33, %v13557_v25  ;;  %v4496_v63 = vmul.f32 %v4304_v23, %v11908_v29  ;;  %v13559_v2 = vld [vmem:[#allocation230_spill] sm:$0xff] }
 0xa36   :  { %7576 = vrcp.f32 %v3736_v15  ;;  %v5292_v9 = vmul.f32 %v12019_v8, %v12019_v8  ;;  %v12033_v36 = vpop.f32.mrf.mxu1  ;;  %v5378_v20 = vpop.xlane.xlu1 %5377  ;;  %v3738_v31 = vadd.f32 1.0, %v7551_v58  ;;  %v13560_v29 = vld [vmem:[#allocation214_spill] sm:$0xff] }
 0xa37   :  { %5098 = vmatmul.mubr.bf16.gmra.mxu0 %v13556_v19  ;;  %7578 = vrsqrt.f32 %v5740_v49  ;;  %v4605_v46 = vpack.c.bf16 %v12024_v18, %v12022_v44  ;;  %v4942_v7 = vpop.f32.mrf.mxu0  ;;  %v5644_v15 = vmul.f32 0.015625, %v5378_v20  ;;  %v7559_v13 = vpop.eup %7558  ;;  %v6030_v52 = vmul.f32 %v11928_v39, %v5928_v0  ;;  %v13576_v44 = vld [vmem:[#allocation233_spill] sm:$0xff] }
 0xa38   :  { %5105 = vmatprep.mubr.bf16.mxu0 %v4598_v56  ;;  %v12042_v57 = vadd.f32 %v4942_v7, %v13559_v2  ;;  %v5472_v5 = vsel %vm886_vm0, %v5292_v9, 0.0  ;;  %v2968_v56 = vpop.f32.mrf.mxu1  ;;  %v3740_v49 = vadd.f32 1.0, %v7553_v34  ;;  %v4494_v19 = vmul.f32 %v4302_v10, %v11888_v28  ;;  %v13561_v10 = vld [vmem:[#allocation236_spill] sm:$0xff] }
 0xa39   :  { %v7561_v54 = vpop.eup %7560  ;;  %5473 = vadd.xlane.f32.xlu1 %v5472_v5  ;;  %v4944_v22 = vpop.f32.mrf.mxu0  ;;  %v5741_v33 = vadd.f32 1e-06, %v5644_v15  ;;  %6126 = vst.msk [vmem:[#allocation2 + $0x28] sm:$0xff] %vm886_vm0, %v6030_v52  ;;  %v4317_v20 = vmul.f32 %v7557_v48, %v13520_v26  ;;  %v4319_v58 = vmul.f32 %v7559_v13, %v13525_v60  ;;  %v13562_v13 = vpack.c.bf16 %v11864_v53, %v11862_v1 }
 0xa3a   :  { %v7563_v42 = vpop.eup %7562  ;;  %v5929_v23 = vmul.f32 %v7561_v54, %v13560_v29  ;;  %v5293_v25 = vmul.f32 %v12042_v57, %v12042_v57  ;;  %v12050_v0 = vpop.f32.mrf.mxu1  ;;  %v4600_v15 = vpack.c.bf16 %v4496_v63, %v4494_v19 }
 0xa3b   :  { %v5381_v9 = vpop.xlane.xlu0 %5380  ;;  %7580 = vrsqrt.f32 %v5741_v33  ;;  %v4947_v43 = vpop.f32.mrf.mxu0  ;;  %v12059_v22 = vmul.f32 %v4317_v20, %v2968_v56  ;;  %v4308_v63 = vmul.f32 %v7563_v42, %v13526_v24  ;;  %v13563_v33 = vld [vmem:[#allocation16_spill] sm:$0xff] }
 0xa3c   :  { %v5645_v7 = vmul.f32 0.015625, %v5381_v9  ;;  %v7565_v34 = vpop.eup %7564  ;;  %v6031_v28 = vmul.f32 %v11928_v39, %v5929_v23  ;;  %v12056_v52 = vadd.f32 %v4947_v43, %v13561_v10  ;;  %v5475_v2 = vsel %vm886_vm0, %v5293_v25, 0.0  ;;  %v2972_v5 = vpop.f32.mrf.mxu1  ;;  %v13564_v9 = vld [vmem:[#allocation235_spill] sm:$0xff] }
 0xa3d   :  { %v7567_v54 = vpop.eup %7566  ;;  %7582 = vrcp.f32 %v3738_v31  ;;  %5476 = vadd.xlane.f32.xlu0 %v5475_v2  ;;  %v4949_v26 = vpop.f32.mrf.mxu0  ;;  %v12061_v48 = vmul.f32 %v4319_v58, %v2972_v5  ;;  %v4306_v23 = vmul.f32 %v7565_v34, %v13523_v35  ;;  %v4500_v24 = vmul.f32 %v4308_v63, %v11959_v30 }
 0xa3e   :  { %v5742_v60 = vadd.f32 1e-06, %v5645_v7  ;;  %7584 = vrcp.f32 %v3740_v49  ;;  %6127 = vst.msk [vmem:[#allocation2 + $0x30] sm:$0xff] %vm886_vm0, %v6031_v28  ;;  %v5930_v19 = vmul.f32 %v7567_v54, %v13563_v33  ;;  %v5294_v56 = vmul.f32 %v12056_v52, %v12056_v52  ;;  %v5384_v31 = vpop.xlane.xlu1 %5383  ;;  %v7569_v29 = vpop.eup %7568  ;;  %v13565_v7 = vld [vmem:[#allocation209_spill] sm:$0xff] }
 0xa3f   :  { %5106 = vmatmul.mubr.bf16.gmra.mxu0 %v13562_v13  ;;  %v4607_v1 = vpack.c.bf16 %v12061_v48, %v12059_v22  ;;  %v4950_v53 = vpop.f32.mrf.mxu0  ;;  %v5646_v49 = vmul.f32 0.015625, %v5384_v31  ;;  %v3744_v10 = vadd.f32 1.0, %v7569_v29  ;;  %v4498_v2 = vmul.f32 %v4306_v23, %v11934_v47  ;;  %v13579_v48 = vld [vmem:[#allocation258_spill] sm:$0xff] }
 0xa40   :  { %5113 = vmatprep.mubr.bf16.mxu0 %v4600_v15  ;;  %7586 = vrsqrt.f32 %v5742_v60  ;;  %v7571_v25 = vpop.eup %7570  ;;  %v6032_v42 = vmul.f32 %v11928_v39, %v5930_v19  ;;  %v12077_v20 = vadd.f32 %v4950_v53, %v13564_v9  ;;  %v5478_v58 = vsel %vm886_vm0, %v5294_v56, 0.0  ;;  %v13566_v56 = vld [vmem:[#allocation229_spill] sm:$0xff] }
 0xa41   :  { %v7573_v43 = vpop.eup %7572  ;;  %v5931_v15 = vmul.f32 %v7571_v25, %v13565_v7  ;;  %5479 = vadd.xlane.f32.xlu1 %v5478_v58  ;;  %v4952_v35 = vpop.f32.mrf.mxu0  ;;  %v5743_v34 = vadd.f32 1e-06, %v5646_v49  ;;  %v4602_v33 = vpack.c.bf16 %v4500_v24, %v4498_v2  ;;  %v13567_v29 = vpack.c.bf16 %v11902_v41, %v11898_v17  ;;  %v13568_v58 = vld [vmem:[#allocation238_spill] sm:$0xff] }
 0xa42   :  { %v7575_v28 = vpop.eup %7574  ;;  %6128 = vst.msk [vmem:[#allocation2 + $0x38] sm:$0xff] %vm886_vm0, %v6032_v42  ;;  %v5295_v30 = vmul.f32 %v12077_v20, %v12077_v20  ;;  %v5387_v5 = vpop.xlane.xlu0 %5386  ;;  %v3742_v63 = vadd.f32 1.0, %v7573_v43 }
 0xa43   :  { %v7577_v54 = vpop.eup %7576  ;;  %v6033_v26 = vmul.f32 %v11928_v39, %v5931_v15  ;;  %7588 = vrsqrt.f32 %v5743_v34  ;;  %v5647_v60 = vmul.f32 0.015625, %v5387_v5  ;;  %v4310_v42 = vmul.f32 %v7575_v28, %v13530_v40  ;;  %v13569_v40 = vld [vmem:[#allocation225_spill] sm:$0xff] }
 0xa44   :  { %v7579_v13 = vpop.eup %7578  ;;  %v5481_v19 = vsel %vm886_vm0, %v5295_v30, 0.0  ;;  %7590 = vrcp.f32 %v3744_v10  ;;  %v4312_v23 = vmul.f32 %v7577_v54, %v13533_v27 }
 0xa45   :  { %6129 = vst.msk [vmem:[#allocation2 + $0x40] sm:$0xff] %vm886_vm0, %v6033_v26  ;;  %v5932_v47 = vmul.f32 %v7579_v13, %v13566_v56  ;;  %5482 = vadd.xlane.f32.xlu0 %v5481_v19  ;;  %v5744_v31 = vadd.f32 1e-06, %v5647_v60  ;;  %v5390_v53 = vpop.xlane.xlu1 %5389  ;;  %v4502_v27 = vmul.f32 %v4310_v42, %v11976_v14 }
 0xa46   :  { %v5648_v25 = vmul.f32 0.015625, %v5390_v53  ;;  %v4504_v9 = vmul.f32 %v4312_v23, %v11997_v61  ;;  %v2974_v23 = vpop.f32.mrf.mxu1 }
 0xa47   :  { %5114 = vmatmul.mubr.bf16.gmra.mxu0 %v13567_v29  ;;  %v6034_v49 = vmul.f32 %v11928_v39, %v5932_v47  ;;  %7592 = vrsqrt.f32 %v5744_v31 }
 0xa48   :  { %5121 = vmatprep.mubr.bf16.mxu0 %v4602_v33  ;;  %v7581_v24 = vpop.eup %7580  ;;  %7594 = vrcp.f32 %v3742_v63  ;;  %v5745_v41 = vadd.f32 1e-06, %v5648_v25  ;;  %v4604_v2 = vpack.c.bf16 %v4504_v9, %v4502_v27  ;;  %v13570_v63 = vld [vmem:[#allocation234_spill] sm:$0xff] }
 0xa49   :  { %6130 = vst.msk [vmem:[#allocation2 + $0x48] sm:$0xff] %vm886_vm0, %v6034_v49  ;;  %v5933_v17 = vmul.f32 %v7581_v24, %v13568_v58  ;;  %v5393_v7 = vpop.xlane.xlu0 %5392  ;;  %v13572_v49 = vpack.c.bf16 %v11987_v62, %v11985_v6 }
 0xa4a   :  { %v7583_v43 = vpop.eup %7582  ;;  %7596 = vrsqrt.f32 %v5745_v41  ;;  %v5649_v34 = vmul.f32 0.015625, %v5393_v7  ;;  %v13573_v41 = vld [vmem:[#allocation19_spill] sm:$0xff] }
 0xa4b   :  { %v7585_v15 = vpop.eup %7584  ;;  %v6035_v35 = vmul.f32 %v11928_v39, %v5933_v17  ;;  %v4314_v60 = vmul.f32 %v7583_v43, %v13539_v50  ;;  %v13571_v50 = vld [vmem:[#allocation253_spill] sm:$0xff] }
 0xa4c   :  { %v5746_v28 = vadd.f32 1e-06, %v5649_v34  ;;  %v4316_v30 = vmul.f32 %v7585_v15, %v13543_v51  ;;  %v13574_v34 = vld [vmem:[#allocation237_spill] sm:$0xff] }
 0xa4d   :  { %v7587_v10 = vpop.eup %7586  ;;  %6131 = vst.msk [vmem:[#allocation2 + $0x50] sm:$0xff] %vm886_vm0, %v6035_v35  ;;  %v5396_v14 = vpop.xlane.xlu1 %5395  ;;  %v4506_v11 = vmul.f32 %v4314_v60, %v12013_v12 }
 0xa4e   :  { %v5934_v61 = vmul.f32 %v7587_v10, %v13569_v40  ;;  %7598 = vrsqrt.f32 %v5746_v28  ;;  %v5650_v54 = vmul.f32 0.015625, %v5396_v14  ;;  %v4508_v13 = vmul.f32 %v4316_v30, %v12033_v36  ;;  %v13575_v28 = vld [vmem:[#allocation245_spill] sm:$0xff] }
 0xa4f   :  { %5122 = vmatmul.mubr.bf16.gmra.mxu0 %v4601_v21 }
 0xa50   :  { %5129 = vmatprep.mubr.bf16.mxu0 %v4604_v2  ;;  %v6036_v5 = vmul.f32 %v11928_v39, %v5934_v61  ;;  %v7589_v26 = vpop.eup %7588  ;;  %v5747_v19 = vadd.f32 1e-06, %v5650_v54  ;;  %v4606_v31 = vpack.c.bf16 %v4508_v13, %v4506_v11 }
 0xa51   :  { %v5935_v33 = vmul.f32 %v7589_v26, %v13570_v63  ;;  %v5399_v59 = vpop.xlane.xlu0 %5398  ;;  %v7591_v51 = vpop.eup %7590  ;;  %v13577_v63 = vld [vmem:[#allocation257_spill] sm:$0xff] }
 0xa52   :  { %6132 = vst.msk [vmem:[#allocation2 + $0x58] sm:$0xff] %vm886_vm0, %v6036_v5  ;;  %7600 = vrsqrt.f32 %v5747_v19  ;;  %v5651_v56 = vmul.f32 0.015625, %v5399_v59  ;;  %v4320_v12 = vmul.f32 %v7591_v51, %v13551_v3 }
 0xa53   :  { %v6037_v21 = vmul.f32 %v11928_v39, %v5935_v33 }
 0xa54   :  { %v7593_v47 = vpop.eup %7592  ;;  %v5748_v53 = vadd.f32 1e-06, %v5651_v56  ;;  %v4512_v17 = vmul.f32 %v4320_v12, %v2974_v23 }
 0xa55   :  { %v7595_v29 = vpop.eup %7594  ;;  %6133 = vst.msk [vmem:[#allocation2 + $0x60] sm:$0xff] %vm886_vm0, %v6037_v21  ;;  %v5936_v36 = vmul.f32 %v7593_v47, %v13571_v50  ;;  %v5402_v25 = vpop.xlane.xlu1 %5401  ;;  %v13578_v47 = vld [vmem:[#allocation242_spill] sm:$0xff] }
 0xa56   :  { %7602 = vrsqrt.f32 %v5748_v53  ;;  %v5652_v42 = vmul.f32 0.015625, %v5402_v25  ;;  %v4318_v58 = vmul.f32 %v7595_v29, %v13553_v16 }
 0xa57   :  { %5130 = vmatmul.mubr.bf16.gmra.mxu0 %v13572_v49  ;;  %v6038_v24 = vmul.f32 %v11928_v39, %v5936_v36  ;;  %v7597_v9 = vpop.eup %7596 }
 0xa58   :  { %5137 = vmatprep.mubr.bf16.mxu0 %v4606_v31  ;;  %v5937_v43 = vmul.f32 %v7597_v9, %v13573_v41  ;;  %v5749_v27 = vadd.f32 1e-06, %v5652_v42  ;;  %v4510_v6 = vmul.f32 %v4318_v58, %v12050_v0 }
 0xa59   :  { %6134 = vst.msk [vmem:[#allocation2 + $0x68] sm:$0xff] %vm886_vm0, %v6038_v24  ;;  %v5405_v62 = vpop.xlane.xlu0 %5404  ;;  %v13580_v24 = vld [vmem:[#allocation22_spill] sm:$0xff] }
 0xa5a   :  { %v6039_v3 = vmul.f32 %v11928_v39, %v5937_v43  ;;  %7604 = vrsqrt.f32 %v5749_v27  ;;  %v5653_v7 = vmul.f32 0.015625, %v5405_v62  ;;  %v4608_v35 = vpack.c.bf16 %v4512_v17, %v4510_v6  ;;  %v13581_v17 = vld [vmem:[#allocation5_spill] sm:$0xff] }
 0xa5b   :  { %v7599_v15 = vpop.eup %7598 }
 0xa5c   :  { %6135 = vst.msk [vmem:[#allocation2 + $0x70] sm:$0xff] %vm886_vm0, %v6039_v3  ;;  %v5938_v10 = vmul.f32 %v7599_v15, %v13574_v34  ;;  %v5750_v16 = vadd.f32 1e-06, %v5653_v7 }
 0xa5e   :  { %v5408_v2 = vpop.xlane.xlu1 %5407  ;;  %v6040_v0 = vmul.f32 %v11928_v39, %v5938_v10  ;;  %7606 = vrsqrt.f32 %v5750_v16 }
 0xa5f   :  { %5138 = vmatmul.mubr.bf16.gmra.mxu0 %v4605_v46  ;;  %v5654_v40 = vmul.f32 0.015625, %v5408_v2  ;;  %v7601_v61 = vpop.eup %7600  ;;  %v13583_v2 = vld [vmem:[#allocation6_spill] sm:$0xff] }
 0xa60   :  { %5145 = vmatprep.mubr.bf16.mxu0 %v4608_v35  ;;  %6136 = vst.msk [vmem:[#allocation2 + $0x78] sm:$0xff] %vm886_vm0, %v6040_v0  ;;  %v5939_v30 = vmul.f32 %v7601_v61, %v13575_v28  ;;  %v13582_v35 = vld [vmem:[#allocation244_spill] sm:$0xff] }
 0xa61   :  { %v5751_v14 = vadd.f32 1e-06, %v5654_v40  ;;  %v5411_v5 = vpop.xlane.xlu0 %5410 }
 0xa62   :  { %v6041_v54 = vmul.f32 %v11928_v39, %v5939_v30  ;;  %v5655_v26 = vmul.f32 0.015625, %v5411_v5 }
 0xa63   :  { %7608 = vrsqrt.f32 %v5751_v14  ;;  %v7603_v60 = vpop.eup %7602 }
 0xa64   :  { %6137 = vst.msk [vmem:[#allocation2 + $0x80] sm:$0xff] %vm886_vm0, %v6041_v54  ;;  %v5940_v18 = vmul.f32 %v7603_v60, %v13576_v44  ;;  %v5752_v46 = vadd.f32 1e-06, %v5655_v26  ;;  %v4955_v13 = vpop.f32.mrf.mxu0  ;;  %v13584_v26 = vld [vmem:[#allocation252_spill] sm:$0xff] }
 0xa65   :  { %v12140_v33 = vadd.f32 %v4955_v13, %v13577_v63  ;;  %v5414_v19 = vpop.xlane.xlu1 %5413 }
 0xa66   :  { %v6042_v11 = vmul.f32 %v11928_v39, %v5940_v18  ;;  %7610 = vrsqrt.f32 %v5752_v46  ;;  %v5656_v59 = vmul.f32 0.015625, %v5414_v19  ;;  %v4957_v51 = vpop.f32.mrf.mxu0  ;;  %v13585_v46 = vld [vmem:[#allocation9_spill] sm:$0xff] }
 0xa67   :  { %5146 = vmatmul.mubr.bf16.gmra.mxu0 %v4607_v1  ;;  %v7605_v21 = vpop.eup %7604  ;;  %v5296_v56 = vmul.f32 %v12140_v33, %v12140_v33 }
 0xa68   :  { %6138 = vst.msk [vmem:[#allocation2 + $0x88] sm:$0xff] %vm886_vm0, %v6042_v11  ;;  %v5941_v31 = vmul.f32 %v7605_v21, %v13578_v47  ;;  %v5753_v29 = vadd.f32 1e-06, %v5656_v59  ;;  %v4958_v22 = vpop.f32.mrf.mxu0  ;;  %v13586_v47 = vld [vmem:[#allocation240_spill] sm:$0xff] }
 0xa69   :  { %v12148_v1 = vadd.f32 %v4958_v22, %v13579_v48  ;;  %v5417_v23 = vpop.xlane.xlu0 %5416  ;;  %v5484_v50 = vsel %vm886_vm0, %v5296_v56, 0.0  ;;  %v13587_v48 = vld [vmem:[#allocation8_spill] sm:$0xff] }
 0xa6a   :  { %v6043_v36 = vmul.f32 %v11928_v39, %v5941_v31  ;;  %7612 = vrsqrt.f32 %v5753_v29  ;;  %v5657_v53 = vmul.f32 0.015625, %v5417_v23  ;;  %5485 = vadd.xlane.f32.xlu1 %v5484_v50  ;;  %v4960_v49 = vpop.f32.mrf.mxu0 }
 0xa6b   :  { %v7607_v12 = vpop.eup %7606  ;;  %v5297_v25 = vmul.f32 %v12148_v1, %v12148_v1 }
 0xa6c   :  { %6139 = vst.msk [vmem:[#allocation2 + $0x90] sm:$0xff] %vm886_vm0, %v6043_v36  ;;  %v5942_v42 = vmul.f32 %v7607_v12, %v13580_v24  ;;  %v5754_v9 = vadd.f32 1e-06, %v5657_v53  ;;  %v4963_v58 = vpop.f32.mrf.mxu0 }
 0xa6d   :  { %v12157_v41 = vadd.f32 %v4963_v58, %v13581_v17  ;;  %v5420_v43 = vpop.xlane.xlu1 %5419  ;;  %v5487_v27 = vsel %vm886_vm0, %v5297_v25, 0.0 }
 0xa6e   :  { %v6044_v6 = vmul.f32 %v11928_v39, %v5942_v42  ;;  %7614 = vrsqrt.f32 %v5754_v9  ;;  %v5658_v62 = vmul.f32 0.015625, %v5420_v43  ;;  %5488 = vadd.xlane.f32.xlu0 %v5487_v27  ;;  %v4965_v3 = vpop.f32.mrf.mxu0  ;;  %v13588_v42 = vld [vmem:[#allocation249_spill] sm:$0xff]  ;;  %v13589_v43 = vld [vmem:[#allocation11_spill] sm:$0xff] }
 0xa6f   :  { %v5298_v15 = vmul.f32 %v12157_v41, %v12157_v41 }
 0xa70   :  { %v7609_v7 = vpop.eup %7608  ;;  %6140 = vst.msk [vmem:[#allocation2 + $0x98] sm:$0xff] %vm886_vm0, %v6044_v6  ;;  %v5755_v10 = vadd.f32 1e-06, %v5658_v62  ;;  %v4966_v16 = vpop.f32.mrf.mxu0 }
 0xa71   :  { %v5943_v34 = vmul.f32 %v7609_v7, %v13582_v35  ;;  %v12166_v0 = vadd.f32 %v4966_v16, %v13583_v2  ;;  %v5423_v40 = vpop.xlane.xlu0 %5422  ;;  %v5490_v61 = vsel %vm886_vm0, %v5298_v15, 0.0 }
 0xa72   :  { %7616 = vrsqrt.f32 %v5755_v10  ;;  %v5659_v30 = vmul.f32 0.015625, %v5423_v40  ;;  %5491 = vadd.xlane.f32.xlu1 %v5490_v61  ;;  %v4968_v14 = vpop.f32.mrf.mxu0  ;;  %v13590_v10 = vld [vmem:[#allocation25_spill] sm:$0xff]  ;;  %v13591_v61 = vld [vmem:[#allocation12_spill] sm:$0xff] }
 0xa73   :  { %v6045_v28 = vmul.f32 %v11928_v39, %v5943_v34  ;;  %v7611_v5 = vpop.eup %7610  ;;  %v5299_v54 = vmul.f32 %v12166_v0, %v12166_v0 }
 0xa74   :  { %v5944_v60 = vmul.f32 %v7611_v5, %v13584_v26  ;;  %v5756_v44 = vadd.f32 1e-06, %v5659_v30  ;;  %v4971_v18 = vpop.f32.mrf.mxu0 }
 0xa75   :  { %6141 = vst.msk [vmem:[#allocation2 + $0xa0] sm:$0xff] %vm886_vm0, %v6045_v28  ;;  %v12175_v13 = vadd.f32 %v4971_v18, %v13585_v46  ;;  %v5426_v63 = vpop.xlane.xlu1 %5425  ;;  %v5493_v19 = vsel %vm886_vm0, %v5299_v54, 0.0  ;;  %v13592_v18 = vld [vmem:[#allocation251_spill] sm:$0xff] }
 0xa76   :  { %v6046_v11 = vmul.f32 %v11928_v39, %v5944_v60  ;;  %7618 = vrsqrt.f32 %v5756_v44  ;;  %v5660_v59 = vmul.f32 0.015625, %v5426_v63  ;;  %5494 = vadd.xlane.f32.xlu0 %v5493_v19  ;;  %v4973_v51 = vpop.f32.mrf.mxu0 }
 0xa77   :  { %v7613_v21 = vpop.eup %7612  ;;  %v5300_v56 = vmul.f32 %v12175_v13, %v12175_v13 }
 0xa78   :  { %6142 = vst.msk [vmem:[#allocation2 + $0xa8] sm:$0xff] %vm886_vm0, %v6046_v11  ;;  %v5945_v31 = vmul.f32 %v7613_v21, %v13586_v47  ;;  %v5757_v29 = vadd.f32 1e-06, %v5660_v59  ;;  %v4974_v22 = vpop.f32.mrf.mxu0  ;;  %v13593_v11 = vld [vmem:[#allocation14_spill] sm:$0xff] }
 0xa79   :  { %v12184_v23 = vadd.f32 %v4974_v22, %v13587_v48  ;;  %v5429_v50 = vpop.xlane.xlu0 %5428  ;;  %v5496_v36 = vsel %vm886_vm0, %v5300_v56, 0.0  ;;  %v13594_v48 = vld [vmem:[#allocation247_spill] sm:$0xff] }
 0xa7a   :  { %v6047_v53 = vmul.f32 %v11928_v39, %v5945_v31  ;;  %7620 = vrsqrt.f32 %v5757_v29  ;;  %v5661_v49 = vmul.f32 0.015625, %v5429_v50  ;;  %5497 = vadd.xlane.f32.xlu1 %v5496_v36  ;;  %v4976_v12 = vpop.f32.mrf.mxu0 }
 0xa7b   :  { %v7615_v25 = vpop.eup %7614  ;;  %v5301_v24 = vmul.f32 %v12184_v23, %v12184_v23 }
 0xa7c   :  { %6143 = vst.msk [vmem:[#allocation2 + $0xb0] sm:$0xff] %vm886_vm0, %v6047_v53  ;;  %v5946_v9 = vmul.f32 %v7615_v25, %v13588_v42  ;;  %v5758_v58 = vadd.f32 1e-06, %v5661_v49  ;;  %v13595_v49 = vld [vmem:[#allocation15_spill] sm:$0xff] }
 0xa7d   :  { %v5432_v6 = vpop.xlane.xlu1 %5431  ;;  %v5499_v62 = vsel %vm886_vm0, %v5301_v24, 0.0 }
 0xa7e   :  { %v6048_v3 = vmul.f32 %v11928_v39, %v5946_v9  ;;  %7622 = vrsqrt.f32 %v5758_v58  ;;  %v5662_v7 = vmul.f32 0.015625, %v5432_v6  ;;  %5500 = vadd.xlane.f32.xlu0 %v5499_v62  ;;  %v13596_v6 = vld [vmem:[#allocation256_spill] sm:$0xff] }
 0xa7f   :  { %v4979_v17 = vpop.f32.mrf.mxu0  ;;  %v7617_v35 = vpop.eup %7616 }
 0xa80   :  { %v12193_v27 = vadd.f32 %v4979_v17, %v13589_v43  ;;  %6144 = vst.msk [vmem:[#allocation2 + $0xb8] sm:$0xff] %vm886_vm0, %v6048_v3  ;;  %v5947_v16 = vmul.f32 %v7617_v35, %v13590_v10  ;;  %v5759_v2 = vadd.f32 1e-06, %v5662_v7 }
 0xa81   :  { %v4981_v15 = vpop.f32.mrf.mxu0  ;;  %v5435_v30 = vpop.xlane.xlu0 %5434 }
 0xa82   :  { %v5302_v34 = vmul.f32 %v12193_v27, %v12193_v27  ;;  %v6049_v5 = vmul.f32 %v11928_v39, %v5947_v16  ;;  %7624 = vrsqrt.f32 %v5759_v2  ;;  %v5663_v54 = vmul.f32 0.015625, %v5435_v30  ;;  %v13597_v15 = vld [vmem:[#allocation17_spill] sm:$0xff] }
 0xa83   :  { %v4982_v40 = vpop.f32.mrf.mxu0  ;;  %v7619_v60 = vpop.eup %7618 }
 0xa84   :  { %v12202_v28 = vadd.f32 %v4982_v40, %v13591_v61  ;;  %v5502_v14 = vsel %vm886_vm0, %v5302_v34, 0.0  ;;  %6145 = vst.msk [vmem:[#allocation2 + $0xc0] sm:$0xff] %vm886_vm0, %v6049_v5  ;;  %v5948_v46 = vmul.f32 %v7619_v60, %v13592_v18  ;;  %v5760_v63 = vadd.f32 1e-06, %v5663_v54  ;;  %v13598_v61 = vld [vmem:[#allocation28_spill] sm:$0xff]  ;;  %v13599_v5 = vld [vmem:[#allocation18_spill] sm:$0xff] }
 0xa85   :  { %5503 = vadd.xlane.f32.xlu1 %v5502_v14  ;;  %v4984_v26 = vpop.f32.mrf.mxu0  ;;  %v5438_v51 = vpop.xlane.xlu1 %5437 }
 0xa86   :  { %v5303_v44 = vmul.f32 %v12202_v28, %v12202_v28  ;;  %v6050_v56 = vmul.f32 %v11928_v39, %v5948_v46  ;;  %7626 = vrsqrt.f32 %v5760_v63  ;;  %v5664_v47 = vmul.f32 0.015625, %v5438_v51  ;;  %v13600_v63 = vld [vmem:[#allocation254_spill] sm:$0xff]  ;;  %v13601_v51 = vld [vmem:[#allocation20_spill] sm:$0xff] }
 0xa87   :  { %v4987_v19 = vpop.f32.mrf.mxu0  ;;  %v7621_v29 = vpop.eup %7620 }
 0xa88   :  { %v12211_v59 = vadd.f32 %v4987_v19, %v13593_v11  ;;  %v5505_v21 = vsel %vm886_vm0, %v5303_v44, 0.0  ;;  %6146 = vst.msk [vmem:[#allocation2 + $0xc8] sm:$0xff] %vm886_vm0, %v6050_v56  ;;  %v5949_v50 = vmul.f32 %v7621_v29, %v13594_v48  ;;  %v5761_v36 = vadd.f32 1e-06, %v5664_v47 }
 0xa89   :  { %5506 = vadd.xlane.f32.xlu0 %v5505_v21  ;;  %v4989_v31 = vpop.f32.mrf.mxu0  ;;  %v5441_v25 = vpop.xlane.xlu0 %5440 }
 0xa8a   :  { %v5304_v22 = vmul.f32 %v12211_v59, %v12211_v59  ;;  %v6051_v42 = vmul.f32 %v11928_v39, %v5949_v50  ;;  %7628 = vrsqrt.f32 %v5761_v36  ;;  %v5665_v9 = vmul.f32 0.015625, %v5441_v25  ;;  %v13602_v36 = vld [vmem:[#allocation31_spill] sm:$0xff] }
 0xa8b   :  { %v4990_v53 = vpop.f32.mrf.mxu0  ;;  %v7623_v17 = vpop.eup %7622 }
 0xa8c   :  { %v12220_v12 = vadd.f32 %v4990_v53, %v13595_v49  ;;  %v5508_v24 = vsel %vm886_vm0, %v5304_v22, 0.0  ;;  %6147 = vst.msk [vmem:[#allocation2 + $0xd0] sm:$0xff] %vm886_vm0, %v6051_v42  ;;  %v5950_v62 = vmul.f32 %v7623_v17, %v13596_v6  ;;  %v5762_v3 = vadd.f32 1e-06, %v5665_v9 }
 0xa8d   :  { %5509 = vadd.xlane.f32.xlu1 %v5508_v24  ;;  %v4992_v58 = vpop.f32.mrf.mxu0  ;;  %v13603_v24 = vld [vmem:[#allocation21_spill] sm:$0xff] }
 0xa8e   :  { %v5305_v43 = vmul.f32 %v12220_v12, %v12220_v12  ;;  %v6052_v10 = vmul.f32 %v11928_v39, %v5950_v62  ;;  %7630 = vrsqrt.f32 %v5762_v3 }
 0xa8f   :  { %v4995_v7 = vpop.f32.mrf.mxu0  ;;  %v7625_v2 = vpop.eup %7624 }
 0xa90   :  { %v12229_v35 = vadd.f32 %v4995_v7, %v13597_v15  ;;  %v5511_v34 = vsel %vm886_vm0, %v5305_v43, 0.0  ;;  %6148 = vst.msk [vmem:[#allocation2 + $0xd8] sm:$0xff] %vm886_vm0, %v6052_v10  ;;  %v5951_v30 = vmul.f32 %v7625_v2, %v13598_v61  ;;  %v13604_v10 = vld [vmem:[#allocation23_spill] sm:$0xff]  ;;  %v12271_v2 = vld [vmem:[%s12692_s4] ss:$0 sm:$0xff] }
 0xa91   :  { %5512 = vadd.xlane.f32.xlu0 %v5511_v34  ;;  %v4997_v16 = vpop.f32.mrf.mxu0 }
 0xa92   :  { %v5306_v40 = vmul.f32 %v12229_v35, %v12229_v35  ;;  %v6053_v60 = vmul.f32 %v11928_v39, %v5951_v30 }
 0xa93   :  { %v4998_v14 = vpop.f32.mrf.mxu0  ;;  %v7627_v18 = vpop.eup %7626 }
 0xa94   :  { %v12238_v54 = vadd.f32 %v4998_v14, %v13599_v5  ;;  %v5514_v26 = vsel %vm886_vm0, %v5306_v40, 0.0  ;;  %6149 = vst.msk [vmem:[#allocation2 + $0xe0] sm:$0xff] %vm886_vm0, %v6053_v60  ;;  %v5952_v19 = vmul.f32 %v7627_v18, %v13600_v63  ;;  %v13605_v60 = vld [vmem:[#allocation24_spill] sm:$0xff] }
 0xa95   :  { %5515 = vadd.xlane.f32.xlu1 %v5514_v26  ;;  %v5000_v44 = vpop.f32.mrf.mxu0  ;;  %v5444_v31 = vpop.xlane.xlu1 %5443 }
 0xa96   :  { %v5307_v46 = vmul.f32 %v12238_v54, %v12238_v54  ;;  %v6054_v47 = vmul.f32 %v11928_v39, %v5952_v19  ;;  %v5666_v50 = vmul.f32 0.015625, %v5444_v31 }
 0xa97   :  { %v5003_v11 = vpop.f32.mrf.mxu0  ;;  %v7629_v22 = vpop.eup %7628 }
 0xa98   :  { %v12247_v21 = vadd.f32 %v5003_v11, %v13601_v51  ;;  %v5517_v56 = vsel %vm886_vm0, %v5307_v46, 0.0  ;;  %6150 = vst.msk [vmem:[#allocation2 + $0xe8] sm:$0xff] %vm886_vm0, %v6054_v47  ;;  %v5953_v53 = vmul.f32 %v7629_v22, %v13602_v36  ;;  %v5763_v25 = vadd.f32 1e-06, %v5666_v50  ;;  %v13606_v47 = vld [vmem:[#allocation26_spill] sm:$0xff] }
 0xa99   :  { %5518 = vadd.xlane.f32.xlu0 %v5517_v56  ;;  %v5005_v29 = vpop.f32.mrf.mxu0  ;;  %v5447_v17 = vpop.xlane.xlu0 %5446 }
 0xa9a   :  { %v5308_v48 = vmul.f32 %v12247_v21, %v12247_v21  ;;  %v6055_v58 = vmul.f32 %v11928_v39, %v5953_v53  ;;  %7632 = vrsqrt.f32 %v5763_v25  ;;  %v5667_v3 = vmul.f32 0.015625, %v5447_v17 }
 0xa9b   :  { %v5006_v49 = vpop.f32.mrf.mxu0  ;;  %v7631_v6 = vpop.eup %7630 }
 0xa9c   :  { %v12256_v42 = vadd.f32 %v5006_v49, %v13603_v24  ;;  %v5520_v9 = vsel %vm886_vm0, %v5308_v48, 0.0  ;;  %6151 = vst.msk [vmem:[#allocation2 + $0xf0] sm:$0xff] %vm886_vm0, %v6055_v58  ;;  %v5954_v7 = vmul.f32 %v7631_v6, %v11753_v55  ;;  %v5764_v34 = vadd.f32 1e-06, %v5667_v3  ;;  %v13607_v24 = vld [vmem:[#allocation27_spill] sm:$0xff] }
 0xa9d   :  { %5521 = vadd.xlane.f32.xlu1 %v5520_v9  ;;  %v5008_v43 = vpop.f32.mrf.mxu0 }
 0xa9e   :  { %v5309_v62 = vmul.f32 %v12256_v42, %v12256_v42  ;;  %v6056_v40 = vmul.f32 %v12271_v2, %v5954_v7  ;;  %7634 = vrsqrt.f32 %v5764_v34 }
 0xa9f   :  { %v5011_v15 = vpop.f32.mrf.mxu0  ;;  %v5450_v61 = vpop.xlane.xlu1 %5449 }
 0xaa0   :  { %v12265_v16 = vadd.f32 %v5011_v15, %v13604_v10  ;;  %v5523_v39 = vsel %vm886_vm0, %v5309_v62, 0.0  ;;  %v5668_v14 = vmul.f32 0.015625, %v5450_v61  ;;  %6152 = vst.msk [vmem:[#allocation2 + $0xf8] sm:$0xff] %vm886_vm0, %v6056_v40 }
 0xaa1   :  { %5524 = vadd.xlane.f32.xlu0 %v5523_v39  ;;  %v5013_v30 = vpop.f32.mrf.mxu0  ;;  %v13609_v39 = vld [vmem:[#allocation29_spill] sm:$0xff] }
 0xaa2   :  { %v5310_v55 = vmul.f32 %v12265_v16, %v12265_v16  ;;  %v5765_v26 = vadd.f32 1e-06, %v5668_v14 }
 0xaa3   :  { %v5014_v5 = vpop.f32.mrf.mxu0  ;;  %v5453_v46 = vpop.xlane.xlu0 %5452 }
 0xaa4   :  { %v12278_v44 = vadd.f32 %v5014_v5, %v13605_v60  ;;  %v5526_v18 = vsel %vm886_vm0, %v5310_v55, 0.0  ;;  %7636 = vrsqrt.f32 %v5765_v26  ;;  %v5669_v11 = vmul.f32 0.015625, %v5453_v46 }
 0xaa5   :  { %5527 = vadd.xlane.f32.xlu1 %v5526_v18  ;;  %v5016_v63 = vpop.f32.mrf.mxu0 }
 0xaa6   :  { %v5311_v19 = vmul.f32 %v12278_v44, %v12278_v44  ;;  %v5766_v56 = vadd.f32 1e-06, %v5669_v11  ;;  %v13610_v63 = vld [vmem:[#allocation7_spill] sm:$0xff]  ;;  %v13611_v11 = vld [vmem:[#allocation30_spill] sm:$0xff] }
 0xaa7   :  { %v5019_v51 = vpop.f32.mrf.mxu0  ;;  %v5456_v50 = vpop.xlane.xlu1 %5455 }
 0xaa8   :  { %v12284_v31 = vadd.f32 %v5019_v51, %v13606_v47  ;;  %v5529_v29 = vsel %vm886_vm0, %v5311_v19, 0.0  ;;  %7638 = vrsqrt.f32 %v5766_v56  ;;  %v7633_v36 = vpop.eup %7632  ;;  %v5670_v53 = vmul.f32 0.015625, %v5456_v50 }
 0xaa9   :  { %5530 = vadd.xlane.f32.xlu0 %v5529_v29  ;;  %v5021_v22 = vpop.f32.mrf.mxu0  ;;  %v5955_v25 = vmul.f32 %v7633_v36, %v11802_v45  ;;  %v13608_v45 = vld [vmem:[#allocation255_spill] sm:$0xff] }
 0xaaa   :  { %v5312_v48 = vmul.f32 %v12284_v31, %v12284_v31  ;;  %v5767_v17 = vadd.f32 1e-06, %v5670_v53 }
 0xaab   :  { %v5022_v49 = vpop.f32.mrf.mxu0  ;;  %v6057_v6 = vmul.f32 %v12271_v2, %v5955_v25  ;;  %v5459_v3 = vpop.xlane.xlu0 %5458  ;;  %v13612_v25 = vld [vmem:[#allocation208_spill] sm:$0xff] }
 0xaac   :  { %v12291_v9 = vadd.f32 %v5022_v49, %v13607_v24  ;;  %v5532_v58 = vsel %vm886_vm0, %v5312_v48, 0.0  ;;  %v7635_v7 = vpop.eup %7634  ;;  %7640 = vrsqrt.f32 %v5767_v17  ;;  %v5671_v15 = vmul.f32 0.015625, %v5459_v3 }
 0xaad   :  { %5533 = vadd.xlane.f32.xlu1 %v5532_v58  ;;  %v5024_v43 = vpop.f32.mrf.mxu0  ;;  %6153 = vst.msk [vmem:[#allocation2 + $0x100] sm:$0xff] %vm886_vm0, %v6057_v6  ;;  %v5956_v10 = vmul.f32 %v7635_v7, %v13608_v45  ;;  %v13613_v58 = vld [vmem:[#allocation32_spill] sm:$0xff] }
 0xaae   :  { %v5313_v62 = vmul.f32 %v12291_v9, %v12291_v9  ;;  %v5768_v30 = vadd.f32 1e-06, %v5671_v15 }
 0xaaf   :  { %v5027_v34 = vpop.f32.mrf.mxu0  ;;  %v6058_v14 = vmul.f32 %v12271_v2, %v5956_v10  ;;  %v5462_v26 = vpop.xlane.xlu1 %5461 }
 0xab0   :  { %v12300_v40 = vadd.f32 %v5027_v34, %v13609_v39  ;;  %v5535_v61 = vsel %vm886_vm0, %v5313_v62, 0.0  ;;  %7642 = vrsqrt.f32 %v5768_v30  ;;  %v5672_v18 = vmul.f32 0.015625, %v5462_v26  ;;  %v13614_v39 = vld [vmem:[#allocation33_spill] sm:$0xff] }
 0xab1   :  { %5536 = vadd.xlane.f32.xlu0 %v5535_v61  ;;  %v5029_v55 = vpop.f32.mrf.mxu0  ;;  %v7637_v60 = vpop.eup %7636  ;;  %6154 = vst.msk [vmem:[#allocation2 + $0x108] sm:$0xff] %vm886_vm0, %v6058_v14 }
 0xab2   :  { %v5314_v5 = vmul.f32 %v12300_v40, %v12300_v40  ;;  %v5957_v19 = vmul.f32 %v7637_v60, %v13610_v63  ;;  %v5769_v47 = vadd.f32 1e-06, %v5672_v18  ;;  %v13615_v55 = vld [vmem:[#allocation259_spill] sm:$0xff] }
 0xab3   :  { %v5030_v46 = vpop.f32.mrf.mxu0  ;;  %v5465_v50 = vpop.xlane.xlu0 %5464 }
 0xab4   :  { %v12309_v51 = vadd.f32 %v5030_v46, %v13611_v11  ;;  %v5538_v56 = vsel %vm886_vm0, %v5314_v5, 0.0  ;;  %v6059_v22 = vmul.f32 %v12271_v2, %v5957_v19  ;;  %7644 = vrsqrt.f32 %v5769_v47 }
 0xab5   :  { %5539 = vadd.xlane.f32.xlu1 %v5538_v56  ;;  %v5032_v29 = vpop.f32.mrf.mxu0  ;;  %v7639_v36 = vpop.eup %7638  ;;  %v5673_v53 = vmul.f32 0.015625, %v5465_v50  ;;  %v13616_v56 = vld [vmem:[#allocation35_spill] sm:$0xff] }
 0xab6   :  { %v5315_v48 = vmul.f32 %v12309_v51, %v12309_v51  ;;  %6155 = vst.msk [vmem:[#allocation2 + $0x110] sm:$0xff] %vm886_vm0, %v6059_v22  ;;  %v5958_v24 = vmul.f32 %v7639_v36, %v13612_v25  ;;  %v13617_v22 = vld [vmem:[#allocation241_spill] sm:$0xff] }
 0xab7   :  { %v5035_v49 = vpop.f32.mrf.mxu0  ;;  %v5770_v6 = vadd.f32 1e-06, %v5673_v53 }
 0xab8   :  { %v12318_v17 = vadd.f32 %v5035_v49, %v13613_v58  ;;  %v5541_v43 = vsel %vm886_vm0, %v5315_v48, 0.0  ;;  %v6060_v3 = vmul.f32 %v12271_v2, %v5958_v24  ;;  %v5468_v15 = vpop.xlane.xlu1 %5467 }
 0xab9   :  { %5542 = vadd.xlane.f32.xlu0 %v5541_v43  ;;  %v5037_v62 = vpop.f32.mrf.mxu0  ;;  %7646 = vrsqrt.f32 %v5770_v6  ;;  %v5674_v34 = vmul.f32 0.015625, %v5468_v15  ;;  %v7641_v10 = vpop.eup %7640  ;;  %v13618_v43 = vld [vmem:[#allocation36_spill] sm:$0xff] }
 0xaba   :  { %v5316_v7 = vmul.f32 %v12318_v17, %v12318_v17  ;;  %6156 = vst.msk [vmem:[#allocation2 + $0x118] sm:$0xff] %vm886_vm0, %v6060_v3  ;;  %v5959_v14 = vmul.f32 %v7641_v10, %v13615_v55 }
 0xabb   :  { %v5038_v45 = vpop.f32.mrf.mxu0  ;;  %v5771_v5 = vadd.f32 1e-06, %v5674_v34 }
 0xabc   :  { %v12326_v61 = vadd.f32 %v5038_v45, %v13614_v39  ;;  %v5544_v30 = vsel %vm886_vm0, %v5316_v7, 0.0  ;;  %v5471_v18 = vpop.xlane.xlu0 %5470  ;;  %v6061_v46 = vmul.f32 %v12271_v2, %v5959_v14  ;;  %v13619_v14 = vld [vmem:[#allocation38_spill] sm:$0xff] }
 0xabd   :  { %5545 = vadd.xlane.f32.xlu1 %v5544_v30  ;;  %v5040_v26 = vpop.f32.mrf.mxu0  ;;  %7648 = vrsqrt.f32 %v5771_v5  ;;  %v5675_v63 = vmul.f32 0.015625, %v5471_v18  ;;  %v7643_v11 = vpop.eup %7642 }
 0xabe   :  { %v5317_v60 = vmul.f32 %v12326_v61, %v12326_v61  ;;  %6157 = vst.msk [vmem:[#allocation2 + $0x120] sm:$0xff] %vm886_vm0, %v6061_v46  ;;  %v5960_v48 = vmul.f32 %v7643_v11, %v13617_v22  ;;  %v13620_v22 = vld [vmem:[#allocation39_spill] sm:$0xff] }
 0xabf   :  { %v5043_v19 = vpop.f32.mrf.mxu0  ;;  %v5772_v50 = vadd.f32 1e-06, %v5675_v63 }
 0xac0   :  { %v12334_v47 = vadd.f32 %v5043_v19, %v13616_v56  ;;  %v5547_v29 = vsel %vm886_vm0, %v5317_v60, 0.0  ;;  %v6062_v49 = vmul.f32 %v12271_v2, %v5960_v48 }
 0xac1   :  { %5548 = vadd.xlane.f32.xlu0 %v5547_v29  ;;  %v5045_v36 = vpop.f32.mrf.mxu0  ;;  %7650 = vrsqrt.f32 %v5772_v50  ;;  %v7645_v24 = vpop.eup %7644 }
 0xac2   :  { %v5318_v53 = vmul.f32 %v12334_v47, %v12334_v47  ;;  %v5474_v58 = vpop.xlane.xlu1 %5473  ;;  %6158 = vst.msk [vmem:[#allocation2 + $0x128] sm:$0xff] %vm886_vm0, %v6062_v49  ;;  %v5961_v3 = vmul.f32 %v7645_v24, %v11939_v38 }
 0xac3   :  { %v5046_v25 = vpop.f32.mrf.mxu0  ;;  %v5676_v7 = vmul.f32 0.015625, %v5474_v58 }
 0xac4   :  { %v12343_v6 = vadd.f32 %v5046_v25, %v13618_v43  ;;  %v5550_v62 = vsel %vm886_vm0, %v5318_v53, 0.0  ;;  %v6063_v45 = vmul.f32 %v12271_v2, %v5961_v3  ;;  %v13621_v3 = vld [vmem:[#allocation41_spill] sm:$0xff] }
 0xac5   :  { %5551 = vadd.xlane.f32.xlu1 %v5550_v62  ;;  %v5048_v15 = vpop.f32.mrf.mxu0  ;;  %v5773_v10 = vadd.f32 1e-06, %v5676_v7 }
 0xac6   :  { %v5319_v34 = vmul.f32 %v12343_v6, %v12343_v6  ;;  %v7647_v30 = vpop.eup %7646  ;;  %v5477_v55 = vpop.xlane.xlu0 %5476  ;;  %6159 = vst.msk [vmem:[#allocation2 + $0x130] sm:$0xff] %vm886_vm0, %v6063_v45 }
 0xac7   :  { %v5051_v39 = vpop.f32.mrf.mxu0  ;;  %v5962_v38 = vmul.f32 %v7647_v30, %v11957_v32  ;;  %7652 = vrsqrt.f32 %v5773_v10  ;;  %v5677_v60 = vmul.f32 0.015625, %v5477_v55 }
 0xac8   :  { %v12352_v5 = vadd.f32 %v5051_v39, %v13619_v14  ;;  %v5553_v26 = vsel %vm886_vm0, %v5319_v34, 0.0  ;;  %v13622_v14 = vld [vmem:[#allocation42_spill] sm:$0xff] }
 0xac9   :  { %5554 = vadd.xlane.f32.xlu0 %v5553_v26  ;;  %v5053_v18 = vpop.f32.mrf.mxu0  ;;  %v6064_v63 = vmul.f32 %v12271_v2, %v5962_v38  ;;  %v5774_v19 = vadd.f32 1e-06, %v5677_v60 }
 0xaca   :  { %v5320_v46 = vmul.f32 %v12352_v5, %v12352_v5  ;;  %v7649_v56 = vpop.eup %7648  ;;  %v5480_v29 = vpop.xlane.xlu1 %5479 }
 0xacb   :  { %v5054_v11 = vpop.f32.mrf.mxu0  ;;  %6160 = vst.msk [vmem:[#allocation2 + $0x138] sm:$0xff] %vm886_vm0, %v6064_v63  ;;  %v5963_v32 = vmul.f32 %v7649_v56, %v11974_v37  ;;  %7654 = vrsqrt.f32 %v5774_v19  ;;  %v5678_v36 = vmul.f32 0.015625, %v5480_v29  ;;  %v13623_v19 = vld [vmem:[#allocation44_spill] sm:$0xff] }
 0xacc   :  { %v12361_v48 = vadd.f32 %v5054_v11, %v13620_v22  ;;  %v5556_v50 = vsel %vm886_vm0, %v5320_v46, 0.0 }
 0xacd   :  { %5557 = vadd.xlane.f32.xlu1 %v5556_v50  ;;  %v5056_v53 = vpop.f32.mrf.mxu0  ;;  %v6065_v25 = vmul.f32 %v12271_v2, %v5963_v32  ;;  %v5775_v24 = vadd.f32 1e-06, %v5678_v36 }
 0xace   :  { %v5321_v49 = vmul.f32 %v12361_v48, %v12361_v48  ;;  %v7651_v43 = vpop.eup %7650  ;;  %v5483_v62 = vpop.xlane.xlu0 %5482 }
 0xacf   :  { %v5059_v58 = vpop.f32.mrf.mxu0  ;;  %6161 = vst.msk [vmem:[#allocation2 + $0x140] sm:$0xff] %vm886_vm0, %v6065_v25  ;;  %v5964_v37 = vmul.f32 %v7651_v43, %v11995_v4  ;;  %7656 = vrsqrt.f32 %v5775_v24  ;;  %v5679_v34 = vmul.f32 0.015625, %v5483_v62 }
 0xad0   :  { %v12370_v7 = vadd.f32 %v5059_v58, %v13621_v3  ;;  %v5559_v15 = vsel %vm886_vm0, %v5321_v49, 0.0 }
 0xad1   :  { %5560 = vadd.xlane.f32.xlu0 %v5559_v15  ;;  %v5061_v45 = vpop.f32.mrf.mxu0  ;;  %v6066_v39 = vmul.f32 %v12271_v2, %v5964_v37  ;;  %v5776_v30 = vadd.f32 1e-06, %v5679_v34 }
 0xad2   :  { %v5322_v10 = vmul.f32 %v12370_v7, %v12370_v7 }
 0xad3   :  { %v5062_v55 = vpop.f32.mrf.mxu0  ;;  %6162 = vst.msk [vmem:[#allocation2 + $0x148] sm:$0xff] %vm886_vm0, %v6066_v39  ;;  %7658 = vrsqrt.f32 %v5776_v30 }
 0xad4   :  { %v12379_v26 = vadd.f32 %v5062_v55, %v13622_v14  ;;  %v5562_v38 = vsel %vm886_vm0, %v5322_v10, 0.0  ;;  %v7653_v60 = vpop.eup %7652 }
 0xad5   :  { %5563 = vadd.xlane.f32.xlu1 %v5562_v38  ;;  %v5064_v4 = vpop.f32.mrf.mxu0  ;;  %v5965_v46 = vmul.f32 %v7653_v60, %v12019_v8  ;;  %v13624_v8 = vld [vmem:[#allocation45_spill] sm:$0xff] }
 0xad6   :  { %v5323_v18 = vmul.f32 %v12379_v26, %v12379_v26 }
 0xad7   :  { %v5067_v63 = vpop.f32.mrf.mxu0  ;;  %v6067_v29 = vmul.f32 %v12271_v2, %v5965_v46 }
 0xad8   :  { %v12387_v11 = vadd.f32 %v5067_v63, %v13623_v19  ;;  %v5565_v56 = vsel %vm886_vm0, %v5323_v18, 0.0  ;;  %v7655_v50 = vpop.eup %7654  ;;  %v13627_v19 = vld [vmem:[#allocation50_spill] sm:$0xff] }
 0xad9   :  { %5566 = vadd.xlane.f32.xlu0 %v5565_v56  ;;  %v5069_v22 = vpop.f32.mrf.mxu0  ;;  %6163 = vst.msk [vmem:[#allocation2 + $0x150] sm:$0xff] %vm886_vm0, %v6067_v29  ;;  %v5966_v36 = vmul.f32 %v7655_v50, %v12042_v57  ;;  %v13625_v57 = vld [vmem:[#allocation47_spill] sm:$0xff] }
 0xada   :  { %v5324_v32 = vmul.f32 %v12387_v11, %v12387_v11 }
 0xadb   :  { %v5070_v53 = vpop.f32.mrf.mxu0  ;;  %v6068_v24 = vmul.f32 %v12271_v2, %v5966_v36 }
 0xadc   :  { %v12396_v49 = vadd.f32 %v5070_v53, %v13624_v8  ;;  %v5568_v25 = vsel %vm886_vm0, %v5324_v32, 0.0  ;;  %v7657_v43 = vpop.eup %7656  ;;  %v13628_v32 = vld [vmem:[#allocation51_spill] sm:$0xff] }
 0xadd   :  { %5569 = vadd.xlane.f32.xlu1 %v5568_v25  ;;  %v5072_v58 = vpop.f32.mrf.mxu0  ;;  %6164 = vst.msk [vmem:[#allocation2 + $0x158] sm:$0xff] %vm886_vm0, %v6068_v24  ;;  %v5967_v3 = vmul.f32 %v7657_v43, %v12056_v52  ;;  %v13626_v52 = vld [vmem:[#allocation48_spill] sm:$0xff] }
 0xade   :  { %v5325_v62 = vmul.f32 %v12396_v49, %v12396_v49  ;;  %v13629_v58 = vld [vmem:[#allocation54_spill] sm:$0xff] }
 0xadf   :  { %v5075_v15 = vpop.f32.mrf.mxu0  ;;  %v6069_v45 = vmul.f32 %v12271_v2, %v5967_v3 }
 0xae0   :  { %v12405_v37 = vadd.f32 %v5075_v15, %v13625_v57  ;;  %v5571_v34 = vsel %vm886_vm0, %v5325_v62, 0.0  ;;  %v7659_v39 = vpop.eup %7658 }
 0xae1   :  { %5572 = vadd.xlane.f32.xlu0 %v5571_v34  ;;  %v5077_v10 = vpop.f32.mrf.mxu0  ;;  %6165 = vst.msk [vmem:[#allocation2 + $0x160] sm:$0xff] %vm886_vm0, %v6069_v45  ;;  %v5968_v55 = vmul.f32 %v7659_v39, %v12077_v20  ;;  %v13630_v34 = vld [vmem:[#allocation55_spill] sm:$0xff] }
 0xae2   :  { %v5326_v30 = vmul.f32 %v12405_v37, %v12405_v37 }
 0xae3   :  { %v5078_v14 = vpop.f32.mrf.mxu0  ;;  %v6070_v60 = vmul.f32 %v12271_v2, %v5968_v55 }
 0xae4   :  { %v12414_v38 = vadd.f32 %v5078_v14, %v13626_v52  ;;  %v5574_v4 = vsel %vm886_vm0, %v5326_v30, 0.0 }
 0xae5   :  { %5575 = vadd.xlane.f32.xlu1 %v5574_v4  ;;  %v5080_v18 = vpop.f32.mrf.mxu0  ;;  %6166 = vst.msk [vmem:[#allocation2 + $0x168] sm:$0xff] %vm886_vm0, %v6070_v60  ;;  %v13631_v4 = vld [vmem:[#allocation57_spill] sm:$0xff] }
 0xae6   :  { %v5327_v46 = vmul.f32 %v12414_v38, %v12414_v38 }
 0xae7   :  { %v5083_v63 = vpop.f32.mrf.mxu0 }
 0xae8   :  { %v12422_v56 = vadd.f32 %v5083_v63, %v13627_v19  ;;  %v5577_v20 = vsel %vm886_vm0, %v5327_v46, 0.0 }
 0xae9   :  { %5578 = vadd.xlane.f32.xlu0 %v5577_v20  ;;  %v5085_v29 = vpop.f32.mrf.mxu0 }
 0xaea   :  { %v5328_v22 = vmul.f32 %v12422_v56, %v12422_v56 }
 0xaeb   :  { %v5086_v50 = vpop.f32.mrf.mxu0 }
 0xaec   :  { %v12428_v36 = vadd.f32 %v5086_v50, %v13628_v32  ;;  %v5580_v53 = vsel %vm886_vm0, %v5328_v22, 0.0  ;;  %v13632_v50 = vld [vmem:[#allocation58_spill] sm:$0xff] }
 0xaed   :  { %5581 = vadd.xlane.f32.xlu1 %v5580_v53  ;;  %v5088_v8 = vpop.f32.mrf.mxu0 }
 0xaee   :  { %v5329_v25 = vmul.f32 %v12428_v36, %v12428_v36 }
 0xaef   :  { %v5091_v24 = vpop.f32.mrf.mxu0 }
 0xaf0   :  { %v12434_v43 = vadd.f32 %v5091_v24, %v13629_v58  ;;  %v5583_v62 = vsel %vm886_vm0, %v5329_v25, 0.0 }
 0xaf1   :  { %5584 = vadd.xlane.f32.xlu0 %v5583_v62  ;;  %v5093_v3 = vpop.f32.mrf.mxu0 }
 0xaf2   :  { %v5330_v15 = vmul.f32 %v12434_v43, %v12434_v43 }
 0xaf3   :  { %v5094_v57 = vpop.f32.mrf.mxu0  ;;  %v5486_v55 = vpop.xlane.xlu1 %5485 }
 0xaf4   :  { %v12440_v45 = vadd.f32 %v5094_v57, %v13630_v34  ;;  %v5586_v10 = vsel %vm886_vm0, %v5330_v15, 0.0  ;;  %v5680_v14 = vmul.f32 0.015625, %v5486_v55  ;;  %v13633_v15 = vld [vmem:[#allocation60_spill] sm:$0xff] }
 0xaf5   :  { %5587 = vadd.xlane.f32.xlu1 %v5586_v10  ;;  %v5096_v39 = vpop.f32.mrf.mxu0 }
 0xaf6   :  { %v5331_v30 = vmul.f32 %v12440_v45, %v12440_v45  ;;  %v5777_v46 = vadd.f32 1e-06, %v5680_v14 }
 0xaf7   :  { %v5099_v52 = vpop.f32.mrf.mxu0  ;;  %v5489_v20 = vpop.xlane.xlu0 %5488 }
 0xaf8   :  { %v12446_v60 = vadd.f32 %v5099_v52, %v13631_v4  ;;  %v5589_v18 = vsel %vm886_vm0, %v5331_v30, 0.0  ;;  %7660 = vrsqrt.f32 %v5777_v46  ;;  %v5681_v29 = vmul.f32 0.015625, %v5489_v20  ;;  %v13634_v4 = vld [vmem:[#allocation61_spill] sm:$0xff] }
 0xaf9   :  { %5590 = vadd.xlane.f32.xlu0 %v5589_v18  ;;  %v5101_v63 = vpop.f32.mrf.mxu0 }
 0xafa   :  { %v5332_v19 = vmul.f32 %v12446_v60, %v12446_v60  ;;  %v5778_v8 = vadd.f32 1e-06, %v5681_v29 }
 0xafb   :  { %v5102_v22 = vpop.f32.mrf.mxu0  ;;  %v5492_v58 = vpop.xlane.xlu1 %5491 }
 0xafc   :  { %v12452_v32 = vadd.f32 %v5102_v22, %v13632_v50  ;;  %v5592_v53 = vsel %vm886_vm0, %v5332_v19, 0.0  ;;  %7662 = vrsqrt.f32 %v5778_v8  ;;  %v5682_v62 = vmul.f32 0.015625, %v5492_v58  ;;  %v13635_v8 = vld [vmem:[#allocation63_spill] sm:$0xff] }
 0xafd   :  { %5593 = vadd.xlane.f32.xlu1 %v5592_v53  ;;  %v5104_v25 = vpop.f32.mrf.mxu0 }
 0xafe   :  { %v5333_v24 = vmul.f32 %v12452_v32, %v12452_v32  ;;  %v5779_v10 = vadd.f32 1e-06, %v5682_v62 }
 0xaff   :  { %v5107_v3 = vpop.f32.mrf.mxu0  ;;  %v5495_v55 = vpop.xlane.xlu0 %5494 }
 0xb00   :  { %v12458_v57 = vadd.f32 %v5107_v3, %v13633_v15  ;;  %v5595_v34 = vsel %vm886_vm0, %v5333_v24, 0.0  ;;  %7664 = vrsqrt.f32 %v5779_v10  ;;  %v5683_v14 = vmul.f32 0.015625, %v5495_v55 }
 0xb01   :  { %5596 = vadd.xlane.f32.xlu0 %v5595_v34  ;;  %v5109_v39 = vpop.f32.mrf.mxu0 }
 0xb02   :  { %v5334_v30 = vmul.f32 %v12458_v57, %v12458_v57  ;;  %v5780_v63 = vadd.f32 1e-06, %v5683_v14  ;;  %v13636_v14 = vld [vmem:[#allocation64_spill] sm:$0xff] }
 0xb03   :  { %v5110_v52 = vpop.f32.mrf.mxu0  ;;  %v5498_v29 = vpop.xlane.xlu1 %5497 }
 0xb04   :  { %v12464_v18 = vadd.f32 %v5110_v52, %v13634_v4  ;;  %v5598_v46 = vsel %vm886_vm0, %v5334_v30, 0.0  ;;  %7666 = vrsqrt.f32 %v5780_v63  ;;  %v5684_v22 = vmul.f32 0.015625, %v5498_v29 }
 0xb05   :  { %5599 = vadd.xlane.f32.xlu1 %v5598_v46  ;;  %v5112_v19 = vpop.f32.mrf.mxu0  ;;  %v7661_v53 = vpop.eup %7660 }
 0xb06   :  { %v5335_v20 = vmul.f32 %v12464_v18, %v12464_v18  ;;  %v5969_v58 = vmul.f32 %v7661_v53, %v12140_v33  ;;  %v5781_v62 = vadd.f32 1e-06, %v5684_v22 }
 0xb07   :  { %v5115_v50 = vpop.f32.mrf.mxu0  ;;  %v5501_v34 = vpop.xlane.xlu0 %5500 }
 0xb08   :  { %v12470_v25 = vadd.f32 %v5115_v50, %v13635_v8  ;;  %v5601_v24 = vsel %vm886_vm0, %v5335_v20, 0.0  ;;  %v6071_v10 = vmul.f32 %v12271_v2, %v5969_v58  ;;  %7668 = vrsqrt.f32 %v5781_v62  ;;  %v13637_v8 = vld [vmem:[#allocation68_spill] sm:$0xff] }
 0xb09   :  { %5602 = vadd.xlane.f32.xlu0 %v5601_v24  ;;  %v5117_v3 = vpop.f32.mrf.mxu0  ;;  %v5685_v39 = vmul.f32 0.015625, %v5501_v34  ;;  %v7663_v55 = vpop.eup %7662 }
 0xb0a   :  { %v5336_v15 = vmul.f32 %v12470_v25, %v12470_v25  ;;  %6167 = vst.msk [vmem:[#allocation2 + $0x170] sm:$0xff] %vm886_vm0, %v6071_v10  ;;  %v5970_v33 = vmul.f32 %v7663_v55, %v12148_v1 }
 0xb0b   :  { %v5118_v30 = vpop.f32.mrf.mxu0  ;;  %v5782_v46 = vadd.f32 1e-06, %v5685_v39 }
 0xb0c   :  { %v12478_v52 = vadd.f32 %v5118_v30, %v13636_v14  ;;  %v5604_v4 = vsel %vm886_vm0, %v5336_v15, 0.0  ;;  %v6072_v29 = vmul.f32 %v12271_v2, %v5970_v33  ;;  %v13638_v14 = vld [vmem:[#allocation69_spill] sm:$0xff] }
 0xb0d   :  { %5605 = vadd.xlane.f32.xlu1 %v5604_v4  ;;  %v5120_v63 = vpop.f32.mrf.mxu0  ;;  %7670 = vrsqrt.f32 %v5782_v46  ;;  %v7665_v53 = vpop.eup %7664 }
 0xb0e   :  { %v5337_v19 = vmul.f32 %v12478_v52, %v12478_v52  ;;  %v5504_v20 = vpop.xlane.xlu1 %5503  ;;  %6168 = vst.msk [vmem:[#allocation2 + $0x178] sm:$0xff] %vm886_vm0, %v6072_v29  ;;  %v5971_v1 = vmul.f32 %v7665_v53, %v12157_v41 }
 0xb0f   :  { %v5686_v22 = vmul.f32 0.015625, %v5504_v20  ;;  %v5123_v50 = vpop.f32.mrf.mxu0 }
 0xb10   :  { %v12487_v24 = vadd.f32 %v5123_v50, %v13637_v8  ;;  %v5607_v58 = vsel %vm886_vm0, %v5337_v19, 0.0  ;;  %v6073_v10 = vmul.f32 %v12271_v2, %v5971_v1  ;;  %v13639_v8 = vld [vmem:[#allocation73_spill] sm:$0xff] }
 0xb11   :  { %v5783_v62 = vadd.f32 1e-06, %v5686_v22  ;;  %5608 = vadd.xlane.f32.xlu0 %v5607_v58  ;;  %v5125_v3 = vpop.f32.mrf.mxu0  ;;  %v7667_v55 = vpop.eup %7666 }
 0xb12   :  { %v5338_v15 = vmul.f32 %v12487_v24, %v12487_v24  ;;  %v5507_v34 = vpop.xlane.xlu0 %5506  ;;  %6169 = vst.msk [vmem:[#allocation2 + $0x180] sm:$0xff] %vm886_vm0, %v6073_v10  ;;  %v5972_v41 = vmul.f32 %v7667_v55, %v12166_v0 }
 0xb13   :  { %7672 = vrsqrt.f32 %v5783_v62  ;;  %v5687_v39 = vmul.f32 0.015625, %v5507_v34  ;;  %v5126_v30 = vpop.f32.mrf.mxu0 }
 0xb14   :  { %v12496_v4 = vadd.f32 %v5126_v30, %v13638_v14  ;;  %v5610_v33 = vsel %vm886_vm0, %v5338_v15, 0.0  ;;  %v6074_v29 = vmul.f32 %v12271_v2, %v5972_v41  ;;  %v13640_v14 = vld [vmem:[#allocation74_spill] sm:$0xff] }
 0xb15   :  { %v5784_v46 = vadd.f32 1e-06, %v5687_v39  ;;  %5611 = vadd.xlane.f32.xlu1 %v5610_v33  ;;  %v5128_v63 = vpop.f32.mrf.mxu0  ;;  %v7669_v53 = vpop.eup %7668 }
 0xb16   :  { %v5339_v19 = vmul.f32 %v12496_v4, %v12496_v4  ;;  %v5510_v20 = vpop.xlane.xlu1 %5509  ;;  %6170 = vst.msk [vmem:[#allocation2 + $0x188] sm:$0xff] %vm886_vm0, %v6074_v29  ;;  %v5973_v0 = vmul.f32 %v7669_v53, %v12175_v13 }
 0xb17   :  { %7674 = vrsqrt.f32 %v5784_v46  ;;  %v5688_v22 = vmul.f32 0.015625, %v5510_v20  ;;  %v5131_v50 = vpop.f32.mrf.mxu0 }
 0xb18   :  { %v12505_v58 = vadd.f32 %v5131_v50, %v13639_v8  ;;  %v5613_v1 = vsel %vm886_vm0, %v5339_v19, 0.0  ;;  %v6075_v10 = vmul.f32 %v12271_v2, %v5973_v0  ;;  %v13641_v8 = vld [vmem:[#allocation78_spill] sm:$0xff] }
 0xb19   :  { %v5785_v62 = vadd.f32 1e-06, %v5688_v22  ;;  %5614 = vadd.xlane.f32.xlu0 %v5613_v1  ;;  %v5133_v3 = vpop.f32.mrf.mxu0 }
 0xb1a   :  { %v5340_v15 = vmul.f32 %v12505_v58, %v12505_v58  ;;  %v5513_v34 = vpop.xlane.xlu0 %5512  ;;  %v7671_v55 = vpop.eup %7670  ;;  %6171 = vst.msk [vmem:[#allocation2 + $0x190] sm:$0xff] %vm886_vm0, %v6075_v10 }
 0xb1b   :  { %7676 = vrsqrt.f32 %v5785_v62  ;;  %v5689_v39 = vmul.f32 0.015625, %v5513_v34  ;;  %v5134_v30 = vpop.f32.mrf.mxu0  ;;  %v5974_v13 = vmul.f32 %v7671_v55, %v12184_v23 }
 0xb1c   :  { %v12514_v33 = vadd.f32 %v5134_v30, %v13640_v14  ;;  %v5616_v41 = vsel %vm886_vm0, %v5340_v15, 0.0  ;;  %v13642_v14 = vld [vmem:[#allocation79_spill] sm:$0xff] }
 0xb1d   :  { %v5786_v46 = vadd.f32 1e-06, %v5689_v39  ;;  %5617 = vadd.xlane.f32.xlu1 %v5616_v41  ;;  %v5136_v63 = vpop.f32.mrf.mxu0  ;;  %v6076_v29 = vmul.f32 %v12271_v2, %v5974_v13 }
 0xb1e   :  { %v5341_v19 = vmul.f32 %v12514_v33, %v12514_v33  ;;  %v5516_v20 = vpop.xlane.xlu1 %5515 }
 0xb1f   :  { %7678 = vrsqrt.f32 %v5786_v46  ;;  %v5690_v22 = vmul.f32 0.015625, %v5516_v20  ;;  %v5139_v50 = vpop.f32.mrf.mxu0  ;;  %6172 = vst.msk [vmem:[#allocation2 + $0x198] sm:$0xff] %vm886_vm0, %v6076_v29 }
 0xb20   :  { %v7673_v53 = vpop.eup %7672  ;;  %v12523_v1 = vadd.f32 %v5139_v50, %v13641_v8  ;;  %v5619_v0 = vsel %vm886_vm0, %v5341_v19, 0.0  ;;  %v13643_v8 = vld [vmem:[#allocation53_spill] sm:$0xff] }
 0xb21   :  { %v5975_v23 = vmul.f32 %v7673_v53, %v12193_v27  ;;  %v5787_v62 = vadd.f32 1e-06, %v5690_v22  ;;  %5620 = vadd.xlane.f32.xlu0 %v5619_v0  ;;  %v5141_v3 = vpop.f32.mrf.mxu0 }
 0xb22   :  { %v5342_v15 = vmul.f32 %v12523_v1, %v12523_v1  ;;  %v5519_v34 = vpop.xlane.xlu0 %5518 }
 0xb23   :  { %v6077_v10 = vmul.f32 %v12271_v2, %v5975_v23  ;;  %7680 = vrsqrt.f32 %v5787_v62  ;;  %v5691_v39 = vmul.f32 0.015625, %v5519_v34  ;;  %v5142_v30 = vpop.f32.mrf.mxu0 }
 0xb24   :  { %v7675_v55 = vpop.eup %7674  ;;  %v12532_v41 = vadd.f32 %v5142_v30, %v13642_v14  ;;  %v5622_v13 = vsel %vm886_vm0, %v5342_v15, 0.0  ;;  %v13644_v14 = vld [vmem:[#allocation83_spill] sm:$0xff] }
 0xb25   :  { %6173 = vst.msk [vmem:[#allocation2 + $0x1a0] sm:$0xff] %vm886_vm0, %v6077_v10  ;;  %v5976_v27 = vmul.f32 %v7675_v55, %v12202_v28  ;;  %v5788_v46 = vadd.f32 1e-06, %v5691_v39  ;;  %5623 = vadd.xlane.f32.xlu1 %v5622_v13  ;;  %v5144_v63 = vpop.f32.mrf.mxu0 }
 0xb26   :  { %v5343_v19 = vmul.f32 %v12532_v41, %v12532_v41  ;;  %v5522_v20 = vpop.xlane.xlu1 %5521 }
 0xb27   :  { %v6078_v29 = vmul.f32 %v12271_v2, %v5976_v27  ;;  %7682 = vrsqrt.f32 %v5788_v46  ;;  %v5692_v22 = vmul.f32 0.015625, %v5522_v20  ;;  %v5147_v50 = vpop.f32.mrf.mxu0 }
 0xb28   :  { %v7677_v53 = vpop.eup %7676  ;;  %v12541_v0 = vadd.f32 %v5147_v50, %v13643_v8  ;;  %v5625_v23 = vsel %vm886_vm0, %v5343_v19, 0.0 }
 0xb29   :  { %6174 = vst.msk [vmem:[#allocation2 + $0x1a8] sm:$0xff] %vm886_vm0, %v6078_v29  ;;  %v5977_v28 = vmul.f32 %v7677_v53, %v12211_v59  ;;  %v5789_v62 = vadd.f32 1e-06, %v5692_v22  ;;  %5626 = vadd.xlane.f32.xlu0 %v5625_v23  ;;  %v5149_v3 = vpop.f32.mrf.mxu0 }
 0xb2a   :  { %v5344_v15 = vmul.f32 %v12541_v0, %v12541_v0  ;;  %v5525_v34 = vpop.xlane.xlu0 %5524 }
 0xb2b   :  { %v6079_v10 = vmul.f32 %v12271_v2, %v5977_v28  ;;  %7684 = vrsqrt.f32 %v5789_v62  ;;  %v5693_v39 = vmul.f32 0.015625, %v5525_v34  ;;  %v5150_v30 = vpop.f32.mrf.mxu0 }
 0xb2c   :  { %v7679_v55 = vpop.eup %7678  ;;  %v12550_v13 = vadd.f32 %v5150_v30, %v13644_v14  ;;  %v5628_v27 = vsel %vm886_vm0, %v5344_v15, 0.0 }
 0xb2d   :  { %6175 = vst.msk [vmem:[#allocation2 + $0x1b0] sm:$0xff] %vm886_vm0, %v6079_v10  ;;  %v5978_v59 = vmul.f32 %v7679_v55, %v12220_v12  ;;  %v5790_v46 = vadd.f32 1e-06, %v5693_v39  ;;  %5629 = vadd.xlane.f32.xlu1 %v5628_v27  ;;  %v5152_v63 = vpop.f32.mrf.mxu0 }
 0xb2e   :  { %v5345_v19 = vmul.f32 %v12550_v13, %v12550_v13  ;;  %v5528_v20 = vpop.xlane.xlu1 %5527 }
 0xb2f   :  { %v6080_v29 = vmul.f32 %v12271_v2, %v5978_v59  ;;  %7686 = vrsqrt.f32 %v5790_v46  ;;  %v5694_v22 = vmul.f32 0.015625, %v5528_v20 }
 0xb30   :  { %v7681_v50 = vpop.eup %7680  ;;  %v5631_v53 = vsel %vm886_vm0, %v5345_v19, 0.0 }
 0xb31   :  { %6176 = vst.msk [vmem:[#allocation2 + $0x1b8] sm:$0xff] %vm886_vm0, %v6080_v29  ;;  %v5979_v8 = vmul.f32 %v7681_v50, %v12229_v35  ;;  %v5791_v23 = vadd.f32 1e-06, %v5694_v22  ;;  %5632 = vadd.xlane.f32.xlu0 %v5631_v53 }
 0xb32   :  { %v5531_v12 = vpop.xlane.xlu0 %5530 }
 0xb33   :  { %v6081_v28 = vmul.f32 %v12271_v2, %v5979_v8  ;;  %7688 = vrsqrt.f32 %v5791_v23  ;;  %v5695_v62 = vmul.f32 0.015625, %v5531_v12 }
 0xb34   :  { %v7683_v3 = vpop.eup %7682 }
 0xb35   :  { %6177 = vst.msk [vmem:[#allocation2 + $0x1c0] sm:$0xff] %vm886_vm0, %v6081_v28  ;;  %v5980_v15 = vmul.f32 %v7683_v3, %v12238_v54  ;;  %v5792_v34 = vadd.f32 1e-06, %v5695_v62 }
 0xb36   :  { %v5534_v10 = vpop.xlane.xlu1 %5533 }
 0xb37   :  { %v6082_v39 = vmul.f32 %v12271_v2, %v5980_v15  ;;  %7690 = vrsqrt.f32 %v5792_v34  ;;  %v5696_v30 = vmul.f32 0.015625, %v5534_v10 }
 0xb38   :  { %v7685_v55 = vpop.eup %7684 }
 0xb39   :  { %6178 = vst.msk [vmem:[#allocation2 + $0x1c8] sm:$0xff] %vm886_vm0, %v6082_v39  ;;  %v5981_v35 = vmul.f32 %v7685_v55, %v12247_v21  ;;  %v5793_v14 = vadd.f32 1e-06, %v5696_v30 }
 0xb3a   :  { %v5537_v27 = vpop.xlane.xlu0 %5536 }
 0xb3b   :  { %v6083_v59 = vmul.f32 %v12271_v2, %v5981_v35  ;;  %7692 = vrsqrt.f32 %v5793_v14  ;;  %v5697_v46 = vmul.f32 0.015625, %v5537_v27 }
 0xb3c   :  { %v7687_v63 = vpop.eup %7686 }
 0xb3d   :  { %6179 = vst.msk [vmem:[#allocation2 + $0x1d0] sm:$0xff] %vm886_vm0, %v6083_v59  ;;  %v5982_v54 = vmul.f32 %v7687_v63, %v12256_v42  ;;  %v5794_v19 = vadd.f32 1e-06, %v5697_v46 }
 0xb3e   :  { %v5540_v20 = vpop.xlane.xlu1 %5539 }
 0xb3f   :  { %v6084_v29 = vmul.f32 %v12271_v2, %v5982_v54  ;;  %7694 = vrsqrt.f32 %v5794_v19  ;;  %v5698_v22 = vmul.f32 0.015625, %v5540_v20 }
 0xb40   :  { %v7689_v50 = vpop.eup %7688 }
 0xb41   :  { %6180 = vst.msk [vmem:[#allocation2 + $0x1d8] sm:$0xff] %vm886_vm0, %v6084_v29  ;;  %v5983_v21 = vmul.f32 %v7689_v50, %v12265_v16  ;;  %v5795_v53 = vadd.f32 1e-06, %v5698_v22 }
 0xb42   :  { %v5543_v8 = vpop.xlane.xlu0 %5542 }
 0xb43   :  { %v6085_v23 = vmul.f32 %v12271_v2, %v5983_v21  ;;  %7696 = vrsqrt.f32 %v5795_v53  ;;  %v5699_v12 = vmul.f32 0.015625, %v5543_v8 }
 0xb44   :  { %v7691_v28 = vpop.eup %7690 }
 0xb45   :  { %6181 = vst.msk [vmem:[#allocation2 + $0x1e0] sm:$0xff] %vm886_vm0, %v6085_v23  ;;  %v5984_v42 = vmul.f32 %v7691_v28, %v12278_v44  ;;  %v5796_v62 = vadd.f32 1e-06, %v5699_v12 }
 0xb46   :  { %v5546_v3 = vpop.xlane.xlu1 %5545 }
 0xb47   :  { %v6086_v15 = vmul.f32 %v12271_v2, %v5984_v42  ;;  %7698 = vrsqrt.f32 %v5796_v62  ;;  %v5700_v34 = vmul.f32 0.015625, %v5546_v3 }
 0xb48   :  { %v7693_v10 = vpop.eup %7692 }
 0xb49   :  { %6182 = vst.msk [vmem:[#allocation2 + $0x1e8] sm:$0xff] %vm886_vm0, %v6086_v15  ;;  %v5985_v16 = vmul.f32 %v7693_v10, %v12284_v31  ;;  %v5797_v39 = vadd.f32 1e-06, %v5700_v34 }
 0xb4a   :  { %v5549_v30 = vpop.xlane.xlu0 %5548 }
 0xb4b   :  { %v6087_v55 = vmul.f32 %v12271_v2, %v5985_v16  ;;  %7700 = vrsqrt.f32 %v5797_v39  ;;  %v5701_v35 = vmul.f32 0.015625, %v5549_v30  ;;  %v12597_v16 = vld [vmem:[%s12692_s4] ss:$0 sm:$0xff]  ;;  %s7789_s4 = smov [#allocation2]  }
 0xb4c   :  { %v7695_v14 = vpop.eup %7694  ;;  %s6222_s14 = sshll.u32 %s7789_s4, 4  ;;  %s6223_s14 = int_to_ptr.vmem [resolvable:$true] %s6222_s14 }
 0xb4d   :  { %6183 = vst.msk [vmem:[#allocation2 + $0x1f0] sm:$0xff] %vm886_vm0, %v6087_v55  ;;  %v5986_v44 = vmul.f32 %v7695_v14, %v12291_v9  ;;  %v5798_v27 = vadd.f32 1e-06, %v5701_v35  ;;  %s7765_s15 = scalar_lea.vmem %s6223_s14, 12288  ;;  %p7770_p1 = scmp.lt.s32.totalorder %s6223_s14, %s6223_s14 }
 0xb4e   :  { %v5552_v59 = vpop.xlane.xlu1 %5551  ;;  %p7766_p0 = scmp.ne.s32.totalorder %s6223_s14, %s7765_s15  ;;  %p7771_p2 = scmp.lt.s32.totalorder %s7765_s15, %s7765_s15 }
 0xb4f   :  { %v6088_v46 = vmul.f32 %v12271_v2, %v5986_v44  ;;  %7702 = vrsqrt.f32 %v5798_v27  ;;  %v5702_v63 = vmul.f32 0.015625, %v5552_v59 }
 0xb50   :  { %v7697_v54 = vpop.eup %7696  ;;  %p7772_p3 = por %p7771_p2, %p7770_p1 }
 0xb51   :  { %6184 = vst.msk [vmem:[#allocation2 + $0x1f8] sm:$0xff] %vm886_vm0, %v6088_v46  ;;  %v5987_v31 = vmul.f32 %v7697_v54, %v12300_v40  ;;  %v5799_v19 = vadd.f32 1e-06, %v5702_v63 }
 0xb52   :  { %v5555_v20 = vpop.xlane.xlu0 %5554  ;;  %p7773_p4 = pnand %p7772_p3, %p7766_p0 }
 0xb53   :  { %v6089_v29 = vmul.f32 %v12271_v2, %v5987_v31  ;;  %7704 = vrsqrt.f32 %v5799_v19  ;;  %v5703_v22 = vmul.f32 0.015625, %v5555_v20 }
 0xb54   :  { %v7699_v50 = vpop.eup %7698 }
 0xb55   :  { %6185 = vst.msk [vmem:[#allocation2 + $0x200] sm:$0xff] %vm886_vm0, %v6089_v29  ;;  %v5988_v9 = vmul.f32 %v7699_v50, %v12309_v51  ;;  %v5800_v21 = vadd.f32 1e-06, %v5703_v22 }
 0xb56   :  { %v5558_v53 = vpop.xlane.xlu1 %5557 }
 0xb57   :  { %v6090_v8 = vmul.f32 %v12271_v2, %v5988_v9  ;;  %7706 = vrsqrt.f32 %v5800_v21  ;;  %v5704_v23 = vmul.f32 0.015625, %v5558_v53 }
 0xb58   :  { %v7701_v12 = vpop.eup %7700 }
 0xb59   :  { %6186 = vst.msk [vmem:[#allocation2 + $0x208] sm:$0xff] %vm886_vm0, %v6090_v8  ;;  %v5989_v40 = vmul.f32 %v7701_v12, %v12318_v17  ;;  %v5801_v28 = vadd.f32 1e-06, %v5704_v23 }
 0xb5a   :  { %v5561_v42 = vpop.xlane.xlu0 %5560 }
 0xb5b   :  { %v6091_v62 = vmul.f32 %v12271_v2, %v5989_v40  ;;  %7708 = vrsqrt.f32 %v5801_v28  ;;  %v5705_v3 = vmul.f32 0.015625, %v5561_v42 }
 0xb5c   :  { %v7703_v15 = vpop.eup %7702 }
 0xb5d   :  { %6187 = vst.msk [vmem:[#allocation2 + $0x210] sm:$0xff] %vm886_vm0, %v6091_v62  ;;  %v5990_v51 = vmul.f32 %v7703_v15, %v12326_v61  ;;  %v5802_v34 = vadd.f32 1e-06, %v5705_v3 }
 0xb5e   :  { %v5564_v10 = vpop.xlane.xlu1 %5563 }
 0xb5f   :  { %v6092_v17 = vmul.f32 %v12597_v16, %v5990_v51  ;;  %7710 = vrsqrt.f32 %v5802_v34  ;;  %v5706_v39 = vmul.f32 0.015625, %v5564_v10 }
 0xb60   :  { %v7705_v30 = vpop.eup %7704 }
 0xb61   :  { %6188 = vst.msk [vmem:[#allocation2 + $0x218] sm:$0xff] %vm886_vm0, %v6092_v17  ;;  %v5991_v2 = vmul.f32 %v7705_v30, %v12334_v47  ;;  %v5803_v55 = vadd.f32 1e-06, %v5706_v39 }
 0xb62   :  { %v5567_v35 = vpop.xlane.xlu0 %5566 }
 0xb63   :  { %v6093_v61 = vmul.f32 %v12597_v16, %v5991_v2  ;;  %7712 = vrsqrt.f32 %v5803_v55  ;;  %v5707_v14 = vmul.f32 0.015625, %v5567_v35 }
 0xb64   :  { %v7707_v44 = vpop.eup %7706 }
 0xb65   :  { %6189 = vst.msk [vmem:[#allocation2 + $0x220] sm:$0xff] %vm886_vm0, %v6093_v61  ;;  %v5992_v27 = vmul.f32 %v7707_v44, %v12343_v6  ;;  %v5804_v59 = vadd.f32 1e-06, %v5707_v14 }
 0xb66   :  { %v5570_v46 = vpop.xlane.xlu1 %5569 }
 0xb67   :  { %v6094_v63 = vmul.f32 %v12597_v16, %v5992_v27  ;;  %7714 = vrsqrt.f32 %v5804_v59  ;;  %v5708_v54 = vmul.f32 0.015625, %v5570_v46 }
 0xb68   :  { %v7709_v31 = vpop.eup %7708 }
 0xb69   :  { %6190 = vst.msk [vmem:[#allocation2 + $0x228] sm:$0xff] %vm886_vm0, %v6094_v63  ;;  %v5993_v47 = vmul.f32 %v7709_v31, %v12352_v5  ;;  %v5805_v19 = vadd.f32 1e-06, %v5708_v54 }
 0xb6a   :  { %v5573_v20 = vpop.xlane.xlu0 %5572 }
 0xb6b   :  { %v6095_v29 = vmul.f32 %v12597_v16, %v5993_v47  ;;  %7716 = vrsqrt.f32 %v5805_v19  ;;  %v5709_v22 = vmul.f32 0.015625, %v5573_v20 }
 0xb6c   :  { %v7711_v50 = vpop.eup %7710 }
 0xb6d   :  { %6191 = vst.msk [vmem:[#allocation2 + $0x230] sm:$0xff] %vm886_vm0, %v6095_v29  ;;  %v5994_v6 = vmul.f32 %v7711_v50, %v12361_v48  ;;  %v5806_v9 = vadd.f32 1e-06, %v5709_v22 }
 0xb6e   :  { %v5576_v21 = vpop.xlane.xlu1 %5575 }
 0xb6f   :  { %v6096_v53 = vmul.f32 %v12597_v16, %v5994_v6  ;;  %7718 = vrsqrt.f32 %v5806_v9  ;;  %v5710_v8 = vmul.f32 0.015625, %v5576_v21 }
 0xb70   :  { %v7713_v23 = vpop.eup %7712 }
 0xb71   :  { %6192 = vst.msk [vmem:[#allocation2 + $0x238] sm:$0xff] %vm886_vm0, %v6096_v53  ;;  %v5995_v5 = vmul.f32 %v7713_v23, %v12370_v7  ;;  %v5807_v12 = vadd.f32 1e-06, %v5710_v8 }
 0xb72   :  { %v5579_v40 = vpop.xlane.xlu0 %5578 }
 0xb73   :  { %v6097_v28 = vmul.f32 %v12597_v16, %v5995_v5  ;;  %7720 = vrsqrt.f32 %v5807_v12  ;;  %v5711_v42 = vmul.f32 0.015625, %v5579_v40 }
 0xb74   :  { %v7715_v62 = vpop.eup %7714 }
 0xb75   :  { %6193 = vst.msk [vmem:[#allocation2 + $0x240] sm:$0xff] %vm886_vm0, %v6097_v28  ;;  %v5996_v48 = vmul.f32 %v7715_v62, %v12379_v26  ;;  %v5808_v3 = vadd.f32 1e-06, %v5711_v42 }
 0xb76   :  { %v5582_v15 = vpop.xlane.xlu1 %5581 }
 0xb77   :  { %v6098_v51 = vmul.f32 %v12597_v16, %v5996_v48  ;;  %7722 = vrsqrt.f32 %v5808_v3  ;;  %v5712_v34 = vmul.f32 0.015625, %v5582_v15 }
 0xb78   :  { %v7717_v10 = vpop.eup %7716 }
 0xb79   :  { %6194 = vst.msk [vmem:[#allocation2 + $0x248] sm:$0xff] %vm886_vm0, %v6098_v51  ;;  %v5997_v7 = vmul.f32 %v7717_v10, %v12387_v11  ;;  %v5809_v17 = vadd.f32 1e-06, %v5712_v34 }
 0xb7a   :  { %v5585_v39 = vpop.xlane.xlu0 %5584 }
 0xb7b   :  { %v6099_v30 = vmul.f32 %v12597_v16, %v5997_v7  ;;  %7724 = vrsqrt.f32 %v5809_v17  ;;  %v5713_v2 = vmul.f32 0.015625, %v5585_v39 }
 0xb7c   :  { %v7719_v55 = vpop.eup %7718 }
 0xb7d   :  { %6195 = vst.msk [vmem:[#allocation2 + $0x250] sm:$0xff] %vm886_vm0, %v6099_v30  ;;  %v5998_v26 = vmul.f32 %v7719_v55, %v12396_v49  ;;  %v5810_v35 = vadd.f32 1e-06, %v5713_v2 }
 0xb7e   :  { %v5588_v61 = vpop.xlane.xlu1 %5587 }
 0xb7f   :  { %v6100_v14 = vmul.f32 %v12597_v16, %v5998_v26  ;;  %7726 = vrsqrt.f32 %v5810_v35  ;;  %v5714_v44 = vmul.f32 0.015625, %v5588_v61 }
 0xb80   :  { %v7721_v27 = vpop.eup %7720 }
 0xb81   :  { %6196 = vst.msk [vmem:[#allocation2 + $0x258] sm:$0xff] %vm886_vm0, %v6100_v14  ;;  %v5999_v11 = vmul.f32 %v7721_v27, %v12405_v37  ;;  %v5811_v59 = vadd.f32 1e-06, %v5714_v44 }
 0xb82   :  { %v5591_v46 = vpop.xlane.xlu0 %5590 }
 0xb83   :  { %v6101_v63 = vmul.f32 %v12597_v16, %v5999_v11  ;;  %7728 = vrsqrt.f32 %v5811_v59  ;;  %v5715_v54 = vmul.f32 0.015625, %v5591_v46 }
 0xb84   :  { %v7723_v31 = vpop.eup %7722 }
 0xb85   :  { %6197 = vst.msk [vmem:[#allocation2 + $0x260] sm:$0xff] %vm886_vm0, %v6101_v63  ;;  %v6000_v49 = vmul.f32 %v7723_v31, %v12414_v38  ;;  %v5812_v47 = vadd.f32 1e-06, %v5715_v54 }
 0xb86   :  { %v5594_v19 = vpop.xlane.xlu1 %5593 }
 0xb87   :  { %v6102_v20 = vmul.f32 %v12597_v16, %v6000_v49  ;;  %7730 = vrsqrt.f32 %v5812_v47  ;;  %v5716_v29 = vmul.f32 0.015625, %v5594_v19 }
 0xb88   :  { %v7725_v22 = vpop.eup %7724 }
 0xb89   :  { %6198 = vst.msk [vmem:[#allocation2 + $0x268] sm:$0xff] %vm886_vm0, %v6102_v20  ;;  %v6001_v37 = vmul.f32 %v7725_v22, %v12422_v56  ;;  %v5813_v50 = vadd.f32 1e-06, %v5716_v29 }
 0xb8a   :  { %v5597_v6 = vpop.xlane.xlu0 %5596 }
 0xb8b   :  { %v6103_v9 = vmul.f32 %v12597_v16, %v6001_v37  ;;  %7732 = vrsqrt.f32 %v5813_v50  ;;  %v5717_v21 = vmul.f32 0.015625, %v5597_v6 }
 0xb8c   :  { %v7727_v53 = vpop.eup %7726 }
 0xb8d   :  { %6199 = vst.msk [vmem:[#allocation2 + $0x270] sm:$0xff] %vm886_vm0, %v6103_v9  ;;  %v6002_v38 = vmul.f32 %v7727_v53, %v12428_v36  ;;  %v5814_v8 = vadd.f32 1e-06, %v5717_v21 }
 0xb8e   :  { %v5600_v23 = vpop.xlane.xlu1 %5599 }
 0xb8f   :  { %v6104_v5 = vmul.f32 %v12597_v16, %v6002_v38  ;;  %7734 = vrsqrt.f32 %v5814_v8  ;;  %v5718_v12 = vmul.f32 0.015625, %v5600_v23 }
 0xb90   :  { %v7729_v40 = vpop.eup %7728 }
 0xb91   :  { %6200 = vst.msk [vmem:[#allocation2 + $0x278] sm:$0xff] %vm886_vm0, %v6104_v5  ;;  %v6003_v56 = vmul.f32 %v7729_v40, %v12434_v43  ;;  %v5815_v28 = vadd.f32 1e-06, %v5718_v12 }
 0xb92   :  { %v5603_v42 = vpop.xlane.xlu0 %5602 }
 0xb93   :  { %v6105_v62 = vmul.f32 %v12597_v16, %v6003_v56  ;;  %7736 = vrsqrt.f32 %v5815_v28  ;;  %v5719_v48 = vmul.f32 0.015625, %v5603_v42 }
 0xb94   :  { %v7731_v3 = vpop.eup %7730 }
 0xb95   :  { %6201 = vst.msk [vmem:[#allocation2 + $0x280] sm:$0xff] %vm886_vm0, %v6105_v62  ;;  %v6004_v36 = vmul.f32 %v7731_v3, %v12440_v45  ;;  %v5816_v15 = vadd.f32 1e-06, %v5719_v48 }
 0xb96   :  { %v5606_v51 = vpop.xlane.xlu1 %5605 }
 0xb97   :  { %v6106_v34 = vmul.f32 %v12597_v16, %v6004_v36  ;;  %7738 = vrsqrt.f32 %v5816_v15  ;;  %v5720_v10 = vmul.f32 0.015625, %v5606_v51 }
 0xb98   :  { %v7733_v7 = vpop.eup %7732 }
 0xb99   :  { %6202 = vst.msk [vmem:[#allocation2 + $0x288] sm:$0xff] %vm886_vm0, %v6106_v34  ;;  %v6005_v43 = vmul.f32 %v7733_v7, %v12446_v60  ;;  %v5817_v17 = vadd.f32 1e-06, %v5720_v10 }
 0xb9a   :  { %v5609_v39 = vpop.xlane.xlu0 %5608 }
 0xb9b   :  { %v6107_v30 = vmul.f32 %v12597_v16, %v6005_v43  ;;  %7740 = vrsqrt.f32 %v5817_v17  ;;  %v5721_v2 = vmul.f32 0.015625, %v5609_v39 }
 0xb9c   :  { %v7735_v55 = vpop.eup %7734 }
 0xb9d   :  { %6203 = vst.msk [vmem:[#allocation2 + $0x290] sm:$0xff] %vm886_vm0, %v6107_v30  ;;  %v6006_v45 = vmul.f32 %v7735_v55, %v12452_v32  ;;  %v5818_v26 = vadd.f32 1e-06, %v5721_v2 }
 0xb9e   :  { %v5612_v35 = vpop.xlane.xlu1 %5611 }
 0xb9f   :  { %v6108_v61 = vmul.f32 %v12597_v16, %v6006_v45  ;;  %7742 = vrsqrt.f32 %v5818_v26  ;;  %v5722_v14 = vmul.f32 0.015625, %v5612_v35 }
 0xba0   :  { %v7737_v44 = vpop.eup %7736 }
 0xba1   :  { %6204 = vst.msk [vmem:[#allocation2 + $0x298] sm:$0xff] %vm886_vm0, %v6108_v61  ;;  %v6007_v60 = vmul.f32 %v7737_v44, %v12458_v57  ;;  %v5819_v27 = vadd.f32 1e-06, %v5722_v14 }
 0xba2   :  { %v5615_v11 = vpop.xlane.xlu0 %5614 }
 0xba3   :  { %v6109_v59 = vmul.f32 %v12597_v16, %v6007_v60  ;;  %7744 = vrsqrt.f32 %v5819_v27  ;;  %v5723_v46 = vmul.f32 0.015625, %v5615_v11 }
 0xba4   :  { %v7739_v63 = vpop.eup %7738 }
 0xba5   :  { %6205 = vst.msk [vmem:[#allocation2 + $0x2a0] sm:$0xff] %vm886_vm0, %v6109_v59  ;;  %v6008_v32 = vmul.f32 %v7739_v63, %v12464_v18  ;;  %v5820_v54 = vadd.f32 1e-06, %v5723_v46 }
 0xba6   :  { %v5618_v31 = vpop.xlane.xlu1 %5617 }
 0xba7   :  { %v6110_v49 = vmul.f32 %v12597_v16, %v6008_v32  ;;  %7746 = vrsqrt.f32 %v5820_v54  ;;  %v5724_v47 = vmul.f32 0.015625, %v5618_v31 }
 0xba8   :  { %v7741_v19 = vpop.eup %7740 }
 0xba9   :  { %6206 = vst.msk [vmem:[#allocation2 + $0x2a8] sm:$0xff] %vm886_vm0, %v6110_v49  ;;  %v6009_v57 = vmul.f32 %v7741_v19, %v12470_v25  ;;  %v5821_v20 = vadd.f32 1e-06, %v5724_v47 }
 0xbaa   :  { %v5621_v29 = vpop.xlane.xlu0 %5620 }
 0xbab   :  { %v6111_v22 = vmul.f32 %v12597_v16, %v6009_v57  ;;  %7748 = vrsqrt.f32 %v5821_v20  ;;  %v5725_v37 = vmul.f32 0.015625, %v5621_v29 }
 0xbac   :  { %v7743_v50 = vpop.eup %7742 }
 0xbad   :  { %6207 = vst.msk [vmem:[#allocation2 + $0x2b0] sm:$0xff] %vm886_vm0, %v6111_v22  ;;  %v6010_v18 = vmul.f32 %v7743_v50, %v12478_v52  ;;  %v5822_v6 = vadd.f32 1e-06, %v5725_v37 }
 0xbae   :  { %v5624_v9 = vpop.xlane.xlu1 %5623 }
 0xbaf   :  { %v6112_v21 = vmul.f32 %v12597_v16, %v6010_v18  ;;  %7750 = vrsqrt.f32 %v5822_v6  ;;  %v5726_v53 = vmul.f32 0.015625, %v5624_v9 }
 0xbb0   :  { %v7745_v38 = vpop.eup %7744 }
 0xbb1   :  { %6208 = vst.msk [vmem:[#allocation2 + $0x2b8] sm:$0xff] %vm886_vm0, %v6112_v21  ;;  %v6011_v25 = vmul.f32 %v7745_v38, %v12487_v24  ;;  %v5823_v8 = vadd.f32 1e-06, %v5726_v53 }
 0xbb2   :  { %v5627_v23 = vpop.xlane.xlu0 %5626 }
 0xbb3   :  { %v6113_v5 = vmul.f32 %v12597_v16, %v6011_v25  ;;  %7752 = vrsqrt.f32 %v5823_v8  ;;  %v5727_v12 = vmul.f32 0.015625, %v5627_v23 }
 0xbb4   :  { %v7747_v40 = vpop.eup %7746 }
 0xbb5   :  { %6209 = vst.msk [vmem:[#allocation2 + $0x2c0] sm:$0xff] %vm886_vm0, %v6113_v5  ;;  %v6012_v52 = vmul.f32 %v7747_v40, %v12496_v4  ;;  %v5824_v56 = vadd.f32 1e-06, %v5727_v12 }
 0xbb6   :  { %v5630_v28 = vpop.xlane.xlu1 %5629 }
 0xbb7   :  { %v6114_v42 = vmul.f32 %v12597_v16, %v6012_v52  ;;  %7754 = vrsqrt.f32 %v5824_v56  ;;  %v5728_v62 = vmul.f32 0.015625, %v5630_v28 }
 0xbb8   :  { %v7749_v48 = vpop.eup %7748 }
 0xbb9   :  { %6210 = vst.msk [vmem:[#allocation2 + $0x2c8] sm:$0xff] %vm886_vm0, %v6114_v42  ;;  %v6013_v24 = vmul.f32 %v7749_v48, %v12505_v58  ;;  %v5825_v3 = vadd.f32 1e-06, %v5728_v62 }
 0xbba   :  { %v5633_v36 = vpop.xlane.xlu0 %5632 }
 0xbbb   :  { %v6115_v15 = vmul.f32 %v12597_v16, %v6013_v24  ;;  %7756 = vrsqrt.f32 %v5825_v3  ;;  %v5729_v51 = vmul.f32 0.015625, %v5633_v36 }
 0xbbc   :  { %v7751_v34 = vpop.eup %7750 }
 0xbbd   :  { %6211 = vst.msk [vmem:[#allocation2 + $0x2d0] sm:$0xff] %vm886_vm0, %v6115_v15  ;;  %v6014_v4 = vmul.f32 %v7751_v34, %v12514_v33  ;;  %v5826_v10 = vadd.f32 1e-06, %v5729_v51 }
 0xbbf   :  { %v6116_v7 = vmul.f32 %v12597_v16, %v6014_v4  ;;  %7758 = vrsqrt.f32 %v5826_v10 }
 0xbc0   :  { %v7753_v43 = vpop.eup %7752 }
 0xbc1   :  { %6212 = vst.msk [vmem:[#allocation2 + $0x2d8] sm:$0xff] %vm886_vm0, %v6116_v7  ;;  %v6015_v58 = vmul.f32 %v7753_v43, %v12523_v1 }
 0xbc3   :  { %v6117_v17 = vmul.f32 %v12597_v16, %v6015_v58 }
 0xbc4   :  { %v7755_v39 = vpop.eup %7754 }
 0xbc5   :  { %6213 = vst.msk [vmem:[#allocation2 + $0x2e0] sm:$0xff] %vm886_vm0, %v6117_v17  ;;  %v6016_v30 = vmul.f32 %v7755_v39, %v12532_v41 }
 0xbc7   :  { %v6118_v2 = vmul.f32 %v12597_v16, %v6016_v30 }
 0xbc8   :  { %v7757_v55 = vpop.eup %7756 }
 0xbc9   :  { %6214 = vst.msk [vmem:[#allocation2 + $0x2e8] sm:$0xff] %vm886_vm0, %v6118_v2  ;;  %v6017_v33 = vmul.f32 %v7757_v55, %v12541_v0 }
 0xbcb   :  { %v6119_v45 = vmul.f32 %v12597_v16, %v6017_v33 }
 0xbcc   :  { %v7759_v26 = vpop.eup %7758 }
 0xbcd   :  { %6215 = vst.msk [vmem:[#allocation2 + $0x2f0] sm:$0xff] %vm886_vm0, %v6119_v45  ;;  %v6018_v1 = vmul.f32 %v7759_v26, %v12550_v13 }
 0xbcf   :  { %v6120_v35 = vmul.f32 %v12597_v16, %v6018_v1 }
 0xbd1   :  { %6216 = vst.msk [vmem:[#allocation2 + $0x2f8] sm:$0xff] %vm886_vm0, %v6120_v35 }
 0xbd2   :  { %7776 = shalt.err (!%p7773_p4)
}
 0xbd3   :  { %s7790_s16 = smov 128   ;;  %s7791_s17 = smov 8  }
 0xbd4   :  { %6228 = dma.vmem_to_hbm [thread:$0]  %s6223_s14, 12288, %s12693_s5, [#allocation3], %s7790_s16, %s7790_s16, %s7791_s17  }
 0xbd5   :  { %7785 = dma.done.wait [#allocation3], 12288  }
 0xbd6   :  { %7786 = vsyncadd [#allocation3], 4294955008 }
 0xbd7   :  { %6232 = vsyncpa [#allocation3], 1 }

</bundles_post_ra>
